<compile_context>
chip_gen: v6e
topology: v6e:2x2x1
jax: 0.10.0
libtpu: 0.0.40
codegen_flags: <defaults>
</compile_context>

<pallas_src>
import functools
import math

import jax
import jax.numpy as jnp
from jax.experimental import pallas as pl
from jax.experimental.pallas import tpu as pltpu


def eviction_kernel(xh_ref, c0_ref, hist_ref, q_ref, mask_ref, par_ref,
                    wqbd_ref, out_ref):
    """Batch-minor forward step.  All per-call refs are (features, TB)."""
    f32 = jnp.float32
    IN_H, TB = xh_ref.shape            # IN_H = pc+addr embed dims + H
    H = c0_ref.shape[0]
    T = hist_ref.shape[0] + 1          # history length AFTER appending c1
    N = mask_ref.shape[0]              # cache lines per set

    # ---- LSTM cell (batch-minor): gates (4H, TB) = W @ [x; h0] + b ----------
    # Gate rows were reordered on the host to (i, f, o, g) so one sigmoid pass
    # covers rows [0:3H] and one tanh pass covers [3H:4H] (no wasted EUP work).
    w_lstm = par_ref[0:4 * H, 0:IN_H]              # (4H, IN+H)  f32
    b_lstm = par_ref[0:4 * H, IN_H:IN_H + 1]       # (4H, 1)
    gates = jnp.dot(w_lstm, xh_ref[...],
                    preferred_element_type=f32) + b_lstm
    sig = jax.nn.sigmoid(gates[0:3 * H, :])        # i, f, o
    g_g = jnp.tanh(gates[3 * H:4 * H, :])          # g
    i_g = sig[0:H, :]
    f_g = sig[H:2 * H, :]
    o_g = sig[2 * H:3 * H, :]
    c1 = f_g * c0_ref[...] + i_g * g_g             # (H, TB)
    h1 = o_g * jnp.tanh(c1)                        # (H, TB)

    # Model quirk (kept): nn.LSTMCell returns (h1, c1) and the module unpacks
    # it as (next_c, next_h), so the state appended to the attention history
    # ("next_h") is the LSTM *cell* state c1.
    keys = jnp.concatenate([hist_ref[...].astype(f32), c1[None, :, :]],
                           axis=0)                 # (T, H, TB)

    # ---- attention query projection: one block-diagonal bf16 MXU matmul ----
    # rows of tq are grouped per cache line: row n*H + h.
    tq = jnp.dot(wqbd_ref[...], q_ref[...],
                 preferred_element_type=f32)       # (N*H, TB)

    # ---- Linear(H+P,1) heads folded into the attention reduction -----------
    # proj[t, b] = keys[t, :, b] . w_head  +  (pos[t] . w_pos + bias)   where
    # the positional/bias part was precomputed on the host (columns of par).
    w_s = par_ref[4 * H:5 * H, 0:1]                # (H, 1)
    w_r = par_ref[4 * H:5 * H, 1:2]
    pos_s = par_ref[5 * H:5 * H + T, 0:1]          # (T, 1) pos-part + bias
    pos_r = par_ref[5 * H:5 * H + T, 1:2]
    proj_s = jnp.sum(keys * w_s[None, :, :], axis=1) + pos_s   # (T, TB)
    proj_r = jnp.sum(keys * w_r[None, :, :], axis=1) + pos_r   # (T, TB)

    # ---- per-cache-line attention + heads (all lane-dense VPU/EUP work) ----
    attw_rows = []
    s_rows = []
    r_rows = []
    for n in range(N):                             # static, N = 8
        tq_n = tq[n * H:(n + 1) * H, :]            # (H, TB)
        # scores[t, b] = sum_h keys[t, h, b] * tq_n[h, b]   (VPU mul + reduce)
        scores = jnp.sum(keys * tq_n[None, :, :], axis=1)       # (T, TB)
        e = jnp.exp(scores - jnp.max(scores, axis=0, keepdims=True))
        attw_n = e / jnp.sum(e, axis=0, keepdims=True)          # exact softmax
        attw_rows.append(attw_n)                                # (T, TB)
        s_rows.append(jnp.sum(attw_n * proj_s, axis=0, keepdims=True))
        r_rows.append(jnp.sum(attw_n * proj_r, axis=0, keepdims=True))

    s_lin = jnp.concatenate(s_rows, axis=0)        # (N, TB)
    r_lin = jnp.concatenate(r_rows, axis=0)        # (N, TB)
    attw = jnp.concatenate(attw_rows, axis=0)      # (N*T, TB)

    # ---- softmax over cache lines + mask renormalize (exact, like torch) ---
    es = jnp.exp(s_lin - jnp.max(s_lin, axis=0, keepdims=True))
    line_sm = es / jnp.sum(es, axis=0, keepdims=True)
    masked = line_sm * mask_ref[...]
    # NOTE: a fully-masked row yields NaN (0/0), matching the PyTorch module.
    probs = masked / jnp.sum(masked, axis=0, keepdims=True)

    # ---- single lane-dense output store: rows [h1 | c1 | attw | probs | r] -
    out_ref[...] = jnp.concatenate([h1, c1, attw, probs, r_lin], axis=0)


def prepare_params(params, pos, num_lines):
    """One-time packing of module weights into two lane-dense kernel slabs."""
    f32, bf16 = jnp.float32, jnp.bfloat16
    H = params['w_ih'].shape[0] // 4
    assert H % 8 == 0
    T = pos.shape[0]
    N = num_lines

    def reorder(a):  # torch LSTM gate order (i, f, g, o) -> (i, f, o, g)
        return jnp.concatenate([a[0:2 * H], a[3 * H:4 * H], a[2 * H:3 * H]],
                               axis=0)

    w_lstm = reorder(jnp.concatenate([params['w_ih'], params['w_hh']],
                                     axis=1)).astype(f32)          # (4H, IN+H)
    b_lstm = reorder(params['b_ih'] + params['b_hh']).astype(f32)  # (4H,)
    in_h = w_lstm.shape[1]
    assert in_h + 1 <= 128, "params slab is 128 lanes wide"

    w_score = params['w_score'][0].astype(f32)     # (H + P,)
    w_reuse = params['w_reuse'][0].astype(f32)
    # Positional part of each head with the head bias folded in (attention
    # weights sum to 1 over history positions, so the fold is exact).
    pos_s = pos.astype(f32) @ w_score[H:] + params['b_score'][0]   # (T,)
    pos_r = pos.astype(f32) @ w_reuse[H:] + params['b_reuse'][0]

    rows = ((5 * H + T + 7) // 8) * 8
    par = jnp.zeros((rows, 128), f32)
    par = par.at[0:4 * H, 0:in_h].set(w_lstm)
    par = par.at[0:4 * H, in_h].set(b_lstm)
    par = par.at[4 * H:5 * H, 0].set(w_score[:H])
    par = par.at[4 * H:5 * H, 1].set(w_reuse[:H])
    par = par.at[5 * H:5 * H + T, 0].set(pos_s)
    par = par.at[5 * H:5 * H + T, 1].set(pos_r)

    # Block-diagonal attention query transform: (N*H, N*Q), bf16 MXU operand.
    wq_bd = jnp.kron(jnp.eye(N, dtype=f32),
                     params['w_attn'].astype(f32)).astype(bf16)
    return {'par': par, 'wq_bd': wq_bd}


def _default_batch_tile(batch):
    """1 tile on single-TensorCore chips (v5e/v6e); 2 parallel tiles on v7x."""
    try:
        kind = jax.devices()[0].device_kind.lower()
    except Exception:
        kind = ""
    if "v7" in kind and batch % 256 == 0:
        return batch // 2
    return batch


def eviction_policy_forward(pc_emb, addr_emb, h0, c0, hist_prev, queries,
                            mask, prep, *, tb=None):
    """One batched forward step (== EvictionPolicyModel.forward on B accesses).

    Returns (probs, pred_reuse_distances, (next_c, next_h), attention_weights)
    where, matching the PyTorch module quirk, next_c == h1 and next_h == c1.
    In a production trace loop the recurrent state (h, c, history) would be
    kept batch-minor between steps; here we convert at the boundary so the
    interface matches the module.
    """
    B, N, Q = queries.shape
    H = h0.shape[-1]
    Tm1 = hist_prev.shape[1]
    T = Tm1 + 1
    f32, bf16 = jnp.float32, jnp.bfloat16

    if tb is None:
        tb = B
    assert B % tb == 0 and tb % 128 == 0, "batch tile must be a 128-multiple"
    nb = B // tb

    # --- batch-minor activations: the batch rides the 128-lane axis ---------
    xhT = jnp.concatenate([pc_emb, addr_emb, h0], axis=-1).T.astype(f32)
    c0T = c0.T.astype(f32)                                       # (H, B)
    histT = jnp.transpose(hist_prev, (1, 2, 0)).astype(bf16)     # (T-1, H, B)
    qT = jnp.transpose(queries, (1, 2, 0)).reshape(N * Q, B).astype(bf16)
    maskT = mask.T.astype(f32)                                   # (N, B)

    par, wq_bd = prep['par'], prep['wq_bd']
    assert par.shape[0] >= 5 * H + T, "param slab / history length mismatch"
    IN_H = xhT.shape[0]
    F = 2 * H + N * T + 2 * N            # output rows: h1|c1|attw|probs|reuse

    out = pl.pallas_call(
        eviction_kernel,
        out_shape=jax.ShapeDtypeStruct((F, B), f32),
        grid=(nb,),
        in_specs=[
            pl.BlockSpec((IN_H, tb), lambda i: (0, i)),          # [x | h0]
            pl.BlockSpec((H, tb), lambda i: (0, i)),             # c0
            pl.BlockSpec((Tm1, H, tb), lambda i: (0, 0, i)),     # history (bf16)
            pl.BlockSpec((N * Q, tb), lambda i: (0, i)),         # queries (bf16)
            pl.BlockSpec((N, tb), lambda i: (0, i)),             # padding mask
            pl.BlockSpec(par.shape, lambda i: (0, 0)),           # f32 param slab
            pl.BlockSpec(wq_bd.shape, lambda i: (0, 0)),         # block-diag wq
        ],
        out_specs=pl.BlockSpec((F, tb), lambda i: (0, i)),
        compiler_params=pltpu.CompilerParams(
            dimension_semantics=("parallel",)),   # shard batch tiles on v7x
    )(xhT, c0T, histT, qT, maskT, par, wq_bd)

    NT = N * T
    h1 = out[0:H, :].T
    c1 = out[H:2 * H, :].T
    attw = out[2 * H:2 * H + NT, :].reshape(N, T, B).transpose(2, 0, 1)
    probs = out[2 * H + NT:2 * H + NT + N, :].T
    reuse = out[2 * H + NT + N:2 * H + NT + 2 * N, :].T
    # next_c == h1 and next_h == c1 (module quirk preserved).
    return probs, reuse, (h1, c1), attw


def eviction_policy_reference(pc_emb, addr_emb, h0, c0, hist_prev, queries,
                              pos, mask, params):
    """Pure-JAX reference of the same forward step (for correctness check)."""
    H = h0.shape[-1]
    x = jnp.concatenate([pc_emb, addr_emb], axis=-1)
    gates = (x @ params['w_ih'].T + params['b_ih']
             + h0 @ params['w_hh'].T + params['b_hh'])
    i = jax.nn.sigmoid(gates[:, 0 * H:1 * H])
    f = jax.nn.sigmoid(gates[:, 1 * H:2 * H])
    g = jnp.tanh(gates[:, 2 * H:3 * H])
    o = jax.nn.sigmoid(gates[:, 3 * H:4 * H])
    c1 = f * c0 + i * g
    h1 = o * jnp.tanh(c1)
    keys = jnp.concatenate([hist_prev, c1[:, None, :]], axis=1)  # appended "next_h" == c1
    tq = jnp.einsum('bnq,hq->bnh', queries, params['w_attn'])
    scores = jnp.einsum('bnh,bth->bnt', tq, keys)
    attw = jax.nn.softmax(scores, axis=-1)
    values = jnp.concatenate(
        [keys, jnp.broadcast_to(pos[None], (keys.shape[0],) + pos.shape)], axis=-1)
    ctx = jnp.einsum('bnt,btd->bnd', attw, values)
    s = jnp.einsum('bnd,d->bn', ctx, params['w_score'][0]) + params['b_score'][0]
    r = jnp.einsum('bnd,d->bn', ctx, params['w_reuse'][0]) + params['b_reuse'][0]
    line_sm = jax.nn.softmax(s, axis=-1)
    masked = line_sm * mask
    probs = masked / jnp.sum(masked, axis=-1, keepdims=True)
    return probs, r, h1, c1, attw


def _uniform(key, shape, bound):
    return jax.random.uniform(key, shape, jnp.float32, -bound, bound)


if __name__ == "__main__":
    # Batched over many independent cache sets per call; feature dims stay the
    # small sizes the module implies.
    B = 256               # cache accesses per call
    PC_DIM, ADDR_DIM = 16, 16
    IN_DIM = PC_DIM + ADDR_DIM
    H = 32                # rnn_hidden_size
    Q = 16                # cache_line_embedder.embed_dim (no cache_pc_embedder)
    P = 16                # positional_embedder.embed_dim
    T = 8                 # history length after append (<= max_attention_history)
    N = 8                 # cache lines per set
    VOCAB = 64
    TB = _default_batch_tile(B)   # B on v5e/v6e (1 TC), B//2 on v7x (2 TCs)

    key = jax.random.PRNGKey(0)
    ks = iter(jax.random.split(key, 32))

    # ---- Embedders (host glue: embedding-table lookups) ----
    pc_table = jax.random.normal(next(ks), (VOCAB, PC_DIM), jnp.float32)
    addr_table = jax.random.normal(next(ks), (VOCAB, ADDR_DIM), jnp.float32)
    line_table = jax.random.normal(next(ks), (VOCAB, Q), jnp.float32)
    pos_table = jax.random.normal(next(ks), (T, P), jnp.float32)

    pc_ids = jax.random.randint(next(ks), (B,), 0, VOCAB)
    addr_ids = jax.random.randint(next(ks), (B,), 0, VOCAB)
    line_ids = jax.random.randint(next(ks), (B, N), 0, VOCAB)

    pc_emb = jnp.take(pc_table, pc_ids, axis=0)
    addr_emb = jnp.take(addr_table, addr_ids, axis=0)
    queries = jnp.take(line_table, line_ids.reshape(-1), axis=0).reshape(B, N, Q)
    pos = pos_table                                              # (T, P)

    h0 = 0.1 * jax.random.normal(next(ks), (B, H), jnp.float32)
    c0 = 0.1 * jax.random.normal(next(ks), (B, H), jnp.float32)
    hist_prev = 0.1 * jax.random.normal(next(ks), (B, T - 1, H), jnp.float32)

    mask = jnp.ones((B, N), jnp.float32)
    mask = mask.at[1, N - 3:].set(0.0).at[5, :2].set(0.0)        # padded cache lines

    # ---- PyTorch-layout parameters (uniform init like nn.Linear/LSTMCell) ----
    bd_lstm = 1.0 / math.sqrt(H)
    bd_head = 1.0 / math.sqrt(H + P)
    bd_attn = 1.0 / math.sqrt(Q)
    params = {
        'w_ih': _uniform(next(ks), (4 * H, IN_DIM), bd_lstm),    # gates i,f,g,o
        'w_hh': _uniform(next(ks), (4 * H, H), bd_lstm),
        'b_ih': _uniform(next(ks), (4 * H,), bd_lstm),
        'b_hh': _uniform(next(ks), (4 * H,), bd_lstm),
        'w_attn': _uniform(next(ks), (H, Q), bd_attn),           # GeneralAttention Linear(Q, H)
        'w_score': _uniform(next(ks), (1, H + P), bd_head),      # cache_line_scorer
        'b_score': _uniform(next(ks), (1,), bd_head),
        'w_reuse': _uniform(next(ks), (1, H + P), bd_head),      # reuse_distance_estimator
        'b_reuse': _uniform(next(ks), (1,), bd_head),
    }

    # TODO(synk): deque/access_history bookkeeping, the access_attention zip
    # generator over CacheAccess python objects, the first-access/variable-T
    # warmup case, inference-time detach(), the reuse_dist-only probs override
    # branch, and the loss() training loop are host-side glue, not kernels.

    prep = prepare_params(params, pos, num_lines=N)              # one-time packing
    fwd = jax.jit(functools.partial(eviction_policy_forward, tb=TB))
    outs = fwd(pc_emb, addr_emb, h0, c0, hist_prev, queries, mask, prep)
    (probs, pred_reuse, (next_c, next_h), attw) = jax.block_until_ready(outs)

    r_probs, r_reuse, r_h1, r_c1, r_attw = eviction_policy_reference(
        pc_emb, addr_emb, h0, c0, hist_prev, queries, pos, mask, params)

    assert probs.shape == (B, N) and pred_reuse.shape == (B, N)
    assert next_c.shape == (B, H) and next_h.shape == (B, H)
    assert attw.shape == (B, N, T)
    assert bool(jnp.all(jnp.isfinite(probs)))
    assert bool(jnp.allclose(jnp.sum(probs, -1), 1.0, atol=1e-3))   # exact renorm
    assert bool(jnp.allclose(next_c, r_h1, atol=1e-3))              # next_c == h1 (f32 path)
    assert bool(jnp.allclose(next_h, r_c1, atol=1e-3))              # next_h == c1 (f32 path)
    # bf16 MXU operands on the attention side -> loose tolerances there
    assert bool(jnp.allclose(attw, r_attw, atol=2e-2))
    assert bool(jnp.allclose(probs, r_probs, atol=2e-2))
    assert bool(jnp.allclose(pred_reuse, r_reuse, atol=2e-2))
    print("KERNEL_OK")
</pallas_src>

<mosaic_0001>
module attributes {stable_mosaic.version = 11 : i64} {
  func.func @eviction_kernel(%arg0: i32, %arg1: memref<64x256xf32, #tpu.memory_space<vmem>>, %arg2: memref<32x256xf32, #tpu.memory_space<vmem>>, %arg3: memref<7x32x256xbf16, #tpu.memory_space<vmem>>, %arg4: memref<128x256xbf16, #tpu.memory_space<vmem>>, %arg5: memref<8x256xf32, #tpu.memory_space<vmem>>, %arg6: memref<168x128xf32, #tpu.memory_space<vmem>>, %arg7: memref<256x128xbf16, #tpu.memory_space<vmem>>, %arg8: memref<144x256xf32, #tpu.memory_space<vmem>>) attributes {dimension_semantics = [#tpu.dimension_semantics<parallel>], iteration_bounds = array<i64: 1>, scalar_prefetch = 0 : i64, scratch_operands = 0 : i64, tpu.core_type = #tpu.core_type<tc>, window_params = [{transform_indices = @transform_0, window_bounds = array<i64: 64, 256>}, {transform_indices = @transform_1, window_bounds = array<i64: 32, 256>}, {transform_indices = @transform_2, window_bounds = array<i64: 7, 32, 256>}, {transform_indices = @transform_3, window_bounds = array<i64: 128, 256>}, {transform_indices = @transform_4, window_bounds = array<i64: 8, 256>}, {pipeline_mode = #tpu.pipeline_mode<synchronous>, transform_indices = @transform_5, window_bounds = array<i64: 168, 128>}, {pipeline_mode = #tpu.pipeline_mode<synchronous>, transform_indices = @transform_6, window_bounds = array<i64: 256, 128>}, {transform_indices = @transform_7, window_bounds = array<i64: 144, 256>}]} {
    %c0 = arith.constant 0 : index
    %c0_0 = arith.constant 0 : index
    %0 = vector.load %arg6[%c0, %c0_0] : memref<168x128xf32, #tpu.memory_space<vmem>>, vector<128x64xf32>
    %c0_1 = arith.constant 0 : index
    %c64 = arith.constant 64 : index
    %1 = vector.load %arg6[%c0_1, %c64] : memref<168x128xf32, #tpu.memory_space<vmem>>, vector<128x1xf32>
    %c0_2 = arith.constant 0 : index
    %c0_3 = arith.constant 0 : index
    %2 = vector.load %arg1[%c0_2, %c0_3] : memref<64x256xf32, #tpu.memory_space<vmem>>, vector<64x256xf32>
    %cst = arith.constant dense<0.000000e+00> : vector<128x256xf32>
    %3 = tpu.matmul %0, %2, %cst {dimension_numbers = #tpu.dot_dimension_numbers<[1], [0], [0], [1], [0, 0, 1, 1], [], []>} : vector<128x64xf32>, vector<64x256xf32>, vector<128x256xf32> -> vector<128x256xf32>
    %4 = vector.broadcast %1 : vector<128x1xf32> to vector<128x256xf32>
    %5 = arith.addf %3, %4 : vector<128x256xf32>
    %6 = vector.extract_strided_slice %5 {offsets = [0, 0], sizes = [96, 256], strides = [1, 1]} : vector<128x256xf32> to vector<96x256xf32>
    %7 = arith.negf %6 : vector<96x256xf32>
    %8 = math.exp %7 : vector<96x256xf32>
    %cst_4 = arith.constant 1.000000e+00 : f32
    %9 = vector.broadcast %cst_4 : f32 to vector<96x256xf32>
    %10 = arith.addf %9, %8 : vector<96x256xf32>
    %11 = arith.divf %9, %10 : vector<96x256xf32>
    %12 = vector.extract_strided_slice %5 {offsets = [96, 0], sizes = [32, 256], strides = [1, 1]} : vector<128x256xf32> to vector<32x256xf32>
    %13 = math.tanh %12 : vector<32x256xf32>
    %14 = vector.extract_strided_slice %11 {offsets = [0, 0], sizes = [32, 256], strides = [1, 1]} : vector<96x256xf32> to vector<32x256xf32>
    %15 = vector.extract_strided_slice %11 {offsets = [32, 0], sizes = [32, 256], strides = [1, 1]} : vector<96x256xf32> to vector<32x256xf32>
    %16 = vector.extract_strided_slice %11 {offsets = [64, 0], sizes = [32, 256], strides = [1, 1]} : vector<96x256xf32> to vector<32x256xf32>
    %c0_5 = arith.constant 0 : index
    %c0_6 = arith.constant 0 : index
    %17 = vector.load %arg2[%c0_5, %c0_6] : memref<32x256xf32, #tpu.memory_space<vmem>>, vector<32x256xf32>
    %18 = arith.mulf %15, %17 : vector<32x256xf32>
    %19 = arith.mulf %14, %13 : vector<32x256xf32>
    %20 = arith.addf %18, %19 : vector<32x256xf32>
    %21 = math.tanh %20 : vector<32x256xf32>
    %22 = arith.mulf %16, %21 : vector<32x256xf32>
    %c0_7 = arith.constant 0 : index
    %c0_8 = arith.constant 0 : index
    %c0_9 = arith.constant 0 : index
    %23 = vector.load %arg3[%c0_7, %c0_8, %c0_9] : memref<7x32x256xbf16, #tpu.memory_space<vmem>>, vector<7x32x256xbf16>
    %24 = arith.extf %23 : vector<7x32x256xbf16> to vector<7x32x256xf32>
    %25 = vector.shape_cast %20 : vector<32x256xf32> to vector<1x32x256xf32>
    %26 = tpu.concatenate %24, %25 in 0 : vector<7x32x256xf32>, vector<1x32x256xf32> -> vector<8x32x256xf32>
    %c0_10 = arith.constant 0 : index
    %c0_11 = arith.constant 0 : index
    %27 = vector.load %arg7[%c0_10, %c0_11] : memref<256x128xbf16, #tpu.memory_space<vmem>>, vector<256x128xbf16>
    %c0_12 = arith.constant 0 : index
    %c0_13 = arith.constant 0 : index
    %28 = vector.load %arg4[%c0_12, %c0_13] : memref<128x256xbf16, #tpu.memory_space<vmem>>, vector<128x256xbf16>
    %cst_14 = arith.constant dense<0.000000e+00> : vector<256x256xf32>
    %29 = tpu.matmul %27, %28, %cst_14 {dimension_numbers = #tpu.dot_dimension_numbers<[1], [0], [0], [1], [0, 0, 1, 1], [], []>} : vector<256x128xbf16>, vector<128x256xbf16>, vector<256x256xf32> -> vector<256x256xf32>
    %c128 = arith.constant 128 : index
    %c0_15 = arith.constant 0 : index
    %30 = vector.load %arg6[%c128, %c0_15] : memref<168x128xf32, #tpu.memory_space<vmem>>, vector<32x1xf32>
    %c128_16 = arith.constant 128 : index
    %c1 = arith.constant 1 : index
    %31 = vector.load %arg6[%c128_16, %c1] : memref<168x128xf32, #tpu.memory_space<vmem>>, vector<32x1xf32>
    %c160 = arith.constant 160 : index
    %c0_17 = arith.constant 0 : index
    %32 = vector.load %arg6[%c160, %c0_17] : memref<168x128xf32, #tpu.memory_space<vmem>>, vector<8x1xf32>
    %c160_18 = arith.constant 160 : index
    %c1_19 = arith.constant 1 : index
    %33 = vector.load %arg6[%c160_18, %c1_19] : memref<168x128xf32, #tpu.memory_space<vmem>>, vector<8x1xf32>
    %34 = vector.shape_cast %30 : vector<32x1xf32> to vector<1x32x1xf32>
    %35 = vector.broadcast %34 : vector<1x32x1xf32> to vector<8x32x256xf32>
    %36 = arith.mulf %26, %35 : vector<8x32x256xf32>
    %cst_20 = arith.constant dense<0.000000e+00> : vector<8x256xf32>
    %37 = vector.multi_reduction <add>, %36, %cst_20 [1] : vector<8x32x256xf32> to vector<8x256xf32>
    %38 = vector.broadcast %32 : vector<8x1xf32> to vector<8x256xf32>
    %39 = arith.addf %37, %38 : vector<8x256xf32>
    %40 = vector.shape_cast %31 : vector<32x1xf32> to vector<1x32x1xf32>
    %41 = vector.broadcast %40 : vector<1x32x1xf32> to vector<8x32x256xf32>
    %42 = arith.mulf %26, %41 : vector<8x32x256xf32>
    %cst_21 = arith.constant dense<0.000000e+00> : vector<8x256xf32>
    %43 = vector.multi_reduction <add>, %42, %cst_21 [1] : vector<8x32x256xf32> to vector<8x256xf32>
    %44 = vector.broadcast %33 : vector<8x1xf32> to vector<8x256xf32>
    %45 = arith.addf %43, %44 : vector<8x256xf32>
    %46 = vector.extract_strided_slice %29 {offsets = [0, 0], sizes = [32, 256], strides = [1, 1]} : vector<256x256xf32> to vector<32x256xf32>
    %47 = vector.shape_cast %46 : vector<32x256xf32> to vector<1x32x256xf32>
    %48 = vector.broadcast %47 : vector<1x32x256xf32> to vector<8x32x256xf32>
    %49 = arith.mulf %26, %48 : vector<8x32x256xf32>
    %cst_22 = arith.constant dense<0.000000e+00> : vector<8x256xf32>
    %50 = vector.multi_reduction <add>, %49, %cst_22 [1] : vector<8x32x256xf32> to vector<8x256xf32>
    %cst_23 = arith.constant dense<0xFF800000> : vector<256xf32>
    %51 = vector.multi_reduction <maximumf>, %50, %cst_23 [0] : vector<8x256xf32> to vector<256xf32>
    %52 = vector.shape_cast %51 : vector<256xf32> to vector<1x256xf32>
    %53 = vector.broadcast %52 : vector<1x256xf32> to vector<8x256xf32>
    %54 = arith.subf %50, %53 : vector<8x256xf32>
    %55 = math.exp %54 : vector<8x256xf32>
    %cst_24 = arith.constant dense<0.000000e+00> : vector<256xf32>
    %56 = vector.multi_reduction <add>, %55, %cst_24 [0] : vector<8x256xf32> to vector<256xf32>
    %57 = vector.shape_cast %56 : vector<256xf32> to vector<1x256xf32>
    %58 = vector.broadcast %57 : vector<1x256xf32> to vector<8x256xf32>
    %59 = arith.divf %55, %58 : vector<8x256xf32>
    %60 = arith.mulf %59, %39 : vector<8x256xf32>
    %cst_25 = arith.constant dense<0.000000e+00> : vector<256xf32>
    %61 = vector.multi_reduction <add>, %60, %cst_25 [0] : vector<8x256xf32> to vector<256xf32>
    %62 = vector.shape_cast %61 : vector<256xf32> to vector<1x256xf32>
    %63 = arith.mulf %59, %45 : vector<8x256xf32>
    %cst_26 = arith.constant dense<0.000000e+00> : vector<256xf32>
    %64 = vector.multi_reduction <add>, %63, %cst_26 [0] : vector<8x256xf32> to vector<256xf32>
    %65 = vector.shape_cast %64 : vector<256xf32> to vector<1x256xf32>
    %66 = vector.extract_strided_slice %29 {offsets = [32, 0], sizes = [32, 256], strides = [1, 1]} : vector<256x256xf32> to vector<32x256xf32>
    %67 = vector.shape_cast %66 : vector<32x256xf32> to vector<1x32x256xf32>
    %68 = vector.broadcast %67 : vector<1x32x256xf32> to vector<8x32x256xf32>
    %69 = arith.mulf %26, %68 : vector<8x32x256xf32>
    %cst_27 = arith.constant dense<0.000000e+00> : vector<8x256xf32>
    %70 = vector.multi_reduction <add>, %69, %cst_27 [1] : vector<8x32x256xf32> to vector<8x256xf32>
    %cst_28 = arith.constant dense<0xFF800000> : vector<256xf32>
    %71 = vector.multi_reduction <maximumf>, %70, %cst_28 [0] : vector<8x256xf32> to vector<256xf32>
    %72 = vector.shape_cast %71 : vector<256xf32> to vector<1x256xf32>
    %73 = vector.broadcast %72 : vector<1x256xf32> to vector<8x256xf32>
    %74 = arith.subf %70, %73 : vector<8x256xf32>
    %75 = math.exp %74 : vector<8x256xf32>
    %cst_29 = arith.constant dense<0.000000e+00> : vector<256xf32>
    %76 = vector.multi_reduction <add>, %75, %cst_29 [0] : vector<8x256xf32> to vector<256xf32>
    %77 = vector.shape_cast %76 : vector<256xf32> to vector<1x256xf32>
    %78 = vector.broadcast %77 : vector<1x256xf32> to vector<8x256xf32>
    %79 = arith.divf %75, %78 : vector<8x256xf32>
    %80 = arith.mulf %79, %39 : vector<8x256xf32>
    %cst_30 = arith.constant dense<0.000000e+00> : vector<256xf32>
    %81 = vector.multi_reduction <add>, %80, %cst_30 [0] : vector<8x256xf32> to vector<256xf32>
    %82 = vector.shape_cast %81 : vector<256xf32> to vector<1x256xf32>
    %83 = arith.mulf %79, %45 : vector<8x256xf32>
    %cst_31 = arith.constant dense<0.000000e+00> : vector<256xf32>
    %84 = vector.multi_reduction <add>, %83, %cst_31 [0] : vector<8x256xf32> to vector<256xf32>
    %85 = vector.shape_cast %84 : vector<256xf32> to vector<1x256xf32>
    %86 = vector.extract_strided_slice %29 {offsets = [64, 0], sizes = [32, 256], strides = [1, 1]} : vector<256x256xf32> to vector<32x256xf32>
    %87 = vector.shape_cast %86 : vector<32x256xf32> to vector<1x32x256xf32>
    %88 = vector.broadcast %87 : vector<1x32x256xf32> to vector<8x32x256xf32>
    %89 = arith.mulf %26, %88 : vector<8x32x256xf32>
    %cst_32 = arith.constant dense<0.000000e+00> : vector<8x256xf32>
    %90 = vector.multi_reduction <add>, %89, %cst_32 [1] : vector<8x32x256xf32> to vector<8x256xf32>
    %cst_33 = arith.constant dense<0xFF800000> : vector<256xf32>
    %91 = vector.multi_reduction <maximumf>, %90, %cst_33 [0] : vector<8x256xf32> to vector<256xf32>
    %92 = vector.shape_cast %91 : vector<256xf32> to vector<1x256xf32>
    %93 = vector.broadcast %92 : vector<1x256xf32> to vector<8x256xf32>
    %94 = arith.subf %90, %93 : vector<8x256xf32>
    %95 = math.exp %94 : vector<8x256xf32>
    %cst_34 = arith.constant dense<0.000000e+00> : vector<256xf32>
    %96 = vector.multi_reduction <add>, %95, %cst_34 [0] : vector<8x256xf32> to vector<256xf32>
    %97 = vector.shape_cast %96 : vector<256xf32> to vector<1x256xf32>
    %98 = vector.broadcast %97 : vector<1x256xf32> to vector<8x256xf32>
    %99 = arith.divf %95, %98 : vector<8x256xf32>
    %100 = arith.mulf %99, %39 : vector<8x256xf32>
    %cst_35 = arith.constant dense<0.000000e+00> : vector<256xf32>
    %101 = vector.multi_reduction <add>, %100, %cst_35 [0] : vector<8x256xf32> to vector<256xf32>
    %102 = vector.shape_cast %101 : vector<256xf32> to vector<1x256xf32>
    %103 = arith.mulf %99, %45 : vector<8x256xf32>
    %cst_36 = arith.constant dense<0.000000e+00> : vector<256xf32>
    %104 = vector.multi_reduction <add>, %103, %cst_36 [0] : vector<8x256xf32> to vector<256xf32>
    %105 = vector.shape_cast %104 : vector<256xf32> to vector<1x256xf32>
    %106 = vector.extract_strided_slice %29 {offsets = [96, 0], sizes = [32, 256], strides = [1, 1]} : vector<256x256xf32> to vector<32x256xf32>
    %107 = vector.shape_cast %106 : vector<32x256xf32> to vector<1x32x256xf32>
    %108 = vector.broadcast %107 : vector<1x32x256xf32> to vector<8x32x256xf32>
    %109 = arith.mulf %26, %108 : vector<8x32x256xf32>
    %cst_37 = arith.constant dense<0.000000e+00> : vector<8x256xf32>
    %110 = vector.multi_reduction <add>, %109, %cst_37 [1] : vector<8x32x256xf32> to vector<8x256xf32>
    %cst_38 = arith.constant dense<0xFF800000> : vector<256xf32>
    %111 = vector.multi_reduction <maximumf>, %110, %cst_38 [0] : vector<8x256xf32> to vector<256xf32>
    %112 = vector.shape_cast %111 : vector<256xf32> to vector<1x256xf32>
    %113 = vector.broadcast %112 : vector<1x256xf32> to vector<8x256xf32>
    %114 = arith.subf %110, %113 : vector<8x256xf32>
    %115 = math.exp %114 : vector<8x256xf32>
    %cst_39 = arith.constant dense<0.000000e+00> : vector<256xf32>
    %116 = vector.multi_reduction <add>, %115, %cst_39 [0] : vector<8x256xf32> to vector<256xf32>
    %117 = vector.shape_cast %116 : vector<256xf32> to vector<1x256xf32>
    %118 = vector.broadcast %117 : vector<1x256xf32> to vector<8x256xf32>
    %119 = arith.divf %115, %118 : vector<8x256xf32>
    %120 = arith.mulf %119, %39 : vector<8x256xf32>
    %cst_40 = arith.constant dense<0.000000e+00> : vector<256xf32>
    %121 = vector.multi_reduction <add>, %120, %cst_40 [0] : vector<8x256xf32> to vector<256xf32>
    %122 = vector.shape_cast %121 : vector<256xf32> to vector<1x256xf32>
    %123 = arith.mulf %119, %45 : vector<8x256xf32>
    %cst_41 = arith.constant dense<0.000000e+00> : vector<256xf32>
    %124 = vector.multi_reduction <add>, %123, %cst_41 [0] : vector<8x256xf32> to vector<256xf32>
    %125 = vector.shape_cast %124 : vector<256xf32> to vector<1x256xf32>
    %126 = vector.extract_strided_slice %29 {offsets = [128, 0], sizes = [32, 256], strides = [1, 1]} : vector<256x256xf32> to vector<32x256xf32>
    %127 = vector.shape_cast %126 : vector<32x256xf32> to vector<1x32x256xf32>
    %128 = vector.broadcast %127 : vector<1x32x256xf32> to vector<8x32x256xf32>
    %129 = arith.mulf %26, %128 : vector<8x32x256xf32>
    %cst_42 = arith.constant dense<0.000000e+00> : vector<8x256xf32>
    %130 = vector.multi_reduction <add>, %129, %cst_42 [1] : vector<8x32x256xf32> to vector<8x256xf32>
    %cst_43 = arith.constant dense<0xFF800000> : vector<256xf32>
    %131 = vector.multi_reduction <maximumf>, %130, %cst_43 [0] : vector<8x256xf32> to vector<256xf32>
    %132 = vector.shape_cast %131 : vector<256xf32> to vector<1x256xf32>
    %133 = vector.broadcast %132 : vector<1x256xf32> to vector<8x256xf32>
    %134 = arith.subf %130, %133 : vector<8x256xf32>
    %135 = math.exp %134 : vector<8x256xf32>
    %cst_44 = arith.constant dense<0.000000e+00> : vector<256xf32>
    %136 = vector.multi_reduction <add>, %135, %cst_44 [0] : vector<8x256xf32> to vector<256xf32>
    %137 = vector.shape_cast %136 : vector<256xf32> to vector<1x256xf32>
    %138 = vector.broadcast %137 : vector<1x256xf32> to vector<8x256xf32>
    %139 = arith.divf %135, %138 : vector<8x256xf32>
    %140 = arith.mulf %139, %39 : vector<8x256xf32>
    %cst_45 = arith.constant dense<0.000000e+00> : vector<256xf32>
    %141 = vector.multi_reduction <add>, %140, %cst_45 [0] : vector<8x256xf32> to vector<256xf32>
    %142 = vector.shape_cast %141 : vector<256xf32> to vector<1x256xf32>
    %143 = arith.mulf %139, %45 : vector<8x256xf32>
    %cst_46 = arith.constant dense<0.000000e+00> : vector<256xf32>
    %144 = vector.multi_reduction <add>, %143, %cst_46 [0] : vector<8x256xf32> to vector<256xf32>
    %145 = vector.shape_cast %144 : vector<256xf32> to vector<1x256xf32>
    %146 = vector.extract_strided_slice %29 {offsets = [160, 0], sizes = [32, 256], strides = [1, 1]} : vector<256x256xf32> to vector<32x256xf32>
    %147 = vector.shape_cast %146 : vector<32x256xf32> to vector<1x32x256xf32>
    %148 = vector.broadcast %147 : vector<1x32x256xf32> to vector<8x32x256xf32>
    %149 = arith.mulf %26, %148 : vector<8x32x256xf32>
    %cst_47 = arith.constant dense<0.000000e+00> : vector<8x256xf32>
    %150 = vector.multi_reduction <add>, %149, %cst_47 [1] : vector<8x32x256xf32> to vector<8x256xf32>
    %cst_48 = arith.constant dense<0xFF800000> : vector<256xf32>
    %151 = vector.multi_reduction <maximumf>, %150, %cst_48 [0] : vector<8x256xf32> to vector<256xf32>
    %152 = vector.shape_cast %151 : vector<256xf32> to vector<1x256xf32>
    %153 = vector.broadcast %152 : vector<1x256xf32> to vector<8x256xf32>
    %154 = arith.subf %150, %153 : vector<8x256xf32>
    %155 = math.exp %154 : vector<8x256xf32>
    %cst_49 = arith.constant dense<0.000000e+00> : vector<256xf32>
    %156 = vector.multi_reduction <add>, %155, %cst_49 [0] : vector<8x256xf32> to vector<256xf32>
    %157 = vector.shape_cast %156 : vector<256xf32> to vector<1x256xf32>
    %158 = vector.broadcast %157 : vector<1x256xf32> to vector<8x256xf32>
    %159 = arith.divf %155, %158 : vector<8x256xf32>
    %160 = arith.mulf %159, %39 : vector<8x256xf32>
    %cst_50 = arith.constant dense<0.000000e+00> : vector<256xf32>
    %161 = vector.multi_reduction <add>, %160, %cst_50 [0] : vector<8x256xf32> to vector<256xf32>
    %162 = vector.shape_cast %161 : vector<256xf32> to vector<1x256xf32>
    %163 = arith.mulf %159, %45 : vector<8x256xf32>
    %cst_51 = arith.constant dense<0.000000e+00> : vector<256xf32>
    %164 = vector.multi_reduction <add>, %163, %cst_51 [0] : vector<8x256xf32> to vector<256xf32>
    %165 = vector.shape_cast %164 : vector<256xf32> to vector<1x256xf32>
    %166 = vector.extract_strided_slice %29 {offsets = [192, 0], sizes = [32, 256], strides = [1, 1]} : vector<256x256xf32> to vector<32x256xf32>
    %167 = vector.shape_cast %166 : vector<32x256xf32> to vector<1x32x256xf32>
    %168 = vector.broadcast %167 : vector<1x32x256xf32> to vector<8x32x256xf32>
    %169 = arith.mulf %26, %168 : vector<8x32x256xf32>
    %cst_52 = arith.constant dense<0.000000e+00> : vector<8x256xf32>
    %170 = vector.multi_reduction <add>, %169, %cst_52 [1] : vector<8x32x256xf32> to vector<8x256xf32>
    %cst_53 = arith.constant dense<0xFF800000> : vector<256xf32>
    %171 = vector.multi_reduction <maximumf>, %170, %cst_53 [0] : vector<8x256xf32> to vector<256xf32>
    %172 = vector.shape_cast %171 : vector<256xf32> to vector<1x256xf32>
    %173 = vector.broadcast %172 : vector<1x256xf32> to vector<8x256xf32>
    %174 = arith.subf %170, %173 : vector<8x256xf32>
    %175 = math.exp %174 : vector<8x256xf32>
    %cst_54 = arith.constant dense<0.000000e+00> : vector<256xf32>
    %176 = vector.multi_reduction <add>, %175, %cst_54 [0] : vector<8x256xf32> to vector<256xf32>
    %177 = vector.shape_cast %176 : vector<256xf32> to vector<1x256xf32>
    %178 = vector.broadcast %177 : vector<1x256xf32> to vector<8x256xf32>
    %179 = arith.divf %175, %178 : vector<8x256xf32>
    %180 = arith.mulf %179, %39 : vector<8x256xf32>
    %cst_55 = arith.constant dense<0.000000e+00> : vector<256xf32>
    %181 = vector.multi_reduction <add>, %180, %cst_55 [0] : vector<8x256xf32> to vector<256xf32>
    %182 = vector.shape_cast %181 : vector<256xf32> to vector<1x256xf32>
    %183 = arith.mulf %179, %45 : vector<8x256xf32>
    %cst_56 = arith.constant dense<0.000000e+00> : vector<256xf32>
    %184 = vector.multi_reduction <add>, %183, %cst_56 [0] : vector<8x256xf32> to vector<256xf32>
    %185 = vector.shape_cast %184 : vector<256xf32> to vector<1x256xf32>
    %186 = vector.extract_strided_slice %29 {offsets = [224, 0], sizes = [32, 256], strides = [1, 1]} : vector<256x256xf32> to vector<32x256xf32>
    %187 = vector.shape_cast %186 : vector<32x256xf32> to vector<1x32x256xf32>
    %188 = vector.broadcast %187 : vector<1x32x256xf32> to vector<8x32x256xf32>
    %189 = arith.mulf %26, %188 : vector<8x32x256xf32>
    %cst_57 = arith.constant dense<0.000000e+00> : vector<8x256xf32>
    %190 = vector.multi_reduction <add>, %189, %cst_57 [1] : vector<8x32x256xf32> to vector<8x256xf32>
    %cst_58 = arith.constant dense<0xFF800000> : vector<256xf32>
    %191 = vector.multi_reduction <maximumf>, %190, %cst_58 [0] : vector<8x256xf32> to vector<256xf32>
    %192 = vector.shape_cast %191 : vector<256xf32> to vector<1x256xf32>
    %193 = vector.broadcast %192 : vector<1x256xf32> to vector<8x256xf32>
    %194 = arith.subf %190, %193 : vector<8x256xf32>
    %195 = math.exp %194 : vector<8x256xf32>
    %cst_59 = arith.constant dense<0.000000e+00> : vector<256xf32>
    %196 = vector.multi_reduction <add>, %195, %cst_59 [0] : vector<8x256xf32> to vector<256xf32>
    %197 = vector.shape_cast %196 : vector<256xf32> to vector<1x256xf32>
    %198 = vector.broadcast %197 : vector<1x256xf32> to vector<8x256xf32>
    %199 = arith.divf %195, %198 : vector<8x256xf32>
    %200 = arith.mulf %199, %39 : vector<8x256xf32>
    %cst_60 = arith.constant dense<0.000000e+00> : vector<256xf32>
    %201 = vector.multi_reduction <add>, %200, %cst_60 [0] : vector<8x256xf32> to vector<256xf32>
    %202 = vector.shape_cast %201 : vector<256xf32> to vector<1x256xf32>
    %203 = arith.mulf %199, %45 : vector<8x256xf32>
    %cst_61 = arith.constant dense<0.000000e+00> : vector<256xf32>
    %204 = vector.multi_reduction <add>, %203, %cst_61 [0] : vector<8x256xf32> to vector<256xf32>
    %205 = vector.shape_cast %204 : vector<256xf32> to vector<1x256xf32>
    %206 = tpu.concatenate %62, %82, %102, %122, %142, %162, %182, %202 in 0 : vector<1x256xf32>, vector<1x256xf32>, vector<1x256xf32>, vector<1x256xf32>, vector<1x256xf32>, vector<1x256xf32>, vector<1x256xf32>, vector<1x256xf32> -> vector<8x256xf32>
    %207 = tpu.concatenate %65, %85, %105, %125, %145, %165, %185, %205 in 0 : vector<1x256xf32>, vector<1x256xf32>, vector<1x256xf32>, vector<1x256xf32>, vector<1x256xf32>, vector<1x256xf32>, vector<1x256xf32>, vector<1x256xf32> -> vector<8x256xf32>
    %208 = tpu.concatenate %59, %79, %99, %119, %139, %159, %179, %199 in 0 : vector<8x256xf32>, vector<8x256xf32>, vector<8x256xf32>, vector<8x256xf32>, vector<8x256xf32>, vector<8x256xf32>, vector<8x256xf32>, vector<8x256xf32> -> vector<64x256xf32>
    %cst_62 = arith.constant dense<0xFF800000> : vector<256xf32>
    %209 = vector.multi_reduction <maximumf>, %206, %cst_62 [0] : vector<8x256xf32> to vector<256xf32>
    %210 = vector.shape_cast %209 : vector<256xf32> to vector<1x256xf32>
    %211 = vector.broadcast %210 : vector<1x256xf32> to vector<8x256xf32>
    %212 = arith.subf %206, %211 : vector<8x256xf32>
    %213 = math.exp %212 : vector<8x256xf32>
    %cst_63 = arith.constant dense<0.000000e+00> : vector<256xf32>
    %214 = vector.multi_reduction <add>, %213, %cst_63 [0] : vector<8x256xf32> to vector<256xf32>
    %215 = vector.shape_cast %214 : vector<256xf32> to vector<1x256xf32>
    %216 = vector.broadcast %215 : vector<1x256xf32> to vector<8x256xf32>
    %217 = arith.divf %213, %216 : vector<8x256xf32>
    %c0_64 = arith.constant 0 : index
    %c0_65 = arith.constant 0 : index
    %218 = vector.load %arg5[%c0_64, %c0_65] : memref<8x256xf32, #tpu.memory_space<vmem>>, vector<8x256xf32>
    %219 = arith.mulf %217, %218 : vector<8x256xf32>
    %cst_66 = arith.constant dense<0.000000e+00> : vector<256xf32>
    %220 = vector.multi_reduction <add>, %219, %cst_66 [0] : vector<8x256xf32> to vector<256xf32>
    %221 = vector.shape_cast %220 : vector<256xf32> to vector<1x256xf32>
    %222 = vector.broadcast %221 : vector<1x256xf32> to vector<8x256xf32>
    %223 = arith.divf %219, %222 : vector<8x256xf32>
    %224 = tpu.concatenate %22, %20, %208, %223, %207 in 0 : vector<32x256xf32>, vector<32x256xf32>, vector<64x256xf32>, vector<8x256xf32>, vector<8x256xf32> -> vector<144x256xf32>
    %c0_67 = arith.constant 0 : index
    %c0_68 = arith.constant 0 : index
    %225 = vector.load %arg8[%c0_67, %c0_68] : memref<144x256xf32, #tpu.memory_space<vmem>>, vector<144x256xf32>
    tpu.vector_store %arg8[%c0_67, %c0_68], %224 {strides = array<i32>} : memref<144x256xf32, #tpu.memory_space<vmem>>, vector<144x256xf32>,
    return
  }
  func.func @transform_0(%arg0: i32) -> (i32, i32) {
    %c0_i32 = arith.constant 0 : i32
    %c0_i32_0 = arith.constant 0 : i32
    return %c0_i32, %arg0 : i32, i32
  }
  func.func @transform_1(%arg0: i32) -> (i32, i32) {
    %c0_i32 = arith.constant 0 : i32
    %c0_i32_0 = arith.constant 0 : i32
    return %c0_i32, %arg0 : i32, i32
  }
  func.func @transform_2(%arg0: i32) -> (i32, i32, i32) {
    %c0_i32 = arith.constant 0 : i32
    %c0_i32_0 = arith.constant 0 : i32
    %c0_i32_1 = arith.constant 0 : i32
    return %c0_i32, %c0_i32_0, %arg0 : i32, i32, i32
  }
  func.func @transform_3(%arg0: i32) -> (i32, i32) {
    %c0_i32 = arith.constant 0 : i32
    %c0_i32_0 = arith.constant 0 : i32
    return %c0_i32, %arg0 : i32, i32
  }
  func.func @transform_4(%arg0: i32) -> (i32, i32) {
    %c0_i32 = arith.constant 0 : i32
    %c0_i32_0 = arith.constant 0 : i32
    return %c0_i32, %arg0 : i32, i32
  }
  func.func @transform_5(%arg0: i32) -> (i32, i32) {
    %c0_i32 = arith.constant 0 : i32
    %c0_i32_0 = arith.constant 0 : i32
    %c0_i32_1 = arith.constant 0 : i32
    return %c0_i32, %c0_i32_0 : i32, i32
  }
  func.func @transform_6(%arg0: i32) -> (i32, i32) {
    %c0_i32 = arith.constant 0 : i32
    %c0_i32_0 = arith.constant 0 : i32
    %c0_i32_1 = arith.constant 0 : i32
    return %c0_i32, %c0_i32_0 : i32, i32
  }
  func.func @transform_7(%arg0: i32) -> (i32, i32) {
    %c0_i32 = arith.constant 0 : i32
    %c0_i32_0 = arith.constant 0 : i32
    return %c0_i32, %arg0 : i32, i32
  }
}

</mosaic_0001>

<bundles_post_ra>
// kernel: eviction_policy_forward.1
= control target key start
LH: loop header
LB: loop body
LE: loop exit
PB: predicated region body
PF: predicated region fallthrough
CT: control target
= control target key end

     0   :  { %v6764_v3 = vmov 0.0   ;;  %v6765_v4 = vmov 0   ;;  %v6766_v6 = vmov 64   ;;  %vm139_vm0 = vcmask 523264   ;;  %s12755_s0 = inlined_call_operand.vmem [shape: f32[64,256], index: 0, kind: input, shape index: {}]   ;;  %s12756_s3 = inlined_call_operand.vmem [shape: bf16[128,256], index: 3, kind: input, shape index: {}]   ;;  %s12757_s5 = inlined_call_operand.vmem [shape: f32[168,128], index: 5, kind: input, shape index: {}]   ;;  %s12758_s6 = inlined_call_operand.vmem [shape: bf16[256,128], index: 6, kind: input, shape index: {}]   ;;  %s12759_s2 = inlined_call_operand.vmem [shape: bf16[7,32,256], index: 2, kind: input, shape index: {}]   ;;  %s12760_s1 = inlined_call_operand.vmem [shape: f32[32,256], index: 1, kind: input, shape index: {}]   ;;  %s12761_s7 = inlined_call_operand.vmem [shape: f32[144,256], index: 7, kind: output, shape index: {}]   ;;  %s12762_s4 = inlined_call_operand.vmem [shape: f32[8,256], index: 4, kind: input, shape index: {}]  }
   0x1   :  { %v58_v0 = vld [vmem:[%s12755_s0 + $0x78] sm:$0xff]  ;;  %v57_v1 = vld [vmem:[%s12755_s0 + $0x70] sm:$0xff]  ;;  %v56_v2 = vld [vmem:[%s12755_s0 + $0x68] sm:$0xff]  ;;  %236 = vmatprep.mubr.f32.mxu0 %v6764_v3  ;;  %923 = vmatprep.mubr.bf16.mxu1 %v6765_v4  ;;  %v6767_v59 = vmov 1   ;;  %vm1847_vm1 = vcmask 1041409   ;;  %vm1850_vm2 = vcmask 1042434  }
   0x2   :  { %188 = vmatprep.subr.mxu0 %v58_v0  ;;  %v6265_v5 = vld [vmem:[%s12756_s3 + $0x74] ss:$8 sps:$4 sm:$0xff]   ;;  %6257 = vset.pattern.permute.xlu1 %v6766_v6  ;;  %v55_v7 = vld [vmem:[%s12755_s0 + $0x60] sm:$0xff]  ;;  %v6267_v8 = vld [vmem:[%s12756_s3 + $0x70] ss:$8 sps:$4 sm:$0xff]   ;;  %vm1853_vm3 = vcmask 1043459  }
   0x3   :  { %189 = vmatpush1.msra.mxu0 %v57_v1  ;;  %v54_v9 = vld [vmem:[%s12755_s0 + $0x58] sm:$0xff]  ;;  %6256 = vset.pattern.permute.xlu0 %v6766_v6  ;;  %v53_v10 = vld [vmem:[%s12755_s0 + $0x50] sm:$0xff]  ;;  %v52_v11 = vld [vmem:[%s12755_s0 + $0x48] sm:$0xff]  ;;  %vm1856_vm4 = vcmask 1044484   ;;  %vm1859_vm5 = vcmask 1045509   ;;  %vm1862_vm6 = vcmask 1046534  }
   0x4   :  { %190 = vmatprep.subr.mxu0 %v56_v2  ;;  %6236 = vmatprep.subr.bf16.mxu1 %v6265_v5  ;;  %v6268_v12 = vld [vmem:[%s12756_s3 + $0x64] ss:$8 sps:$4 sm:$0xff]   ;;  %v6270_v14 = vld [vmem:[%s12756_s3 + $0x60] ss:$8 sps:$4 sm:$0xff]   ;;  %v50_v15 = vld [vmem:[%s12755_s0 + $0x38] sm:$0xff]  ;;  %vm1865_vm7 = vcmask 1047559  }
   0x5   :  { %191 = vmatpush1.msra.mxu0 %v55_v7  ;;  %6244 = vmatpush1.bf16.msra.mxu1 %v6267_v8  ;;  %v51_v13 = vld [vmem:[%s12755_s0 + $0x40] sm:$0xff]  ;;  %v49_v16 = vld [vmem:[%s12755_s0 + $0x30] sm:$0xff]  ;;  %v48_v18 = vld [vmem:[%s12755_s0 + $0x28] sm:$0xff]  ;;  %vm5625_vm8 = vcmask 1040384   ;;  %vm5628_vm9 = vcmask 1041408   ;;  %vm5631_vm10 = vcmask 1042432  }
   0x6   :  { %192 = vmatprep.subr.mxu0 %v54_v9  ;;  %6237 = vmatprep.subr.bf16.mxu1 %v6268_v12  ;;  %v6271_v17 = vld [vmem:[%s12756_s3 + $0x54] ss:$8 sps:$4 sm:$0xff]   ;;  %v47_v19 = vld [vmem:[%s12755_s0 + $0x20] sm:$0xff]  ;;  %v6273_v20 = vld [vmem:[%s12756_s3 + $0x50] ss:$8 sps:$4 sm:$0xff]   ;;  %vm5634_vm11 = vcmask 1043456  }
   0x7   :  { %193 = vmatpush1.msra.mxu0 %v53_v10  ;;  %v6274_v21 = vld [vmem:[%s12756_s3 + $0x44] ss:$8 sps:$4 sm:$0xff]   ;;  %v46_v22 = vld [vmem:[%s12755_s0 + $0x18] sm:$0xff]  ;;  %v45_v24 = vld [vmem:[%s12755_s0 + $0x10] sm:$0xff]  ;;  %vm5637_vm12 = vcmask 1044480   ;;  %vm5640_vm13 = vcmask 1045504  }
   0x8   :  { %194 = vmatprep.subr.mxu0 %v52_v11  ;;  %v27_v23 = vld [vmem:[%s12757_s5] sm:$0xff]  ;;  %v44_v25 = vld [vmem:[%s12755_s0 + $0x8] sm:$0xff]  ;;  %v6277_v28 = vld [vmem:[%s12756_s3 + $0x34] ss:$8 sps:$4 sm:$0xff]   ;;  %vm5643_vm14 = vcmask 1046528  }
   0x9   :  { %195 = vmatpush1.msra.mxu0 %v51_v13  ;;  %6245 = vmatpush1.bf16.msra.mxu1 %v6270_v14  ;;  %v6276_v26 = vld [vmem:[%s12756_s3 + $0x40] ss:$8 sps:$4 sm:$0xff]   ;;  %v6279_v30 = vld [vmem:[%s12756_s3 + $0x30] ss:$8 sps:$4 sm:$0xff]   ;;  %v6280_v31 = vld [vmem:[%s12756_s3 + $0x24] ss:$8 sps:$4 sm:$0xff]  }
   0xa   :  { %196 = vmatprep.subr.mxu0 %v50_v15  ;;  %6238 = vmatprep.subr.bf16.mxu1 %v6271_v17  ;;  %v43_v27 = vld [vmem:[%s12755_s0] sm:$0xff]  ;;  %v28_v29 = vld [vmem:[%s12757_s5 + $0x8] sm:$0xff]  ;;  %v6283_v34 = vld [vmem:[%s12756_s3 + $0x14] ss:$8 sps:$4 sm:$0xff]  }
   0xb   :  { %197 = vmatpush1.msra.mxu0 %v49_v16  ;;  %61 = vperm.xlu0 %6256, %v27_v23   ;;  %v31_v32 = vld [vmem:[%s12757_s5 + $0x20] sm:$0xff]  ;;  %v29_v35 = vld [vmem:[%s12757_s5 + $0x10] sm:$0xff]  ;;  %v32_v36 = vld [vmem:[%s12757_s5 + $0x28] sm:$0xff] }
   0xc   :  { %198 = vmatprep.subr.mxu0 %v48_v18  ;;  %v6282_v33 = vld [vmem:[%s12756_s3 + $0x20] ss:$8 sps:$4 sm:$0xff]   ;;  %81 = vperm.xlu1 %6257, %v31_v32   ;;  %v6285_v37 = vld [vmem:[%s12756_s3 + $0x10] ss:$8 sps:$4 sm:$0xff]   ;;  %v6286_v38 = vld [vmem:[%s12756_s3 + $0x4] ss:$8 sps:$4 sm:$0xff]  }
   0xd   :  { %199 = vmatpush1.msra.mxu0 %v47_v19  ;;  %6246 = vmatpush1.bf16.msra.mxu1 %v6273_v20  ;;  %v30_v39 = vld [vmem:[%s12757_s5 + $0x18] sm:$0xff]  ;;  %v33_v40 = vld [vmem:[%s12757_s5 + $0x30] sm:$0xff]  ;;  %v6288_v41 = vld [vmem:[%s12756_s3] ss:$8 sps:$4 sm:$0xff]  }
   0xe   :  { %200 = vmatprep.subr.mxu0 %v46_v22  ;;  %6239 = vmatprep.subr.bf16.mxu1 %v6274_v21  ;;  %v6940_v42 = vld [vmem:[%s12757_s5 + $0x60] sm:$0xff]  ;;  %v6289_v43 = vld [vmem:[%s12758_s6 + $0x28] sm:$0xff]   ;;  %v34_v44 = vld [vmem:[%s12757_s5 + $0x38] sm:$0xff] }
   0xf   :  { %201 = vmatpush1.msra.mxu0 %v45_v24  ;;  %66 = vperm.xlu0 %6256, %v28_v29   ;;  %v6954_v45 = vld [vmem:[%s12757_s5 + $0x68] sm:$0xff]  ;;  %v6960_v46 = vld [vmem:[%s12757_s5 + $0x70] sm:$0xff]  ;;  %v6972_v48 = vld [vmem:[%s12757_s5 + $0x78] sm:$0xff] }
  0x10   :  { %202 = vmatprep.subr.mxu0 %v44_v25  ;;  %86 = vperm.xlu1 %6257, %v32_v36   ;;  %v6290_v47 = vld [vmem:[%s12758_s6 + $0x30] sm:$0xff]   ;;  %v1035_v49 = vld [vmem:[%s12757_s5 + $0x88] sm:$0xff]  ;;  %v1034_v50 = vld [vmem:[%s12757_s5 + $0x80] sm:$0xff] }
  0x11   :  { %203 = vmatpush1.msra.mxu0 %v43_v27  ;;  %6247 = vmatpush1.bf16.msra.mxu1 %v6276_v26  ;;  %v35_v51 = vld [vmem:[%s12757_s5 + $0x40] sm:$0xff]  ;;  %v1036_v52 = vld [vmem:[%s12757_s5 + $0x90] sm:$0xff]  ;;  %v6291_v53 = vld [vmem:[%s12758_s6 + $0x38] sm:$0xff]  }
  0x12   :  { %6164 = vmatmul.mubr.msk.f32.vlgmr.msra.gmra.mxu0 %vm139_vm0, %v27_v23  ;;  %841 = vmatprep.subr.bf16.mxu0 %v6265_v5  ;;  %v1037_v54 = vld [vmem:[%s12757_s5 + $0x98] sm:$0xff]  ;;  %v36_v55 = vld [vmem:[%s12757_s5 + $0x48] sm:$0xff]  ;;  %v1038_v56 = vld [vmem:[%s12757_s5 + $0xa0] sm:$0xff] }
  0x13   :  { %842 = vmatpush1.bf16.msra.mxu0 %v6267_v8  ;;  %6240 = vmatprep.subr.bf16.mxu1 %v6277_v28  ;;  %v37_v57 = vld [vmem:[%s12757_s5 + $0x50] sm:$0xff]  ;;  %v6292_v58 = vld [vmem:[%s12758_s6 + $0x40] sm:$0xff]   ;;  %v38_v60 = vld [vmem:[%s12757_s5 + $0x58] sm:$0xff] }
  0x14   :  { %242 = vmatprep.mubr.f32.mxu0 %v6764_v3  ;;  %843 = vmatprep.subr.bf16.mxu0 %v6268_v12  ;;  %v6293_v61 = vld [vmem:[%s12758_s6 + $0x48] sm:$0xff]   ;;  %v6294_v62 = vld [vmem:[%s12758_s6 + $0x50] sm:$0xff]   ;;  %v6295_v63 = vld [vmem:[%s12758_s6] sm:$0xff]  }
  0x15   :  { %6248 = vmatpush1.bf16.msra.mxu1 %v6279_v30  ;;  %71 = vperm.xlu0 %6256, %v29_v35   ;;  %v6296_v0 = vld [vmem:[%s12758_s6 + $0x58] sm:$0xff]   ;;  %v6297_v1 = vld [vmem:[%s12758_s6 + $0x8] sm:$0xff]   ;;  %v6298_v2 = vld [vmem:[%s12758_s6 + $0x60] sm:$0xff]  }
  0x16   :  { %6165 = vmatmul.mubr.msk.f32.gmra.mxu0 %vm139_vm0, %v28_v29  ;;  %6241 = vmatprep.subr.bf16.mxu1 %v6280_v31  ;;  %v6300_v5 = vld [vmem:[%s12758_s6 + $0x68] sm:$0xff]   ;;  %v6302_v7 = vld [vmem:[%s12758_s6 + $0x70] sm:$0xff]   ;;  %v6303_v8 = vld [vmem:[%s12758_s6 + $0x20] sm:$0xff]  }
  0x17   :  { %248 = vmatprep.mubr.f32.mxu0 %v6764_v3  ;;  %844 = vmatpush1.bf16.msra.mxu0 %v6270_v14  ;;  %v6304_v9 = vld [vmem:[%s12758_s6 + $0x78] sm:$0xff]   ;;  %v535_v23 = vld [vmem:[%s12759_s2 + $0x10] sm:$0xff] }
  0x18   :  { %845 = vmatprep.subr.bf16.mxu0 %v6271_v17  ;;  %91 = vperm.xlu1 %6257, %v33_v40   ;;  %v539_v24 = vld [vmem:[%s12759_s2 + $0x30] sm:$0xff] }
  0x19   :  { %6249 = vmatpush1.bf16.msra.mxu1 %v6282_v33  ;;  %76 = vperm.xlu0 %6256, %v30_v39   ;;  %v543_v25 = vld [vmem:[%s12759_s2 + $0x50] sm:$0xff] }
  0x1a   :  { %6166 = vmatmul.mubr.msk.f32.gmra.mxu0 %vm139_vm0, %v29_v35  ;;  %6242 = vmatprep.subr.bf16.mxu1 %v6283_v34  ;;  %v547_v27 = vld [vmem:[%s12759_s2 + $0x70] sm:$0xff] }
  0x1b   :  { %254 = vmatprep.mubr.f32.mxu0 %v6764_v3  ;;  %846 = vmatpush1.bf16.msra.mxu0 %v6273_v20  ;;  %v555_v29 = vld [vmem:[%s12759_s2 + $0xb0] sm:$0xff] }
  0x1c   :  { %847 = vmatprep.subr.bf16.mxu0 %v6274_v21  ;;  %96 = vperm.xlu1 %6257, %v34_v44  }
  0x1d   :  { %6250 = vmatpush1.bf16.msra.mxu1 %v6285_v37  ;;  %121 = vperm.xlu0 %6256, %v6940_v42  }
  0x1e   :  { %6167 = vmatmul.mubr.msk.f32.gmra.mxu0 %vm139_vm0, %v30_v39  ;;  %6243 = vmatprep.subr.bf16.mxu1 %v6286_v38  ;;  %v7138_v39 = vunpack.c.h.bf16 %v535_v23 }
  0x1f   :  { %260 = vmatprep.mubr.f32.mxu0 %v6764_v3  ;;  %848 = vmatpush1.bf16.msra.mxu0 %v6276_v26 }
  0x20   :  { %849 = vmatprep.subr.bf16.mxu0 %v6277_v28  ;;  %126 = vperm.xlu1 %6257, %v6954_v45   ;;  %v551_v28 = vld [vmem:[%s12759_s2 + $0x90] sm:$0xff]  ;;  %13287 = vst [vmem:[#allocation10_spill] sm:$0xff] %v7138_v39 }
  0x21   :  { %6251 = vmatpush1.bf16.msra.mxu1 %v6288_v41  ;;  %131 = vperm.xlu0 %6256, %v6960_v46  }
  0x22   :  { %6168 = vmatmul.mubr.msk.f32.gmra.mxu0 %vm139_vm0, %v31_v32  ;;  %v7124_v32 = vunpack.c.l.bf16 %v535_v23  ;;  %v545_v23 = vld [vmem:[%s12759_s2 + $0x60] sm:$0xff] }
  0x23   :  { %266 = vmatprep.mubr.f32.mxu0 %v6764_v3  ;;  %850 = vmatpush1.bf16.msra.mxu0 %v6279_v30  ;;  %v559_v30 = vld [vmem:[%s12759_s2 + $0xd0] sm:$0xff] }
  0x24   :  { %924 = vmatmul.mubr.bf16.vlgmr.msra.gmra.mxu1 %v6289_v43  ;;  %851 = vmatprep.subr.bf16.mxu0 %v6280_v31  ;;  %13280 = vst [vmem:[#allocation3_spill] sm:$0xff] %v7124_v32 }
  0x25   :  { %933 = vmatprep.mubr.bf16.mxu1 %v6765_v4  ;;  %136 = vperm.xlu1 %6257, %v6972_v48  }
  0x26   :  { %6169 = vmatmul.mubr.msk.f32.gmra.mxu0 %vm139_vm0, %v32_v36  ;;  %6258 = vset.pattern.permute.xlu0 %v6765_v4  ;;  %v7132_v36 = vunpack.c.l.bf16 %v547_v27 }
  0x27   :  { %272 = vmatprep.mubr.f32.mxu0 %v6764_v3  ;;  %852 = vmatpush1.bf16.msra.mxu0 %v6282_v33  ;;  %v7126_v33 = vunpack.c.l.bf16 %v539_v24 }
  0x28   :  { %853 = vmatprep.subr.bf16.mxu0 %v6283_v34  ;;  %1041 = vperm.xlu0 %6258, %v1034_v50   ;;  %v7128_v34 = vunpack.c.l.bf16 %v543_v25  ;;  %13284 = vst [vmem:[#allocation7_spill] sm:$0xff] %v7132_v36 }
  0x29   :  { %6259 = vset.pattern.permute.xlu1 %v6765_v4  ;;  %13281 = vst [vmem:[#allocation4_spill] sm:$0xff] %v7126_v33 }
  0x2a   :  { %6170 = vmatmul.mubr.msk.f32.gmra.mxu0 %vm139_vm0, %v33_v40  ;;  %1046 = vperm.xlu1 %6259, %v1035_v49   ;;  %13282 = vst [vmem:[#allocation5_spill] sm:$0xff] %v7128_v34  ;;  %v536_v40 = vld [vmem:[%s12759_s2 + $0x18] sm:$0xff] }
  0x2b   :  { %278 = vmatprep.mubr.f32.mxu0 %v6764_v3  ;;  %854 = vmatpush1.bf16.msra.mxu0 %v6285_v37  ;;  %v7134_v37 = vunpack.c.l.bf16 %v551_v28 }
  0x2c   :  { %934 = vmatmul.mubr.bf16.gmra.mxu1 %v6290_v47  ;;  %855 = vmatprep.subr.bf16.mxu0 %v6286_v38  ;;  %v7136_v38 = vunpack.c.l.bf16 %v555_v29  ;;  %v548_v47 = vld [vmem:[%s12759_s2 + $0x78] sm:$0xff] }
  0x2d   :  { %943 = vmatprep.mubr.bf16.mxu1 %v6765_v4  ;;  %1056 = vperm.xlu0 %6258, %v1037_v54   ;;  %13285 = vst [vmem:[#allocation8_spill] sm:$0xff] %v7134_v37 }
  0x2e   :  { %6171 = vmatmul.mubr.msk.f32.gmra.mxu0 %vm139_vm0, %v34_v44  ;;  %1051 = vperm.xlu1 %6259, %v1036_v52   ;;  %13286 = vst [vmem:[#allocation9_spill] sm:$0xff] %v7136_v38  ;;  %v7149_v44 = vunpack.c.l.bf16 %v559_v30 }
  0x2f   :  { %284 = vmatprep.mubr.f32.mxu0 %v6764_v3  ;;  %856 = vmatpush1.bf16.msra.mxu0 %v6288_v41  ;;  %v540_v41 = vld [vmem:[%s12759_s2 + $0x38] sm:$0xff] }
  0x30   :  { %13288 = vst [vmem:[#allocation11_spill] sm:$0xff] %v7149_v44 }
  0x31   :  { %6260 = vset.pattern.permute.xlu0 %v6767_v59 }
  0x32   :  { %6172 = vmatmul.mubr.msk.f32.gmra.mxu0 %vm139_vm0, %v35_v51  ;;  %1269 = vperm.xlu1 %6259, %v1038_v56  }
  0x33   :  { %290 = vmatprep.mubr.f32.mxu0 %v6764_v3  ;;  %1303 = vperm.xlu0 %6260, %v1034_v50  }
  0x34   :  { %944 = vmatmul.mubr.bf16.gmra.mxu1 %v6291_v53  ;;  %v7168_v53 = vunpack.c.h.bf16 %v555_v29  ;;  %v553_v29 = vld [vmem:[%s12759_s2 + $0xa0] sm:$0xff] }
  0x35   :  { %953 = vmatprep.mubr.bf16.mxu1 %v6765_v4 }
  0x36   :  { %6173 = vmatmul.mubr.msk.f32.gmra.mxu0 %vm139_vm0, %v36_v55  ;;  %6261 = vset.pattern.permute.xlu1 %v6767_v59  ;;  %13293 = vst [vmem:[#allocation16_spill] sm:$0xff] %v7168_v53 }
  0x37   :  { %296 = vmatprep.mubr.f32.mxu0 %v6764_v3  ;;  %1307 = vperm.xlu1 %6261, %v1035_v49   ;;  %v556_v49 = vld [vmem:[%s12759_s2 + $0xb8] sm:$0xff] }
  0x38   :  { %1315 = vperm.xlu0 %6260, %v1037_v54   ;;  %v560_v54 = vld [vmem:[%s12759_s2 + $0xd8] sm:$0xff] }
  0x3a   :  { %6174 = vmatmul.mubr.msk.f32.gmra.mxu0 %vm139_vm0, %v37_v57 }
  0x3b   :  { %302 = vmatprep.mubr.f32.mxu0 %v6764_v3  ;;  %1311 = vperm.xlu1 %6261, %v1036_v52   ;;  %v7166_v52 = vunpack.c.h.bf16 %v551_v28  ;;  %v7221_v28 = vunpack.c.h.bf16 %v560_v54 }
  0x3c   :  { %954 = vmatmul.mubr.bf16.gmra.mxu1 %v6292_v58  ;;  %6263 = vset.pattern.permute.xlu0 %v6766_v6  ;;  %v7177_v58 = vunpack.c.l.bf16 %v536_v40 }
  0x3d   :  { %963 = vmatprep.mubr.bf16.mxu1 %v6765_v4  ;;  %106 = vperm.xlu0 %6263, %v36_v55   ;;  %13292 = vst [vmem:[#allocation15_spill] sm:$0xff] %v7166_v52  ;;  %13310 = vst [vmem:[#allocation33_spill] sm:$0xff] %v7221_v28 }
  0x3e   :  { %6175 = vmatmul.mubr.msk.f32.gmra.mxu0 %vm139_vm0, %v38_v60  ;;  %13296 = vst [vmem:[#allocation19_spill] sm:$0xff] %v7177_v58 }
  0x3f   :  { %308 = vmatprep.mubr.f32.mxu0 %v6764_v3  ;;  %6262 = vset.pattern.permute.xlu1 %v6766_v6  ;;  %v6301_v6 = vld [vmem:[%s12758_s6 + $0x18] sm:$0xff]  }
  0x40   :  { %101 = vperm.xlu1 %6262, %v35_v51   ;;  %v7164_v51 = vunpack.c.h.bf16 %v547_v27  ;;  %v7219_v27 = vunpack.c.h.bf16 %v556_v49 }
  0x41   :  { %6264 = vset.pattern.permute.xlu0 %v6767_v59  ;;  %v7179_v59 = vunpack.c.l.bf16 %v540_v41 }
  0x42   :  { %6176 = vmatmul.mubr.msk.f32.gmra.mxu0 %vm139_vm0, %v6940_v42  ;;  %1527 = vperm.xlu0 %6264, %v1038_v56   ;;  %v544_v42 = vld [vmem:[%s12759_s2 + $0x58] sm:$0xff]  ;;  %13291 = vst [vmem:[#allocation14_spill] sm:$0xff] %v7164_v51  ;;  %13309 = vst [vmem:[#allocation32_spill] sm:$0xff] %v7219_v27 }
  0x43   :  { %314 = vmatprep.mubr.f32.mxu0 %v6764_v3  ;;  %13297 = vst [vmem:[#allocation20_spill] sm:$0xff] %v7179_v59 }
  0x44   :  { %964 = vmatmul.mubr.bf16.gmra.mxu1 %v6293_v61  ;;  %111 = vperm.xlu1 %6262, %v37_v57   ;;  %v7175_v57 = vunpack.c.h.bf16 %v559_v30  ;;  %v557_v30 = vld [vmem:[%s12759_s2 + $0xc0] sm:$0xff] }
  0x45   :  { %973 = vmatprep.mubr.bf16.mxu1 %v6765_v4 }
  0x46   :  { %6177 = vmatmul.mubr.msk.f32.gmra.mxu0 %vm139_vm0, %v6954_v45  ;;  %v7151_v45 = vunpack.c.h.bf16 %v539_v24  ;;  %13295 = vst [vmem:[#allocation18_spill] sm:$0xff] %v7175_v57  ;;  %v549_v24 = vld [vmem:[%s12759_s2 + $0x80] sm:$0xff] }
  0x47   :  { %320 = vmatprep.mubr.f32.mxu0 %v6764_v3 }
  0x48   :  { %116 = vperm.xlu1 %6262, %v38_v60   ;;  %13289 = vst [vmem:[#allocation12_spill] sm:$0xff] %v7151_v45  ;;  %v7181_v60 = vunpack.c.l.bf16 %v544_v42 }
  0x4a   :  { %6178 = vmatmul.mubr.msk.f32.gmra.mxu0 %vm139_vm0, %v6960_v46  ;;  %v7153_v46 = vunpack.c.h.bf16 %v543_v25  ;;  %13298 = vst [vmem:[#allocation21_spill] sm:$0xff] %v7181_v60 }
  0x4b   :  { %326 = vmatprep.mubr.f32.mxu0 %v6764_v3  ;;  %v6299_v3 = vld [vmem:[%s12758_s6 + $0x10] sm:$0xff]  }
  0x4c   :  { %974 = vmatmul.mubr.bf16.gmra.mxu1 %v6294_v62  ;;  %13290 = vst [vmem:[#allocation13_spill] sm:$0xff] %v7153_v46  ;;  %v7183_v62 = vunpack.c.l.bf16 %v548_v47 }
  0x4d   :  { %983 = vmatprep.mubr.bf16.mxu1 %v6765_v4 }
  0x4e   :  { %6179 = vmatmul.mubr.msk.f32.gmra.mxu0 %vm139_vm0, %v6972_v48  ;;  %v552_v48 = vld [vmem:[%s12759_s2 + $0x98] sm:$0xff]  ;;  %13299 = vst [vmem:[#allocation22_spill] sm:$0xff] %v7183_v62 }
  0x4f   :  { %873 = vmatprep.mubr.bf16.mxu0 %v6765_v4  ;;  %v7217_v25 = vunpack.c.h.bf16 %v552_v48 }
  0x51   :  { %13308 = vst [vmem:[#allocation31_spill] sm:$0xff] %v7217_v25 }
  0x52   :  { %874 = vmatmul.mubr.bf16.vlgmr.msra.gmra.mxu0 %v6295_v63  ;;  %v7185_v63 = vunpack.c.l.bf16 %v552_v48  ;;  %v7239_v48 = vunpack.c.l.bf16 %v545_v23 }
  0x53   :  { %883 = vmatprep.mubr.bf16.mxu0 %v6765_v4 }
  0x54   :  { %984 = vmatmul.mubr.bf16.gmra.mxu1 %v6296_v0  ;;  %13300 = vst [vmem:[#allocation23_spill] sm:$0xff] %v7185_v63  ;;  %v7187_v0 = vunpack.c.l.bf16 %v556_v49  ;;  %13315 = vst [vmem:[#allocation38_spill] sm:$0xff] %v7239_v48  ;;  %v7241_v49 = vunpack.c.l.bf16 %v549_v24 }
  0x55   :  { %993 = vmatprep.mubr.bf16.mxu1 %v6765_v4 }
  0x56   :  { %13301 = vst [vmem:[#allocation24_spill] sm:$0xff] %v7187_v0  ;;  %13316 = vst [vmem:[#allocation39_spill] sm:$0xff] %v7241_v49 }
  0x5a   :  { %884 = vmatmul.mubr.bf16.gmra.mxu0 %v6297_v1 }
  0x5b   :  { %893 = vmatprep.mubr.bf16.mxu0 %v6765_v4 }
  0x5c   :  { %994 = vmatmul.mubr.bf16.gmra.mxu1 %v6298_v2  ;;  %v7189_v2 = vunpack.c.l.bf16 %v560_v54  ;;  %v7243_v54 = vunpack.c.l.bf16 %v553_v29 }
  0x5d   :  { %1003 = vmatprep.mubr.bf16.mxu1 %v6765_v4 }
  0x5e   :  { %13302 = vst [vmem:[#allocation25_spill] sm:$0xff] %v7189_v2  ;;  %13317 = vst [vmem:[#allocation40_spill] sm:$0xff] %v7243_v54 }
  0x62   :  { %894 = vmatmul.mubr.bf16.gmra.mxu0 %v6299_v3  ;;  %v7191_v3 = vunpack.c.h.bf16 %v536_v40 }
  0x63   :  { %903 = vmatprep.mubr.bf16.mxu0 %v6765_v4 }
  0x64   :  { %1004 = vmatmul.mubr.bf16.gmra.mxu1 %v6300_v5  ;;  %13303 = vst [vmem:[#allocation26_spill] sm:$0xff] %v7191_v3  ;;  %v7193_v5 = vunpack.c.h.bf16 %v540_v41 }
  0x65   :  { %1013 = vmatprep.mubr.bf16.mxu1 %v6765_v4 }
  0x66   :  { %13304 = vst [vmem:[#allocation27_spill] sm:$0xff] %v7193_v5 }
  0x6a   :  { %904 = vmatmul.mubr.bf16.gmra.mxu0 %v6301_v6  ;;  %v533_v6 = vld [vmem:[%s12759_s2] sm:$0xff] }
  0x6b   :  { %913 = vmatprep.mubr.bf16.mxu0 %v6765_v4 }
  0x6c   :  { %1014 = vmatmul.mubr.bf16.gmra.mxu1 %v6302_v7  ;;  %v537_v7 = vld [vmem:[%s12759_s2 + $0x20] sm:$0xff] }
  0x6d   :  { %1023 = vmatprep.mubr.bf16.mxu1 %v6765_v4 }
  0x72   :  { %914 = vmatmul.mubr.bf16.gmra.mxu0 %v6303_v8 }
  0x74   :  { %1024 = vmatmul.mubr.bf16.gmra.mxu1 %v6304_v9 }
  0x86   :  { %v62_v12 = vpop.permute.xlu0 %61 }
  0x87   :  { %v7085_v10 = vpop.permute.xlu1 %81 }
  0x8a   :  { %v67_v15 = vpop.permute.xlu0 %66 }
  0x8b   :  { %v7087_v13 = vpop.permute.xlu1 %86 }
  0x90   :  { %v7091_v18 = vpop.permute.xlu0 %71 }
  0x93   :  { %v7089_v4 = vpop.permute.xlu1 %91 }
  0x94   :  { %v7095_v21 = vpop.permute.xlu0 %76 }
  0x97   :  { %v7093_v19 = vpop.permute.xlu1 %96 }
  0x98   :  { %v7130_v35 = vpop.permute.xlu0 %121 }
  0x99   :  { %13283 = vst [vmem:[#allocation6_spill] sm:$0xff] %v7130_v35  ;;  %v550_v35 = vld [vmem:[%s12759_s2 + $0x88] sm:$0xff] }
  0x9b   :  { %v7108_v26 = vpop.permute.xlu1 %126 }
  0x9c   :  { %13279 = vst [vmem:[#allocation2_spill] sm:$0xff] %v7108_v26  ;;  %v546_v26 = vld [vmem:[%s12759_s2 + $0x68] sm:$0xff] }
  0xa0   :  { %v7173_v55 = vpop.permute.xlu1 %136 }
  0xa1   :  { %13294 = vst [vmem:[#allocation17_spill] sm:$0xff] %v7173_v55 }
  0xd2   :  { %v238_v11 = vpop.f32.mrf.mxu0 }
  0xd3   :  { %v239_v43 = vadd.f32 %v238_v11, %v62_v12  ;;  %v7201_v11 = vpop.permute.xlu0 %131 }
  0xd4   :  { %v240_v14 = vpop.f32.mrf.mxu0  ;;  %13305 = vst [vmem:[#allocation28_spill] sm:$0xff] %v7201_v11  ;;  %v534_v11 = vld [vmem:[%s12759_s2 + $0x8] sm:$0xff] }
  0xd5   :  { %v241_v50 = vadd.f32 %v240_v14, %v62_v12  ;;  %v6180_v1 = vmul.f32 -1.442695, %v239_v43  ;;  %v7203_v12 = vunpack.c.h.bf16 %v544_v42  ;;  %v7205_v14 = vunpack.c.h.bf16 %v548_v47  ;;  %v7235_v43 = vpop.permute.xlu1 %1046 }
  0xd6   :  { %v244_v16 = vpop.f32.mrf.mxu0  ;;  %v7233_v42 = vunpack.c.l.bf16 %v537_v7  ;;  %13313 = vst [vmem:[#allocation36_spill] sm:$0xff] %v7235_v43  ;;  %v7251_v43 = vunpack.c.h.bf16 %v537_v7  ;;  %v7266_v7 = vunpack.c.h.bf16 %v545_v23  ;;  %v558_v23 = vld [vmem:[%s12759_s2 + $0xc8] sm:$0xff] }
  0xd7   :  { %v245_v61 = vadd.f32 %v244_v16, %v67_v15  ;;  %v6181_v8 = vmul.f32 -1.442695, %v241_v50  ;;  %13306 = vst [vmem:[#allocation29_spill] sm:$0xff] %v7203_v12  ;;  %13307 = vst [vmem:[#allocation30_spill] sm:$0xff] %v7205_v14  ;;  %v541_v16 = vld [vmem:[%s12759_s2 + $0x40] sm:$0xff]  ;;  %6305 = vpow2.f32 %v6180_v1  ;;  %v7249_v1 = vunpack.c.h.bf16 %v533_v6 }
  0xd8   :  { %v246_v17 = vpop.f32.mrf.mxu0  ;;  %13312 = vst [vmem:[#allocation35_spill] sm:$0xff] %v7233_v42  ;;  %v7237_v47 = vunpack.c.l.bf16 %v541_v16  ;;  %13320 = vst [vmem:[#allocation43_spill] sm:$0xff] %v7251_v43 }
  0xd9   :  { %v247_v9 = vadd.f32 %v246_v17, %v67_v15  ;;  %v6182_v40 = vmul.f32 -1.442695, %v245_v61  ;;  %6307 = vpow2.f32 %v6181_v8  ;;  %v7245_v61 = vunpack.c.l.bf16 %v557_v30  ;;  %13319 = vst [vmem:[#allocation42_spill] sm:$0xff] %v7249_v1  ;;  %v538_v8 = vld [vmem:[%s12759_s2 + $0x28] sm:$0xff]  ;;  %13323 = vst [vmem:[#allocation46_spill] sm:$0xff] %v7266_v7 }
  0xda   :  { %v250_v20 = vpop.f32.mrf.mxu0  ;;  %13314 = vst [vmem:[#allocation37_spill] sm:$0xff] %v7237_v47  ;;  %v7275_v1 = vunpack.c.h.bf16 %v549_v24  ;;  %v7289_v7 = vunpack.c.l.bf16 %v534_v11 }
  0xdb   :  { %v251_v15 = vadd.f32 %v250_v20, %v7091_v18  ;;  %v7231_v20 = vunpack.c.l.bf16 %v533_v6  ;;  %v6183_v50 = vmul.f32 -1.442695, %v247_v9  ;;  %13318 = vst [vmem:[#allocation41_spill] sm:$0xff] %v7245_v61  ;;  %v542_v9 = vld [vmem:[%s12759_s2 + $0x48] sm:$0xff]  ;;  %6309 = vpow2.f32 %v6182_v40 }
  0xdc   :  { %v7097_v22 = vpop.f32.mrf.mxu0  ;;  %v7264_v6 = vunpack.c.h.bf16 %v541_v16  ;;  %13324 = vst [vmem:[#allocation47_spill] sm:$0xff] %v7275_v1  ;;  %v7277_v40 = vunpack.c.h.bf16 %v553_v29  ;;  %v554_v16 = vld [vmem:[%s12759_s2 + $0xa8] sm:$0xff]  ;;  %13328 = vst [vmem:[#allocation51_spill] sm:$0xff] %v7289_v7  ;;  %v7295_v29 = vpop.permute.xlu1 %1051 }
  0xdd   :  { %v253_v41 = vadd.f32 %v7097_v22, %v7091_v18  ;;  %13311 = vst [vmem:[#allocation34_spill] sm:$0xff] %v7231_v20  ;;  %v6184_v18 = vmul.f32 -1.442695, %v251_v15  ;;  %6311 = vpow2.f32 %v6183_v50  ;;  %13331 = vst [vmem:[#allocation54_spill] sm:$0xff] %v7295_v29  ;;  %v7301_v1 = vunpack.c.l.bf16 %v554_v16 }
  0xde   :  { %v7122_v31 = vpop.f32.mrf.mxu0  ;;  %13322 = vst [vmem:[#allocation45_spill] sm:$0xff] %v7264_v6  ;;  %13325 = vst [vmem:[#allocation48_spill] sm:$0xff] %v7277_v40  ;;  %v7299_v40 = vunpack.c.l.bf16 %v550_v35  ;;  %v7303_v50 = vunpack.c.l.bf16 %v558_v23  ;;  %v7305_v6 = vunpack.c.h.bf16 %v534_v11 }
  0xdf   :  { %v257_v22 = vadd.f32 %v7122_v31, %v7095_v21  ;;  %v6185_v15 = vmul.f32 -1.442695, %v253_v41  ;;  %v7262_v31 = vpop.permute.xlu0 %1041  ;;  %v7279_v41 = vunpack.c.h.bf16 %v557_v30  ;;  %6313 = vpow2.f32 %v6184_v18  ;;  %13334 = vst [vmem:[#allocation57_spill] sm:$0xff] %v7301_v1 }
  0xe0   :  { %v258_v56 = vpop.f32.mrf.mxu0  ;;  %13321 = vst [vmem:[#allocation44_spill] sm:$0xff] %v7262_v31  ;;  %13333 = vst [vmem:[#allocation56_spill] sm:$0xff] %v7299_v40  ;;  %v7310_v18 = vunpack.c.h.bf16 %v542_v9  ;;  %v7320_v1 = vunpack.c.h.bf16 %v554_v16  ;;  %v7346_v16 = vpop.permute.xlu1 %1269 }
  0xe1   :  { %v259_v43 = vadd.f32 %v258_v56, %v7095_v21  ;;  %13326 = vst [vmem:[#allocation49_spill] sm:$0xff] %v7279_v41  ;;  %v7291_v21 = vunpack.c.l.bf16 %v538_v8  ;;  %v7293_v56 = vunpack.c.l.bf16 %v542_v9  ;;  %v6186_v24 = vmul.f32 -1.442695, %v257_v22  ;;  %13335 = vst [vmem:[#allocation58_spill] sm:$0xff] %v7303_v50 }
  0xe2   :  { %v262_v17 = vpop.f32.mrf.mxu0  ;;  %v7297_v41 = vunpack.c.l.bf16 %v546_v26  ;;  %6315 = vpow2.f32 %v6185_v15  ;;  %13336 = vst [vmem:[#allocation59_spill] sm:$0xff] %v7305_v6  ;;  %13338 = vst [vmem:[#allocation61_spill] sm:$0xff] %v7310_v18  ;;  %v7318_v15 = vunpack.c.h.bf16 %v550_v35  ;;  %v7322_v50 = vunpack.c.h.bf16 %v558_v23 }
  0xe3   :  { %13329 = vst [vmem:[#allocation52_spill] sm:$0xff] %v7291_v21  ;;  %13330 = vst [vmem:[#allocation53_spill] sm:$0xff] %v7293_v56  ;;  %v6187_v7 = vmul.f32 -1.442695, %v259_v43  ;;  %v263_v21 = vadd.f32 %v262_v17, %v7085_v10  ;;  %v7308_v56 = vunpack.c.h.bf16 %v538_v8  ;;  %v7314_v29 = vpop.permute.xlu0 %1056  ;;  %6317 = vpow2.f32 %v6186_v24 }
  0xe4   :  { %v264_v55 = vpop.f32.mrf.mxu0  ;;  %v7287_v31 = vpop.f32.mrf.mxu1  ;;  %13332 = vst [vmem:[#allocation55_spill] sm:$0xff] %v7297_v41  ;;  %13340 = vst [vmem:[#allocation63_spill] sm:$0xff] %v7314_v29  ;;  %v7316_v41 = vunpack.c.h.bf16 %v546_v26  ;;  %v7327_v43 = vmul.f32 %v7314_v29, %v7177_v58  ;;  %v7331_v8 = vmul.f32 %v7314_v29, %v7191_v3  ;;  %v7336_v35 = vmul.f32 %v7314_v29, %v7179_v59 }
  0xe5   :  { %13327 = vst [vmem:[#allocation50_spill] sm:$0xff] %v7287_v31  ;;  %13337 = vst [vmem:[#allocation60_spill] sm:$0xff] %v7308_v56  ;;  %v265_v11 = vadd.f32 %v264_v55, %v7085_v10  ;;  %v7340_v9 = vmul.f32 %v7314_v29, %v7193_v5  ;;  %v7344_v10 = vmul.f32 %v7314_v29, %v7181_v60  ;;  %6319 = vpow2.f32 %v6187_v7 }
  0xe6   :  { %v268_v30 = vpop.f32.mrf.mxu0  ;;  %v7312_v22 = vpop.f32.mrf.mxu1  ;;  %13341 = vst [vmem:[#allocation64_spill] sm:$0xff] %v7316_v41  ;;  %13342 = vst [vmem:[#allocation65_spill] sm:$0xff] %v7318_v15  ;;  %v6188_v55 = vmul.f32 -1.442695, %v263_v21  ;;  %v7350_v23 = vmul.f32 %v7314_v29, %v7203_v12  ;;  %v7354_v24 = vmul.f32 %v7314_v29, %v7183_v62  ;;  %v7363_v7 = vmul.f32 %v7314_v29, %v7205_v14 }
  0xe7   :  { %13339 = vst [vmem:[#allocation62_spill] sm:$0xff] %v7312_v22  ;;  %13343 = vst [vmem:[#allocation66_spill] sm:$0xff] %v7320_v1  ;;  %v269_v26 = vadd.f32 %v268_v30, %v7087_v13  ;;  %v6306_v30 = vpop.eup %6305  ;;  %v7372_v15 = vmul.f32 %v7314_v29, %v7185_v63 }
  0xe8   :  { %13344 = vst [vmem:[#allocation67_spill] sm:$0xff] %v7322_v50  ;;  %v270_v17 = vpop.f32.mrf.mxu0  ;;  %13345 = vst [vmem:[#allocation68_spill] sm:$0xff] %v7327_v43  ;;  %v6308_v21 = vpop.eup %6307  ;;  %v6189_v43 = vmul.f32 -1.442695, %v265_v11  ;;  %6321 = vpow2.f32 %v6188_v55  ;;  %v7376_v11 = vmul.f32 %v7314_v29, %v7217_v25  ;;  %v7390_v50 = vmul.f32 %v7314_v29, %v7189_v2 }
  0xe9   :  { %13346 = vst [vmem:[#allocation69_spill] sm:$0xff] %v7331_v8  ;;  %13347 = vst [vmem:[#allocation70_spill] sm:$0xff] %v7336_v35  ;;  %v6190_v8 = vmul.f32 -1.442695, %v269_v26  ;;  %v6310_v41 = vpop.eup %6309  ;;  %v7394_v55 = vmul.f32 %v7314_v29, %v7221_v28 }
  0xea   :  { %13348 = vst [vmem:[#allocation71_spill] sm:$0xff] %v7340_v9  ;;  %13349 = vst [vmem:[#allocation72_spill] sm:$0xff] %v7344_v10  ;;  %v7359_v10 = vpop.f32.mrf.mxu1  ;;  %v274_v1 = vpop.f32.mrf.mxu0  ;;  %v7386_v9 = vmul.f32 %v7314_v29, %v7219_v27  ;;  %6323 = vpow2.f32 %v6189_v43 }
  0xeb   :  { %13350 = vst [vmem:[#allocation73_spill] sm:$0xff] %v7346_v16  ;;  %13351 = vst [vmem:[#allocation74_spill] sm:$0xff] %v7350_v23  ;;  %v7398_v23 = vmul.f32 %v7287_v31, %v7124_v32  ;;  %v407_v16 = vadd.f32 1.0, %v6310_v41  ;;  %6325 = vpow2.f32 %v6190_v8  ;;  %v275_v41 = vadd.f32 %v274_v1, %v7089_v4 }
  0xec   :  { %13352 = vst [vmem:[#allocation75_spill] sm:$0xff] %v7354_v24  ;;  %13353 = vst [vmem:[#allocation76_spill] sm:$0xff] %v7359_v10  ;;  %v271_v24 = vadd.f32 %v270_v17, %v7087_v13  ;;  %v7380_v13 = vmul.f32 %v7314_v29, %v7187_v0  ;;  %v406_v17 = vadd.f32 1.0, %v6308_v21  ;;  %v7382_v26 = vpop.f32.mrf.mxu1  ;;  %v7402_v21 = vmul.f32 %v7287_v31, %v7126_v33 }
  0xed   :  { %13354 = vst [vmem:[#allocation77_spill] sm:$0xff] %v7363_v7  ;;  %13355 = vst [vmem:[#allocation78_spill] sm:$0xff] %v7372_v15  ;;  %v405_v7 = vadd.f32 1.0, %v6306_v30  ;;  %v6312_v30 = vpop.eup %6311 }
  0xee   :  { %13356 = vst [vmem:[#allocation79_spill] sm:$0xff] %v7376_v11  ;;  %13357 = vst [vmem:[#allocation80_spill] sm:$0xff] %v7380_v13  ;;  %v6191_v35 = vmul.f32 -1.442695, %v271_v24  ;;  %v6314_v11 = vpop.eup %6313  ;;  %v7418_v24 = vmul.f32 %v7287_v31, %v7136_v38  ;;  %v13396_v13 = vld [vmem:[#allocation42_spill] sm:$0xff] }
  0xef   :  { %13358 = vst [vmem:[#allocation81_spill] sm:$0xff] %v7382_v26  ;;  %13359 = vst [vmem:[#allocation82_spill] sm:$0xff] %v7386_v9  ;;  %v276_v9 = vpop.f32.mrf.mxu0  ;;  %v6316_v43 = vpop.eup %6315  ;;  %6327 = vrcp.f32 %v405_v7  ;;  %v409_v7 = vadd.f32 1.0, %v6314_v11  ;;  %v7450_v11 = vmul.f32 %v7312_v22, %v7168_v53 }
  0xf0   :  { %13360 = vst [vmem:[#allocation83_spill] sm:$0xff] %v7390_v50  ;;  %13361 = vst [vmem:[#allocation84_spill] sm:$0xff] %v7394_v55  ;;  %v7406_v50 = vmul.f32 %v7287_v31, %v7128_v34  ;;  %v7410_v55 = vmul.f32 %v7287_v31, %v7132_v36  ;;  %6329 = vrcp.f32 %v406_v17  ;;  %v277_v8 = vadd.f32 %v276_v9, %v7089_v4  ;;  %v6318_v1 = vpop.eup %6317 }
  0xf1   :  { %13362 = vst [vmem:[#allocation85_spill] sm:$0xff] %v7398_v23  ;;  %13363 = vst [vmem:[#allocation86_spill] sm:$0xff] %v7402_v21  ;;  %v7414_v23 = vmul.f32 %v7287_v31, %v7134_v37  ;;  %v408_v21 = vadd.f32 1.0, %v6312_v30  ;;  %6331 = vpow2.f32 %v6191_v35  ;;  %v410_v17 = vadd.f32 1.0, %v6316_v43 }
  0xf2   :  { %13364 = vst [vmem:[#allocation87_spill] sm:$0xff] %v7406_v50  ;;  %13365 = vst [vmem:[#allocation88_spill] sm:$0xff] %v7410_v55  ;;  %v7423_v50 = vmul.f32 %v7287_v31, %v7149_v44  ;;  %v7426_v55 = vpop.f32.mrf.mxu1  ;;  %6333 = vrcp.f32 %v407_v16  ;;  %v7438_v30 = vmul.f32 %v7312_v22, %v7153_v46  ;;  %v7442_v4 = vmul.f32 %v7312_v22, %v7164_v51  ;;  %v6320_v43 = vpop.eup %6319 }
  0xf3   :  { %13366 = vst [vmem:[#allocation89_spill] sm:$0xff] %v7414_v23  ;;  %13367 = vst [vmem:[#allocation90_spill] sm:$0xff] %v7418_v24  ;;  %v7430_v23 = vmul.f32 %v7312_v22, %v7138_v39  ;;  %v7434_v24 = vmul.f32 %v7312_v22, %v7151_v45  ;;  %v7446_v9 = vmul.f32 %v7312_v22, %v7166_v52  ;;  %v6192_v16 = vmul.f32 -1.442695, %v275_v41  ;;  %v7474_v41 = vpop.permute.xlu1 %1307 }
  0xf4   :  { %13368 = vst [vmem:[#allocation91_spill] sm:$0xff] %v7423_v50  ;;  %13369 = vst [vmem:[#allocation92_spill] sm:$0xff] %v7426_v55  ;;  %v7454_v35 = vmul.f32 %v7312_v22, %v7175_v57  ;;  %6335 = vrcp.f32 %v408_v21  ;;  %v7468_v22 = vmul.f32 %v7359_v10, %v7181_v60  ;;  %v7472_v21 = vmul.f32 %v7359_v10, %v7183_v62 }
  0xf5   :  { %13370 = vst [vmem:[#allocation93_spill] sm:$0xff] %v7430_v23  ;;  %13371 = vst [vmem:[#allocation94_spill] sm:$0xff] %v7434_v24  ;;  %v280_v24 = vpop.f32.mrf.mxu0  ;;  %v7464_v23 = vpop.f32.mrf.mxu1  ;;  %6337 = vrcp.f32 %v409_v7  ;;  %v7486_v7 = vmul.f32 %v7359_v10, %v7189_v2  ;;  %v3113_v50 = vmul.f32 %v7426_v55, %v7243_v54  ;;  %v3121_v31 = vmul.f32 %v7426_v55, %v7245_v61  ;;  %v13401_v54 = vld [vmem:[#allocation46_spill] sm:$0xff]  ;;  %v13402_v61 = vld [vmem:[#allocation47_spill] sm:$0xff] }
  0xf6   :  { %13372 = vst [vmem:[#allocation95_spill] sm:$0xff] %v7438_v30  ;;  %13373 = vst [vmem:[#allocation96_spill] sm:$0xff] %v7442_v4  ;;  %v7458_v30 = vmul.f32 %v7359_v10, %v7177_v58  ;;  %v7462_v4 = vmul.f32 %v7359_v10, %v7179_v59  ;;  %6339 = vrcp.f32 %v410_v17  ;;  %v7494_v17 = vmul.f32 %v7382_v26, %v7193_v5  ;;  %v13414_v5 = vld [vmem:[#allocation58_spill] sm:$0xff] }
  0xf7   :  { %13374 = vst [vmem:[#allocation97_spill] sm:$0xff] %v7446_v9  ;;  %13375 = vst [vmem:[#allocation98_spill] sm:$0xff] %v7450_v11  ;;  %v6193_v9 = vmul.f32 -1.442695, %v277_v8  ;;  %v411_v11 = vadd.f32 1.0, %v6318_v1  ;;  %v7482_v8 = vmul.f32 %v7359_v10, %v7187_v0  ;;  %v412_v1 = vadd.f32 1.0, %v6320_v43  ;;  %v282_v43 = vpop.f32.mrf.mxu0 }
  0xf8   :  { %13376 = vst [vmem:[#allocation99_spill] sm:$0xff] %v7454_v35  ;;  %13377 = vst [vmem:[#allocation100_spill] sm:$0xff] %v7458_v30  ;;  %v7478_v35 = vmul.f32 %v7359_v10, %v7185_v63  ;;  %6341 = vpow2.f32 %v6192_v16  ;;  %v281_v16 = vadd.f32 %v280_v24, %v7093_v19  ;;  %v7505_v10 = vpop.f32.mrf.mxu1  ;;  %v3073_v24 = vmul.f32 %v7426_v55, %v7231_v20 }
  0xf9   :  { %13378 = vst [vmem:[#allocation101_spill] sm:$0xff] %v7462_v4  ;;  %13379 = vst [vmem:[#allocation102_spill] sm:$0xff] %v7464_v23  ;;  %6343 = vpow2.f32 %v6193_v9  ;;  %v3081_v9 = vmul.f32 %v7426_v55, %v7233_v42  ;;  %v283_v4 = vadd.f32 %v282_v43, %v7093_v19  ;;  %v13400_v43 = vld [vmem:[#allocation45_spill] sm:$0xff]  ;;  %v13403_v42 = vld [vmem:[#allocation51_spill] sm:$0xff] }
  0xfa   :  { %13380 = vst [vmem:[#allocation103_spill] sm:$0xff] %v7468_v22  ;;  %13381 = vst [vmem:[#allocation104_spill] sm:$0xff] %v7472_v21  ;;  %v7490_v21 = vmul.f32 %v7382_v26, %v7191_v3  ;;  %v6322_v22 = vpop.eup %6321  ;;  %6345 = vrcp.f32 %v411_v11  ;;  %v3089_v11 = vmul.f32 %v7426_v55, %v7237_v47  ;;  %v7540_v15 = vpop.f32.mrf.mxu1  ;;  %v3098_v47 = vmul.f32 %v7464_v23, %v13401_v54  ;;  %v13407_v54 = vld [vmem:[#allocation53_spill] sm:$0xff] }
  0xfb   :  { %13382 = vst [vmem:[#allocation105_spill] sm:$0xff] %v7474_v41  ;;  %13383 = vst [vmem:[#allocation106_spill] sm:$0xff] %v7478_v35  ;;  %v7498_v35 = vmul.f32 %v7382_v26, %v7203_v12  ;;  %6347 = vrcp.f32 %v412_v1  ;;  %v6194_v41 = vmul.f32 -1.442695, %v281_v16  ;;  %v3074_v1 = vmul.f32 %v7464_v23, %v13396_v13 }
  0xfc   :  { %13384 = vst [vmem:[#allocation107_spill] sm:$0xff] %v7482_v8  ;;  %13385 = vst [vmem:[#allocation108_spill] sm:$0xff] %v7486_v7  ;;  %v7502_v8 = vmul.f32 %v7382_v26, %v7205_v14  ;;  %v7552_v13 = vmul.f32 %v7464_v23, %v13402_v61  ;;  %v3075_v20 = vmul.f32 %v7505_v10, %v13403_v42 }
  0xfd   :  { %13386 = vst [vmem:[#allocation109_spill] sm:$0xff] %v7490_v21  ;;  %13387 = vst [vmem:[#allocation110_spill] sm:$0xff] %v7494_v17  ;;  %v7509_v21 = vmul.f32 %v7382_v26, %v7217_v25  ;;  %v7513_v17 = vmul.f32 %v7382_v26, %v7219_v27  ;;  %v13408_v27 = vld [vmem:[#allocation55_spill] sm:$0xff]  ;;  %v3107_v42 = vmul.f32 %v7505_v10, %v7299_v40  ;;  %v13409_v25 = vld [vmem:[#allocation57_spill] sm:$0xff] }
  0xfe   :  { %13388 = vst [vmem:[#allocation111_spill] sm:$0xff] %v7498_v35  ;;  %13389 = vst [vmem:[#allocation112_spill] sm:$0xff] %v7502_v8  ;;  %v7517_v35 = vmul.f32 %v7382_v26, %v7221_v28  ;;  %v6324_v8 = vpop.eup %6323  ;;  %v3105_v26 = vmul.f32 %v7426_v55, %v7241_v49  ;;  %v13399_v49 = vld [vmem:[#allocation43_spill] sm:$0xff]  ;;  %v6195_v28 = vmul.f32 -1.442695, %v283_v4  ;;  %v3099_v61 = vmul.f32 %v7505_v10, %v13408_v27 }
  0xff   :  { %13390 = vst [vmem:[#allocation113_spill] sm:$0xff] %v7505_v10  ;;  %13391 = vst [vmem:[#allocation114_spill] sm:$0xff] %v7509_v21  ;;  %v3097_v21 = vmul.f32 %v7426_v55, %v7239_v48  ;;  %v6326_v7 = vpop.eup %6325  ;;  %v3082_v19 = vmul.f32 %v7464_v23, %v13399_v49  ;;  %v3090_v48 = vmul.f32 %v7464_v23, %v13400_v43  ;;  %v13406_v49 = vld [vmem:[#allocation48_spill] sm:$0xff] }
 0x100   :  { %13392 = vst [vmem:[#allocation115_spill] sm:$0xff] %v7513_v17  ;;  %13393 = vst [vmem:[#allocation116_spill] sm:$0xff] %v7517_v35  ;;  %v413_v17 = vadd.f32 1.0, %v6322_v22  ;;  %v7529_v35 = vpop.permute.xlu1 %1311  ;;  %v7532_v30 = vpop.eup %6327  ;;  %v415_v16 = vadd.f32 1.0, %v6326_v7  ;;  %v3114_v43 = vmul.f32 %v7464_v23, %v13406_v49  ;;  %v3091_v7 = vmul.f32 %v7505_v10, %v13407_v54  ;;  %v13412_v49 = vld [vmem:[#allocation49_spill] sm:$0xff] }
 0x101   :  { %13394 = vst [vmem:[#allocation117_spill] sm:$0xff] %v7529_v35  ;;  %13395 = vst [vmem:[#allocation118_spill] sm:$0xff] %v7532_v30  ;;  %v286_v22 = vpop.f32.mrf.mxu0  ;;  %v7542_v29 = vpop.eup %6329  ;;  %v414_v35 = vadd.f32 1.0, %v6324_v8  ;;  %v3122_v54 = vmul.f32 %v7464_v23, %v13412_v49  ;;  %v3123_v27 = vmul.f32 %v7505_v10, %v13414_v5  ;;  %v3137_v40 = vadd.f32 %v3075_v20, %v3073_v24  ;;  %v13417_v20 = vld [vmem:[#allocation64_spill] sm:$0xff] }
 0x102   :  { %13397 = vst [vmem:[#allocation119_spill] sm:$0xff] %v7540_v15  ;;  %13398 = vst [vmem:[#allocation120_spill] sm:$0xff] %v7542_v29  ;;  %v6332_v55 = vpop.eup %6331  ;;  %v13404_v29 = vld [vmem:[#allocation52_spill] sm:$0xff]  ;;  %6349 = vrcp.f32 %v413_v17  ;;  %v3076_v3 = vmul.f32 %v7540_v15, %v7305_v6  ;;  %v3092_v23 = vmul.f32 %v7540_v15, %v7310_v18  ;;  %v3100_v24 = vmul.f32 %v7540_v15, %v13417_v20  ;;  %v13421_v18 = vld [vmem:[#allocation66_spill] sm:$0xff] }
 0x103   :  { %v3083_v8 = vmul.f32 %v7505_v10, %v13404_v29  ;;  %v7558_v30 = vpop.eup %6333  ;;  %6351 = vpow2.f32 %v6194_v41  ;;  %v3115_v29 = vmul.f32 %v7505_v10, %v13409_v25  ;;  %v288_v14 = vpop.f32.mrf.mxu0  ;;  %v416_v4 = vadd.f32 1.0, %v6332_v55 }
 0x104   :  { %13405 = vst [vmem:[#allocation121_spill] sm:$0xff] %v7558_v30  ;;  %v7570_v30 = vpop.f32.mrf.mxu1  ;;  %v7572_v17 = vpop.eup %6335  ;;  %6353 = vrcp.f32 %v414_v35  ;;  %v3173_v55 = vadd.f32 %v3091_v7, %v3089_v11  ;;  %v3084_v35 = vmul.f32 %v7540_v15, %v7308_v56  ;;  %v13419_v11 = vld [vmem:[#allocation65_spill] sm:$0xff]  ;;  %v7604_v49 = vadd.f32 %v3092_v23, %v3090_v48 }
 0x105   :  { %13410 = vst [vmem:[#allocation122_spill] sm:$0xff] %v7570_v30  ;;  %13411 = vst [vmem:[#allocation123_spill] sm:$0xff] %v7572_v17  ;;  %v7576_v41 = vpop.permute.xlu0 %1303  ;;  %v7580_v12 = vpop.eup %6337  ;;  %6355 = vrcp.f32 %v415_v16  ;;  %v3155_v25 = vadd.f32 %v3083_v8, %v3081_v9  ;;  %v3227_v16 = vadd.f32 %v3115_v29, %v3113_v50  ;;  %v3108_v7 = vmul.f32 %v7540_v15, %v13419_v11 }
 0x106   :  { %13413 = vst [vmem:[#allocation124_spill] sm:$0xff] %v7576_v41  ;;  %13415 = vst [vmem:[#allocation125_spill] sm:$0xff] %v7580_v12  ;;  %v102_v2 = vpop.permute.xlu1 %101  ;;  %v7584_v17 = vpop.eup %6339  ;;  %6357 = vpow2.f32 %v6195_v28  ;;  %v3191_v41 = vadd.f32 %v3099_v61, %v3097_v21  ;;  %v3209_v12 = vadd.f32 %v3107_v42, %v3105_v26  ;;  %v3245_v28 = vadd.f32 %v3123_v27, %v3121_v31  ;;  %v13422_v61 = vld [vmem:[#allocation67_spill] sm:$0xff] }
 0x107   :  { %13416 = vst [vmem:[#allocation126_spill] sm:$0xff] %v7584_v17  ;;  %v6342_v10 = vpop.eup %6341  ;;  %v7592_v9 = vpop.f32.mrf.mxu0  ;;  %6359 = vrcp.f32 %v416_v4  ;;  %v287_v56 = vadd.f32 %v286_v22, %v102_v2  ;;  %v3116_v42 = vmul.f32 %v7540_v15, %v13421_v18  ;;  %v3124_v29 = vmul.f32 %v7540_v15, %v13422_v61 }
 0x108   :  { %v7594_v8 = vpop.f32.mrf.mxu1  ;;  %v6344_v17 = vpop.eup %6343  ;;  %v3146_v50 = vadd.f32 %v3076_v3, %v3074_v1  ;;  %v289_v26 = vadd.f32 %v288_v14, %v102_v2  ;;  %v417_v21 = vadd.f32 1.0, %v6342_v10  ;;  %v3164_v20 = vadd.f32 %v3084_v35, %v3082_v19 }
 0x109   :  { %13418 = vst [vmem:[#allocation127_spill] sm:$0xff] %v7594_v8  ;;  %v7598_v6 = vpop.eup %6345  ;;  %v7606_v4 = vpop.permute.xlu0 %1315  ;;  %v3077_v27 = vmul.f32 %v7570_v30, %v7124_v32  ;;  %v418_v22 = vadd.f32 1.0, %v6344_v17  ;;  %v3085_v18 = vmul.f32 %v7570_v30, %v7126_v33  ;;  %v3093_v2 = vmul.f32 %v7570_v30, %v7128_v34 }
 0x10a   :  { %13420 = vst [vmem:[#allocation128_spill] sm:$0xff] %v7598_v6  ;;  %13423 = vst [vmem:[#allocation129_spill] sm:$0xff] %v7606_v4  ;;  %v7610_v31 = vpop.eup %6347  ;;  %v7612_v6 = vadd.f32 %v3100_v24, %v3098_v47  ;;  %v294_v3 = vpop.f32.mrf.mxu0  ;;  %v6196_v48 = vmul.f32 -1.442695, %v287_v56  ;;  %v3101_v10 = vmul.f32 %v7570_v30, %v7132_v36  ;;  %v3109_v23 = vmul.f32 %v7570_v30, %v7134_v37 }
 0x10b   :  { %13424 = vst [vmem:[#allocation130_spill] sm:$0xff] %v7610_v31  ;;  %v7618_v14 = vpop.f32.mrf.mxu1  ;;  %v3117_v47 = vmul.f32 %v7570_v30, %v7136_v38  ;;  %v3218_v1 = vadd.f32 %v3108_v7, %v7552_v13  ;;  %v7627_v19 = vadd.f32 %v3116_v42, %v3114_v43  ;;  %v7629_v17 = vadd.f32 %v3124_v29, %v3122_v54 }
 0x10c   :  { %13425 = vst [vmem:[#allocation131_spill] sm:$0xff] %v7618_v14  ;;  %v6197_v35 = vmul.f32 -1.442695, %v289_v26  ;;  %6361 = vrcp.f32 %v417_v21  ;;  %v3125_v56 = vmul.f32 %v7570_v30, %v7149_v44  ;;  %v3138_v24 = vadd.f32 %v3137_v40, %v3077_v27  ;;  %v7639_v43 = vpop.f32.mrf.mxu0 }
 0x10d   :  { %v3079_v15 = vmul.f32 %v7618_v14, %v7177_v58  ;;  %6363 = vrcp.f32 %v418_v22  ;;  %v3156_v31 = vadd.f32 %v3155_v25, %v3085_v18  ;;  %v3174_v38 = vadd.f32 %v3173_v55, %v3093_v2  ;;  %v107_v18 = vpop.permute.xlu0 %106 }
 0x10e   :  { %v3095_v13 = vmul.f32 %v7618_v14, %v7181_v60  ;;  %6365 = vpow2.f32 %v6196_v48  ;;  %v3192_v7 = vadd.f32 %v3191_v41, %v3101_v10  ;;  %v3210_v42 = vadd.f32 %v3209_v12, %v3109_v23  ;;  %v7672_v60 = vpop.f32.mrf.mxu1 }
 0x10f   :  { %v7635_v4 = vpop.eup %6349  ;;  %v3228_v29 = vadd.f32 %v3227_v16, %v3117_v47  ;;  %6367 = vpow2.f32 %v6197_v35  ;;  %v3078_v40 = vmul.f32 %v7594_v8, %v7138_v39  ;;  %v3086_v25 = vmul.f32 %v7594_v8, %v7151_v45  ;;  %v7659_v47 = vpop.f32.mrf.mxu0  ;;  %13426 = vst [vmem:[#allocation132_spill] sm:$0xff] %v7672_v60 }
 0x110   :  { %v6352_v54 = vpop.eup %6351  ;;  %v3087_v55 = vmul.f32 %v7618_v14, %v7179_v59  ;;  %v3246_v27 = vadd.f32 %v3245_v28, %v3125_v56  ;;  %v3103_v12 = vmul.f32 %v7618_v14, %v7183_v62  ;;  %v3111_v41 = vmul.f32 %v7618_v14, %v7185_v63 }
 0x111   :  { %v7641_v26 = vpop.eup %6353  ;;  %v3139_v16 = vadd.f32 %v3138_v24, %v3079_v15  ;;  %v419_v2 = vadd.f32 1.0, %v6352_v54  ;;  %v3094_v48 = vmul.f32 %v7594_v8, %v7153_v46  ;;  %v3119_v10 = vmul.f32 %v7618_v14, %v7187_v0  ;;  %v13427_v46 = vld [vmem:[#allocation25_spill] sm:$0xff]  ;;  %v7676_v39 = vpop.f32.mrf.mxu0 }
 0x112   :  { %v7649_v21 = vpop.eup %6355  ;;  %v3175_v23 = vadd.f32 %v3174_v38, %v3095_v13  ;;  %v3102_v28 = vmul.f32 %v7594_v8, %v7164_v51  ;;  %v3110_v35 = vmul.f32 %v7594_v8, %v7166_v52  ;;  %v3118_v15 = vmul.f32 %v7594_v8, %v7168_v53 }
 0x113   :  { %v6358_v22 = vpop.eup %6357  ;;  %v293_v56 = vadd.f32 %v7592_v9, %v107_v18  ;;  %v3126_v54 = vmul.f32 %v7594_v8, %v7175_v57  ;;  %v3147_v30 = vadd.f32 %v3146_v50, %v3078_v40  ;;  %v3165_v38 = vadd.f32 %v3164_v20, %v3086_v25  ;;  %v13429_v40 = vld [vmem:[#allocation29_spill] sm:$0xff] }
 0x114   :  { %v7668_v24 = vpop.eup %6359  ;;  %v3157_v13 = vadd.f32 %v3156_v31, %v3087_v55  ;;  %v295_v0 = vadd.f32 %v294_v3, %v107_v18  ;;  %v3140_v63 = vrot.slane %v3139_v16, 4  ;;  %v3193_v62 = vadd.f32 %v3192_v7, %v3103_v12  ;;  %v13428_v7 = vld [vmem:[#allocation26_spill] sm:$0xff] }
 0x115   :  { %v3211_v51 = vadd.f32 %v3210_v42, %v3111_v41  ;;  %v420_v52 = vadd.f32 1.0, %v6358_v22  ;;  %v3127_v53 = vmul.f32 %v7618_v14, %v13427_v46  ;;  %v3176_v45 = vrot.slane %v3175_v23, 4 }
 0x116   :  { %v3229_v9 = vadd.f32 %v3228_v29, %v3119_v10  ;;  %6369 = vrcp.f32 %v419_v2  ;;  %v3183_v8 = vadd.f32 %v7604_v49, %v3094_v48  ;;  %v3201_v20 = vadd.f32 %v7612_v6, %v3102_v28  ;;  %v7686_v6 = vpop.f32.mrf.mxu0  ;;  %v13432_v28 = vld [vmem:[#allocation27_spill] sm:$0xff] }
 0x117   :  { %v6198_v50 = vmul.f32 -1.442695, %v293_v56  ;;  %v3219_v31 = vadd.f32 %v3218_v1, %v3110_v35  ;;  %v3158_v3 = vrot.slane %v3157_v13, 4  ;;  %v3080_v42 = vmul.f32 %v7672_v60, %v13428_v7  ;;  %v13433_v35 = vld [vmem:[#allocation30_spill] sm:$0xff] }
 0x118   :  { %v3096_v25 = vmul.f32 %v7672_v60, %v13429_v40  ;;  %v6199_v18 = vmul.f32 -1.442695, %v295_v0  ;;  %v3141_v55 = vadd.f32 %v3140_v63, %v3139_v16  ;;  %v3194_v12 = vrot.slane %v3193_v62, 4 }
 0x119   :  { %v3212_v29 = vrot.slane %v3211_v51, 4  ;;  %v7684_v41 = vpop.eup %6361  ;;  %6371 = vrcp.f32 %v420_v52  ;;  %v3177_v22 = vadd.f32 %v3176_v45, %v3175_v23  ;;  %v3230_v49 = vrot.slane %v3229_v9, 4 }
 0x11a   :  { %13430 = vst [vmem:[#allocation133_spill] sm:$0xff] %v7684_v41  ;;  %v3247_v2 = vadd.f32 %v3246_v27, %v3127_v53  ;;  %v7688_v1 = vpop.eup %6363  ;;  %v3237_v48 = vadd.f32 %v7627_v19, %v3118_v15  ;;  %v3255_v10 = vadd.f32 %v7629_v17, %v3126_v54  ;;  %6373 = vpow2.f32 %v6198_v50  ;;  %v13434_v17 = vld [vmem:[#allocation31_spill] sm:$0xff]  ;;  %v310_v50 = vpop.f32.mrf.mxu0 }
 0x11b   :  { %13431 = vst [vmem:[#allocation134_spill] sm:$0xff] %v7688_v1  ;;  %v3088_v63 = vmul.f32 %v7672_v60, %v13432_v28  ;;  %v6366_v0 = vpop.eup %6365  ;;  %v3159_v16 = vadd.f32 %v3158_v3, %v3157_v13  ;;  %v3104_v52 = vmul.f32 %v7672_v60, %v13433_v35  ;;  %v3148_v45 = vadd.f32 %v3147_v30, %v3080_v42  ;;  %v13435_v28 = vld [vmem:[#allocation32_spill] sm:$0xff]  ;;  %v13436_v3 = vld [vmem:[#allocation33_spill] sm:$0xff] }
 0x11c   :  { %v3184_v23 = vadd.f32 %v3183_v8, %v3096_v25  ;;  %v6368_v53 = vpop.eup %6367  ;;  %6375 = vpow2.f32 %v6199_v18  ;;  %v3142_v27 = vrot.slane %v3141_v55, 2  ;;  %v3195_v56 = vadd.f32 %v3194_v12, %v3193_v62  ;;  %v312_v41 = vpop.f32.mrf.mxu0 }
 0x11d   :  { %v3213_v14 = vadd.f32 %v3212_v29, %v3211_v51  ;;  %v3178_v1 = vrot.slane %v3177_v22, 2  ;;  %v3231_v19 = vadd.f32 %v3230_v49, %v3229_v9  ;;  %v3248_v15 = vrot.slane %v3247_v2, 4  ;;  %v13437_v29 = vld [vmem:[#allocation6_spill] sm:$0xff] }
 0x11e   :  { %v3112_v54 = vmul.f32 %v7672_v60, %v13434_v17  ;;  %v421_v40 = vadd.f32 1.0, %v6366_v0  ;;  %v3120_v13 = vmul.f32 %v7672_v60, %v13435_v28  ;;  %v3128_v30 = vmul.f32 %v7672_v60, %v13436_v3 }
 0x11f   :  { %v3166_v8 = vadd.f32 %v3165_v38, %v3088_v63  ;;  %v3160_v42 = vrot.slane %v3159_v16, 2  ;;  %v3149_v25 = vrot.slane %v3148_v45, 4  ;;  %v3185_v18 = vrot.slane %v3184_v23, 4 }
 0x120   :  { %v3202_v62 = vadd.f32 %v3201_v20, %v3104_v52  ;;  %v3143_v51 = vadd.f32 %v3142_v27, %v3141_v55  ;;  %v3196_v12 = vrot.slane %v3195_v56, 2  ;;  %v3214_v9 = vrot.slane %v3213_v14, 2 }
 0x121   :  { %v311_v49 = vadd.f32 %v310_v50, %v13437_v29  ;;  %v422_v35 = vadd.f32 1.0, %v6368_v53  ;;  %v3179_v17 = vadd.f32 %v3178_v1, %v3177_v22  ;;  %v3232_v7 = vrot.slane %v3231_v19, 2 }
 0x122   :  { %v3220_v0 = vadd.f32 %v3219_v31, %v3112_v54  ;;  %v3167_v46 = vrot.slane %v3166_v8, 4  ;;  %v3238_v57 = vadd.f32 %v3237_v48, %v3120_v13  ;;  %v3256_v28 = vadd.f32 %v3255_v10, %v3128_v30 }
 0x123   :  { %6377 = vtanh.f32 %v311_v49  ;;  %v7703_v60 = vpop.eup %6369  ;;  %v3150_v38 = vadd.f32 %v3149_v25, %v3148_v45  ;;  %v3186_v63 = vadd.f32 %v3185_v18, %v3184_v23  ;;  %v3203_v20 = vrot.slane %v3202_v62, 4  ;;  %v316_v45 = vpop.f32.mrf.mxu0 }
 0x124   :  { %6379 = vrcp.f32 %v421_v40  ;;  %v3144_v55 = vrot.slane %v3143_v51, 1  ;;  %v3161_v52 = vadd.f32 %v3160_v42, %v3159_v16  ;;  %v3197_v27 = vadd.f32 %v3196_v12, %v3195_v56  ;;  %v112_v40 = vpop.permute.xlu1 %111 }
 0x125   :  { %v3215_v3 = vadd.f32 %v3214_v9, %v3213_v14  ;;  %v3180_v50 = vrot.slane %v3179_v17, 1  ;;  %v7705_v53 = vadd.f32 %v3232_v7, %v3231_v19  ;;  %v3249_v22 = vadd.f32 %v3248_v15, %v3247_v2 }
 0x126   :  { %v313_v31 = vadd.f32 %v312_v41, %v13437_v29  ;;  %v7708_v1 = vpop.eup %6371  ;;  %v3168_v48 = vadd.f32 %v3167_v46, %v3166_v8  ;;  %v3221_v10 = vrot.slane %v3220_v0, 4  ;;  %v3239_v54 = vrot.slane %v3238_v57, 4  ;;  %v13440_v8 = vld [vmem:[#allocation2_spill] sm:$0xff] }
 0x127   :  { %v3257_v13 = vrot.slane %v3256_v28, 4  ;;  %v6374_v23 = vpop.eup %6373  ;;  %v3151_v30 = vrot.slane %v3150_v38, 2  ;;  %v3187_v25 = vrot.slane %v3186_v63, 2  ;;  %v3204_v16 = vadd.f32 %v3203_v20, %v3202_v62 }
 0x128   :  { %6381 = vtanh.f32 %v313_v31  ;;  %v7710_v14 = vadd.f32 %v3144_v55, %v3143_v51  ;;  %v3162_v7 = vrot.slane %v3161_v52, 1  ;;  %v3198_v56 = vrot.slane %v3197_v27, 1  ;;  %v318_v51 = vpop.f32.mrf.mxu0 }
 0x129   :  { %v3216_v2 = vrot.slane %v3215_v3, 1  ;;  %v6376_v19 = vpop.eup %6375  ;;  %v7712_v41 = vadd.f32 %v3180_v50, %v3179_v17  ;;  %v3250_v15 = vrot.slane %v3249_v22, 2  ;;  %v299_v46 = vadd.f32 %v7639_v43, %v112_v40 }
 0x12a   :  { %13438 = vst [vmem:[#allocation6_spill] sm:$0xff] %v7710_v14  ;;  %v317_v42 = vadd.f32 %v316_v45, %v13440_v8  ;;  %v3169_v18 = vrot.slane %v3168_v48, 2  ;;  %v3222_v12 = vadd.f32 %v3221_v10, %v3220_v0  ;;  %v3240_v9 = vadd.f32 %v3239_v54, %v3238_v57 }
 0x12b   :  { %13439 = vst [vmem:[#allocation135_spill] sm:$0xff] %v7712_v41  ;;  %v3258_v29 = vadd.f32 %v3257_v13, %v3256_v28  ;;  %v3152_v49 = vadd.f32 %v3151_v30, %v3150_v38  ;;  %v3188_v62 = vadd.f32 %v3187_v25, %v3186_v63  ;;  %v3205_v20 = vrot.slane %v3204_v16, 2  ;;  %v485_v28 = vld [vmem:[%s12760_s1] sm:$0xff] }
 0x12c   :  { %6383 = vtanh.f32 %v317_v42  ;;  %v7716_v55 = vadd.f32 %v3162_v7, %v3161_v52  ;;  %v7718_v31 = vadd.f32 %v3198_v56, %v3197_v27  ;;  %v3234_v17 = vrot.slane %v7705_v53, 1  ;;  %v13444_v25 = vld [vmem:[#allocation118_spill] sm:$0xff] }
 0x12d   :  { %6385 = vrcp.f32 %v422_v35  ;;  %v7721_v50 = vadd.f32 %v3216_v2, %v3215_v3  ;;  %v3251_v43 = vadd.f32 %v3250_v15, %v3249_v22  ;;  %v3281_v0 = vmax.f32 %v7710_v14, %v7712_v41  ;;  %v13474_v41 = vld [vmem:[#allocation45_spill] sm:$0xff] }
 0x12e   :  { %13441 = vst [vmem:[#allocation2_spill] sm:$0xff] %v7716_v55  ;;  %13442 = vst [vmem:[#allocation136_spill] sm:$0xff] %v7718_v31  ;;  %v6200_v57 = vmul.f32 -1.442695, %v299_v46  ;;  %v3223_v38 = vrot.slane %v3222_v12, 2  ;;  %v3241_v63 = vrot.slane %v3240_v9, 2  ;;  %v319_v52 = vadd.f32 %v318_v51, %v13440_v8  ;;  %v7736_v46 = vpop.f32.mrf.mxu1 }
 0x12f   :  { %13443 = vst [vmem:[#allocation137_spill] sm:$0xff] %v7721_v50  ;;  %v3259_v35 = vrot.slane %v3258_v29, 2  ;;  %v3153_v10 = vrot.slane %v3152_v49, 1  ;;  %v3170_v54 = vadd.f32 %v3169_v18, %v3168_v48  ;;  %v3189_v13 = vrot.slane %v3188_v62, 1  ;;  %13445 = vst [vmem:[#allocation118_spill] sm:$0xff] %v7736_v46 }
 0x130   :  { %v6378_v27 = vpop.eup %6377  ;;  %v3206_v3 = vadd.f32 %v3205_v20, %v3204_v16  ;;  %v301_v22 = vadd.f32 %v7659_v47, %v112_v40  ;;  %v493_v30 = vmul.f32 %v7635_v4, %v485_v28  ;;  %6387 = vtanh.f32 %v319_v52  ;;  %v486_v4 = vld [vmem:[%s12760_s1 + $0x8] sm:$0xff]  ;;  %v487_v52 = vld [vmem:[%s12760_s1 + $0x10] sm:$0xff] }
 0x131   :  { %v7729_v45 = vpop.eup %6379  ;;  %v501_v7 = vmul.f32 %v6378_v27, %v13444_v25  ;;  %v423_v56 = vadd.f32 1.0, %v6374_v23  ;;  %v3252_v2 = vrot.slane %v3251_v43, 1  ;;  %v3282_v15 = vmax.f32 %v7716_v55, %v7718_v31  ;;  %v13457_v25 = vld [vmem:[#allocation121_spill] sm:$0xff] }
 0x132   :  { %6389 = vpow2.f32 %v6200_v57  ;;  %v3224_v48 = vadd.f32 %v3223_v38, %v3222_v12  ;;  %v3242_v8 = vadd.f32 %v3241_v63, %v3240_v9  ;;  %v3260_v16 = vadd.f32 %v3259_v35, %v3258_v29  ;;  %v7758_v9 = vpop.f32.mrf.mxu1  ;;  %v117_v35 = vpop.permute.xlu1 %116 }
 0x133   :  { %v7738_v42 = vadd.f32 %v501_v7, %v493_v30  ;;  %v424_v47 = vadd.f32 1.0, %v6376_v19  ;;  %v7744_v40 = vmax.f32 %v3281_v0, %v7721_v50  ;;  %v3171_v23 = vrot.slane %v3170_v54, 1  ;;  %13450 = vst [vmem:[#allocation142_spill] sm:$0xff] %v7758_v9 }
 0x134   :  { %v3207_v18 = vrot.slane %v3206_v3, 1  ;;  %v7746_v51 = vadd.f32 %v3153_v10, %v3152_v49  ;;  %v7748_v57 = vadd.f32 %v3189_v13, %v3188_v62  ;;  %v6201_v12 = vmul.f32 -1.442695, %v301_v22  ;;  %v13451_v49 = vld [vmem:[#allocation120_spill] sm:$0xff]  ;;  %v7783_v30 = vpop.f32.mrf.mxu1 }
 0x135   :  { %13446 = vst [vmem:[#allocation138_spill] sm:$0xff] %v7744_v40  ;;  %v6382_v20 = vpop.eup %6381  ;;  %6391 = vtanh.f32 %v7738_v42  ;;  %6132 = vst [vmem:[%s12761_s7 + $0x40] sm:$0xff] %v7738_v42  ;;  %v7756_v19 = vadd.f32 %v3234_v17, %v7705_v53  ;;  %v494_v29 = vmul.f32 %v7641_v26, %v486_v4  ;;  %v7762_v62 = vadd.f32 %v3252_v2, %v3251_v43 }
 0x136   :  { %13447 = vst [vmem:[#allocation139_spill] sm:$0xff] %v7746_v51  ;;  %13448 = vst [vmem:[#allocation140_spill] sm:$0xff] %v7748_v57  ;;  %6393 = vrcp.f32 %v423_v56  ;;  %v502_v0 = vmul.f32 %v6382_v20, %v13451_v49  ;;  %v3225_v28 = vrot.slane %v3224_v48, 1  ;;  %v3243_v38 = vrot.slane %v3242_v8, 1  ;;  %v13463_v20 = vld [vmem:[#allocation37_spill] sm:$0xff]  ;;  %v13467_v49 = vld [vmem:[#allocation39_spill] sm:$0xff]  ;;  %v7824_v43 = vpop.f32.mrf.mxu1 }
 0x137   :  { %13449 = vst [vmem:[#allocation141_spill] sm:$0xff] %v7756_v19  ;;  %13452 = vst [vmem:[#allocation120_spill] sm:$0xff] %v7762_v62  ;;  %v3261_v63 = vrot.slane %v3260_v16, 1  ;;  %6395 = vrcp.f32 %v424_v47  ;;  %v7767_v27 = vadd.f32 %v3171_v23, %v3170_v54  ;;  %v7769_v53 = vadd.f32 %v3207_v18, %v3206_v3  ;;  %v13462_v23 = vld [vmem:[#allocation35_spill] sm:$0xff] }
 0x138   :  { %v7771_v17 = vadd.f32 %v502_v0, %v494_v29  ;;  %v7774_v10 = vmax.f32 %v3282_v15, %v7756_v19  ;;  %v3288_v13 = vmax.f32 %v7746_v51, %v7748_v57  ;;  %6397 = vpow2.f32 %v6201_v12  ;;  %13456 = vst [vmem:[#allocation146_spill] sm:$0xff] %v7783_v30  ;;  %13471 = vst [vmem:[#allocation151_spill] sm:$0xff] %v7824_v43  ;;  %v13472_v19 = vld [vmem:[#allocation43_spill] sm:$0xff]  ;;  %v13475_v51 = vld [vmem:[#allocation46_spill] sm:$0xff] }
 0x139   :  { %13453 = vst [vmem:[#allocation143_spill] sm:$0xff] %v7767_v27  ;;  %13454 = vst [vmem:[#allocation144_spill] sm:$0xff] %v7769_v53  ;;  %v6384_v26 = vpop.eup %6383  ;;  %v305_v54 = vadd.f32 %v7676_v39, %v117_v35  ;;  %v495_v3 = vmul.f32 %v7649_v21, %v487_v52  ;;  %v7792_v56 = vadd.f32 %v3225_v28, %v3224_v48  ;;  %v13461_v39 = vld [vmem:[#allocation34_spill] sm:$0xff]  ;;  %v488_v48 = vld [vmem:[%s12760_s1 + $0x18] sm:$0xff] }
 0x13a   :  { %13455 = vst [vmem:[#allocation145_spill] sm:$0xff] %v7774_v10  ;;  %v7780_v22 = vpop.eup %6385  ;;  %6399 = vtanh.f32 %v7771_v17  ;;  %6133 = vst [vmem:[%s12761_s7 + $0x48] sm:$0xff] %v7771_v17  ;;  %v503_v7 = vmul.f32 %v6384_v26, %v13457_v25  ;;  %v7794_v2 = vadd.f32 %v3243_v38, %v3242_v8  ;;  %v7796_v15 = vadd.f32 %v3261_v63, %v3260_v16  ;;  %v13466_v16 = vld [vmem:[#allocation38_spill] sm:$0xff]  ;;  %v13468_v28 = vld [vmem:[#allocation40_spill] sm:$0xff] }
 0x13b   :  { %13458 = vst [vmem:[#allocation121_spill] sm:$0xff] %v7792_v56  ;;  %v3575_v4 = vmul.f32 %v7736_v46, %v13461_v39  ;;  %v3583_v18 = vmul.f32 %v7736_v46, %v13462_v23  ;;  %v3591_v21 = vmul.f32 %v7736_v46, %v13463_v20  ;;  %v7812_v8 = vmax.f32 %v3288_v13, %v7792_v56  ;;  %v13469_v52 = vld [vmem:[#allocation41_spill] sm:$0xff]  ;;  %v322_v13 = vpop.f32.mrf.mxu0  ;;  %v13473_v57 = vld [vmem:[#allocation123_spill] sm:$0xff]  ;;  %v13477_v10 = vld [vmem:[#allocation52_spill] sm:$0xff] }
 0x13c   :  { %13459 = vst [vmem:[#allocation147_spill] sm:$0xff] %v7794_v2  ;;  %13460 = vst [vmem:[#allocation148_spill] sm:$0xff] %v7796_v15  ;;  %v7806_v12 = vadd.f32 %v503_v7, %v495_v3  ;;  %v3599_v29 = vmul.f32 %v7736_v46, %v13466_v16  ;;  %v3607_v0 = vmul.f32 %v7736_v46, %v13467_v49  ;;  %v13470_v3 = vld [vmem:[#allocation42_spill] sm:$0xff]  ;;  %v6202_v7 = vmul.f32 -1.442695, %v305_v54  ;;  %v13476_v62 = vld [vmem:[#allocation51_spill] sm:$0xff] }
 0x13d   :  { %13465 = vst [vmem:[#allocation150_spill] sm:$0xff] %v7812_v8  ;;  %v3615_v38 = vmul.f32 %v7736_v46, %v13468_v28  ;;  %v6388_v63 = vpop.eup %6387  ;;  %v3623_v26 = vmul.f32 %v7736_v46, %v13469_v52  ;;  %v3576_v25 = vmul.f32 %v7758_v9, %v13470_v3  ;;  %v3584_v56 = vmul.f32 %v7758_v9, %v13472_v19  ;;  %v13478_v8 = vld [vmem:[#allocation53_spill] sm:$0xff]  ;;  %v13481_v27 = vld [vmem:[#allocation56_spill] sm:$0xff] }
 0x13e   :  { %13464 = vst [vmem:[#allocation149_spill] sm:$0xff] %v7806_v12  ;;  %6401 = vtanh.f32 %v7806_v12  ;;  %6134 = vst [vmem:[%s12761_s7 + $0x50] sm:$0xff] %v7806_v12  ;;  %v307_v50 = vadd.f32 %v7686_v6, %v117_v35  ;;  %v496_v31 = vmul.f32 %v7668_v24, %v488_v48  ;;  %v504_v54 = vmul.f32 %v6388_v63, %v13473_v57  ;;  %v13479_v6 = vld [vmem:[#allocation55_spill] sm:$0xff]  ;;  %v13480_v57 = vld [vmem:[#allocation28_spill] sm:$0xff] }
 0x13f   :  { %v6390_v47 = vpop.eup %6389  ;;  %v3592_v55 = vmul.f32 %v7758_v9, %v13474_v41  ;;  %v3600_v14 = vmul.f32 %v7758_v9, %v13475_v51  ;;  %v3577_v40 = vmul.f32 %v7783_v30, %v13476_v62  ;;  %v3585_v46 = vmul.f32 %v7783_v30, %v13477_v10  ;;  %v13482_v51 = vld [vmem:[#allocation57_spill] sm:$0xff]  ;;  %v7855_v10 = vpop.f32.mrf.mxu1  ;;  %v13488_v52 = vld [vmem:[#allocation60_spill] sm:$0xff] }
 0x140   :  { %v3593_v15 = vmul.f32 %v7783_v30, %v13478_v8  ;;  %v3601_v24 = vmul.f32 %v7783_v30, %v13479_v6  ;;  %v7848_v35 = vadd.f32 %v504_v54, %v496_v31  ;;  %v323_v48 = vadd.f32 %v322_v13, %v13480_v57  ;;  %13483 = vst [vmem:[#allocation123_spill] sm:$0xff] %v7855_v10  ;;  %v13485_v13 = vld [vmem:[#allocation48_spill] sm:$0xff]  ;;  %v13489_v28 = vld [vmem:[#allocation61_spill] sm:$0xff] }
 0x141   :  { %v425_v53 = vadd.f32 1.0, %v6390_v47  ;;  %6403 = vpow2.f32 %v6202_v7  ;;  %v3609_v2 = vmul.f32 %v7783_v30, %v13481_v27  ;;  %v3617_v41 = vmul.f32 %v7783_v30, %v13482_v51  ;;  %v13484_v47 = vld [vmem:[#allocation47_spill] sm:$0xff]  ;;  %v13486_v51 = vld [vmem:[#allocation49_spill] sm:$0xff] }
 0x142   :  { %v6392_v63 = vpop.eup %6391  ;;  %v6203_v8 = vmul.f32 -1.442695, %v307_v50  ;;  %v3625_v6 = vmul.f32 %v7783_v30, %v13414_v5  ;;  %6405 = vtanh.f32 %v7848_v35  ;;  %6135 = vst [vmem:[%s12761_s7 + $0x58] sm:$0xff] %v7848_v35  ;;  %v3608_v7 = vmul.f32 %v7758_v9, %v13484_v47  ;;  %v13487_v27 = vld [vmem:[#allocation59_spill] sm:$0xff] }
 0x143   :  { %v6394_v62 = vpop.eup %6393  ;;  %v525_v31 = vmul.f32 %v6392_v63, %v7729_v45  ;;  %v3616_v54 = vmul.f32 %v7758_v9, %v13485_v13  ;;  %v3624_v50 = vmul.f32 %v7758_v9, %v13486_v51  ;;  %6407 = vtanh.f32 %v323_v48  ;;  %v7880_v9 = vpop.f32.mrf.mxu1 }
 0x144   :  { %v6396_v30 = vpop.eup %6395  ;;  %v3639_v5 = vadd.f32 %v3577_v40, %v3575_v4  ;;  %v3657_v45 = vadd.f32 %v3585_v46, %v3583_v18  ;;  %v3675_v63 = vadd.f32 %v3593_v15, %v3591_v21  ;;  %v3578_v19 = vmul.f32 %v7824_v43, %v13487_v27  ;;  %13490 = vst [vmem:[#allocation28_spill] sm:$0xff] %v7880_v9  ;;  %v324_v18 = vpop.f32.mrf.mxu0  ;;  %v13491_v21 = vld [vmem:[#allocation64_spill] sm:$0xff] }
 0x145   :  { %6124 = vst [vmem:[%s12761_s7] sm:$0xff] %v525_v31  ;;  %v6398_v3 = vpop.eup %6397  ;;  %6409 = vrcp.f32 %v425_v53  ;;  %v3693_v47 = vadd.f32 %v3601_v24, %v3599_v29  ;;  %v3586_v13 = vmul.f32 %v7824_v43, %v13488_v52  ;;  %v3594_v48 = vmul.f32 %v7824_v43, %v13489_v28  ;;  %v13492_v29 = vld [vmem:[#allocation66_spill] sm:$0xff] }
 0x146   :  { %6411 = vpow2.f32 %v6203_v8  ;;  %v3711_v40 = vadd.f32 %v3609_v2, %v3607_v0  ;;  %v3729_v15 = vadd.f32 %v3617_v41, %v3615_v38  ;;  %v3747_v4 = vadd.f32 %v3625_v6, %v3623_v26  ;;  %v7900_v26 = vpop.f32.mrf.mxu1 }
 0x147   :  { %v6400_v46 = vpop.eup %6399  ;;  %v3602_v31 = vmul.f32 %v7824_v43, %v13491_v21  ;;  %v3610_v53 = vmul.f32 %v7824_v43, %v13419_v11  ;;  %v3618_v24 = vmul.f32 %v7824_v43, %v13492_v29  ;;  %v426_v28 = vadd.f32 1.0, %v6398_v3  ;;  %13493 = vst [vmem:[#allocation152_spill] sm:$0xff] %v7900_v26 }
 0x148   :  { %v526_v52 = vmul.f32 %v6400_v46, %v7780_v22  ;;  %v3626_v27 = vmul.f32 %v7824_v43, %v13422_v61  ;;  %v3648_v8 = vadd.f32 %v3578_v19, %v3576_v25  ;;  %v3579_v41 = vmul.f32 %v7855_v10, %v7124_v32  ;;  %v13494_v25 = vld [vmem:[#allocation9_spill] sm:$0xff] }
 0x149   :  { %v3666_v2 = vadd.f32 %v3586_v13, %v3584_v56  ;;  %v7893_v0 = vadd.f32 %v3594_v48, %v3592_v55  ;;  %v3587_v38 = vmul.f32 %v7855_v10, %v7126_v33  ;;  %v325_v22 = vadd.f32 %v324_v18, %v13480_v57 }
 0x14a   :  { %6125 = vst [vmem:[%s12761_s7 + $0x8] sm:$0xff] %v526_v52  ;;  %v3595_v19 = vmul.f32 %v7855_v10, %v7128_v34  ;;  %v3603_v56 = vmul.f32 %v7855_v10, %v7132_v36  ;;  %v3611_v55 = vmul.f32 %v7855_v10, %v7134_v37  ;;  %v3619_v52 = vmul.f32 %v7855_v10, %v13494_v25 }
 0x14b   :  { %v6402_v3 = vpop.eup %6401  ;;  %v3702_v6 = vadd.f32 %v3602_v31, %v3600_v14  ;;  %v3720_v13 = vadd.f32 %v3610_v53, %v3608_v7  ;;  %v3627_v48 = vmul.f32 %v7855_v10, %v7149_v44  ;;  %6413 = vrcp.f32 %v426_v28  ;;  %v13502_v10 = vld [vmem:[#allocation125_spill] sm:$0xff]  ;;  %v328_v44 = vpop.f32.mrf.mxu0 }
 0x14c   :  { %v527_v46 = vmul.f32 %v6402_v3, %v6394_v62  ;;  %v3738_v57 = vadd.f32 %v3618_v24, %v3616_v54  ;;  %v3640_v18 = vadd.f32 %v3639_v5, %v3579_v41  ;;  %v3581_v43 = vmul.f32 %v7900_v26, %v7177_v58  ;;  %v489_v5 = vld [vmem:[%s12760_s1 + $0x20] sm:$0xff]  ;;  %v13496_v24 = vld [vmem:[#allocation12_spill] sm:$0xff] }
 0x14d   :  { %v3756_v34 = vadd.f32 %v3626_v27, %v3624_v50  ;;  %v3658_v36 = vadd.f32 %v3657_v45, %v3587_v38  ;;  %v3589_v14 = vmul.f32 %v7900_v26, %v7179_v59  ;;  %6415 = vtanh.f32 %v325_v22  ;;  %v13495_v50 = vld [vmem:[#allocation10_spill] sm:$0xff]  ;;  %v13497_v38 = vld [vmem:[#allocation13_spill] sm:$0xff] }
 0x14e   :  { %6126 = vst [vmem:[%s12761_s7 + $0x10] sm:$0xff] %v527_v46  ;;  %v6404_v7 = vpop.eup %6403  ;;  %v3676_v31 = vadd.f32 %v3675_v63, %v3595_v19  ;;  %v3694_v53 = vadd.f32 %v3693_v47, %v3603_v56  ;;  %v3712_v62 = vadd.f32 %v3711_v40, %v3611_v55  ;;  %v3730_v28 = vadd.f32 %v3729_v15, %v3619_v52  ;;  %v13498_v47 = vld [vmem:[#allocation21_spill] sm:$0xff]  ;;  %v13499_v15 = vld [vmem:[#allocation22_spill] sm:$0xff]  ;;  %v13500_v55 = vld [vmem:[#allocation23_spill] sm:$0xff] }
 0x14f   :  { %v6406_v54 = vpop.eup %6405  ;;  %v3748_v27 = vadd.f32 %v3747_v4, %v3627_v48  ;;  %v3580_v45 = vmul.f32 %v7880_v9, %v13495_v50  ;;  %v3588_v41 = vmul.f32 %v7880_v9, %v13496_v24  ;;  %v3596_v22 = vmul.f32 %v7880_v9, %v13497_v38  ;;  %v13501_v48 = vld [vmem:[#allocation133_spill] sm:$0xff]  ;;  %v13503_v38 = vld [vmem:[#allocation14_spill] sm:$0xff]  ;;  %v13505_v24 = vld [vmem:[#allocation16_spill] sm:$0xff] }
 0x150   :  { %v6408_v3 = vpop.eup %6407  ;;  %v528_v63 = vmul.f32 %v6406_v54, %v6396_v30  ;;  %v3597_v40 = vmul.f32 %v7900_v26, %v13498_v47  ;;  %v3605_v19 = vmul.f32 %v7900_v26, %v13499_v15  ;;  %v3641_v56 = vadd.f32 %v3640_v18, %v3581_v43  ;;  %v13504_v54 = vld [vmem:[#allocation15_spill] sm:$0xff]  ;;  %v13506_v43 = vld [vmem:[#allocation18_spill] sm:$0xff] }
 0x151   :  { %v3613_v4 = vmul.f32 %v7900_v26, %v13500_v55  ;;  %v3659_v52 = vadd.f32 %v3658_v36, %v3589_v14  ;;  %v497_v46 = vmul.f32 %v13501_v48, %v489_v5  ;;  %v505_v59 = vmul.f32 %v6408_v3, %v13502_v10  ;;  %v13507_v14 = vld [vmem:[#allocation24_spill] sm:$0xff]  ;;  %v13508_v3 = vld [vmem:[#allocation25_spill] sm:$0xff] }
 0x152   :  { %v7937_v58 = vpop.eup %6409  ;;  %v3604_v30 = vmul.f32 %v7880_v9, %v13503_v38  ;;  %v3612_v47 = vmul.f32 %v7880_v9, %v13504_v54  ;;  %v3620_v15 = vmul.f32 %v7880_v9, %v13505_v24  ;;  %v3628_v18 = vmul.f32 %v7880_v9, %v13506_v43  ;;  %6127 = vst [vmem:[%s12761_s7 + $0x18] sm:$0xff] %v528_v63 }
 0x153   :  { %v6412_v36 = vpop.eup %6411  ;;  %v427_v10 = vadd.f32 1.0, %v6404_v7  ;;  %v3621_v5 = vmul.f32 %v7900_v26, %v13507_v14  ;;  %v3629_v48 = vmul.f32 %v7900_v26, %v13508_v3  ;;  %v7954_v55 = vadd.f32 %v505_v59, %v497_v46  ;;  %v330_v26 = vpop.f32.mrf.mxu0 }
 0x154   :  { %v3649_v54 = vadd.f32 %v3648_v8, %v3580_v45  ;;  %v3642_v38 = vrot.slane %v3641_v56, 4  ;;  %v3677_v24 = vadd.f32 %v3676_v31, %v3597_v40  ;;  %v3695_v50 = vadd.f32 %v3694_v53, %v3605_v19  ;;  %v7962_v8 = vpop.f32.mrf.mxu1  ;;  %v490_v40 = vld [vmem:[%s12760_s1 + $0x28] sm:$0xff]  ;;  %v13510_v19 = vld [vmem:[#allocation17_spill] sm:$0xff] }
 0x155   :  { %v3667_v9 = vadd.f32 %v3666_v2, %v3588_v41  ;;  %v3660_v43 = vrot.slane %v3659_v52, 4  ;;  %v3713_v25 = vadd.f32 %v3712_v62, %v3613_v4  ;;  %6417 = vtanh.f32 %v7954_v55  ;;  %6136 = vst [vmem:[%s12761_s7 + $0x60] sm:$0xff] %v7954_v55  ;;  %13509 = vst [vmem:[#allocation133_spill] sm:$0xff] %v7962_v8 }
 0x156   :  { %v3685_v7 = vadd.f32 %v7893_v0, %v3596_v22  ;;  %v3703_v63 = vadd.f32 %v3702_v6, %v3604_v30  ;;  %v3721_v59 = vadd.f32 %v3720_v13, %v3612_v47  ;;  %v3739_v46 = vadd.f32 %v3738_v57, %v3620_v15  ;;  %v13511_v57 = vld [vmem:[#allocation26_spill] sm:$0xff]  ;;  %v13515_v30 = vld [vmem:[#allocation31_spill] sm:$0xff] }
 0x157   :  { %6419 = vrcp.f32 %v427_v10  ;;  %v3757_v31 = vadd.f32 %v3756_v34, %v3628_v18  ;;  %v3731_v53 = vadd.f32 %v3730_v28, %v3621_v5  ;;  %v3749_v2 = vadd.f32 %v3748_v27, %v3629_v48  ;;  %v13512_v34 = vld [vmem:[#allocation27_spill] sm:$0xff]  ;;  %v13514_v15 = vld [vmem:[#allocation30_spill] sm:$0xff]  ;;  %v13516_v18 = vld [vmem:[#allocation32_spill] sm:$0xff] }
 0x158   :  { %v3643_v45 = vadd.f32 %v3642_v38, %v3641_v56  ;;  %v3678_v62 = vrot.slane %v3677_v24, 4  ;;  %v3696_v41 = vrot.slane %v3695_v50, 4  ;;  %v329_v4 = vadd.f32 %v328_v44, %v13510_v19  ;;  %v7968_v0 = vpop.eup %6413  ;;  %v13513_v38 = vld [vmem:[#allocation29_spill] sm:$0xff]  ;;  %v13518_v5 = vld [vmem:[#allocation126_spill] sm:$0xff] }
 0x159   :  { %v3661_v6 = vadd.f32 %v3660_v43, %v3659_v52  ;;  %v3714_v13 = vrot.slane %v3713_v25, 4  ;;  %v3582_v22 = vmul.f32 %v7962_v8, %v13511_v57  ;;  %v3590_v28 = vmul.f32 %v7962_v8, %v13512_v34  ;;  %v13517_v43 = vld [vmem:[#allocation134_spill] sm:$0xff] }
 0x15a   :  { %v6416_v27 = vpop.eup %6415  ;;  %v3598_v47 = vmul.f32 %v7962_v8, %v13513_v38  ;;  %v3606_v56 = vmul.f32 %v7962_v8, %v13514_v15  ;;  %v3614_v44 = vmul.f32 %v7962_v8, %v13515_v30  ;;  %6421 = vtanh.f32 %v329_v4  ;;  %v13519_v38 = vld [vmem:[#allocation33_spill] sm:$0xff] }
 0x15b   :  { %v3622_v52 = vmul.f32 %v7962_v8, %v13516_v18  ;;  %v498_v10 = vmul.f32 %v13517_v43, %v490_v40  ;;  %v506_v48 = vmul.f32 %v6416_v27, %v13518_v5  ;;  %v331_v34 = vadd.f32 %v330_v26, %v13510_v19 }
 0x15c   :  { %v3679_v57 = vadd.f32 %v3678_v62, %v3677_v24  ;;  %v3697_v3 = vadd.f32 %v3696_v41, %v3695_v50  ;;  %v3732_v14 = vrot.slane %v3731_v53, 4  ;;  %v3630_v37 = vmul.f32 %v7962_v8, %v13519_v38 }
 0x15d   :  { %v3650_v15 = vadd.f32 %v3649_v54, %v3582_v22  ;;  %v3668_v33 = vadd.f32 %v3667_v9, %v3590_v28  ;;  %v7987_v32 = vadd.f32 %v506_v48, %v498_v10  ;;  %6423 = vtanh.f32 %v331_v34 }
 0x15e   :  { %v3644_v4 = vrot.slane %v3643_v45, 2  ;;  %v3686_v30 = vadd.f32 %v3685_v7, %v3598_v47  ;;  %v3704_v18 = vadd.f32 %v3703_v63, %v3606_v56  ;;  %v3722_v61 = vadd.f32 %v3721_v59, %v3614_v44 }
 0x15f   :  { %13520 = vst [vmem:[#allocation125_spill] sm:$0xff] %v7987_v32  ;;  %v3662_v40 = vrot.slane %v3661_v6, 2  ;;  %v3750_v43 = vrot.slane %v3749_v2, 4  ;;  %v3740_v27 = vadd.f32 %v3739_v46, %v3622_v52  ;;  %6425 = vtanh.f32 %v7987_v32  ;;  %6137 = vst [vmem:[%s12761_s7 + $0x68] sm:$0xff] %v7987_v32 }
 0x160   :  { %v428_v26 = vadd.f32 1.0, %v6412_v36  ;;  %v3680_v50 = vrot.slane %v3679_v57, 2  ;;  %v3698_v9 = vrot.slane %v3697_v3, 2  ;;  %v3715_v24 = vadd.f32 %v3714_v13, %v3713_v25  ;;  %v13521_v36 = vld [vmem:[#allocation44_spill] sm:$0xff] }
 0x161   :  { %v3733_v54 = vadd.f32 %v3732_v14, %v3731_v53  ;;  %v3651_v62 = vrot.slane %v3650_v15, 4  ;;  %v3669_v41 = vrot.slane %v3668_v33, 4  ;;  %v3758_v7 = vadd.f32 %v3757_v31, %v3630_v37 }
 0x162   :  { %v6418_v63 = vpop.eup %6417  ;;  %v3645_v59 = vadd.f32 %v3644_v4, %v3643_v45  ;;  %v3687_v19 = vrot.slane %v3686_v30, 4  ;;  %v3705_v22 = vrot.slane %v3704_v18, 4  ;;  %v3723_v46 = vrot.slane %v3722_v61, 4 }
 0x163   :  { %v3663_v34 = vadd.f32 %v3662_v40, %v3661_v6  ;;  %v3751_v28 = vadd.f32 %v3750_v43, %v3749_v2  ;;  %v529_v47 = vmul.f32 %v6418_v63, %v7937_v58  ;;  %v3741_v56 = vrot.slane %v3740_v27, 4  ;;  %v491_v58 = vld [vmem:[%s12760_s1 + $0x30] sm:$0xff] }
 0x164   :  { %v7995_v44 = vpop.eup %6419  ;;  %6427 = vrcp.f32 %v428_v26  ;;  %v7999_v25 = vmul.f32 %v13521_v36, %v7738_v42  ;;  %v3681_v14 = vadd.f32 %v3680_v50, %v3679_v57  ;;  %v3699_v53 = vadd.f32 %v3698_v9, %v3697_v3  ;;  %v492_v50 = vld [vmem:[%s12760_s1 + $0x38] sm:$0xff] }
 0x165   :  { %v3716_v37 = vrot.slane %v3715_v24, 2  ;;  %6128 = vst [vmem:[%s12761_s7 + $0x20] sm:$0xff] %v529_v47  ;;  %v3652_v31 = vadd.f32 %v3651_v62, %v3650_v15  ;;  %v3670_v45 = vadd.f32 %v3669_v41, %v3668_v33  ;;  %v3759_v2 = vrot.slane %v3758_v7, 4  ;;  %v13522_v15 = vld [vmem:[#allocation128_spill] sm:$0xff]  ;;  %v13525_v47 = vld [vmem:[#allocation130_spill] sm:$0xff] }
 0x166   :  { %v3646_v6 = vrot.slane %v3645_v59, 1  ;;  %v3688_v13 = vadd.f32 %v3687_v19, %v3686_v30  ;;  %v3706_v52 = vadd.f32 %v3705_v22, %v3704_v18  ;;  %v3724_v10 = vadd.f32 %v3723_v46, %v3722_v61 }
 0x167   :  { %v6422_v5 = vpop.eup %6421  ;;  %v3664_v48 = vrot.slane %v3663_v34, 1  ;;  %v3734_v57 = vrot.slane %v3733_v54, 2  ;;  %v3752_v3 = vrot.slane %v3751_v28, 2  ;;  %v3742_v4 = vadd.f32 %v3741_v56, %v3740_v27 }
 0x168   :  { %v3682_v40 = vrot.slane %v3681_v14, 1  ;;  %v3700_v43 = vrot.slane %v3699_v53, 1  ;;  %v499_v26 = vmul.f32 %v7703_v60, %v491_v58  ;;  %v507_v33 = vmul.f32 %v6422_v5, %v13522_v15 }
 0x169   :  { %v3717_v9 = vadd.f32 %v3716_v37, %v3715_v24  ;;  %v3653_v62 = vrot.slane %v3652_v31, 2  ;;  %v3671_v30 = vrot.slane %v3670_v45, 2  ;;  %v3760_v18 = vadd.f32 %v3759_v2, %v3758_v7 }
 0x16a   :  { %v6424_v61 = vpop.eup %6423  ;;  %v3689_v41 = vrot.slane %v3688_v13, 2  ;;  %v3707_v63 = vrot.slane %v3706_v52, 2  ;;  %v3725_v19 = vrot.slane %v3724_v10, 2  ;;  %v8012_v22 = vadd.f32 %v507_v33, %v499_v26 }
 0x16b   :  { %v8014_v27 = vadd.f32 %v3646_v6, %v3645_v59  ;;  %v3743_v46 = vrot.slane %v3742_v4, 2  ;;  %v500_v60 = vmul.f32 %v7708_v1, %v492_v50  ;;  %v508_v56 = vmul.f32 %v6424_v61, %v13525_v47  ;;  %v975_v50 = vpop.f32.mrf.mxu1 }
 0x16c   :  { %13523 = vst [vmem:[#allocation17_spill] sm:$0xff] %v8012_v22  ;;  %v6426_v58 = vpop.eup %6425  ;;  %v8018_v5 = vadd.f32 %v3682_v40, %v3681_v14  ;;  %v3735_v24 = vadd.f32 %v3734_v57, %v3733_v54  ;;  %v3753_v37 = vadd.f32 %v3752_v3, %v3751_v28  ;;  %6429 = vtanh.f32 %v8012_v22  ;;  %6138 = vst [vmem:[%s12761_s7 + $0x70] sm:$0xff] %v8012_v22  ;;  %v13528_v54 = vld [vmem:[#allocation36_spill] sm:$0xff] }
 0x16d   :  { %13524 = vst [vmem:[#allocation134_spill] sm:$0xff] %v8014_v27  ;;  %v3654_v7 = vadd.f32 %v3653_v62, %v3652_v31  ;;  %v3672_v59 = vadd.f32 %v3671_v30, %v3670_v45  ;;  %v530_v2 = vmul.f32 %v6426_v58, %v7968_v0  ;;  %v8026_v6 = vadd.f32 %v508_v56, %v500_v60  ;;  %v13535_v60 = vld [vmem:[#allocation54_spill] sm:$0xff] }
 0x16e   :  { %13526 = vst [vmem:[#allocation126_spill] sm:$0xff] %v8018_v5  ;;  %v3690_v1 = vadd.f32 %v3689_v41, %v3688_v13  ;;  %v3708_v26 = vadd.f32 %v3707_v63, %v3706_v52  ;;  %v3726_v15 = vadd.f32 %v3725_v19, %v3724_v10  ;;  %v3761_v14 = vrot.slane %v3760_v18, 2 }
 0x16f   :  { %13527 = vst [vmem:[#allocation128_spill] sm:$0xff] %v8026_v6  ;;  %v1117_v28 = vmul.f32 %v13528_v54, %v7806_v12  ;;  %v3718_v57 = vrot.slane %v3717_v9, 1  ;;  %v3744_v3 = vadd.f32 %v3743_v46, %v3742_v4  ;;  %6129 = vst [vmem:[%s12761_s7 + $0x28] sm:$0xff] %v530_v2  ;;  %6431 = vtanh.f32 %v8026_v6  ;;  %v13549_v46 = vld [vmem:[#allocation52_spill] sm:$0xff] }
 0x170   :  { %6139 = vst [vmem:[%s12761_s7 + $0x78] sm:$0xff] %v8026_v6  ;;  %v8038_v0 = vadd.f32 %v3664_v48, %v3663_v34  ;;  %v8040_v31 = vadd.f32 %v3700_v43, %v3699_v53  ;;  %v3736_v45 = vrot.slane %v3735_v24, 1  ;;  %v3754_v13 = vrot.slane %v3753_v37, 1  ;;  %v875_v6 = vpop.f32.mrf.mxu0 }
 0x171   :  { %v6428_v52 = vpop.eup %6427  ;;  %v1118_v10 = vmul.f32 %v13528_v54, %v7848_v35  ;;  %v3783_v4 = vmax.f32 %v8014_v27, %v8018_v5  ;;  %v3655_v40 = vrot.slane %v3654_v7, 1  ;;  %v3673_v33 = vrot.slane %v3672_v59, 1  ;;  %v13551_v27 = vld [vmem:[#allocation55_spill] sm:$0xff] }
 0x172   :  { %13529 = vst [vmem:[#allocation130_spill] sm:$0xff] %v8038_v0  ;;  %13530 = vst [vmem:[#allocation153_spill] sm:$0xff] %v8040_v31  ;;  %v3691_v62 = vrot.slane %v3690_v1, 1  ;;  %v3709_v30 = vrot.slane %v3708_v26, 1  ;;  %v3727_v61 = vrot.slane %v3726_v15, 1  ;;  %v8046_v41 = vadd.f32 %v3761_v14, %v3760_v18 }
 0x173   :  { %v1116_v34 = vmul.f32 %v13521_v36, %v7771_v17  ;;  %v1249_v53 = vadd.f32 %v1117_v28, %v7999_v25  ;;  %v8051_v48 = vadd.f32 %v3718_v57, %v3717_v9  ;;  %v3745_v43 = vrot.slane %v3744_v3, 1  ;;  %v977_v9 = vpop.f32.mrf.mxu1 }
 0x174   :  { %13531 = vst [vmem:[#allocation154_spill] sm:$0xff] %v8046_v41  ;;  %v8053_v63 = vadd.f32 %v3736_v45, %v3735_v24  ;;  %v8055_v19 = vadd.f32 %v3754_v13, %v3753_v37  ;;  %v1119_v47 = vmul.f32 %v13535_v60, %v7954_v55  ;;  %v8064_v58 = vadd.f32 %v3655_v40, %v3654_v7 }
 0x175   :  { %13532 = vst [vmem:[#allocation155_spill] sm:$0xff] %v8051_v48  ;;  %v1258_v18 = vadd.f32 %v1118_v10, %v1116_v34  ;;  %v8062_v56 = vmax.f32 %v3783_v4, %v8051_v48  ;;  %v8066_v25 = vadd.f32 %v3673_v33, %v3672_v59  ;;  %v8068_v2 = vadd.f32 %v3691_v62, %v3690_v1  ;;  %v13545_v4 = vld [vmem:[#allocation41_spill] sm:$0xff]  ;;  %v13546_v33 = vld [vmem:[#allocation42_spill] sm:$0xff]  ;;  %v979_v34 = vpop.f32.mrf.mxu1 }
 0x176   :  { %13533 = vst [vmem:[#allocation156_spill] sm:$0xff] %v8053_v63  ;;  %13534 = vst [vmem:[#allocation157_spill] sm:$0xff] %v8055_v19  ;;  %v8070_v24 = vadd.f32 %v3709_v30, %v3708_v26  ;;  %v8072_v37 = vadd.f32 %v3727_v61, %v3726_v15  ;;  %v8075_v28 = vadd.f32 %v3745_v43, %v3744_v3  ;;  %v13544_v26 = vld [vmem:[#allocation40_spill] sm:$0xff]  ;;  %v13547_v30 = vld [vmem:[#allocation43_spill] sm:$0xff] }
 0x177   :  { %13536 = vst [vmem:[#allocation54_spill] sm:$0xff] %v8062_v56  ;;  %13537 = vst [vmem:[#allocation158_spill] sm:$0xff] %v8064_v58  ;;  %v4077_v57 = vmul.f32 %v975_v50, %v13461_v39  ;;  %v4085_v45 = vmul.f32 %v975_v50, %v13462_v23  ;;  %v4093_v7 = vmul.f32 %v975_v50, %v13463_v20  ;;  %v13550_v48 = vld [vmem:[#allocation53_spill] sm:$0xff] }
 0x178   :  { %13538 = vst [vmem:[#allocation159_spill] sm:$0xff] %v8066_v25  ;;  %13539 = vst [vmem:[#allocation160_spill] sm:$0xff] %v8068_v2  ;;  %v8080_v13 = vadd.f32 %v1249_v53, %v1119_v47  ;;  %v4101_v59 = vmul.f32 %v975_v50, %v13466_v16  ;;  %v4109_v1 = vmul.f32 %v975_v50, %v13467_v49  ;;  %v13548_v53 = vld [vmem:[#allocation51_spill] sm:$0xff]  ;;  %v13553_v19 = vld [vmem:[#allocation57_spill] sm:$0xff] }
 0x179   :  { %13540 = vst [vmem:[#allocation161_spill] sm:$0xff] %v8070_v24  ;;  %13541 = vst [vmem:[#allocation162_spill] sm:$0xff] %v8072_v37  ;;  %v4117_v10 = vmul.f32 %v975_v50, %v13544_v26  ;;  %v6430_v15 = vpop.eup %6429  ;;  %v4125_v40 = vmul.f32 %v975_v50, %v13545_v4  ;;  %v4133_v3 = vmul.f32 %v975_v50, %v7738_v42  ;;  %v13554_v50 = vld [vmem:[#allocation58_spill] sm:$0xff]  ;;  %v13557_v24 = vld [vmem:[#allocation47_spill] sm:$0xff] }
 0x17a   :  { %13542 = vst [vmem:[#allocation163_spill] sm:$0xff] %v8075_v28  ;;  %13543 = vst [vmem:[#allocation164_spill] sm:$0xff] %v8080_v13  ;;  %v4078_v62 = vmul.f32 %v977_v9, %v13546_v33  ;;  %v4086_v61 = vmul.f32 %v977_v9, %v13547_v30  ;;  %v531_v43 = vmul.f32 %v6430_v15, %v7995_v44  ;;  %v13552_v28 = vld [vmem:[#allocation56_spill] sm:$0xff]  ;;  %v13555_v44 = vld [vmem:[#allocation45_spill] sm:$0xff] }
 0x17b   :  { %v4079_v47 = vmul.f32 %v979_v34, %v13548_v53  ;;  %v4087_v14 = vmul.f32 %v979_v34, %v13549_v46  ;;  %v4095_v5 = vmul.f32 %v979_v34, %v13550_v48  ;;  %v4103_v8 = vmul.f32 %v979_v34, %v13551_v27  ;;  %v13556_v37 = vld [vmem:[#allocation46_spill] sm:$0xff]  ;;  %v13558_v2 = vld [vmem:[#allocation48_spill] sm:$0xff] }
 0x17c   :  { %v4111_v56 = vmul.f32 %v979_v34, %v13552_v28  ;;  %v4119_v31 = vmul.f32 %v979_v34, %v13553_v19  ;;  %v4127_v0 = vmul.f32 %v979_v34, %v13554_v50  ;;  %v6432_v63 = vpop.eup %6431  ;;  %6130 = vst [vmem:[%s12761_s7 + $0x30] sm:$0xff] %v531_v43  ;;  %v4094_v15 = vmul.f32 %v977_v9, %v13555_v44 }
 0x17d   :  { %v4102_v25 = vmul.f32 %v977_v9, %v13556_v37  ;;  %v4110_v41 = vmul.f32 %v977_v9, %v13557_v24  ;;  %v4135_v58 = vmul.f32 %v979_v34, %v7806_v12  ;;  %v4118_v38 = vmul.f32 %v977_v9, %v13558_v2 }
 0x17e   :  { %v4126_v13 = vmul.f32 %v977_v9, %v13486_v51  ;;  %v4134_v54 = vmul.f32 %v977_v9, %v7771_v17  ;;  %v532_v36 = vmul.f32 %v6432_v63, %v6428_v52  ;;  %v1120_v50 = vmul.f32 %v13535_v60, %v7987_v32  ;;  %v981_v52 = vpop.f32.mrf.mxu1 }
 0x17f   :  { %v4141_v43 = vadd.f32 %v4079_v47, %v4077_v57  ;;  %v8109_v19 = vadd.f32 %v4087_v14, %v4085_v45  ;;  %v8111_v28 = vadd.f32 %v4095_v5, %v4093_v7  ;;  %v4195_v34 = vadd.f32 %v4103_v8, %v4101_v59  ;;  %v13559_v57 = vld [vmem:[#allocation59_spill] sm:$0xff]  ;;  %v13560_v45 = vld [vmem:[#allocation60_spill] sm:$0xff]  ;;  %v13561_v7 = vld [vmem:[#allocation61_spill] sm:$0xff] }
 0x180   :  { %6131 = vst [vmem:[%s12761_s7 + $0x38] sm:$0xff] %v532_v36  ;;  %v4213_v12 = vadd.f32 %v4111_v56, %v4109_v1  ;;  %v8116_v27 = vadd.f32 %v4119_v31, %v4117_v10  ;;  %v8118_v48 = vadd.f32 %v4127_v0, %v4125_v40  ;;  %v4267_v63 = vadd.f32 %v4135_v58, %v4133_v3  ;;  %v13563_v56 = vld [vmem:[#allocation67_spill] sm:$0xff] }
 0x181   :  { %v8121_v9 = vmul.f32 %v875_v6, %v13461_v39  ;;  %v4080_v14 = vmul.f32 %v981_v52, %v13559_v57  ;;  %v4088_v5 = vmul.f32 %v981_v52, %v13560_v45  ;;  %v4096_v47 = vmul.f32 %v981_v52, %v13561_v7  ;;  %v985_v7 = vpop.f32.mrf.mxu1 }
 0x182   :  { %v4104_v32 = vmul.f32 %v981_v52, %v13491_v21  ;;  %v4112_v8 = vmul.f32 %v981_v52, %v13419_v11  ;;  %v4120_v36 = vmul.f32 %v981_v52, %v13492_v29  ;;  %v8129_v31 = vadd.f32 %v1258_v18, %v1120_v50  ;;  %v877_v21 = vpop.f32.mrf.mxu0 }
 0x183   :  { %v1568_v0 = vmul.f32 %v875_v6, %v13462_v23  ;;  %v4128_v58 = vmul.f32 %v981_v52, %v13563_v56  ;;  %v4136_v59 = vmul.f32 %v981_v52, %v7848_v35  ;;  %v1576_v1 = vmul.f32 %v875_v6, %v13463_v20 }
 0x184   :  { %13562 = vst [vmem:[#allocation165_spill] sm:$0xff] %v8129_v31  ;;  %v1584_v10 = vmul.f32 %v875_v6, %v13466_v16  ;;  %v1592_v40 = vmul.f32 %v875_v6, %v13467_v49  ;;  %v1600_v3 = vmul.f32 %v875_v6, %v13544_v26  ;;  %v1608_v11 = vmul.f32 %v875_v6, %v13545_v4 }
 0x185   :  { %v1616_v18 = vmul.f32 %v875_v6, %v7738_v42  ;;  %v8140_v50 = vadd.f32 %v4080_v14, %v4078_v62  ;;  %v8142_v31 = vadd.f32 %v4088_v5, %v4086_v61  ;;  %v8144_v56 = vadd.f32 %v4096_v47, %v4094_v15  ;;  %v13573_v42 = vld [vmem:[#allocation3_spill] sm:$0xff]  ;;  %v13581_v61 = vld [vmem:[#allocation4_spill] sm:$0xff]  ;;  %v879_v14 = vpop.f32.mrf.mxu0  ;;  %v13582_v5 = vld [vmem:[#allocation5_spill] sm:$0xff] }
 0x186   :  { %v8146_v35 = vadd.f32 %v4104_v32, %v4102_v25  ;;  %v8148_v52 = vadd.f32 %v4112_v8, %v4110_v41  ;;  %v8150_v29 = vadd.f32 %v4120_v36, %v4118_v38  ;;  %v8152_v45 = vadd.f32 %v4128_v58, %v4126_v13  ;;  %v13583_v8 = vld [vmem:[#allocation7_spill] sm:$0xff]  ;;  %v13584_v58 = vld [vmem:[#allocation8_spill] sm:$0xff] }
 0x187   :  { %13564 = vst [vmem:[#allocation166_spill] sm:$0xff] %v8140_v50  ;;  %13565 = vst [vmem:[#allocation167_spill] sm:$0xff] %v8142_v31  ;;  %v8154_v57 = vadd.f32 %v4136_v59, %v4134_v54  ;;  %v8157_v4 = vmul.f32 %v877_v21, %v13546_v33  ;;  %v4081_v6 = vmul.f32 %v985_v7, %v13573_v42 }
 0x188   :  { %13566 = vst [vmem:[#allocation168_spill] sm:$0xff] %v8144_v56  ;;  %13567 = vst [vmem:[#allocation169_spill] sm:$0xff] %v8146_v35  ;;  %v8161_v62 = vmul.f32 %v877_v21, %v13547_v30  ;;  %v8164_v32 = vmul.f32 %v877_v21, %v13555_v44  ;;  %v8167_v41 = vmul.f32 %v877_v21, %v13556_v37 }
 0x189   :  { %13568 = vst [vmem:[#allocation170_spill] sm:$0xff] %v8148_v52  ;;  %13569 = vst [vmem:[#allocation171_spill] sm:$0xff] %v8150_v29  ;;  %v8170_v38 = vmul.f32 %v877_v21, %v13557_v24  ;;  %v8173_v54 = vmul.f32 %v877_v21, %v13558_v2  ;;  %v8176_v25 = vmul.f32 %v877_v21, %v13486_v51  ;;  %v13585_v24 = vld [vmem:[#allocation9_spill] sm:$0xff]  ;;  %v13586_v2 = vld [vmem:[#allocation63_spill] sm:$0xff] }
 0x18a   :  { %13570 = vst [vmem:[#allocation172_spill] sm:$0xff] %v8152_v45  ;;  %13571 = vst [vmem:[#allocation173_spill] sm:$0xff] %v8154_v57  ;;  %v8179_v13 = vmul.f32 %v877_v21, %v7771_v17  ;;  %v4089_v15 = vmul.f32 %v985_v7, %v13581_v61  ;;  %v4097_v47 = vmul.f32 %v985_v7, %v13582_v5  ;;  %v13588_v51 = vld [vmem:[#allocation11_spill] sm:$0xff]  ;;  %v13593_v45 = vld [vmem:[#allocation58_spill] sm:$0xff] }
 0x18b   :  { %13572 = vst [vmem:[#allocation174_spill] sm:$0xff] %v8157_v4  ;;  %13574 = vst [vmem:[#allocation175_spill] sm:$0xff] %v8161_v62  ;;  %v4105_v36 = vmul.f32 %v985_v7, %v13583_v8  ;;  %v4113_v59 = vmul.f32 %v985_v7, %v13584_v58  ;;  %v4121_v37 = vmul.f32 %v985_v7, %v13585_v24  ;;  %v13592_v4 = vld [vmem:[#allocation57_spill] sm:$0xff] }
 0x18c   :  { %13575 = vst [vmem:[#allocation176_spill] sm:$0xff] %v8164_v32  ;;  %13576 = vst [vmem:[#allocation177_spill] sm:$0xff] %v8167_v41  ;;  %v8188_v44 = vmul.f32 %v13586_v2, %v8012_v22  ;;  %v4129_v30 = vmul.f32 %v985_v7, %v13588_v51  ;;  %v4137_v17 = vmul.f32 %v985_v7, %v7954_v55  ;;  %v13591_v32 = vld [vmem:[#allocation56_spill] sm:$0xff]  ;;  %v13594_v52 = vld [vmem:[#allocation149_spill] sm:$0xff]  ;;  %v8208_v22 = vpop.f32.mrf.mxu1 }
 0x18d   :  { %13577 = vst [vmem:[#allocation178_spill] sm:$0xff] %v8170_v38  ;;  %13578 = vst [vmem:[#allocation179_spill] sm:$0xff] %v8173_v54  ;;  %v4142_v21 = vadd.f32 %v4141_v43, %v4081_v6  ;;  %v1562_v33 = vmul.f32 %v879_v14, %v13548_v53  ;;  %v13590_v38 = vld [vmem:[#allocation55_spill] sm:$0xff]  ;;  %v1594_v62 = vmul.f32 %v879_v14, %v13591_v32  ;;  %v13595_v6 = vld [vmem:[#allocation128_spill] sm:$0xff] }
 0x18e   :  { %13579 = vst [vmem:[#allocation180_spill] sm:$0xff] %v8176_v25  ;;  %13580 = vst [vmem:[#allocation181_spill] sm:$0xff] %v8179_v13  ;;  %v1570_v13 = vmul.f32 %v879_v14, %v13549_v46  ;;  %v13589_v25 = vld [vmem:[#allocation53_spill] sm:$0xff]  ;;  %v1586_v41 = vmul.f32 %v879_v14, %v13590_v38  ;;  %v1602_v57 = vmul.f32 %v879_v14, %v13592_v4 }
 0x18f   :  { %13587 = vst [vmem:[#allocation63_spill] sm:$0xff] %v8188_v44  ;;  %v1578_v54 = vmul.f32 %v879_v14, %v13589_v25  ;;  %v1610_v29 = vmul.f32 %v879_v14, %v13593_v45  ;;  %v1618_v35 = vmul.f32 %v879_v14, %v13594_v52  ;;  %v4160_v56 = vadd.f32 %v8109_v19, %v4089_v15 }
 0x190   :  { %v4178_v55 = vadd.f32 %v8111_v28, %v4097_v47  ;;  %v4196_v43 = vadd.f32 %v4195_v34, %v4105_v36  ;;  %v4214_v7 = vadd.f32 %v4213_v12, %v4113_v59  ;;  %v8204_v44 = vmul.f32 %v13586_v2, %v13595_v6 }
 0x191   :  { %v4232_v31 = vadd.f32 %v8116_v27, %v4121_v37  ;;  %v4250_v50 = vadd.f32 %v8118_v48, %v4129_v30  ;;  %v4268_v51 = vadd.f32 %v4267_v63, %v4137_v17  ;;  %v8211_v45 = vadd.f32 %v1562_v33, %v8121_v9  ;;  %v13605_v48 = vld [vmem:[#allocation10_spill] sm:$0xff]  ;;  %v13606_v33 = vld [vmem:[#allocation12_spill] sm:$0xff]  ;;  %v13607_v63 = vld [vmem:[#allocation13_spill] sm:$0xff] }
 0x192   :  { %13596 = vst [vmem:[#allocation149_spill] sm:$0xff] %v8204_v44  ;;  %v8213_v52 = vadd.f32 %v1570_v13, %v1568_v0  ;;  %v8215_v19 = vadd.f32 %v1578_v54, %v1576_v1  ;;  %v8217_v28 = vadd.f32 %v1586_v41, %v1584_v10  ;;  %v8219_v12 = vadd.f32 %v1594_v62, %v1592_v40  ;;  %v13608_v0 = vld [vmem:[#allocation14_spill] sm:$0xff]  ;;  %v13610_v1 = vld [vmem:[#allocation16_spill] sm:$0xff]  ;;  %v989_v62 = vpop.f32.mrf.mxu1 }
 0x193   :  { %13597 = vst [vmem:[#allocation182_spill] sm:$0xff] %v8211_v45  ;;  %v8221_v2 = vadd.f32 %v1602_v57, %v1600_v3  ;;  %v8223_v34 = vadd.f32 %v1610_v29, %v1608_v11  ;;  %v8225_v27 = vadd.f32 %v1618_v35, %v1616_v18  ;;  %v8229_v37 = vmul.f32 %v8208_v22, %v13605_v48  ;;  %v13609_v11 = vld [vmem:[#allocation15_spill] sm:$0xff]  ;;  %v13611_v40 = vld [vmem:[#allocation44_spill] sm:$0xff] }
 0x194   :  { %13598 = vst [vmem:[#allocation183_spill] sm:$0xff] %v8213_v52  ;;  %13599 = vst [vmem:[#allocation184_spill] sm:$0xff] %v8215_v19  ;;  %v8233_v30 = vmul.f32 %v8208_v22, %v13606_v33  ;;  %v8237_v9 = vmul.f32 %v8208_v22, %v13607_v63  ;;  %v8241_v57 = vmul.f32 %v8208_v22, %v13608_v0  ;;  %v13612_v18 = vld [vmem:[#allocation36_spill] sm:$0xff]  ;;  %v13617_v63 = vld [vmem:[#allocation23_spill] sm:$0xff] }
 0x195   :  { %13600 = vst [vmem:[#allocation185_spill] sm:$0xff] %v8217_v28  ;;  %13601 = vst [vmem:[#allocation186_spill] sm:$0xff] %v8219_v12  ;;  %v8245_v29 = vmul.f32 %v8208_v22, %v13609_v11  ;;  %v8249_v10 = vmul.f32 %v8208_v22, %v13610_v1  ;;  %v8253_v3 = vmul.f32 %v13611_v40, %v13461_v39  ;;  %v13615_v1 = vld [vmem:[#allocation21_spill] sm:$0xff] }
 0x196   :  { %13602 = vst [vmem:[#allocation187_spill] sm:$0xff] %v8221_v2  ;;  %13603 = vst [vmem:[#allocation188_spill] sm:$0xff] %v8223_v34  ;;  %v8257_v35 = vmul.f32 %v13612_v18, %v13548_v53  ;;  %v8261_v41 = vmul.f32 %v13535_v60, %v13573_v42  ;;  %v8265_v54 = vmul.f32 %v13611_v40, %v13462_v23  ;;  %v13613_v23 = vld [vmem:[#allocation19_spill] sm:$0xff]  ;;  %v13619_v34 = vld [vmem:[#allocation25_spill] sm:$0xff] }
 0x197   :  { %13604 = vst [vmem:[#allocation189_spill] sm:$0xff] %v8225_v27  ;;  %v8269_v13 = vmul.f32 %v13612_v18, %v13549_v46  ;;  %v8273_v15 = vmul.f32 %v13535_v60, %v13581_v61  ;;  %v8277_v14 = vmul.f32 %v13611_v40, %v13463_v20  ;;  %v8281_v47 = vmul.f32 %v13612_v18, %v13589_v25  ;;  %v13621_v52 = vld [vmem:[#allocation41_spill] sm:$0xff] }
 0x198   :  { %v8285_v36 = vmul.f32 %v13535_v60, %v13582_v5  ;;  %v8289_v59 = vmul.f32 %v13611_v40, %v13466_v16  ;;  %v8293_v17 = vmul.f32 %v13612_v18, %v13590_v38  ;;  %v8297_v46 = vmul.f32 %v13535_v60, %v13583_v8 }
 0x199   :  { %v8301_v25 = vmul.f32 %v13611_v40, %v13467_v49  ;;  %v8305_v53 = vmul.f32 %v13612_v18, %v13591_v32  ;;  %v8309_v16 = vmul.f32 %v13535_v60, %v13584_v58  ;;  %v8313_v38 = vmul.f32 %v13611_v40, %v13544_v26  ;;  %v13614_v49 = vld [vmem:[#allocation20_spill] sm:$0xff]  ;;  %v13616_v32 = vld [vmem:[#allocation22_spill] sm:$0xff] }
 0x19a   :  { %v8317_v20 = vmul.f32 %v13612_v18, %v13592_v4  ;;  %v4083_v39 = vmul.f32 %v989_v62, %v13613_v23  ;;  %v4091_v44 = vmul.f32 %v989_v62, %v13614_v49  ;;  %v4099_v11 = vmul.f32 %v989_v62, %v13615_v1  ;;  %v13618_v26 = vld [vmem:[#allocation24_spill] sm:$0xff]  ;;  %v13620_v4 = vld [vmem:[#allocation17_spill] sm:$0xff] }
 0x19b   :  { %v4107_v0 = vmul.f32 %v989_v62, %v13616_v32  ;;  %v4115_v33 = vmul.f32 %v989_v62, %v13617_v63  ;;  %v8326_v48 = vmul.f32 %v13535_v60, %v13585_v24  ;;  %v4123_v27 = vmul.f32 %v989_v62, %v13618_v26 }
 0x19c   :  { %v4131_v2 = vmul.f32 %v989_v62, %v13619_v34  ;;  %v4139_v12 = vmul.f32 %v989_v62, %v13620_v4  ;;  %v4143_v28 = vadd.f32 %v4142_v21, %v4083_v39  ;;  %v4161_v23 = vadd.f32 %v4160_v56, %v4091_v44 }
 0x19d   :  { %v4179_v19 = vadd.f32 %v4178_v55, %v4099_v11  ;;  %v4197_v49 = vadd.f32 %v4196_v43, %v4107_v0  ;;  %v8333_v1 = vmul.f32 %v13611_v40, %v13621_v52  ;;  %v4215_v32 = vadd.f32 %v4214_v7, %v4115_v33 }
 0x19e   :  { %v4233_v63 = vadd.f32 %v4232_v31, %v4123_v27  ;;  %v4251_v45 = vadd.f32 %v4250_v50, %v4131_v2  ;;  %v4144_v58 = vrot.slane %v4143_v28, 4  ;;  %v4162_v24 = vrot.slane %v4161_v23, 4 }
 0x19f   :  { %v4180_v6 = vrot.slane %v4179_v19, 4  ;;  %v4198_v8 = vrot.slane %v4197_v49, 4  ;;  %v4216_v26 = vrot.slane %v4215_v32, 4  ;;  %v4269_v61 = vadd.f32 %v4268_v51, %v4139_v12 }
 0x1a0   :  { %v4234_v5 = vrot.slane %v4233_v63, 4  ;;  %v4252_v34 = vrot.slane %v4251_v45, 4  ;;  %v4145_v4 = vadd.f32 %v4144_v58, %v4143_v28  ;;  %v4163_v39 = vadd.f32 %v4162_v24, %v4161_v23 }
 0x1a1   :  { %v4181_v44 = vadd.f32 %v4180_v6, %v4179_v19  ;;  %v4199_v56 = vadd.f32 %v4198_v8, %v4197_v49  ;;  %v4217_v21 = vadd.f32 %v4216_v26, %v4215_v32  ;;  %v4270_v0 = vrot.slane %v4269_v61, 4 }
 0x1a2   :  { %v4235_v55 = vadd.f32 %v4234_v5, %v4233_v63  ;;  %v4253_v43 = vadd.f32 %v4252_v34, %v4251_v45  ;;  %v4146_v11 = vrot.slane %v4145_v4, 2  ;;  %v4164_v7 = vrot.slane %v4163_v39, 2 }
 0x1a3   :  { %v4182_v31 = vrot.slane %v4181_v44, 2  ;;  %v4200_v50 = vrot.slane %v4199_v56, 2  ;;  %v4218_v2 = vrot.slane %v4217_v21, 2  ;;  %v4271_v62 = vadd.f32 %v4270_v0, %v4269_v61 }
 0x1a4   :  { %v4236_v27 = vrot.slane %v4235_v55, 2  ;;  %v4254_v33 = vrot.slane %v4253_v43, 2  ;;  %v4147_v52 = vadd.f32 %v4146_v11, %v4145_v4  ;;  %v4165_v40 = vadd.f32 %v4164_v7, %v4163_v39  ;;  %v13622_v4 = vld [vmem:[#allocation58_spill] sm:$0xff]  ;;  %v13623_v7 = vld [vmem:[#allocation11_spill] sm:$0xff] }
 0x1a5   :  { %v4183_v42 = vadd.f32 %v4182_v31, %v4181_v44  ;;  %v4201_v51 = vadd.f32 %v4200_v50, %v4199_v56  ;;  %v4219_v58 = vadd.f32 %v4218_v2, %v4217_v21  ;;  %v4272_v49 = vrot.slane %v4271_v62, 2 }
 0x1a6   :  { %v4237_v23 = vadd.f32 %v4236_v27, %v4235_v55  ;;  %v4255_v24 = vadd.f32 %v4254_v33, %v4253_v43  ;;  %v4148_v26 = vrot.slane %v4147_v52, 1  ;;  %v4166_v32 = vrot.slane %v4165_v40, 1 }
 0x1a7   :  { %v4184_v45 = vrot.slane %v4183_v42, 1  ;;  %v4202_v5 = vrot.slane %v4201_v51, 1  ;;  %v4220_v8 = vrot.slane %v4219_v58, 1  ;;  %v4273_v28 = vadd.f32 %v4272_v49, %v4271_v62  ;;  %v13626_v62 = vld [vmem:[#allocation166_spill] sm:$0xff] }
 0x1a8   :  { %v4238_v6 = vrot.slane %v4237_v23, 1  ;;  %v4256_v19 = vrot.slane %v4255_v24, 1  ;;  %v4149_v12 = vadd.f32 %v4148_v26, %v4147_v52  ;;  %v4167_v34 = vadd.f32 %v4166_v32, %v4165_v40 }
 0x1a9   :  { %v4185_v63 = vadd.f32 %v4184_v45, %v4183_v42  ;;  %v4203_v61 = vadd.f32 %v4202_v5, %v4201_v51  ;;  %v1109_v39 = vmul.f32 %v13612_v18, %v13622_v4  ;;  %v1123_v44 = vadd.f32 %v8257_v35, %v8253_v3  ;;  %v13632_v45 = vld [vmem:[#allocation70_spill] sm:$0xff] }
 0x1aa   :  { %v1141_v56 = vadd.f32 %v8269_v13, %v8265_v54  ;;  %v4274_v21 = vrot.slane %v4273_v28, 1  ;;  %v4221_v55 = vadd.f32 %v4220_v8, %v4219_v58  ;;  %v4239_v43 = vadd.f32 %v4238_v6, %v4237_v23  ;;  %v13630_v23 = vld [vmem:[#allocation168_spill] sm:$0xff] }
 0x1ab   :  { %v4285_v0 = vmax.f32 %v4149_v12, %v4185_v63  ;;  %v4286_v11 = vmax.f32 %v4167_v34, %v4203_v61  ;;  %v1111_v52 = vmul.f32 %v13535_v60, %v13623_v7  ;;  %v1159_v42 = vadd.f32 %v8281_v47, %v8277_v14  ;;  %v13624_v14 = vld [vmem:[#allocation18_spill] sm:$0xff] }
 0x1ac   :  { %v1177_v40 = vadd.f32 %v8293_v17, %v8289_v59  ;;  %v4275_v31 = vadd.f32 %v4274_v21, %v4273_v28  ;;  %v1195_v3 = vadd.f32 %v8305_v53, %v8301_v25  ;;  %v4257_v35 = vadd.f32 %v4256_v19, %v4255_v24  ;;  %v13625_v59 = vld [vmem:[#allocation125_spill] sm:$0xff] }
 0x1ad   :  { %v4287_v54 = vmax.f32 %v4285_v0, %v4221_v55  ;;  %v4288_v13 = vmax.f32 %v4286_v11, %v4239_v43  ;;  %v1124_v50 = vadd.f32 %v1123_v44, %v8261_v41  ;;  %v1142_v2 = vadd.f32 %v1141_v56, %v8273_v15  ;;  %v13627_v41 = vld [vmem:[#allocation167_spill] sm:$0xff] }
 0x1ae   :  { %v1213_v27 = vadd.f32 %v8317_v20, %v8313_v38  ;;  %v1231_v33 = vadd.f32 %v1109_v39, %v8333_v1  ;;  %v4130_v47 = vmul.f32 %v8208_v22, %v13624_v14  ;;  %v8358_v17 = vmul.f32 %v8208_v22, %v13625_v59  ;;  %v13628_v38 = vld [vmem:[#allocation63_spill] sm:$0xff]  ;;  %v13629_v1 = vld [vmem:[#allocation164_spill] sm:$0xff] }
 0x1af   :  { %v4289_v53 = vmax.f32 %v4287_v54, %v4257_v35  ;;  %v4290_v25 = vmax.f32 %v4288_v13, %v4275_v31  ;;  %v8362_v51 = vadd.f32 %v13626_v62, %v8229_v37  ;;  %v8366_v15 = vadd.f32 %v13627_v41, %v8233_v30  ;;  %v13631_v37 = vld [vmem:[#allocation68_spill] sm:$0xff] }
 0x1b0   :  { %v1160_v20 = vadd.f32 %v1159_v42, %v8285_v36  ;;  %v1251_v58 = vadd.f32 %v13629_v1, %v13628_v38  ;;  %v8373_v24 = vadd.f32 %v13630_v23, %v8237_v9  ;;  %v1178_v22 = vadd.f32 %v1177_v40, %v8297_v46  ;;  %v13633_v39 = vld [vmem:[#allocation72_spill] sm:$0xff]  ;;  %v13634_v42 = vld [vmem:[#allocation75_spill] sm:$0xff]  ;;  %v881_v23 = vpop.f32.mrf.mxu0 }
 0x1b1   :  { %v1196_v49 = vadd.f32 %v1195_v3, %v8309_v16  ;;  %v4291_v26 = vmax.f32 %v4289_v53, %v4290_v25  ;;  %v1125_v32 = vadd.f32 %v1124_v50, %v13631_v37  ;;  %v1143_v5 = vadd.f32 %v1142_v2, %v13632_v45  ;;  %v13635_v3 = vld [vmem:[#allocation78_spill] sm:$0xff]  ;;  %v13640_v1 = vld [vmem:[#allocation171_spill] sm:$0xff] }
 0x1b2   :  { %v1214_v30 = vadd.f32 %v1213_v27, %v8326_v48  ;;  %v1232_v8 = vadd.f32 %v1231_v33, %v1111_v52  ;;  %v1161_v44 = vadd.f32 %v1160_v20, %v13633_v39  ;;  %v1252_v9 = vrot.slane %v1251_v58, 4  ;;  %v13636_v52 = vld [vmem:[#allocation80_spill] sm:$0xff]  ;;  %v13639_v20 = vld [vmem:[#allocation170_spill] sm:$0xff] }
 0x1b3   :  { %v4299_v36 = vsub.f32 %v4149_v12, %v4291_v26  ;;  %v4301_v6 = vsub.f32 %v4167_v34, %v4291_v26  ;;  %v4303_v19 = vsub.f32 %v4185_v63, %v4291_v26  ;;  %v4305_v28 = vsub.f32 %v4203_v61, %v4291_v26  ;;  %v13637_v34 = vld [vmem:[#allocation83_spill] sm:$0xff] }
 0x1b4   :  { %v4307_v56 = vsub.f32 %v4221_v55, %v4291_v26  ;;  %v4309_v21 = vsub.f32 %v4239_v43, %v4291_v26  ;;  %v4311_v46 = vsub.f32 %v4257_v35, %v4291_v26  ;;  %v1179_v40 = vadd.f32 %v1178_v22, %v13634_v42  ;;  %v13648_v42 = vld [vmem:[#allocation66_spill] sm:$0xff] }
 0x1b5   :  { %v4315_v0 = vmul.f32 1.442695, %v4299_v36  ;;  %v4319_v16 = vmul.f32 1.442695, %v4301_v6  ;;  %v4323_v11 = vmul.f32 1.442695, %v4303_v19  ;;  %v1197_v54 = vadd.f32 %v1196_v49, %v13635_v3 }
 0x1b6   :  { %v4313_v13 = vsub.f32 %v4275_v31, %v4291_v26  ;;  %v4327_v48 = vmul.f32 1.442695, %v4305_v28  ;;  %v1215_v12 = vadd.f32 %v1214_v30, %v13636_v52  ;;  %v1233_v63 = vadd.f32 %v1232_v8, %v13637_v34  ;;  %v13638_v31 = vld [vmem:[#allocation169_spill] sm:$0xff]  ;;  %v13643_v6 = vld [vmem:[#allocation59_spill] sm:$0xff] }
 0x1b7   :  { %6433 = vpow2.f32 %v4315_v0  ;;  %v4331_v61 = vmul.f32 1.442695, %v4307_v56  ;;  %v1126_v50 = vrot.slane %v1125_v32, 4  ;;  %v1144_v2 = vrot.slane %v1143_v5, 4 }
 0x1b8   :  { %6435 = vpow2.f32 %v4319_v16  ;;  %v4335_v55 = vmul.f32 1.442695, %v4309_v21  ;;  %v1162_v43 = vrot.slane %v1161_v44, 4  ;;  %v1253_v35 = vadd.f32 %v1252_v9, %v1251_v58  ;;  %v13646_v9 = vld [vmem:[#allocation64_spill] sm:$0xff] }
 0x1b9   :  { %6437 = vpow2.f32 %v4323_v11  ;;  %v4339_v27 = vmul.f32 1.442695, %v4311_v46  ;;  %v1180_v33 = vrot.slane %v1179_v40, 4  ;;  %v1198_v59 = vrot.slane %v1197_v54, 4 }
 0x1ba   :  { %6439 = vpow2.f32 %v4327_v48  ;;  %v4343_v53 = vmul.f32 1.442695, %v4313_v13  ;;  %v8387_v25 = vadd.f32 %v13638_v31, %v8241_v57  ;;  %v1216_v62 = vrot.slane %v1215_v12, 4  ;;  %v13641_v57 = vld [vmem:[#allocation172_spill] sm:$0xff]  ;;  %v6733_v48 = vld [vmem:[%s12761_s7 + $0x58] sm:$0xff] }
 0x1bb   :  { %v1234_v41 = vrot.slane %v1233_v63, 4  ;;  %6441 = vpow2.f32 %v4331_v61  ;;  %v8391_v38 = vadd.f32 %v13639_v20, %v8245_v29  ;;  %v8395_v58 = vadd.f32 %v13640_v1, %v8249_v10  ;;  %v13642_v29 = vld [vmem:[#allocation173_spill] sm:$0xff] }
 0x1bc   :  { %v1127_v22 = vadd.f32 %v1126_v50, %v1125_v32  ;;  %6443 = vpow2.f32 %v4335_v55  ;;  %v1145_v49 = vadd.f32 %v1144_v2, %v1143_v5  ;;  %v1163_v26 = vadd.f32 %v1162_v43, %v1161_v44  ;;  %v13644_v32 = vld [vmem:[#allocation60_spill] sm:$0xff]  ;;  %v13645_v5 = vld [vmem:[#allocation61_spill] sm:$0xff]  ;;  %v13652_v2 = vld [vmem:[#allocation175_spill] sm:$0xff] }
 0x1bd   :  { %v1254_v37 = vrot.slane %v1253_v35, 2  ;;  %6445 = vpow2.f32 %v4339_v27  ;;  %v8398_v45 = vadd.f32 %v13641_v57, %v4130_v47  ;;  %v1181_v30 = vadd.f32 %v1180_v33, %v1179_v40  ;;  %v13647_v47 = vld [vmem:[#allocation65_spill] sm:$0xff]  ;;  %v13654_v43 = vld [vmem:[#allocation176_spill] sm:$0xff] }
 0x1be   :  { %v1199_v8 = vadd.f32 %v1198_v59, %v1197_v54  ;;  %6447 = vpow2.f32 %v4343_v53  ;;  %v8402_v36 = vadd.f32 %v13642_v29, %v8358_v17  ;;  %v1563_v10 = vmul.f32 %v881_v23, %v13643_v6  ;;  %v13649_v17 = vld [vmem:[#allocation67_spill] sm:$0xff]  ;;  %v13656_v27 = vld [vmem:[#allocation177_spill] sm:$0xff] }
 0x1bf   :  { %v1217_v19 = vadd.f32 %v1216_v62, %v1215_v12  ;;  %v1235_v28 = vadd.f32 %v1234_v41, %v1233_v63  ;;  %v1571_v39 = vmul.f32 %v881_v23, %v13644_v32  ;;  %v1579_v44 = vmul.f32 %v881_v23, %v13645_v5  ;;  %v13650_v12 = vld [vmem:[#allocation174_spill] sm:$0xff] }
 0x1c0   :  { %v1587_v56 = vmul.f32 %v881_v23, %v13646_v9  ;;  %v1128_v21 = vrot.slane %v1127_v22, 2  ;;  %v1595_v46 = vmul.f32 %v881_v23, %v13647_v47  ;;  %v1146_v0 = vrot.slane %v1145_v49, 2 }
 0x1c1   :  { %v1164_v16 = vrot.slane %v1163_v26, 2  ;;  %v1255_v11 = vadd.f32 %v1254_v37, %v1253_v35  ;;  %v1603_v40 = vmul.f32 %v881_v23, %v13648_v42  ;;  %v1611_v3 = vmul.f32 %v881_v23, %v13649_v17 }
 0x1c2   :  { %v1182_v54 = vrot.slane %v1181_v30, 2  ;;  %v1200_v13 = vrot.slane %v1199_v8, 2  ;;  %v1619_v52 = vmul.f32 %v6733_v48, %v881_v23  ;;  %v8415_v34 = vadd.f32 %v1563_v10, %v13650_v12 }
 0x1c3   :  { %v1218_v63 = vrot.slane %v1217_v19, 2  ;;  %v1236_v61 = vrot.slane %v1235_v28, 2  ;;  %v8420_v55 = vadd.f32 %v1571_v39, %v13652_v2  ;;  %v8423_v35 = vadd.f32 %v1579_v44, %v13654_v43 }
 0x1c4   :  { %13651 = vst [vmem:[#allocation36_spill] sm:$0xff] %v8415_v34  ;;  %v8417_v50 = vpop.eup %6433  ;;  %v8426_v33 = vadd.f32 %v1587_v56, %v13656_v27  ;;  %v1129_v59 = vadd.f32 %v1128_v21, %v1127_v22  ;;  %v1147_v31 = vadd.f32 %v1146_v0, %v1145_v49  ;;  %v1165_v62 = vadd.f32 %v1164_v16, %v1163_v26  ;;  %v13658_v27 = vld [vmem:[#allocation178_spill] sm:$0xff] }
 0x1c5   :  { %13653 = vst [vmem:[#allocation17_spill] sm:$0xff] %v8420_v55  ;;  %13655 = vst [vmem:[#allocation125_spill] sm:$0xff] %v8423_v35  ;;  %v8428_v53 = vpop.eup %6435  ;;  %v1256_v41 = vrot.slane %v1255_v11, 1  ;;  %v1183_v1 = vadd.f32 %v1182_v54, %v1181_v30  ;;  %v1201_v23 = vadd.f32 %v1200_v13, %v1199_v8  ;;  %v1219_v29 = vadd.f32 %v1218_v63, %v1217_v19 }
 0x1c6   :  { %13657 = vst [vmem:[#allocation166_spill] sm:$0xff] %v8426_v33  ;;  %v8430_v20 = vpop.eup %6437  ;;  %v4363_v37 = vrot.slane %v8428_v53, 7  ;;  %v1237_v10 = vadd.f32 %v1236_v61, %v1235_v28  ;;  %v1130_v49 = vrot.slane %v1129_v59, 1  ;;  %v1148_v44 = vrot.slane %v1147_v31, 1  ;;  %v991_v33 = vpop.f32.mrf.mxu1 }
 0x1c7   :  { %v8433_v57 = vpop.eup %6439  ;;  %v4365_v22 = vrot.slane %v8430_v20, 6  ;;  %v1166_v21 = vrot.slane %v1165_v62, 1  ;;  %v1257_v13 = vadd.f32 %v1256_v41, %v1255_v11  ;;  %v1184_v63 = vrot.slane %v1183_v1, 1  ;;  %v13662_v41 = vld [vmem:[#allocation180_spill] sm:$0xff] }
 0x1c8   :  { %v8436_v39 = vpop.eup %6441  ;;  %v4364_v26 = vsel %vm1847_vm1, %v4363_v37, %v8417_v50  ;;  %v4367_v30 = vrot.slane %v8433_v57, 5  ;;  %v1202_v61 = vrot.slane %v1201_v23, 1  ;;  %v8456_v37 = vadd.f32 %v1595_v46, %v13658_v27  ;;  %v13664_v46 = vld [vmem:[#allocation181_spill] sm:$0xff] }
 0x1c9   :  { %v8441_v8 = vpop.eup %6443  ;;  %v4366_v56 = vsel %vm1850_vm2, %v4365_v22, %v4364_v26  ;;  %v4369_v19 = vrot.slane %v8436_v39, 4  ;;  %v1220_v22 = vrot.slane %v1219_v29, 1  ;;  %v1895_v26 = vlaneseq }
 0x1ca   :  { %v8445_v28 = vpop.eup %6445  ;;  %v4368_v0 = vsel %vm1853_vm3, %v4367_v30, %v4366_v56  ;;  %v4371_v16 = vrot.slane %v8441_v8, 3  ;;  %13659 = vst [vmem:[#allocation167_spill] sm:$0xff] %v8456_v37  ;;  %v13660_v56 = vld [vmem:[#allocation179_spill] sm:$0xff]  ;;  %v1167_v35 = vadd.f32 %v1166_v21, %v1165_v62  ;;  %v8467_v27 = vadd.f32 %v1619_v52, %v13664_v46  ;;  %v13672_v62 = vld [vmem:[#allocation29_spill] sm:$0xff] }
 0x1cb   :  { %v8449_v54 = vpop.eup %6447  ;;  %v4370_v48 = vsel %vm1856_vm4, %v4369_v19, %v4368_v0  ;;  %v4373_v12 = vrot.slane %v8445_v28, 2  ;;  %v8460_v11 = vadd.f32 %v1603_v40, %v13660_v56  ;;  %v8463_v19 = vadd.f32 %v1611_v3, %v13662_v41 }
 0x1cc   :  { %v4372_v2 = vsel %vm1859_vm5, %v4371_v16, %v4370_v48  ;;  %v4375_v43 = vrot.slane %v8449_v54, 1  ;;  %v1238_v0 = vrot.slane %v1237_v10, 1  ;;  %v1131_v16 = vadd.f32 %v1130_v49, %v1129_v59  ;;  %13665 = vst [vmem:[#allocation168_spill] sm:$0xff] %v8467_v27  ;;  %v13671_v59 = vld [vmem:[#allocation27_spill] sm:$0xff] }
 0x1cd   :  { %v4374_v30 = vsel %vm1862_vm6, %v4373_v12, %v4372_v2  ;;  %13661 = vst [vmem:[#allocation63_spill] sm:$0xff] %v8460_v11  ;;  %13663 = vst [vmem:[#allocation164_spill] sm:$0xff] %v8463_v19  ;;  %v1149_v48 = vadd.f32 %v1148_v44, %v1147_v31  ;;  %v1185_v37 = vadd.f32 %v1184_v63, %v1183_v1  ;;  %v13666_v12 = vld [vmem:[#allocation73_spill] sm:$0xff]  ;;  %v1896_v3 = vshrl.u32 %v1895_v26, 7  ;;  %v13669_v19 = vld [vmem:[#allocation26_spill] sm:$0xff] }
 0x1ce   :  { %v4376_v4 = vsel %vm1865_vm7, %v4375_v43, %v4374_v30  ;;  %v1203_v34 = vadd.f32 %v1202_v61, %v1201_v23  ;;  %v13667_v2 = vrot.slane %v13666_v12, 7  ;;  %v1221_v56 = vadd.f32 %v1220_v22, %v1219_v29  ;;  %v13673_v44 = vld [vmem:[#allocation30_spill] sm:$0xff]  ;;  %v885_v22 = vpop.f32.mrf.mxu0  ;;  %v13683_v26 = vld [vmem:[#allocation31_spill] sm:$0xff] }
 0x1cf   :  { %v4393_v55 = vrot.slane %v4376_v4, 4  ;;  %v4084_v11 = vmul.f32 %v991_v33, %v13669_v19  ;;  %v8474_v43 = vadd.f32 %v1238_v0, %v1237_v10  ;;  %v4092_v31 = vmul.f32 %v991_v33, %v13671_v59  ;;  %v13684_v0 = vld [vmem:[#allocation32_spill] sm:$0xff] }
 0x1d0   :  { %v8471_v40 = vadd.f32 %v13667_v2, %v1257_v13  ;;  %v4100_v49 = vmul.f32 %v991_v33, %v13672_v62  ;;  %v4108_v52 = vmul.f32 %v991_v33, %v13673_v44  ;;  %v8480_v1 = vadd.f32 %v13666_v12, %v1131_v16  ;;  %v13714_v62 = vld [vmem:[#allocation15_spill] sm:$0xff] }
 0x1d1   :  { %v4394_v41 = vadd.f32 %v4393_v55, %v4376_v4  ;;  %13670 = vst [vmem:[#allocation70_spill] sm:$0xff] %v8474_v43  ;;  %v13675_v23 = vrot.slane %v13666_v12, 1  ;;  %v13677_v29 = vrot.slane %v13666_v12, 2  ;;  %v13679_v10 = vrot.slane %v13666_v12, 3  ;;  %v13689_v43 = vld [vmem:[#allocation3_spill] sm:$0xff] }
 0x1d2   :  { %13668 = vst [vmem:[#allocation68_spill] sm:$0xff] %v8471_v40  ;;  %13674 = vst [vmem:[#allocation72_spill] sm:$0xff] %v8480_v1  ;;  %v13681_v63 = vrot.slane %v13666_v12, 4  ;;  %v4116_v30 = vmul.f32 %v991_v33, %v13683_v26  ;;  %v4124_v16 = vmul.f32 %v991_v33, %v13684_v0  ;;  %v13693_v1 = vld [vmem:[#allocation128_spill] sm:$0xff]  ;;  %v13712_v0 = vld [vmem:[#allocation14_spill] sm:$0xff]  ;;  %v8589_v59 = vmul.f32 %v13535_v60, %v13714_v62 }
 0x1d3   :  { %v8484_v21 = vadd.f32 %v13675_v23, %v1149_v48  ;;  %v8488_v4 = vadd.f32 %v13677_v29, %v1167_v35  ;;  %v4395_v55 = vrot.slane %v4394_v41, 2  ;;  %v8492_v13 = vadd.f32 %v13679_v10, %v1185_v37  ;;  %v13688_v37 = vld [vmem:[#allocation33_spill] sm:$0xff] }
 0x1d4   :  { %v8496_v61 = vadd.f32 %v13681_v63, %v1203_v34  ;;  %v13685_v48 = vrot.slane %v13666_v12, 5  ;;  %v8504_v35 = vsub.s32 0, %v1896_v3  ;;  %v4152_v23 = vadd.f32 %v8362_v51, %v4084_v11  ;;  %v13690_v11 = vld [vmem:[#allocation4_spill] sm:$0xff] }
 0x1d5   :  { %13676 = vst [vmem:[#allocation75_spill] sm:$0xff] %v8484_v21  ;;  %13678 = vst [vmem:[#allocation78_spill] sm:$0xff] %v8488_v4  ;;  %v4396_v2 = vadd.f32 %v4395_v55, %v4394_v41  ;;  %v4132_v29 = vmul.f32 %v991_v33, %v13688_v37  ;;  %v4170_v10 = vadd.f32 %v8366_v15, %v4092_v31  ;;  %v13694_v37 = vld [vmem:[#allocation8_spill] sm:$0xff] }
 0x1d6   :  { %13680 = vst [vmem:[#allocation80_spill] sm:$0xff] %v8492_v13  ;;  %13682 = vst [vmem:[#allocation83_spill] sm:$0xff] %v8496_v61  ;;  %v8502_v46 = vadd.f32 %v13685_v48, %v1221_v56  ;;  %v4188_v34 = vadd.f32 %v8373_v24, %v4100_v49  ;;  %v4206_v63 = vadd.f32 %v8387_v25, %v4108_v52  ;;  %v4153_v13 = vrot.slane %v4152_v23, 4 }
 0x1d7   :  { %13687 = vst [vmem:[#allocation170_spill] sm:$0xff] %v8504_v35  ;;  %v4397_v40 = vrot.slane %v4396_v2, 1  ;;  %v1564_v61 = vmul.f32 %v885_v22, %v13689_v43  ;;  %v4224_v56 = vadd.f32 %v8391_v38, %v4116_v30  ;;  %v4171_v48 = vrot.slane %v4170_v10, 4  ;;  %v13691_v43 = vld [vmem:[#allocation5_spill] sm:$0xff]  ;;  %v13692_v38 = vld [vmem:[#allocation7_spill] sm:$0xff] }
 0x1d8   :  { %13686 = vst [vmem:[#allocation169_spill] sm:$0xff] %v8502_v46  ;;  %v4189_v3 = vrot.slane %v4188_v34, 4  ;;  %v4207_v46 = vrot.slane %v4206_v63, 4  ;;  %v4242_v41 = vadd.f32 %v8395_v58, %v4124_v16  ;;  %v1572_v55 = vmul.f32 %v885_v22, %v13690_v11 }
 0x1d9   :  { %v4398_v51 = vadd.f32 %v4397_v40, %v4396_v2  ;;  %v4154_v12 = vadd.f32 %v4153_v13, %v4152_v23  ;;  %v4225_v15 = vrot.slane %v4224_v56, 4  ;;  %v4172_v31 = vadd.f32 %v4171_v48, %v4170_v10  ;;  %v13695_v40 = vld [vmem:[#allocation9_spill] sm:$0xff] }
 0x1da   :  { %v4190_v24 = vadd.f32 %v4189_v3, %v4188_v34  ;;  %v4208_v49 = vadd.f32 %v4207_v46, %v4206_v63  ;;  %v4260_v25 = vadd.f32 %v8398_v45, %v4132_v29  ;;  %v1580_v4 = vmul.f32 %v885_v22, %v13691_v43  ;;  %v6734_v45 = vld [vmem:[%s12761_s7 + $0x60] sm:$0xff]  ;;  %v13697_v3 = vld [vmem:[#allocation183_spill] sm:$0xff] }
 0x1db   :  { %v4408_v52 = vrot.slane %v4398_v51, %v8504_v35  ;;  %v1588_v30 = vmul.f32 %v885_v22, %v13692_v38  ;;  %v4140_v21 = vmul.f32 %v991_v33, %v13693_v1  ;;  %v1596_v58 = vmul.f32 %v885_v22, %v13694_v37  ;;  %v13696_v33 = vld [vmem:[#allocation182_spill] sm:$0xff]  ;;  %v13699_v37 = vld [vmem:[#allocation185_spill] sm:$0xff]  ;;  %v13701_v43 = vld [vmem:[#allocation187_spill] sm:$0xff] }
 0x1dc   :  { %v1604_v16 = vmul.f32 %v885_v22, %v13695_v40  ;;  %v1612_v13 = vmul.f32 %v885_v22, %v13623_v7  ;;  %v4243_v2 = vrot.slane %v4242_v41, 4  ;;  %v1620_v46 = vmul.f32 %v6734_v45, %v885_v22  ;;  %v13698_v7 = vld [vmem:[#allocation184_spill] sm:$0xff]  ;;  %v13700_v22 = vld [vmem:[#allocation186_spill] sm:$0xff] }
 0x1dd   :  { %6449 = vrcp.f32 %v4408_v52  ;;  %v4155_v23 = vrot.slane %v4154_v12, 2  ;;  %v4191_v29 = vrot.slane %v4190_v24, 2  ;;  %v4173_v10 = vrot.slane %v4172_v31, 2 }
 0x1de   :  { %v4209_v34 = vrot.slane %v4208_v49, 2  ;;  %v4226_v63 = vadd.f32 %v4225_v15, %v4224_v56  ;;  %v4261_v48 = vrot.slane %v4260_v25, 4  ;;  %v8527_v1 = vadd.f32 %v13696_v33, %v1564_v61  ;;  %v13702_v61 = vld [vmem:[#allocation188_spill] sm:$0xff] }
 0x1df   :  { %v8530_v51 = vadd.f32 %v13697_v3, %v1572_v55  ;;  %v8533_v40 = vadd.f32 %v13698_v7, %v1580_v4  ;;  %v4278_v52 = vadd.f32 %v8402_v36, %v4140_v21  ;;  %v8537_v38 = vadd.f32 %v13699_v37, %v1588_v30  ;;  %v13703_v21 = vld [vmem:[#allocation189_spill] sm:$0xff]  ;;  %v13704_v30 = vld [vmem:[#allocation42_spill] sm:$0xff] }
 0x1e0   :  { %v8540_v45 = vadd.f32 %v13700_v22, %v1596_v58  ;;  %v8543_v56 = vadd.f32 %v13701_v43, %v1604_v16  ;;  %v4244_v15 = vadd.f32 %v4243_v2, %v4242_v41  ;;  %v8546_v33 = vadd.f32 %v13702_v61, %v1612_v13  ;;  %v13705_v58 = vld [vmem:[#allocation44_spill] sm:$0xff]  ;;  %v13706_v16 = vld [vmem:[#allocation10_spill] sm:$0xff] }
 0x1e1   :  { %v4156_v55 = vadd.f32 %v4155_v23, %v4154_v12  ;;  %v4192_v3 = vadd.f32 %v4191_v29, %v4190_v24  ;;  %v4279_v11 = vrot.slane %v4278_v52, 4  ;;  %v4174_v7 = vadd.f32 %v4173_v10, %v4172_v31  ;;  %v13707_v12 = vld [vmem:[#allocation43_spill] sm:$0xff] }
 0x1e2   :  { %v4210_v4 = vadd.f32 %v4209_v34, %v4208_v49  ;;  %v4227_v35 = vrot.slane %v4226_v63, 2  ;;  %v4262_v36 = vadd.f32 %v4261_v48, %v4260_v25  ;;  %v8549_v37 = vadd.f32 %v13703_v21, %v1620_v46  ;;  %v13708_v25 = vld [vmem:[#allocation12_spill] sm:$0xff]  ;;  %v13709_v46 = vld [vmem:[#allocation45_spill] sm:$0xff] }
 0x1e3   :  { %v1060_v22 = vmul.f32 %v13705_v58, %v13704_v30  ;;  %v1062_v43 = vmul.f32 %v13612_v18, %v13643_v6  ;;  %v4280_v41 = vadd.f32 %v4279_v11, %v4278_v52  ;;  %v8557_v13 = vmul.f32 %v13535_v60, %v13706_v16  ;;  %v13710_v21 = vld [vmem:[#allocation13_spill] sm:$0xff]  ;;  %v13711_v6 = vld [vmem:[#allocation46_spill] sm:$0xff] }
 0x1e4   :  { %v1068_v31 = vmul.f32 %v13705_v58, %v13707_v12  ;;  %v1070_v24 = vmul.f32 %v13612_v18, %v13644_v32  ;;  %v4245_v49 = vrot.slane %v4244_v15, 2  ;;  %v8565_v2 = vmul.f32 %v13535_v60, %v13708_v25 }
 0x1e5   :  { %v1076_v23 = vmul.f32 %v13705_v58, %v13709_v46  ;;  %v4157_v29 = vrot.slane %v4156_v55, 1  ;;  %v4193_v11 = vrot.slane %v4192_v3, 1  ;;  %v4175_v10 = vrot.slane %v4174_v7, 1 }
 0x1e6   :  { %v4211_v34 = vrot.slane %v4210_v4, 1  ;;  %v4228_v48 = vadd.f32 %v4227_v35, %v4226_v63  ;;  %v4263_v52 = vrot.slane %v4262_v36, 2  ;;  %v1078_v61 = vmul.f32 %v13612_v18, %v13645_v5  ;;  %v13713_v35 = vld [vmem:[#allocation47_spill] sm:$0xff] }
 0x1e7   :  { %v8573_v32 = vmul.f32 %v13535_v60, %v13710_v21  ;;  %v1084_v12 = vmul.f32 %v13705_v58, %v13711_v6  ;;  %v4281_v30 = vrot.slane %v4280_v41, 2  ;;  %v1086_v46 = vmul.f32 %v13612_v18, %v13646_v9 }
 0x1e8   :  { %v8581_v26 = vmul.f32 %v13535_v60, %v13712_v0  ;;  %v1092_v63 = vmul.f32 %v13705_v58, %v13713_v35  ;;  %v4246_v44 = vadd.f32 %v4245_v49, %v4244_v15  ;;  %v1094_v5 = vmul.f32 %v13612_v18, %v13647_v47  ;;  %v13716_v49 = vld [vmem:[#allocation48_spill] sm:$0xff] }
 0x1e9   :  { %v8591_v6 = vadd.f32 %v4157_v29, %v4156_v55  ;;  %v8593_v27 = vadd.f32 %v4193_v11, %v4192_v3  ;;  %v8595_v19 = vadd.f32 %v4175_v10, %v4174_v7  ;;  %v8597_v0 = vadd.f32 %v4211_v34, %v4210_v4  ;;  %v13717_v29 = vld [vmem:[#allocation16_spill] sm:$0xff]  ;;  %v13718_v7 = vld [vmem:[#allocation49_spill] sm:$0xff] }
 0x1ea   :  { %v6450_v9 = vpop.eup %6449  ;;  %v4229_v21 = vrot.slane %v4228_v48, 1  ;;  %v4264_v25 = vadd.f32 %v4263_v52, %v4262_v36  ;;  %v1100_v47 = vmul.f32 %v13705_v58, %v13716_v49  ;;  %v1102_v35 = vmul.f32 %v13612_v18, %v13648_v42 }
 0x1eb   :  { %v8600_v15 = vmul.f32 %v6450_v9, %v8428_v53  ;;  %v4282_v55 = vadd.f32 %v4281_v30, %v4280_v41  ;;  %v8608_v3 = vmul.f32 %v13535_v60, %v13717_v29  ;;  %v8612_v4 = vmul.f32 %v13705_v58, %v13718_v7 }
 0x1ec   :  { %v8616_v36 = vmul.f32 %v13612_v18, %v13649_v17  ;;  %v4247_v53 = vrot.slane %v4246_v44, 1  ;;  %v8619_v11 = vmul.f32 %v6450_v9, %v8430_v20  ;;  %v1132_v10 = vadd.f32 %v1062_v43, %v1060_v22 }
 0x1ed   :  { %13715 = vst [vmem:[#allocation171_spill] sm:$0xff] %v8600_v15  ;;  %v1150_v34 = vadd.f32 %v1070_v24, %v1068_v31  ;;  %v4292_v30 = vmax.f32 %v8591_v6, %v8593_v27  ;;  %v8624_v41 = vmul.f32 %v6450_v9, %v8433_v57  ;;  %v8626_v52 = vadd.f32 %v4229_v21, %v4228_v48 }
 0x1ee   :  { %13719 = vst [vmem:[#allocation172_spill] sm:$0xff] %v8619_v11  ;;  %v4265_v58 = vrot.slane %v4264_v25, 1  ;;  %v4293_v42 = vmax.f32 %v8595_v19, %v8597_v0  ;;  %v8631_v18 = vmul.f32 %v6450_v9, %v8417_v50  ;;  %v8634_v20 = vmul.f32 %v6450_v9, %v8436_v39 }
 0x1ef   :  { %13720 = vst [vmem:[#allocation173_spill] sm:$0xff] %v8624_v41  ;;  %v5948_v22 = vrot.slane %v8600_v15, 7  ;;  %v4283_v43 = vrot.slane %v4282_v55, 1  ;;  %v8638_v31 = vmul.f32 %v6450_v9, %v8441_v8  ;;  %v1168_v57 = vadd.f32 %v1078_v61, %v1076_v23  ;;  %v8653_v23 = vpop.f32.mrf.mxu0 }
 0x1f0   :  { %13721 = vst [vmem:[#allocation174_spill] sm:$0xff] %v8631_v18  ;;  %13722 = vst [vmem:[#allocation175_spill] sm:$0xff] %v8634_v20  ;;  %v1186_v24 = vadd.f32 %v1086_v46, %v1084_v12  ;;  %v4248_v48 = vadd.f32 %v4247_v53, %v4246_v44  ;;  %v8641_v21 = vmul.f32 %v6450_v9, %v8445_v28  ;;  %v5950_v50 = vrot.slane %v8619_v11, 6 }
 0x1f1   :  { %13723 = vst [vmem:[#allocation176_spill] sm:$0xff] %v8638_v31  ;;  %v5949_v17 = vsel %vm1847_vm1, %v5948_v22, %v8631_v18  ;;  %v4294_v39 = vmax.f32 %v4292_v30, %v8626_v52  ;;  %v8648_v7 = vmul.f32 %v6450_v9, %v8449_v54  ;;  %v5952_v49 = vrot.slane %v8624_v41, 5 }
 0x1f2   :  { %13724 = vst [vmem:[#allocation177_spill] sm:$0xff] %v8641_v21  ;;  %v1204_v8 = vadd.f32 %v1094_v5, %v1092_v63  ;;  %v4266_v15 = vadd.f32 %v4265_v58, %v4264_v25  ;;  %v5951_v12 = vsel %vm1850_vm2, %v5950_v50, %v5949_v17  ;;  %v5954_v44 = vrot.slane %v8634_v20, 4 }
 0x1f3   :  { %13725 = vst [vmem:[#allocation178_spill] sm:$0xff] %v8648_v7  ;;  %v4284_v28 = vadd.f32 %v4283_v43, %v4282_v55  ;;  %v4295_v46 = vmax.f32 %v4293_v42, %v4248_v48  ;;  %v5953_v61 = vsel %vm1853_vm3, %v5952_v49, %v5951_v12  ;;  %v5956_v53 = vrot.slane %v8638_v31, 3  ;;  %v13726_v43 = vld [vmem:[#allocation69_spill] sm:$0xff] }
 0x1f4   :  { %v1133_v30 = vadd.f32 %v1132_v10, %v8557_v13  ;;  %v1151_v9 = vadd.f32 %v1150_v34, %v8565_v2  ;;  %v5955_v54 = vsel %vm1856_vm4, %v5954_v44, %v5953_v61  ;;  %v5958_v5 = vrot.slane %v8641_v21, 2  ;;  %v889_v34 = vpop.f32.mrf.mxu0 }
 0x1f5   :  { %v4296_v25 = vmax.f32 %v4294_v39, %v4266_v15  ;;  %v4297_v17 = vmax.f32 %v4295_v46, %v4284_v28  ;;  %v5957_v63 = vsel %vm1859_vm5, %v5956_v53, %v5955_v54  ;;  %v5960_v42 = vrot.slane %v8648_v7, 1  ;;  %v13727_v39 = vld [vmem:[#allocation71_spill] sm:$0xff]  ;;  %v13729_v54 = vld [vmem:[#allocation20_spill] sm:$0xff] }
 0x1f6   :  { %v8665_v55 = vmul.f32 %v13535_v60, %v13624_v14  ;;  %v1222_v49 = vadd.f32 %v1102_v35, %v1100_v47  ;;  %v5959_v58 = vsel %vm1862_vm6, %v5958_v5, %v5957_v63  ;;  %v8669_v13 = vadd.f32 %v1168_v57, %v8573_v32  ;;  %v13728_v46 = vld [vmem:[#allocation19_spill] sm:$0xff]  ;;  %v13730_v5 = vld [vmem:[#allocation21_spill] sm:$0xff] }
 0x1f7   :  { %v8672_v2 = vadd.f32 %v1186_v24, %v8581_v26  ;;  %v4298_v10 = vmax.f32 %v4296_v25, %v4297_v17  ;;  %v5961_v22 = vsel %vm1865_vm7, %v5960_v42, %v5959_v58  ;;  %v8676_v50 = vadd.f32 %v1133_v30, %v13726_v43  ;;  %v13732_v17 = vld [vmem:[#allocation23_spill] sm:$0xff]  ;;  %v13733_v42 = vld [vmem:[#allocation24_spill] sm:$0xff] }
 0x1f8   :  { %v8679_v12 = vadd.f32 %v1151_v9, %v13727_v39  ;;  %v8682_v60 = vadd.f32 %v1204_v8, %v8589_v59  ;;  %6150 = vst [vmem:[%s12761_s7 + $0xd0] sm:$0xff] %v5961_v22  ;;  %v1566_v61 = vmul.f32 %v889_v34, %v13728_v46  ;;  %v8694_v9 = vadd.f32 %v1222_v49, %v8608_v3 }
 0x1f9   :  { %v4300_v32 = vsub.f32 %v8591_v6, %v4298_v10  ;;  %v4302_v47 = vsub.f32 %v8595_v19, %v4298_v10  ;;  %v4304_v26 = vsub.f32 %v8593_v27, %v4298_v10  ;;  %v4306_v35 = vsub.f32 %v8597_v0, %v4298_v10 }
 0x1fa   :  { %v4308_v57 = vsub.f32 %v8626_v52, %v4298_v10  ;;  %v4310_v24 = vsub.f32 %v4248_v48, %v4298_v10  ;;  %v4312_v44 = vsub.f32 %v4266_v15, %v4298_v10  ;;  %v4314_v59 = vsub.f32 %v4284_v28, %v4298_v10  ;;  %v13731_v52 = vld [vmem:[#allocation22_spill] sm:$0xff]  ;;  %v13734_v10 = vld [vmem:[#allocation25_spill] sm:$0xff] }
 0x1fb   :  { %v4317_v8 = vmul.f32 1.442695, %v4300_v32  ;;  %v4321_v53 = vmul.f32 1.442695, %v4302_v47  ;;  %v4325_v30 = vmul.f32 1.442695, %v4304_v26  ;;  %v1574_v19 = vmul.f32 %v889_v34, %v13729_v54 }
 0x1fc   :  { %v4329_v6 = vmul.f32 1.442695, %v4306_v35  ;;  %v1582_v27 = vmul.f32 %v889_v34, %v13730_v5  ;;  %v8700_v0 = vadd.f32 %v8616_v36, %v8612_v4  ;;  %v4333_v15 = vmul.f32 1.442695, %v4308_v57  ;;  %v8714_v47 = vld [vmem:[%s12761_s7 + $0x70] sm:$0xff]  ;;  %v13747_v5 = vld [vmem:[#allocation63_spill] sm:$0xff] }
 0x1fd   :  { %6451 = vpow2.f32 %v4317_v8  ;;  %v1590_v48 = vmul.f32 %v889_v34, %v13731_v52  ;;  %v4337_v28 = vmul.f32 1.442695, %v4310_v24  ;;  %v4341_v25 = vmul.f32 1.442695, %v4312_v44  ;;  %13735 = vst [vmem:[#allocation179_spill] sm:$0xff] %v8714_v47 }
 0x1fe   :  { %6453 = vpow2.f32 %v4321_v53  ;;  %v1598_v63 = vmul.f32 %v889_v34, %v13732_v17  ;;  %v4345_v3 = vmul.f32 1.442695, %v4314_v59  ;;  %v1606_v49 = vmul.f32 %v889_v34, %v13733_v42  ;;  %v13745_v42 = vld [vmem:[#allocation166_spill] sm:$0xff] }
 0x1ff   :  { %6455 = vpow2.f32 %v4325_v30  ;;  %v1626_v58 = vadd.f32 %v8527_v1, %v1566_v61  ;;  %v1614_v22 = vmul.f32 %v889_v34, %v13734_v10  ;;  %v1644_v4 = vadd.f32 %v8530_v51, %v1574_v19 }
 0x200   :  { %6457 = vpow2.f32 %v4329_v6  ;;  %v1662_v36 = vadd.f32 %v8533_v40, %v1582_v27  ;;  %v1680_v39 = vadd.f32 %v8537_v38, %v1590_v48  ;;  %v1698_v32 = vadd.f32 %v8540_v45, %v1598_v63 }
 0x201   :  { %6459 = vpow2.f32 %v4333_v15  ;;  %v1627_v43 = vrot.slane %v1626_v58, 4  ;;  %v1622_v1 = vmul.f32 %v8714_v47, %v889_v34  ;;  %v1645_v26 = vrot.slane %v1644_v4, 4  ;;  %v13744_v47 = vld [vmem:[#allocation125_spill] sm:$0xff] }
 0x202   :  { %6461 = vpow2.f32 %v4337_v28  ;;  %v1663_v35 = vrot.slane %v1662_v36, 4  ;;  %v1681_v57 = vrot.slane %v1680_v39, 4  ;;  %v1699_v40 = vrot.slane %v1698_v32, 4 }
 0x203   :  { %6463 = vpow2.f32 %v4341_v25  ;;  %v1628_v51 = vadd.f32 %v1627_v43, %v1626_v58  ;;  %v8719_v38 = vmul.f32 %v8653_v23, %v13706_v16  ;;  %v1646_v45 = vadd.f32 %v1645_v26, %v1644_v4 }
 0x204   :  { %6465 = vpow2.f32 %v4345_v3  ;;  %v1664_v24 = vadd.f32 %v1663_v35, %v1662_v36  ;;  %v1682_v61 = vadd.f32 %v1681_v57, %v1680_v39  ;;  %v1700_v59 = vadd.f32 %v1699_v40, %v1698_v32 }
 0x205   :  { %v1629_v44 = vrot.slane %v1628_v51, 2  ;;  %v1716_v8 = vadd.f32 %v8543_v56, %v1606_v49  ;;  %v1647_v53 = vrot.slane %v1646_v45, 2  ;;  %v1734_v30 = vadd.f32 %v8546_v33, %v1614_v22 }
 0x206   :  { %v1665_v34 = vrot.slane %v1664_v24, 2  ;;  %v1752_v6 = vadd.f32 %v8549_v37, %v1622_v1  ;;  %v1683_v27 = vrot.slane %v1682_v61, 2  ;;  %v1701_v15 = vrot.slane %v1700_v59, 2 }
 0x207   :  { %v1630_v19 = vadd.f32 %v1629_v44, %v1628_v51  ;;  %v1717_v48 = vrot.slane %v1716_v8, 4  ;;  %v1648_v28 = vadd.f32 %v1647_v53, %v1646_v45  ;;  %v1735_v63 = vrot.slane %v1734_v30, 4 }
 0x208   :  { %v1666_v25 = vadd.f32 %v1665_v34, %v1664_v24  ;;  %v1753_v3 = vrot.slane %v1752_v6, 4  ;;  %v1684_v4 = vadd.f32 %v1683_v27, %v1682_v61  ;;  %v1702_v36 = vadd.f32 %v1701_v15, %v1700_v59 }
 0x209   :  { %v1631_v58 = vrot.slane %v1630_v19, 1  ;;  %v1718_v43 = vadd.f32 %v1717_v48, %v1716_v8  ;;  %v1649_v56 = vrot.slane %v1648_v28, 1  ;;  %v1736_v32 = vadd.f32 %v1735_v63, %v1734_v30 }
 0x20a   :  { %v8724_v39 = vpop.eup %6451  ;;  %v1667_v49 = vrot.slane %v1666_v25, 1  ;;  %v1754_v33 = vadd.f32 %v1753_v3, %v1752_v6  ;;  %v1685_v1 = vrot.slane %v1684_v4, 1  ;;  %v1703_v26 = vrot.slane %v1702_v36, 1 }
 0x20b   :  { %v8726_v22 = vpop.eup %6453  ;;  %v8728_v37 = vadd.f32 %v1631_v58, %v1630_v19  ;;  %v1719_v35 = vrot.slane %v1718_v43, 2  ;;  %v8733_v40 = vadd.f32 %v1649_v56, %v1648_v28  ;;  %v1737_v24 = vrot.slane %v1736_v32, 2 }
 0x20c   :  { %v8730_v51 = vpop.eup %6455  ;;  %v4377_v57 = vrot.slane %v8726_v22, 7  ;;  %v8735_v45 = vadd.f32 %v1667_v49, %v1666_v25  ;;  %v8740_v59 = vadd.f32 %v1685_v1, %v1684_v4  ;;  %v8742_v8 = vadd.f32 %v1703_v26, %v1702_v36 }
 0x20d   :  { %v8737_v44 = vpop.eup %6457  ;;  %v4379_v61 = vrot.slane %v8730_v51, 6  ;;  %v1720_v53 = vadd.f32 %v1719_v35, %v1718_v43  ;;  %v1738_v19 = vadd.f32 %v1737_v24, %v1736_v32  ;;  %v1755_v27 = vrot.slane %v1754_v33, 2  ;;  %v13736_v24 = vld [vmem:[#allocation12_spill] sm:$0xff] }
 0x20e   :  { %v8744_v34 = vpop.eup %6459  ;;  %v4378_v30 = vsel %vm1847_vm1, %v4377_v57, %v8724_v39  ;;  %v4381_v6 = vrot.slane %v8737_v44, 5  ;;  %v1768_v63 = vmax.f32 %v8728_v37, %v8735_v45  ;;  %v1769_v26 = vmax.f32 %v8733_v40, %v8740_v59 }
 0x20f   :  { %v8749_v15 = vpop.eup %6461  ;;  %v4380_v48 = vsel %vm1850_vm2, %v4379_v61, %v4378_v30  ;;  %v4383_v28 = vrot.slane %v8744_v34, 4  ;;  %v1721_v25 = vrot.slane %v1720_v53, 1  ;;  %v1739_v36 = vrot.slane %v1738_v19, 1 }
 0x210   :  { %v8755_v3 = vpop.eup %6463  ;;  %v4382_v58 = vsel %vm1853_vm3, %v4381_v6, %v4380_v48  ;;  %v4385_v4 = vrot.slane %v8749_v15, 3  ;;  %v1756_v43 = vadd.f32 %v1755_v27, %v1754_v33  ;;  %v1573_v61 = vmul.f32 %v8653_v23, %v13736_v24  ;;  %v891_v24 = vpop.f32.mrf.mxu0 }
 0x211   :  { %v8759_v56 = vpop.eup %6465  ;;  %v4384_v49 = vsel %vm1856_vm4, %v4383_v28, %v4382_v58  ;;  %v4387_v32 = vrot.slane %v8755_v3, 2  ;;  %v8763_v1 = vadd.f32 %v1721_v25, %v1720_v53  ;;  %v8772_v6 = vadd.f32 %v1739_v36, %v1738_v19  ;;  %v13737_v28 = vld [vmem:[#allocation13_spill] sm:$0xff]  ;;  %v13738_v58 = vld [vmem:[#allocation14_spill] sm:$0xff] }
 0x212   :  { %v4386_v35 = vsel %vm1859_vm5, %v4385_v4, %v4384_v49  ;;  %v4389_v57 = vrot.slane %v8759_v56, 1  ;;  %v1757_v30 = vrot.slane %v1756_v43, 1  ;;  %v1770_v27 = vmax.f32 %v1768_v63, %v8742_v8 }
 0x213   :  { %v4388_v33 = vsel %vm1862_vm6, %v4387_v32, %v4386_v35  ;;  %v1771_v53 = vmax.f32 %v1769_v26, %v8763_v1  ;;  %v1581_v25 = vmul.f32 %v8653_v23, %v13737_v28  ;;  %v1589_v4 = vmul.f32 %v8653_v23, %v13738_v58  ;;  %v13739_v32 = vld [vmem:[#allocation74_spill] sm:$0xff]  ;;  %v13743_v28 = vld [vmem:[#allocation17_spill] sm:$0xff] }
 0x214   :  { %v4390_v48 = vsel %vm1865_vm7, %v4389_v57, %v4388_v33  ;;  %v8781_v49 = vadd.f32 %v1757_v30, %v1756_v43  ;;  %v1597_v19 = vmul.f32 %v8653_v23, %v13714_v62  ;;  %v1605_v63 = vmul.f32 %v8653_v23, %v13717_v29  ;;  %v6736_v43 = vld [vmem:[%s12761_s7 + $0x68] sm:$0xff]  ;;  %v13740_v33 = vld [vmem:[#allocation77_spill] sm:$0xff]  ;;  %v13741_v62 = vld [vmem:[#allocation36_spill] sm:$0xff] }
 0x215   :  { %v4399_v16 = vrot.slane %v4390_v48, 4  ;;  %v1772_v36 = vmax.f32 %v1770_v27, %v8772_v6  ;;  %v8790_v26 = vadd.f32 %v8669_v13, %v13739_v32  ;;  %v1613_v35 = vmul.f32 %v8653_v23, %v13624_v14  ;;  %v13742_v32 = vld [vmem:[#allocation26_spill] sm:$0xff] }
 0x216   :  { %v1621_v57 = vmul.f32 %v6736_v43, %v8653_v23  ;;  %v1773_v30 = vmax.f32 %v1771_v53, %v8781_v49  ;;  %v8801_v29 = vadd.f32 %v8672_v2, %v13740_v33  ;;  %v1634_v13 = vadd.f32 %v13741_v62, %v8719_v38  ;;  %v13746_v43 = vld [vmem:[#allocation167_spill] sm:$0xff]  ;;  %v13748_v33 = vld [vmem:[#allocation164_spill] sm:$0xff] }
 0x217   :  { %v4400_v27 = vadd.f32 %v4399_v16, %v4390_v48  ;;  %v1567_v58 = vmul.f32 %v891_v24, %v13742_v32  ;;  %v1652_v14 = vadd.f32 %v13743_v28, %v1573_v61  ;;  %v1670_v10 = vadd.f32 %v13744_v47, %v1581_v25  ;;  %v13749_v48 = vld [vmem:[#allocation168_spill] sm:$0xff]  ;;  %v13750_v28 = vld [vmem:[#allocation27_spill] sm:$0xff]  ;;  %v13751_v25 = vld [vmem:[#allocation29_spill] sm:$0xff] }
 0x218   :  { %v1688_v17 = vadd.f32 %v13745_v42, %v1589_v4  ;;  %v1774_v52 = vmax.f32 %v1772_v36, %v1773_v30  ;;  %v1706_v53 = vadd.f32 %v13746_v43, %v1597_v19  ;;  %v1724_v54 = vadd.f32 %v13747_v5, %v1605_v63  ;;  %v13752_v4 = vld [vmem:[#allocation30_spill] sm:$0xff]  ;;  %v13753_v5 = vld [vmem:[#allocation31_spill] sm:$0xff]  ;;  %v13754_v63 = vld [vmem:[#allocation32_spill] sm:$0xff] }
 0x219   :  { %v4401_v23 = vrot.slane %v4400_v27, 2  ;;  %v1635_v2 = vadd.f32 %v1634_v13, %v1567_v58  ;;  %v1742_v16 = vadd.f32 %v13748_v33, %v1613_v35  ;;  %v1760_v46 = vadd.f32 %v13749_v48, %v1621_v57 }
 0x21a   :  { %v1784_v62 = vsub.f32 %v8733_v40, %v1774_v52  ;;  %v1786_v38 = vsub.f32 %v8735_v45, %v1774_v52  ;;  %v1575_v47 = vmul.f32 %v891_v24, %v13750_v28  ;;  %v1583_v42 = vmul.f32 %v891_v24, %v13751_v25  ;;  %v13755_v40 = vld [vmem:[#allocation33_spill] sm:$0xff]  ;;  %v13756_v28 = vld [vmem:[#allocation170_spill] sm:$0xff] }
 0x21b   :  { %v4402_v61 = vadd.f32 %v4401_v23, %v4400_v27  ;;  %v1591_v36 = vmul.f32 %v891_v24, %v13752_v4  ;;  %v1782_v19 = vsub.f32 %v8728_v37, %v1774_v52  ;;  %v1599_v58 = vmul.f32 %v891_v24, %v13753_v5  ;;  %v6737_v37 = vld [vmem:[%s12761_s7 + $0x78] sm:$0xff] }
 0x21c   :  { %v1802_v30 = vmul.f32 1.442695, %v1784_v62  ;;  %v1607_v35 = vmul.f32 %v891_v24, %v13754_v63  ;;  %v1788_v57 = vsub.f32 %v8740_v59, %v1774_v52  ;;  %v1615_v43 = vmul.f32 %v891_v24, %v13755_v40 }
 0x21d   :  { %v4403_v13 = vrot.slane %v4402_v61, 1  ;;  %v1636_v45 = vrot.slane %v1635_v2, 4  ;;  %v1790_v27 = vsub.f32 %v8742_v8, %v1774_v52  ;;  %v1792_v23 = vsub.f32 %v8763_v1, %v1774_v52 }
 0x21e   :  { %v1806_v33 = vmul.f32 1.442695, %v1786_v38  ;;  %v1623_v48 = vmul.f32 %v6737_v37, %v891_v24  ;;  %v1794_v5 = vsub.f32 %v8772_v6, %v1774_v52  ;;  %6467 = vpow2.f32 %v1802_v30 }
 0x21f   :  { %v4404_v62 = vadd.f32 %v4403_v13, %v4402_v61  ;;  %v1653_v63 = vadd.f32 %v1652_v14, %v1575_v47  ;;  %v1798_v4 = vmul.f32 1.442695, %v1782_v19  ;;  %v1671_v59 = vadd.f32 %v1670_v10, %v1583_v42 }
 0x220   :  { %v1689_v25 = vadd.f32 %v1688_v17, %v1591_v36  ;;  %v1707_v40 = vadd.f32 %v1706_v53, %v1599_v58  ;;  %v1810_v8 = vmul.f32 1.442695, %v1788_v57  ;;  %v1637_v7 = vadd.f32 %v1636_v45, %v1635_v2  ;;  %v13757_v58 = vld [vmem:[#allocation79_spill] sm:$0xff] }
 0x221   :  { %v4412_v32 = vrot.slane %v4404_v62, %v13756_v28  ;;  %v1654_v1 = vrot.slane %v1653_v63, 4  ;;  %6469 = vpow2.f32 %v1806_v33  ;;  %v1672_v38 = vrot.slane %v1671_v59, 4 }
 0x222   :  { %v1690_v21 = vrot.slane %v1689_v25, 4  ;;  %v1708_v31 = vrot.slane %v1707_v40, 4  ;;  %v1796_v24 = vsub.f32 %v8781_v49, %v1774_v52  ;;  %v1725_v6 = vadd.f32 %v1724_v54, %v1607_v35 }
 0x223   :  { %6471 = vrcp.f32 %v4412_v32  ;;  %v1655_v61 = vadd.f32 %v1654_v1, %v1653_v63  ;;  %v1814_v30 = vmul.f32 1.442695, %v1790_v27  ;;  %v1673_v14 = vadd.f32 %v1672_v38, %v1671_v59 }
 0x224   :  { %v1691_v47 = vadd.f32 %v1690_v21, %v1689_v25  ;;  %v1709_v10 = vadd.f32 %v1708_v31, %v1707_v40  ;;  %6473 = vpow2.f32 %v1798_v4  ;;  %v1818_v17 = vmul.f32 1.442695, %v1792_v23  ;;  %v13758_v25 = vld [vmem:[#allocation149_spill] sm:$0xff] }
 0x225   :  { %v1638_v53 = vrot.slane %v1637_v7, 2  ;;  %v1726_v42 = vrot.slane %v1725_v6, 4  ;;  %6475 = vpow2.f32 %v1810_v8  ;;  %v1656_v2 = vrot.slane %v1655_v61, 2  ;;  %v13759_v4 = vld [vmem:[#allocation165_spill] sm:$0xff] }
 0x226   :  { %v1674_v36 = vrot.slane %v1673_v14, 2  ;;  %v1692_v19 = vrot.slane %v1691_v47, 2  ;;  %v8833_v13 = vadd.f32 %v8682_v60, %v13757_v58  ;;  %v1822_v32 = vmul.f32 1.442695, %v1794_v5  ;;  %v13760_v5 = vld [vmem:[#allocation82_spill] sm:$0xff] }
 0x227   :  { %v1826_v52 = vmul.f32 1.442695, %v1796_v24  ;;  %v1710_v49 = vrot.slane %v1709_v10, 2  ;;  %6477 = vpow2.f32 %v1814_v30  ;;  %v1727_v54 = vadd.f32 %v1726_v42, %v1725_v6  ;;  %v13761_v24 = vld [vmem:[#allocation75_spill] sm:$0xff] }
 0x228   :  { %v1743_v63 = vadd.f32 %v1742_v16, %v1615_v43  ;;  %v1761_v21 = vadd.f32 %v1760_v46, %v1623_v48  ;;  %v1135_v31 = vrot.slane %v8676_v50, 4  ;;  %v8838_v35 = vadd.f32 %v13759_v4, %v13758_v25 }
 0x229   :  { %v1639_v57 = vadd.f32 %v1638_v53, %v1637_v7  ;;  %v1675_v40 = vadd.f32 %v1674_v36, %v1673_v14  ;;  %v1153_v45 = vrot.slane %v8679_v12, 4  ;;  %6479 = vpow2.f32 %v1818_v17  ;;  %v13763_v17 = vld [vmem:[#allocation72_spill] sm:$0xff]  ;;  %v13764_v36 = vld [vmem:[#allocation78_spill] sm:$0xff] }
 0x22a   :  { %v1657_v60 = vadd.f32 %v1656_v2, %v1655_v61  ;;  %v1693_v27 = vadd.f32 %v1692_v19, %v1691_v47  ;;  %v8843_v23 = vadd.f32 %v8694_v9, %v13760_v5  ;;  %v8847_v46 = vadd.f32 %v8700_v0, %v8665_v55  ;;  %v13762_v61 = vld [vmem:[#allocation171_spill] sm:$0xff] }
 0x22b   :  { %6481 = vpow2.f32 %v1822_v32  ;;  %v1711_v16 = vadd.f32 %v1710_v49, %v1709_v10  ;;  %v8849_v43 = vpop.eup %6467  ;;  %v1728_v7 = vrot.slane %v1727_v54, 2  ;;  %v1744_v33 = vrot.slane %v1743_v63, 4  ;;  %v13766_v49 = vld [vmem:[#allocation80_spill] sm:$0xff] }
 0x22c   :  { %6483 = vpow2.f32 %v1826_v52  ;;  %v1762_v37 = vrot.slane %v1761_v21, 4  ;;  %v1640_v59 = vrot.slane %v1639_v57, 1  ;;  %v1676_v8 = vrot.slane %v1675_v40, 1 }
 0x22d   :  { %v8854_v9 = vadd.f32 %v1135_v31, %v8676_v50  ;;  %v1658_v0 = vrot.slane %v1657_v60, 1  ;;  %v1694_v1 = vrot.slane %v1693_v27, 1  ;;  %v8861_v6 = vmul.f32 %v13762_v61, %v13761_v24 }
 0x22e   :  { %v8857_v38 = vpop.eup %6469  ;;  %v8864_v30 = vadd.f32 %v1153_v45, %v8679_v12  ;;  %v1846_v14 = vrot.slane %v8849_v43, 7  ;;  %v1712_v47 = vrot.slane %v1711_v16, 1  ;;  %v8869_v50 = vmul.f32 %v8631_v18, %v13763_v17 }
 0x22f   :  { %v1729_v53 = vadd.f32 %v1728_v7, %v1727_v54  ;;  %v1745_v42 = vadd.f32 %v1744_v33, %v1743_v63  ;;  %v1763_v2 = vadd.f32 %v1762_v37, %v1761_v21  ;;  %v8873_v19 = vmul.f32 %v8619_v11, %v13764_v36 }
 0x230   :  { %v6472_v10 = vpop.eup %6471  ;;  %v8878_v12 = vadd.f32 %v1640_v59, %v1639_v57  ;;  %v8880_v32 = vadd.f32 %v1676_v8, %v1675_v40  ;;  %v8886_v31 = vmul.f32 %v8624_v41, %v13766_v49  ;;  %v1849_v54 = vrot.slane %v8857_v38, 6  ;;  %v13858_v49 = vld [vmem:[#allocation55_spill] sm:$0xff] }
 0x231   :  { %v8876_v58 = vmul.f32 %v6472_v10, %v8726_v22  ;;  %v8882_v52 = vpop.eup %6473  ;;  %v8889_v63 = vadd.f32 %v1658_v0, %v1657_v60  ;;  %v8891_v21 = vadd.f32 %v1694_v1, %v1693_v27  ;;  %v4463_v22 = vrot.slane %v8861_v6, 7 }
 0x232   :  { %v8893_v25 = vpop.eup %6475  ;;  %v8897_v4 = vmul.f32 %v6472_v10, %v8730_v51  ;;  %v1848_v57 = vsel %vm1847_vm1, %v1846_v14, %v8882_v52  ;;  %v8901_v40 = vadd.f32 %v1712_v47, %v1711_v16  ;;  %v8904_v45 = vmul.f32 %v6472_v10, %v8737_v44 }
 0x233   :  { %13765 = vst [vmem:[#allocation180_spill] sm:$0xff] %v8876_v58  ;;  %v1730_v5 = vrot.slane %v1729_v53, 1  ;;  %v1746_v60 = vrot.slane %v1745_v42, 2  ;;  %v1764_v7 = vrot.slane %v1763_v2, 2  ;;  %v8909_v33 = vmul.f32 %v6472_v10, %v8724_v39 }
 0x234   :  { %13767 = vst [vmem:[#allocation181_spill] sm:$0xff] %v8897_v4  ;;  %13768 = vst [vmem:[#allocation128_spill] sm:$0xff] %v8904_v45  ;;  %v8906_v27 = vpop.eup %6477  ;;  %v8912_v37 = vmul.f32 %v6472_v10, %v8744_v34  ;;  %v5962_v51 = vrot.slane %v8876_v58, 7  ;;  %v1775_v16 = vmax.f32 %v8878_v12, %v8880_v32  ;;  %v8918_v59 = vmul.f32 %v6472_v10, %v8749_v15 }
 0x235   :  { %13769 = vst [vmem:[#allocation182_spill] sm:$0xff] %v8909_v33  ;;  %v1851_v44 = vsel %vm1850_vm2, %v1849_v54, %v1848_v57  ;;  %v1852_v8 = vrot.slane %v8893_v25, 5  ;;  %v1776_v0 = vmax.f32 %v8889_v63, %v8891_v21  ;;  %v8927_v34 = vmul.f32 %v6472_v10, %v8755_v3 }
 0x236   :  { %13770 = vst [vmem:[#allocation183_spill] sm:$0xff] %v8912_v37  ;;  %13771 = vst [vmem:[#allocation184_spill] sm:$0xff] %v8918_v59  ;;  %v8924_v39 = vpop.eup %6479  ;;  %v8930_v1 = vmul.f32 %v6472_v10, %v8759_v56  ;;  %v5963_v6 = vsel %vm1847_vm1, %v5962_v51, %v8909_v33  ;;  %v5964_v15 = vrot.slane %v8897_v4, 6  ;;  %v5966_v47 = vrot.slane %v8904_v45, 5 }
 0x237   :  { %13772 = vst [vmem:[#allocation185_spill] sm:$0xff] %v8927_v34  ;;  %v1855_v54 = vrot.slane %v8906_v27, 4  ;;  %v1747_v57 = vadd.f32 %v1746_v60, %v1745_v42  ;;  %v1765_v55 = vadd.f32 %v1764_v7, %v1763_v2  ;;  %v5968_v56 = vrot.slane %v8912_v37, 4 }
 0x238   :  { %13773 = vst [vmem:[#allocation186_spill] sm:$0xff] %v8930_v1  ;;  %v8935_v14 = vpop.eup %6481  ;;  %v5965_v3 = vsel %vm1850_vm2, %v5964_v15, %v5963_v6  ;;  %v1854_v10 = vsel %vm1853_vm3, %v1852_v8, %v1851_v44  ;;  %v1777_v51 = vmax.f32 %v1775_v16, %v8901_v40  ;;  %v5970_v41 = vrot.slane %v8918_v59, 3 }
 0x239   :  { %v8939_v62 = vpop.eup %6483  ;;  %v5967_v48 = vsel %vm1853_vm3, %v5966_v47, %v5965_v3  ;;  %v1857_v18 = vsel %vm1856_vm4, %v1855_v54, %v1854_v10  ;;  %v1858_v11 = vrot.slane %v8924_v39, 3  ;;  %v5972_v2 = vrot.slane %v8927_v34, 2  ;;  %v13787_v34 = vld [vmem:[#allocation178_spill] sm:$0xff] }
 0x23a   :  { %v5969_v42 = vsel %vm1856_vm4, %v5968_v56, %v5967_v48  ;;  %v5974_v60 = vrot.slane %v8930_v1, 1  ;;  %v1861_v7 = vrot.slane %v8935_v14, 2  ;;  %v1864_v8 = vrot.slane %v8939_v62, 1 }
 0x23b   :  { %v5971_v44 = vsel %vm1859_vm5, %v5970_v41, %v5969_v42  ;;  %v1860_v16 = vsel %vm1859_vm5, %v1858_v11, %v1857_v18  ;;  %v1748_v6 = vrot.slane %v1747_v57, 1  ;;  %v8958_v54 = vadd.f32 %v1730_v5, %v1729_v53  ;;  %v13774_v5 = vld [vmem:[#allocation84_spill] sm:$0xff] }
 0x23c   :  { %v5973_v15 = vsel %vm1862_vm6, %v5972_v2, %v5971_v44  ;;  %v1863_v47 = vsel %vm1862_vm6, %v1861_v7, %v1860_v16  ;;  %v1766_v48 = vrot.slane %v1765_v55, 1  ;;  %v4465_v3 = vrot.slane %v8873_v19, 6  ;;  %v13777_v44 = vld [vmem:[#allocation83_spill] sm:$0xff] }
 0x23d   :  { %v5975_v56 = vsel %vm1865_vm7, %v5974_v60, %v5973_v15  ;;  %v1866_v10 = vsel %vm1865_vm7, %v1864_v8, %v1863_v47  ;;  %v8963_v61 = vadd.f32 %v1748_v6, %v1747_v57  ;;  %v4464_v11 = vsel %vm1847_vm1, %v4463_v22, %v8869_v50 }
 0x23e   :  { %6151 = vst [vmem:[%s12761_s7 + $0xd8] sm:$0xff] %v5975_v56  ;;  %v1883_v41 = vrot.slane %v1866_v10, 4  ;;  %v8970_v18 = vadd.f32 %v1766_v48, %v1765_v55  ;;  %v1778_v53 = vmax.f32 %v1776_v0, %v8958_v54  ;;  %v1225_v19 = vrot.slane %v8843_v23, 4  ;;  %v13779_v48 = vld [vmem:[#allocation70_spill] sm:$0xff]  ;;  %v13780_v56 = vld [vmem:[#allocation73_spill] sm:$0xff] }
 0x23f   :  { %v1242_v42 = vadd.f32 %v8847_v46, %v13774_v5  ;;  %v1261_v57 = vrot.slane %v8838_v35, 4  ;;  %v1779_v2 = vmax.f32 %v1777_v51, %v8963_v61  ;;  %v13775_v50 = vrot.slane %v8790_v26, 4  ;;  %v13783_v5 = vld [vmem:[#allocation169_spill] sm:$0xff] }
 0x240   :  { %v13776_v60 = vrot.slane %v8801_v29, 4  ;;  %v1884_v7 = vadd.f32 %v1883_v41, %v1866_v10  ;;  %v1780_v0 = vmax.f32 %v1778_v53, %v8970_v18  ;;  %v4439_v16 = vmul.f32 %v8634_v20, %v13777_v44 }
 0x241   :  { %v1172_v22 = vadd.f32 %v13775_v50, %v8790_v26  ;;  %v4466_v46 = vsel %vm1850_vm2, %v4465_v3, %v4464_v11  ;;  %v1137_v8 = vrot.slane %v8854_v9, 2  ;;  %v13778_v51 = vrot.slane %v8833_v13, 4  ;;  %v13784_v50 = vld [vmem:[#allocation176_spill] sm:$0xff] }
 0x242   :  { %v1190_v55 = vadd.f32 %v13776_v60, %v8801_v29  ;;  %v4467_v26 = vrot.slane %v8886_v31, 5  ;;  %v1155_v15 = vrot.slane %v8864_v30, 2  ;;  %v1885_v47 = vrot.slane %v1884_v7, 2 }
 0x243   :  { %v1208_v6 = vadd.f32 %v13778_v51, %v8833_v13  ;;  %v8994_v29 = vmax.f32 %v1779_v2, %v1780_v0  ;;  %v13781_v10 = vrot.slane %v13780_v56, 6  ;;  %v1226_v3 = vadd.f32 %v1225_v19, %v8843_v23 }
 0x244   :  { %v1243_v11 = vrot.slane %v1242_v42, 4  ;;  %v1262_v53 = vadd.f32 %v1261_v57, %v8838_v35  ;;  %v4441_v13 = vmul.f32 %v13784_v50, %v13783_v5  ;;  %v4468_v31 = vsel %vm1853_vm3, %v4467_v26, %v4466_v46  ;;  %v13785_v57 = vld [vmem:[#allocation177_spill] sm:$0xff] }
 0x245   :  { %v8999_v41 = vadd.f32 %v13781_v10, %v13779_v48  ;;  %v1886_v60 = vadd.f32 %v1885_v47, %v1884_v7  ;;  %v1785_v2 = vsub.f32 %v8889_v63, %v8994_v29  ;;  %v4469_v0 = vrot.slane %v4439_v16, 4 }
 0x246   :  { %v1173_v51 = vrot.slane %v1172_v22, 2  ;;  %v1191_v20 = vrot.slane %v1190_v55, 2  ;;  %v1209_v1 = vrot.slane %v1208_v6, 2  ;;  %v1138_v48 = vadd.f32 %v1137_v8, %v8854_v9 }
 0x247   :  { %13782 = vst [vmem:[#allocation187_spill] sm:$0xff] %v8999_v41  ;;  %v1156_v23 = vadd.f32 %v1155_v15, %v8864_v30  ;;  %v1887_v19 = vrot.slane %v1886_v60, 1  ;;  %v1787_v35 = vsub.f32 %v8880_v32, %v8994_v29  ;;  %v4443_v10 = vmul.f32 %v13785_v57, %v8999_v41  ;;  %v13786_v32 = vld [vmem:[#allocation68_spill] sm:$0xff] }
 0x248   :  { %v4470_v7 = vsel %vm1856_vm4, %v4469_v0, %v4468_v31  ;;  %v1244_v46 = vadd.f32 %v1243_v11, %v1242_v42  ;;  %v1804_v26 = vmul.f32 1.442695, %v1785_v2  ;;  %v4471_v63 = vrot.slane %v4441_v13, 3 }
 0x249   :  { %v1227_v16 = vrot.slane %v1226_v3, 2  ;;  %v1888_v47 = vadd.f32 %v1887_v19, %v1886_v60  ;;  %v1783_v50 = vsub.f32 %v8878_v12, %v8994_v29  ;;  %v1174_v9 = vadd.f32 %v1173_v51, %v1172_v22 }
 0x24a   :  { %v1192_v8 = vadd.f32 %v1191_v20, %v1190_v55  ;;  %v1263_v30 = vrot.slane %v1262_v53, 2  ;;  %v1789_v15 = vsub.f32 %v8891_v21, %v8994_v29  ;;  %v4445_v59 = vmul.f32 %v13787_v34, %v13786_v32  ;;  %v13799_v34 = vld [vmem:[#allocation144_spill] sm:$0xff] }
 0x24b   :  { %v4472_v57 = vsel %vm1859_vm5, %v4471_v63, %v4470_v7  ;;  %v1898_v42 = vrot.slane %v1888_v47, %v13756_v28  ;;  %v1808_v11 = vmul.f32 1.442695, %v1787_v35  ;;  %v4473_v13 = vrot.slane %v4443_v10, 2 }
 0x24c   :  { %v1245_v31 = vrot.slane %v1244_v46, 2  ;;  %v1791_v60 = vsub.f32 %v8901_v40, %v8994_v29  ;;  %6485 = vpow2.f32 %v1804_v26  ;;  %v1210_v12 = vadd.f32 %v1209_v1, %v1208_v6  ;;  %v13788_v40 = vld [vmem:[#allocation160_spill] sm:$0xff]  ;;  %v13789_v1 = vld [vmem:[#allocation158_spill] sm:$0xff] }
 0x24d   :  { %6487 = vrcp.f32 %v1898_v42  ;;  %v1793_v20 = vsub.f32 %v8958_v54, %v8994_v29  ;;  %v1800_v21 = vmul.f32 1.442695, %v1783_v50  ;;  %v4474_v22 = vsel %vm1862_vm6, %v4473_v13, %v4472_v57  ;;  %v13793_v42 = vld [vmem:[#allocation161_spill] sm:$0xff] }
 0x24e   :  { %v1228_v55 = vadd.f32 %v1227_v16, %v1226_v3  ;;  %v1795_v2 = vsub.f32 %v8963_v61, %v8994_v29  ;;  %v1812_v0 = vmul.f32 1.442695, %v1789_v15  ;;  %v4475_v51 = vrot.slane %v4445_v59, 1 }
 0x24f   :  { %v1264_v19 = vadd.f32 %v1263_v30, %v1262_v53  ;;  %v1797_v35 = vsub.f32 %v8970_v18, %v8994_v29  ;;  %6489 = vpow2.f32 %v1808_v11  ;;  %v3790_v6 = vmax.f32 %v13789_v1, %v13788_v40  ;;  %v13790_v29 = vld [vmem:[#allocation154_spill] sm:$0xff]  ;;  %v13794_v11 = vld [vmem:[#allocation159_spill] sm:$0xff]  ;;  %v13837_v1 = vld [vmem:[#allocation41_spill] sm:$0xff] }
 0x250   :  { %v1139_v10 = vrot.slane %v1138_v48, 1  ;;  %v1246_v7 = vadd.f32 %v1245_v31, %v1244_v46  ;;  %v1816_v54 = vmul.f32 1.442695, %v1791_v60  ;;  %v4476_v50 = vsel %vm1865_vm7, %v4475_v51, %v4474_v22  ;;  %v13795_v31 = vld [vmem:[#allocation162_spill] sm:$0xff] }
 0x251   :  { %v1157_v57 = vrot.slane %v1156_v23, 1  ;;  %6491 = vpow2.f32 %v1800_v21  ;;  %v1820_v3 = vmul.f32 1.442695, %v1793_v20  ;;  %v1175_v26 = vrot.slane %v1174_v9, 1 }
 0x252   :  { %v1193_v61 = vrot.slane %v1192_v8, 1  ;;  %6493 = vpow2.f32 %v1812_v0  ;;  %v1824_v59 = vmul.f32 1.442695, %v1795_v2  ;;  %v1211_v53 = vrot.slane %v1210_v12, 1 }
 0x253   :  { %v1229_v63 = vrot.slane %v1228_v55, 1  ;;  %v1265_v16 = vrot.slane %v1264_v19, 1  ;;  %v1828_v18 = vmul.f32 1.442695, %v1797_v35  ;;  %v13791_v47 = vrot.slane %v13790_v29, 1 }
 0x254   :  { %v4493_v46 = vrot.slane %v4476_v50, 4  ;;  %v1247_v15 = vrot.slane %v1246_v7, 1  ;;  %6495 = vpow2.f32 %v1816_v54  ;;  %v3791_v13 = vmax.f32 %v13794_v11, %v13793_v42 }
 0x255   :  { %v9038_v30 = vadd.f32 %v13791_v47, %v13790_v29  ;;  %v9043_v60 = vmax.f32 %v3790_v6, %v13795_v31  ;;  %v1140_v20 = vadd.f32 %v1139_v10, %v1138_v48  ;;  %6497 = vpow2.f32 %v1820_v3  ;;  %v13797_v29 = vld [vmem:[#allocation147_spill] sm:$0xff] }
 0x256   :  { %v1158_v21 = vadd.f32 %v1157_v57, %v1156_v23  ;;  %v1176_v22 = vadd.f32 %v1175_v26, %v1174_v9  ;;  %v1194_v2 = vadd.f32 %v1193_v61, %v1192_v8  ;;  %6499 = vpow2.f32 %v1824_v59  ;;  %v13798_v47 = vld [vmem:[#allocation143_spill] sm:$0xff]  ;;  %v13804_v23 = vld [vmem:[#allocation156_spill] sm:$0xff]  ;;  %v13805_v9 = vld [vmem:[#allocation130_spill] sm:$0xff] }
 0x257   :  { %13792 = vst [vmem:[#allocation188_spill] sm:$0xff] %v9038_v30  ;;  %13796 = vst [vmem:[#allocation189_spill] sm:$0xff] %v9043_v60  ;;  %v1212_v0 = vadd.f32 %v1211_v53, %v1210_v12  ;;  %v1230_v51 = vadd.f32 %v1229_v63, %v1228_v55  ;;  %v1266_v35 = vadd.f32 %v1265_v16, %v1264_v19  ;;  %6501 = vpow2.f32 %v1828_v18  ;;  %v13806_v8 = vld [vmem:[#allocation153_spill] sm:$0xff]  ;;  %v13811_v26 = vld [vmem:[#allocation163_spill] sm:$0xff] }
 0x258   :  { %v13800_v54 = vmax.f32 %v13798_v47, %v13799_v34  ;;  %v4494_v31 = vadd.f32 %v4493_v46, %v4476_v50  ;;  %v1248_v48 = vadd.f32 %v1247_v15, %v1246_v7  ;;  %v13807_v12 = vmax.f32 %v13805_v9, %v13806_v8  ;;  %v13836_v8 = vld [vmem:[#allocation40_spill] sm:$0xff] }
 0x259   :  { %v9053_v10 = vpop.eup %6485  ;;  %v9064_v61 = vmax.f32 %v3791_v13, %v13811_v26  ;;  %v9069_v7 = vadd.f32 %v13780_v56, %v1140_v20  ;;  %v13814_v50 = vrot.slane %v13780_v56, 1  ;;  %v13816_v16 = vrot.slane %v13780_v56, 2 }
 0x25a   :  { %v9049_v40 = vmax.f32 %v13800_v54, %v13797_v29  ;;  %v9059_v55 = vmax.f32 %v13807_v12, %v13804_v23  ;;  %v6488_v53 = vpop.eup %6487  ;;  %v13818_v46 = vrot.slane %v13780_v56, 3  ;;  %v13820_v13 = vrot.slane %v13780_v56, 4 }
 0x25b   :  { %13812 = vst [vmem:[#allocation71_spill] sm:$0xff] %v9064_v61  ;;  %13813 = vst [vmem:[#allocation74_spill] sm:$0xff] %v9069_v7  ;;  %v9073_v63 = vadd.f32 %v13814_v50, %v1158_v21  ;;  %v9077_v18 = vadd.f32 %v13816_v16, %v1176_v22  ;;  %v13822_v12 = vrot.slane %v13780_v56, 5  ;;  %v13824_v59 = vrot.slane %v13780_v56, 7  ;;  %v995_v50 = vpop.f32.mrf.mxu1 }
 0x25c   :  { %13801 = vst [vmem:[#allocation44_spill] sm:$0xff] %v9049_v40  ;;  %13808 = vst [vmem:[#allocation69_spill] sm:$0xff] %v9059_v55  ;;  %v9081_v15 = vadd.f32 %v13818_v46, %v1194_v2  ;;  %v9085_v54 = vadd.f32 %v13820_v13, %v1212_v0  ;;  %v9096_v22 = vmul.f32 %v6488_v53, %v8849_v43  ;;  %v9098_v16 = vpop.eup %6489  ;;  %v4495_v2 = vrot.slane %v4494_v31, 2  ;;  %v13829_v0 = vld [vmem:[#allocation34_spill] sm:$0xff] }
 0x25d   :  { %13815 = vst [vmem:[#allocation77_spill] sm:$0xff] %v9073_v63  ;;  %13817 = vst [vmem:[#allocation36_spill] sm:$0xff] %v9077_v18  ;;  %v9089_v20 = vadd.f32 %v13822_v12, %v1230_v51  ;;  %v9093_v21 = vadd.f32 %v13824_v59, %v1266_v35  ;;  %v13827_v46 = vrot.slane %v13780_v56, 6  ;;  %v9105_v13 = vmul.f32 %v995_v50, %v13829_v0  ;;  %v13830_v12 = vld [vmem:[#allocation35_spill] sm:$0xff]  ;;  %v13831_v35 = vld [vmem:[#allocation37_spill] sm:$0xff]  ;;  %v997_v61 = vpop.f32.mrf.mxu1 }
 0x25e   :  { %13819 = vst [vmem:[#allocation17_spill] sm:$0xff] %v9081_v15  ;;  %13821 = vst [vmem:[#allocation125_spill] sm:$0xff] %v9085_v54  ;;  %v1867_v51 = vrot.slane %v9053_v10, 7  ;;  %v9109_v6 = vmul.f32 %v995_v50, %v13830_v12  ;;  %v9112_v59 = vmul.f32 %v995_v50, %v13831_v35  ;;  %v13832_v43 = vld [vmem:[#allocation38_spill] sm:$0xff]  ;;  %v9118_v23 = vmul.f32 %v6488_v53, %v8857_v38  ;;  %v9120_v56 = vpop.eup %6491 }
 0x25f   :  { %13823 = vst [vmem:[#allocation166_spill] sm:$0xff] %v9089_v20  ;;  %13825 = vst [vmem:[#allocation167_spill] sm:$0xff] %v9093_v21  ;;  %v9102_v3 = vadd.f32 %v13827_v46, %v1248_v48  ;;  %v9115_v26 = vmul.f32 %v995_v50, %v13832_v43  ;;  %v13835_v48 = vld [vmem:[#allocation39_spill] sm:$0xff]  ;;  %v9126_v9 = vmul.f32 %v995_v50, %v13836_v8  ;;  %v9134_v19 = vpop.eup %6493  ;;  %v5718_v29 = vrot.slane %v9096_v22, 7  ;;  %v13845_v40 = vld [vmem:[#allocation42_spill] sm:$0xff] }
 0x260   :  { %13826 = vst [vmem:[#allocation63_spill] sm:$0xff] %v9096_v22  ;;  %13833 = vst [vmem:[#allocation168_spill] sm:$0xff] %v9118_v23  ;;  %v9123_v46 = vmul.f32 %v995_v50, %v13835_v48  ;;  %v9129_v30 = vmul.f32 %v995_v50, %v13837_v1  ;;  %v9132_v60 = vmul.f32 %v6488_v53, %v8893_v25  ;;  %v1869_v55 = vrot.slane %v9098_v16, 6  ;;  %v9149_v25 = vld [vmem:[%s12761_s7 + $0x40] sm:$0xff] }
 0x261   :  { %13828 = vst [vmem:[#allocation164_spill] sm:$0xff] %v9102_v3  ;;  %13834 = vst [vmem:[#allocation79_spill] sm:$0xff] %v9120_v56  ;;  %v9137_v57 = vmul.f32 %v6488_v53, %v8882_v52  ;;  %v9140_v38 = vmul.f32 %v6488_v53, %v8906_v27  ;;  %v9144_v34 = vadd.f32 %v4495_v2, %v4494_v31  ;;  %v9159_v42 = vpop.eup %6495  ;;  %v5720_v2 = vrot.slane %v9118_v23, 6  ;;  %v13848_v3 = vld [vmem:[#allocation43_spill] sm:$0xff] }
 0x262   :  { %13838 = vst [vmem:[#allocation149_spill] sm:$0xff] %v9132_v60  ;;  %v9152_v47 = vmul.f32 %v9149_v25, %v995_v50  ;;  %v9155_v52 = vmul.f32 %v6488_v53, %v8924_v39  ;;  %v1868_v27 = vsel %vm1847_vm1, %v1867_v51, %v9120_v56  ;;  %13843 = vst [vmem:[#allocation73_spill] sm:$0xff] %v9159_v42  ;;  %v9170_v50 = vpop.eup %6497  ;;  %v5722_v51 = vrot.slane %v9132_v60, 5 }
 0x263   :  { %13839 = vst [vmem:[#allocation165_spill] sm:$0xff] %v9137_v57  ;;  %13840 = vst [vmem:[#allocation82_spill] sm:$0xff] %v9140_v38  ;;  %v9162_v11 = vmul.f32 %v6488_v53, %v8935_v14  ;;  %v5719_v31 = vsel %vm1847_vm1, %v5718_v29, %v9137_v57  ;;  %v9168_v21 = vmul.f32 %v997_v61, %v13845_v40  ;;  %v1871_v14 = vrot.slane %v9134_v19, 5  ;;  %v9180_v20 = vpop.eup %6499  ;;  %v13850_v40 = vld [vmem:[#allocation45_spill] sm:$0xff] }
 0x264   :  { %13841 = vst [vmem:[#allocation84_spill] sm:$0xff] %v9144_v34  ;;  %13842 = vst [vmem:[#allocation70_spill] sm:$0xff] %v9155_v52  ;;  %v9173_v39 = vmul.f32 %v6488_v53, %v8939_v62  ;;  %v9177_v34 = vmul.f32 %v997_v61, %v13848_v3  ;;  %v5721_v29 = vsel %vm1850_vm2, %v5720_v2, %v5719_v31  ;;  %v5724_v37 = vrot.slane %v9140_v38, 4  ;;  %v999_v62 = vpop.f32.mrf.mxu1  ;;  %v9188_v53 = vpop.eup %6501  ;;  %v13852_v38 = vld [vmem:[#allocation46_spill] sm:$0xff] }
 0x265   :  { %13844 = vst [vmem:[#allocation154_spill] sm:$0xff] %v9162_v11  ;;  %13846 = vst [vmem:[#allocation190_spill] sm:$0xff] %v9170_v50  ;;  %v9185_v54 = vmul.f32 %v997_v61, %v13850_v40  ;;  %v1870_v32 = vsel %vm1850_vm2, %v1869_v55, %v1868_v27  ;;  %v5723_v41 = vsel %vm1853_vm3, %v5722_v51, %v5721_v29  ;;  %v5726_v3 = vrot.slane %v9155_v52, 3 }
 0x266   :  { %13847 = vst [vmem:[#allocation191_spill] sm:$0xff] %v9173_v39  ;;  %13849 = vst [vmem:[#allocation192_spill] sm:$0xff] %v9180_v20  ;;  %v1872_v5 = vsel %vm1853_vm3, %v1871_v14, %v1870_v32  ;;  %v1873_v44 = vrot.slane %v9159_v42, 4  ;;  %v5725_v31 = vsel %vm1856_vm4, %v5724_v37, %v5723_v41  ;;  %v5728_v2 = vrot.slane %v9162_v11, 2  ;;  %v13853_v14 = vld [vmem:[#allocation47_spill] sm:$0xff] }
 0x267   :  { %13851 = vst [vmem:[#allocation193_spill] sm:$0xff] %v9188_v53  ;;  %v9197_v40 = vmul.f32 %v997_v61, %v13852_v38  ;;  %v1875_v55 = vrot.slane %v9170_v50, 3  ;;  %v5727_v27 = vsel %vm1859_vm5, %v5726_v3, %v5725_v31  ;;  %v5730_v60 = vrot.slane %v9173_v39, 1  ;;  %v9210_v38 = vpop.f32.mrf.mxu1  ;;  %v13854_v3 = vld [vmem:[#allocation48_spill] sm:$0xff] }
 0x268   :  { %v1874_v51 = vsel %vm1856_vm4, %v1873_v44, %v1872_v5  ;;  %v1877_v29 = vrot.slane %v9180_v20, 2  ;;  %v5729_v32 = vsel %vm1862_vm6, %v5728_v2, %v5727_v27  ;;  %v9206_v52 = vmul.f32 %v997_v61, %v13853_v14  ;;  %v13855_v5 = vld [vmem:[#allocation51_spill] sm:$0xff]  ;;  %v13860_v20 = vld [vmem:[#allocation57_spill] sm:$0xff] }
 0x269   :  { %v1876_v37 = vsel %vm1859_vm5, %v1875_v55, %v1874_v51  ;;  %v1879_v41 = vrot.slane %v9188_v53, 1  ;;  %v5731_v11 = vsel %vm1865_vm7, %v5730_v60, %v5729_v32  ;;  %v9214_v31 = vmul.f32 %v997_v61, %v13854_v3  ;;  %v13856_v55 = vld [vmem:[#allocation52_spill] sm:$0xff]  ;;  %v13857_v51 = vld [vmem:[#allocation53_spill] sm:$0xff] }
 0x26a   :  { %v1878_v44 = vsel %vm1862_vm6, %v1877_v29, %v1876_v37  ;;  %v4581_v39 = vmul.f32 %v999_v62, %v13855_v5  ;;  %6140 = vst [vmem:[%s12761_s7 + $0x80] sm:$0xff] %v5731_v11  ;;  %v4589_v27 = vmul.f32 %v999_v62, %v13856_v55  ;;  %v4597_v14 = vmul.f32 %v999_v62, %v13857_v51  ;;  %v13859_v32 = vld [vmem:[#allocation56_spill] sm:$0xff]  ;;  %v13861_v29 = vld [vmem:[#allocation58_spill] sm:$0xff]  ;;  %v13863_v11 = vld [vmem:[#allocation49_spill] sm:$0xff] }
 0x26b   :  { %v1880_v2 = vsel %vm1865_vm7, %v1879_v41, %v1878_v44  ;;  %v4605_v53 = vmul.f32 %v999_v62, %v13858_v49  ;;  %v4613_v3 = vmul.f32 %v999_v62, %v13859_v32  ;;  %v4621_v50 = vmul.f32 %v999_v62, %v13860_v20  ;;  %v6739_v41 = vld [vmem:[%s12761_s7 + $0x48] sm:$0xff]  ;;  %v9243_v32 = vld [vmem:[%s12761_s7 + $0x50] sm:$0xff]  ;;  %v1005_v20 = vpop.f32.mrf.mxu1 }
 0x26c   :  { %v1889_v60 = vrot.slane %v1880_v2, 4  ;;  %v4629_v37 = vmul.f32 %v999_v62, %v13861_v29  ;;  %v9230_v42 = vmul.f32 %v8909_v33, %v9069_v7  ;;  %v9233_v56 = vmul.f32 %v997_v61, %v13863_v11  ;;  %13864 = vst [vmem:[#allocation195_spill] sm:$0xff] %v9243_v32 }
 0x26d   :  { %v9238_v44 = vmul.f32 %v6739_v41, %v997_v61  ;;  %v4637_v29 = vmul.f32 %v9243_v32, %v999_v62  ;;  %v9248_v33 = vmul.f32 %v8876_v58, %v9073_v63  ;;  %v9252_v11 = vmul.f32 %v8897_v4, %v9077_v18 }
 0x26e   :  { %13862 = vst [vmem:[#allocation194_spill] sm:$0xff] %v9230_v42  ;;  %v9256_v61 = vmul.f32 %v8904_v45, %v9081_v15  ;;  %v1890_v41 = vadd.f32 %v1889_v60, %v1880_v2  ;;  %v895_v42 = vpop.f32.mrf.mxu0  ;;  %v4643_v7 = vadd.f32 %v4581_v39, %v9105_v13  ;;  %v4661_v49 = vadd.f32 %v4589_v27, %v9109_v6  ;;  %v13874_v27 = vld [vmem:[#allocation8_spill] sm:$0xff] }
 0x26f   :  { %13865 = vst [vmem:[#allocation196_spill] sm:$0xff] %v9248_v33  ;;  %13866 = vst [vmem:[#allocation197_spill] sm:$0xff] %v9252_v11  ;;  %v4679_v62 = vadd.f32 %v4597_v14, %v9112_v59  ;;  %v4697_v32 = vadd.f32 %v4605_v53, %v9115_v26  ;;  %v4715_v63 = vadd.f32 %v4613_v3, %v9123_v46  ;;  %v9275_v59 = vpop.f32.mrf.mxu1  ;;  %v13873_v14 = vld [vmem:[#allocation7_spill] sm:$0xff] }
 0x270   :  { %13867 = vst [vmem:[#allocation198_spill] sm:$0xff] %v9256_v61  ;;  %v1891_v58 = vrot.slane %v1890_v41, 2  ;;  %v4733_v4 = vadd.f32 %v4621_v50, %v9126_v9  ;;  %v4751_v18 = vadd.f32 %v4629_v37, %v9129_v30  ;;  %v4769_v45 = vadd.f32 %v4637_v29, %v9152_v47  ;;  %v13870_v9 = vld [vmem:[#allocation3_spill] sm:$0xff]  ;;  %v13871_v30 = vld [vmem:[#allocation4_spill] sm:$0xff]  ;;  %v13872_v47 = vld [vmem:[#allocation5_spill] sm:$0xff] }
 0x271   :  { %v9267_v2 = vmul.f32 %v895_v42, %v13829_v0  ;;  %v9270_v13 = vmul.f32 %v895_v42, %v13830_v12  ;;  %v9273_v6 = vmul.f32 %v895_v42, %v13831_v35  ;;  %v9278_v46 = vmul.f32 %v895_v42, %v13832_v43  ;;  %v13875_v29 = vld [vmem:[#allocation9_spill] sm:$0xff]  ;;  %v9293_v43 = vld [vmem:[%s12761_s7 + $0x60] sm:$0xff] }
 0x272   :  { %v1892_v26 = vadd.f32 %v1891_v58, %v1890_v41  ;;  %v4583_v50 = vmul.f32 %v1005_v20, %v13870_v9  ;;  %v4591_v39 = vmul.f32 %v1005_v20, %v13871_v30  ;;  %v4599_v53 = vmul.f32 %v1005_v20, %v13872_v47  ;;  %v13877_v58 = vld [vmem:[#allocation11_spill] sm:$0xff]  ;;  %13878 = vst [vmem:[#allocation202_spill] sm:$0xff] %v9293_v43 }
 0x273   :  { %13868 = vst [vmem:[#allocation199_spill] sm:$0xff] %v9273_v6  ;;  %13869 = vst [vmem:[#allocation200_spill] sm:$0xff] %v9278_v46  ;;  %v4607_v3 = vmul.f32 %v1005_v20, %v13873_v14  ;;  %v4615_v60 = vmul.f32 %v1005_v20, %v13874_v27  ;;  %v4623_v37 = vmul.f32 %v1005_v20, %v13875_v29  ;;  %v13883_v27 = vld [vmem:[#allocation60_spill] sm:$0xff]  ;;  %v13888_v6 = vld [vmem:[#allocation23_spill] sm:$0xff] }
 0x274   :  { %v1893_v35 = vrot.slane %v1892_v26, 1  ;;  %v9287_v12 = vmul.f32 %v895_v42, %v13835_v48  ;;  %v4631_v41 = vmul.f32 %v1005_v20, %v13877_v58  ;;  %v4639_v0 = vmul.f32 %v9293_v43, %v1005_v20  ;;  %v13882_v48 = vld [vmem:[#allocation59_spill] sm:$0xff]  ;;  %v1009_v58 = vpop.f32.mrf.mxu1 }
 0x275   :  { %v9297_v61 = vmul.f32 %v895_v42, %v13836_v8  ;;  %v9300_v15 = vmul.f32 %v895_v42, %v13837_v1  ;;  %v9303_v11 = vmul.f32 %v9149_v25, %v895_v42  ;;  %v4582_v33 = vmul.f32 %v9210_v38, %v13882_v48  ;;  %v13884_v42 = vld [vmem:[#allocation19_spill] sm:$0xff]  ;;  %v13886_v48 = vld [vmem:[#allocation21_spill] sm:$0xff] }
 0x276   :  { %13876 = vst [vmem:[#allocation201_spill] sm:$0xff] %v9287_v12  ;;  %v1894_v29 = vadd.f32 %v1893_v35, %v1892_v26  ;;  %v4590_v14 = vmul.f32 %v9210_v38, %v13883_v27  ;;  %v4644_v47 = vadd.f32 %v4643_v7, %v4583_v50  ;;  %v4662_v30 = vadd.f32 %v4661_v49, %v4591_v39  ;;  %v13887_v35 = vld [vmem:[#allocation22_spill] sm:$0xff]  ;;  %v13889_v49 = vld [vmem:[#allocation24_spill] sm:$0xff] }
 0x277   :  { %13879 = vst [vmem:[#allocation203_spill] sm:$0xff] %v9297_v61  ;;  %13880 = vst [vmem:[#allocation204_spill] sm:$0xff] %v9300_v15  ;;  %v4680_v20 = vadd.f32 %v4679_v62, %v4599_v53  ;;  %v4698_v43 = vadd.f32 %v4697_v32, %v4607_v3  ;;  %v4716_v8 = vadd.f32 %v4715_v63, %v4615_v60  ;;  %v13890_v32 = vld [vmem:[#allocation25_spill] sm:$0xff] }
 0x278   :  { %13881 = vst [vmem:[#allocation205_spill] sm:$0xff] %v9303_v11  ;;  %v4734_v9 = vadd.f32 %v4733_v4, %v4623_v37  ;;  %v1902_v1 = vrot.slane %v1894_v29, %v13756_v28  ;;  %v4752_v15 = vadd.f32 %v4751_v18, %v4631_v41  ;;  %v4770_v61 = vadd.f32 %v4769_v45, %v4639_v0  ;;  %v13885_v11 = vld [vmem:[#allocation20_spill] sm:$0xff]  ;;  %v13891_v4 = vld [vmem:[#allocation179_spill] sm:$0xff] }
 0x279   :  { %v4585_v25 = vmul.f32 %v1009_v58, %v13884_v42  ;;  %v4593_v12 = vmul.f32 %v1009_v58, %v13885_v11  ;;  %v4601_v46 = vmul.f32 %v1009_v58, %v13886_v48  ;;  %v4609_v26 = vmul.f32 %v1009_v58, %v13887_v35 }
 0x27a   :  { %v4617_v27 = vmul.f32 %v1009_v58, %v13888_v6  ;;  %6503 = vrcp.f32 %v1902_v1  ;;  %v4625_v7 = vmul.f32 %v1009_v58, %v13889_v49  ;;  %v4633_v63 = vmul.f32 %v1009_v58, %v13890_v32  ;;  %v13892_v6 = vld [vmem:[#allocation61_spill] sm:$0xff] }
 0x27b   :  { %v4641_v62 = vmul.f32 %v13891_v4, %v1009_v58  ;;  %v4645_v50 = vadd.f32 %v4644_v47, %v4585_v25  ;;  %v4663_v18 = vadd.f32 %v4662_v30, %v4593_v12  ;;  %v4681_v45 = vadd.f32 %v4680_v20, %v4601_v46  ;;  %v13893_v46 = vld [vmem:[#allocation64_spill] sm:$0xff]  ;;  %v9328_v25 = vpop.f32.mrf.mxu0  ;;  %v6742_v4 = vld [vmem:[%s12761_s7 + $0x58] sm:$0xff] }
 0x27c   :  { %v4699_v0 = vadd.f32 %v4698_v43, %v4609_v26  ;;  %v4717_v39 = vadd.f32 %v4716_v8, %v4617_v27  ;;  %v4735_v53 = vadd.f32 %v4734_v9, %v4625_v7  ;;  %v4753_v3 = vadd.f32 %v4752_v15, %v4633_v63  ;;  %v13894_v43 = vld [vmem:[#allocation65_spill] sm:$0xff]  ;;  %v13896_v27 = vld [vmem:[#allocation67_spill] sm:$0xff]  ;;  %13897 = vst [vmem:[#allocation179_spill] sm:$0xff] %v9328_v25 }
 0x27d   :  { %v4771_v60 = vadd.f32 %v4770_v61, %v4641_v62  ;;  %v4646_v29 = vrot.slane %v4645_v50, 4  ;;  %v4664_v37 = vrot.slane %v4663_v18, 4  ;;  %v4682_v41 = vrot.slane %v4681_v45, 4  ;;  %v13895_v61 = vld [vmem:[#allocation66_spill] sm:$0xff] }
 0x27e   :  { %v4700_v35 = vrot.slane %v4699_v0, 4  ;;  %v4598_v1 = vmul.f32 %v9210_v38, %v13892_v6  ;;  %v4718_v49 = vrot.slane %v4717_v39, 4  ;;  %v4736_v48 = vrot.slane %v4735_v53, 4 }
 0x27f   :  { %v4754_v32 = vrot.slane %v4753_v3, 4  ;;  %v4647_v11 = vadd.f32 %v4646_v29, %v4645_v50  ;;  %v4665_v58 = vadd.f32 %v4664_v37, %v4663_v18  ;;  %v4683_v47 = vadd.f32 %v4682_v41, %v4681_v45 }
 0x280   :  { %v4701_v12 = vadd.f32 %v4700_v35, %v4699_v0  ;;  %v4606_v8 = vmul.f32 %v9210_v38, %v13893_v46  ;;  %v4614_v15 = vmul.f32 %v9210_v38, %v13894_v43  ;;  %v4622_v9 = vmul.f32 %v9210_v38, %v13895_v61 }
 0x281   :  { %v4772_v30 = vrot.slane %v4771_v60, 4  ;;  %v4630_v20 = vmul.f32 %v9210_v38, %v13896_v27  ;;  %v4648_v26 = vrot.slane %v4647_v11, 2  ;;  %v4719_v7 = vadd.f32 %v4718_v49, %v4717_v39 }
 0x282   :  { %v4737_v63 = vadd.f32 %v4736_v48, %v4735_v53  ;;  %v1923_v35 = vmul.f32 %v9096_v22, %v13761_v24  ;;  %v4638_v62 = vmul.f32 %v6742_v4, %v9210_v38  ;;  %v9337_v50 = vadd.f32 %v4582_v33, %v9168_v21  ;;  %v9354_v21 = vpop.f32.mrf.mxu0 }
 0x283   :  { %v4684_v18 = vrot.slane %v4683_v47, 2  ;;  %v9340_v45 = vadd.f32 %v4590_v14, %v9177_v34  ;;  %v4666_v0 = vrot.slane %v4665_v58, 2  ;;  %v4702_v29 = vrot.slane %v4701_v12, 2 }
 0x284   :  { %v4755_v49 = vadd.f32 %v4754_v32, %v4753_v3  ;;  %v9343_v48 = vadd.f32 %v4598_v1, %v9185_v54  ;;  %v9346_v39 = vadd.f32 %v4606_v8, %v9197_v40  ;;  %v9349_v53 = vadd.f32 %v4614_v15, %v9206_v52 }
 0x285   :  { %v4773_v38 = vadd.f32 %v4772_v30, %v4771_v60  ;;  %v9352_v33 = vadd.f32 %v4622_v9, %v9214_v31  ;;  %v4649_v34 = vadd.f32 %v4648_v26, %v4647_v11  ;;  %v4720_v14 = vrot.slane %v4719_v7, 2 }
 0x286   :  { %v4738_v37 = vrot.slane %v4737_v63, 2  ;;  %v9358_v32 = vmul.f32 %v9118_v23, %v13764_v36  ;;  %v1953_v54 = vrot.slane %v1923_v35, 7  ;;  %v9361_v40 = vadd.f32 %v4630_v20, %v9233_v56 }
 0x287   :  { %v4685_v3 = vadd.f32 %v4684_v18, %v4683_v47  ;;  %v6504_v52 = vpop.eup %6503  ;;  %v9364_v60 = vadd.f32 %v4638_v62, %v9238_v44  ;;  %v4667_v31 = vadd.f32 %v4666_v0, %v4665_v58  ;;  %v4703_v41 = vadd.f32 %v4702_v29, %v4701_v12  ;;  %v13901_v18 = vld [vmem:[#allocation79_spill] sm:$0xff]  ;;  %v13903_v29 = vld [vmem:[#allocation73_spill] sm:$0xff] }
 0x288   :  { %v4756_v1 = vrot.slane %v4755_v49, 2  ;;  %v1921_v11 = vmul.f32 %v9137_v57, %v13763_v17  ;;  %v9369_v8 = vmul.f32 %v6504_v52, %v9053_v10  ;;  %v9373_v15 = vmul.f32 %v9354_v21, %v13855_v5  ;;  %v13947_v17 = vld [vmem:[#allocation9_spill] sm:$0xff] }
 0x289   :  { %v4774_v56 = vrot.slane %v4773_v38, 2  ;;  %v9377_v47 = vmul.f32 %v9354_v21, %v13856_v55  ;;  %v4650_v44 = vrot.slane %v4649_v34, 1  ;;  %v4721_v9 = vadd.f32 %v4720_v14, %v4719_v7 }
 0x28a   :  { %13898 = vst [vmem:[#allocation206_spill] sm:$0xff] %v9369_v8  ;;  %v4739_v58 = vadd.f32 %v4738_v37, %v4737_v63  ;;  %v1954_v12 = vsel %vm1847_vm1, %v1953_v54, %v1921_v11  ;;  %v1955_v30 = vrot.slane %v9358_v32, 6  ;;  %v9382_v20 = vmul.f32 %v6504_v52, %v9098_v16  ;;  %v13905_v37 = vld [vmem:[#allocation190_spill] sm:$0xff]  ;;  %v13907_v11 = vld [vmem:[#allocation192_spill] sm:$0xff] }
 0x28b   :  { %v4686_v10 = vrot.slane %v4685_v3, 1  ;;  %v9385_v26 = vmul.f32 %v6504_v52, %v9134_v19  ;;  %v4668_v35 = vrot.slane %v4667_v31, 1  ;;  %v4704_v4 = vrot.slane %v4703_v41, 1 }
 0x28c   :  { %13899 = vst [vmem:[#allocation207_spill] sm:$0xff] %v9382_v20  ;;  %v4757_v62 = vadd.f32 %v4756_v1, %v4755_v49  ;;  %v9388_v0 = vmul.f32 %v6504_v52, %v13901_v18  ;;  %v9391_v7 = vmul.f32 %v6504_v52, %v13903_v29  ;;  %v5732_v63 = vrot.slane %v9369_v8, 7  ;;  %v13909_v29 = vld [vmem:[#allocation193_spill] sm:$0xff] }
 0x28d   :  { %13900 = vst [vmem:[#allocation208_spill] sm:$0xff] %v9385_v26  ;;  %v4775_v14 = vadd.f32 %v4774_v56, %v4773_v38  ;;  %v9395_v32 = vmul.f32 %v6504_v52, %v13905_v37  ;;  %v9397_v16 = vadd.f32 %v4650_v44, %v4649_v34  ;;  %v4722_v54 = vrot.slane %v4721_v9, 1 }
 0x28e   :  { %13902 = vst [vmem:[#allocation79_spill] sm:$0xff] %v9388_v0  ;;  %13904 = vst [vmem:[#allocation73_spill] sm:$0xff] %v9391_v7  ;;  %v4740_v19 = vrot.slane %v4739_v58, 1  ;;  %v9400_v23 = vmul.f32 %v6504_v52, %v13907_v11  ;;  %v5733_v49 = vsel %vm1847_vm1, %v5732_v63, %v9388_v0  ;;  %v5734_v1 = vrot.slane %v9382_v20, 6  ;;  %v13911_v11 = vld [vmem:[#allocation10_spill] sm:$0xff] }
 0x28f   :  { %13906 = vst [vmem:[#allocation190_spill] sm:$0xff] %v9395_v32  ;;  %v9405_v18 = vadd.f32 %v4686_v10, %v4685_v3  ;;  %v9408_v22 = vmul.f32 %v6504_v52, %v13909_v29  ;;  %v5736_v38 = vrot.slane %v9385_v26, 5  ;;  %v4669_v56 = vadd.f32 %v4668_v35, %v4667_v31  ;;  %v13912_v10 = vld [vmem:[#allocation12_spill] sm:$0xff] }
 0x290   :  { %13908 = vst [vmem:[#allocation192_spill] sm:$0xff] %v9400_v23  ;;  %v4705_v34 = vadd.f32 %v4704_v4, %v4703_v41  ;;  %v5735_v44 = vsel %vm1850_vm2, %v5734_v1, %v5733_v49  ;;  %v5738_v37 = vrot.slane %v9391_v7, 4  ;;  %v4584_v57 = vmul.f32 %v9275_v59, %v13911_v11  ;;  %v13913_v11 = vld [vmem:[#allocation13_spill] sm:$0xff] }
 0x291   :  { %13910 = vst [vmem:[#allocation193_spill] sm:$0xff] %v9408_v22  ;;  %v4758_v55 = vrot.slane %v4757_v62, 1  ;;  %v5737_v63 = vsel %vm1853_vm3, %v5736_v38, %v5735_v44  ;;  %v5740_v3 = vrot.slane %v9395_v32, 3  ;;  %v4592_v52 = vmul.f32 %v9275_v59, %v13912_v10 }
 0x292   :  { %v4776_v29 = vrot.slane %v4775_v14, 1  ;;  %v5739_v5 = vsel %vm1856_vm4, %v5738_v37, %v5737_v63  ;;  %v5742_v31 = vrot.slane %v9400_v23, 2  ;;  %v4723_v41 = vadd.f32 %v4722_v54, %v4721_v9  ;;  %v13914_v63 = vld [vmem:[#allocation14_spill] sm:$0xff] }
 0x293   :  { %v4787_v35 = vmax.f32 %v9397_v16, %v9405_v18  ;;  %v5741_v4 = vsel %vm1859_vm5, %v5740_v3, %v5739_v5  ;;  %v5744_v49 = vrot.slane %v9408_v22, 1  ;;  %v4741_v1 = vadd.f32 %v4740_v19, %v4739_v58  ;;  %v13915_v5 = vld [vmem:[#allocation15_spill] sm:$0xff]  ;;  %v13916_v19 = vld [vmem:[#allocation16_spill] sm:$0xff] }
 0x294   :  { %v4788_v38 = vmax.f32 %v4669_v56, %v4705_v34  ;;  %v5743_v44 = vsel %vm1862_vm6, %v5742_v31, %v5741_v4  ;;  %v4600_v10 = vmul.f32 %v9275_v59, %v13913_v11  ;;  %v4759_v27 = vadd.f32 %v4758_v55, %v4757_v62  ;;  %v13917_v31 = vld [vmem:[#allocation18_spill] sm:$0xff]  ;;  %v9451_v4 = vld [vmem:[%s12761_s7 + $0x68] sm:$0xff] }
 0x295   :  { %v4789_v61 = vmax.f32 %v4787_v35, %v4723_v41  ;;  %v5745_v37 = vsel %vm1865_vm7, %v5744_v49, %v5743_v44  ;;  %v4608_v9 = vmul.f32 %v9275_v59, %v13914_v63  ;;  %v4777_v54 = vadd.f32 %v4776_v29, %v4775_v14  ;;  %v13918_v14 = vld [vmem:[#allocation55_spill] sm:$0xff]  ;;  %13919 = vst [vmem:[#allocation209_spill] sm:$0xff] %v9451_v4  ;;  %v13920_v44 = vld [vmem:[#allocation80_spill] sm:$0xff] }
 0x296   :  { %v4790_v43 = vmax.f32 %v4788_v38, %v4741_v1  ;;  %6141 = vst [vmem:[%s12761_s7 + $0x88] sm:$0xff] %v5745_v37  ;;  %v4616_v58 = vmul.f32 %v9275_v59, %v13915_v5  ;;  %v4624_v3 = vmul.f32 %v9275_v59, %v13916_v19  ;;  %v4632_v55 = vmul.f32 %v9275_v59, %v13917_v31  ;;  %v13921_v37 = vld [vmem:[#allocation149_spill] sm:$0xff]  ;;  %v13922_v31 = vld [vmem:[#allocation83_spill] sm:$0xff] }
 0x297   :  { %v4791_v62 = vmax.f32 %v4789_v61, %v4759_v27  ;;  %v9442_v35 = vmul.f32 %v9354_v21, %v13857_v51  ;;  %v9446_v29 = vmul.f32 %v9354_v21, %v13918_v14  ;;  %v4640_v49 = vmul.f32 %v9451_v4, %v9275_v59  ;;  %v13923_v51 = vld [vmem:[#allocation82_spill] sm:$0xff]  ;;  %v13924_v5 = vld [vmem:[#allocation169_spill] sm:$0xff] }
 0x298   :  { %v4792_v38 = vmax.f32 %v4790_v43, %v4777_v54  ;;  %v9457_v61 = vmul.f32 %v13921_v37, %v13920_v44  ;;  %v9461_v19 = vmul.f32 %v13923_v51, %v13922_v31  ;;  %v13925_v14 = vld [vmem:[#allocation70_spill] sm:$0xff]  ;;  %v9468_v11 = vsel %vm1850_vm2, %v1955_v30, %v1954_v12  ;;  %v13945_v44 = vld [vmem:[#allocation7_spill] sm:$0xff] }
 0x299   :  { %v9465_v63 = vmul.f32 %v13925_v14, %v13924_v5  ;;  %v4653_v46 = vadd.f32 %v9337_v50, %v4584_v57  ;;  %v4671_v59 = vadd.f32 %v9340_v45, %v4592_v52  ;;  %v4689_v43 = vadd.f32 %v9343_v48, %v4600_v10  ;;  %v1011_v14 = vpop.f32.mrf.mxu1 }
 0x29a   :  { %v4793_v4 = vmax.f32 %v4791_v62, %v4792_v38  ;;  %v4707_v37 = vadd.f32 %v9346_v39, %v4608_v9  ;;  %v4725_v6 = vadd.f32 %v9349_v53, %v4616_v58  ;;  %v4743_v51 = vadd.f32 %v9352_v33, %v4624_v3  ;;  %v13926_v53 = vld [vmem:[#allocation26_spill] sm:$0xff]  ;;  %v13928_v62 = vld [vmem:[#allocation29_spill] sm:$0xff] }
 0x29b   :  { %v4761_v31 = vadd.f32 %v9361_v40, %v4632_v55  ;;  %v4779_v5 = vadd.f32 %v9364_v60, %v4640_v49  ;;  %v4586_v58 = vmul.f32 %v1011_v14, %v13926_v53  ;;  %v13927_v40 = vld [vmem:[#allocation27_spill] sm:$0xff]  ;;  %v4602_v60 = vmul.f32 %v1011_v14, %v13928_v62  ;;  %v13932_v38 = vld [vmem:[#allocation33_spill] sm:$0xff] }
 0x29c   :  { %v4801_v12 = vsub.f32 %v9397_v16, %v4793_v4  ;;  %v4803_v30 = vsub.f32 %v4669_v56, %v4793_v4  ;;  %v4805_v57 = vsub.f32 %v9405_v18, %v4793_v4  ;;  %v4807_v50 = vsub.f32 %v4705_v34, %v4793_v4  ;;  %v13929_v34 = vld [vmem:[#allocation30_spill] sm:$0xff] }
 0x29d   :  { %v4809_v45 = vsub.f32 %v4723_v41, %v4793_v4  ;;  %v4811_v48 = vsub.f32 %v4741_v1, %v4793_v4  ;;  %v4813_v10 = vsub.f32 %v4759_v27, %v4793_v4  ;;  %v4815_v52 = vsub.f32 %v4777_v54, %v4793_v4  ;;  %v13930_v27 = vld [vmem:[#allocation31_spill] sm:$0xff]  ;;  %v13931_v54 = vld [vmem:[#allocation32_spill] sm:$0xff] }
 0x29e   :  { %v4817_v39 = vmul.f32 1.442695, %v4801_v12  ;;  %v4821_v9 = vmul.f32 1.442695, %v4803_v30  ;;  %v4825_v33 = vmul.f32 1.442695, %v4805_v57  ;;  %v4594_v55 = vmul.f32 %v1011_v14, %v13927_v40 }
 0x29f   :  { %v4829_v3 = vmul.f32 1.442695, %v4807_v50  ;;  %v4833_v16 = vmul.f32 1.442695, %v4809_v45  ;;  %v4837_v56 = vmul.f32 1.442695, %v4811_v48  ;;  %v4610_v41 = vmul.f32 %v1011_v14, %v13929_v34 }
 0x2a0   :  { %6505 = vpow2.f32 %v4817_v39  ;;  %v4841_v49 = vmul.f32 1.442695, %v4813_v10  ;;  %v4845_v18 = vmul.f32 1.442695, %v4815_v52  ;;  %v4618_v1 = vmul.f32 %v1011_v14, %v13930_v27  ;;  %v6744_v30 = vld [vmem:[%s12761_s7 + $0x78] sm:$0xff] }
 0x2a1   :  { %6507 = vpow2.f32 %v4821_v9  ;;  %v4626_v4 = vmul.f32 %v1011_v14, %v13931_v54  ;;  %v4634_v12 = vmul.f32 %v1011_v14, %v13932_v38  ;;  %v4642_v57 = vmul.f32 %v6744_v30, %v1011_v14 }
 0x2a2   :  { %6509 = vpow2.f32 %v4825_v33  ;;  %v4654_v50 = vadd.f32 %v4653_v46, %v4586_v58  ;;  %v4672_v45 = vadd.f32 %v4671_v59, %v4594_v55  ;;  %v4690_v48 = vadd.f32 %v4689_v43, %v4602_v60 }
 0x2a3   :  { %6511 = vpow2.f32 %v4829_v3  ;;  %v4708_v10 = vadd.f32 %v4707_v37, %v4610_v41  ;;  %v4726_v52 = vadd.f32 %v4725_v6, %v4618_v1  ;;  %v4744_v39 = vadd.f32 %v4743_v51, %v4626_v4 }
 0x2a4   :  { %6513 = vpow2.f32 %v4833_v16  ;;  %v4655_v9 = vrot.slane %v4654_v50, 4  ;;  %v4673_v33 = vrot.slane %v4672_v45, 4  ;;  %v4691_v27 = vrot.slane %v4690_v48, 4 }
 0x2a5   :  { %6515 = vpow2.f32 %v4837_v56  ;;  %v4709_v54 = vrot.slane %v4708_v10, 4  ;;  %v4727_v38 = vrot.slane %v4726_v52, 4  ;;  %v4745_v34 = vrot.slane %v4744_v39, 4 }
 0x2a6   :  { %6517 = vpow2.f32 %v4841_v49  ;;  %v4656_v62 = vadd.f32 %v4655_v9, %v4654_v50  ;;  %v4674_v40 = vadd.f32 %v4673_v33, %v4672_v45  ;;  %v4692_v14 = vadd.f32 %v4691_v27, %v4690_v48 }
 0x2a7   :  { %6519 = vpow2.f32 %v4845_v18  ;;  %v4710_v3 = vadd.f32 %v4709_v54, %v4708_v10  ;;  %v4728_v46 = vadd.f32 %v4727_v38, %v4726_v52  ;;  %v4746_v59 = vadd.f32 %v4745_v34, %v4744_v39 }
 0x2a8   :  { %v4762_v43 = vadd.f32 %v4761_v31, %v4634_v12  ;;  %v4657_v58 = vrot.slane %v4656_v62, 2  ;;  %v4675_v37 = vrot.slane %v4674_v40, 2  ;;  %v4693_v6 = vrot.slane %v4692_v14, 2 }
 0x2a9   :  { %v4780_v51 = vadd.f32 %v4779_v5, %v4642_v57  ;;  %v4711_v55 = vrot.slane %v4710_v3, 2  ;;  %v4729_v60 = vrot.slane %v4728_v46, 2  ;;  %v4747_v16 = vrot.slane %v4746_v59, 2 }
 0x2aa   :  { %v4763_v56 = vrot.slane %v4762_v43, 4  ;;  %v4658_v49 = vadd.f32 %v4657_v58, %v4656_v62  ;;  %v4676_v41 = vadd.f32 %v4675_v37, %v4674_v40  ;;  %v4694_v1 = vadd.f32 %v4693_v6, %v4692_v14 }
 0x2ab   :  { %v4781_v4 = vrot.slane %v4780_v51, 4  ;;  %v4712_v18 = vadd.f32 %v4711_v55, %v4710_v3  ;;  %v4730_v30 = vadd.f32 %v4729_v60, %v4728_v46  ;;  %v4748_v50 = vadd.f32 %v4747_v16, %v4746_v59 }
 0x2ac   :  { %v4764_v27 = vadd.f32 %v4763_v56, %v4762_v43  ;;  %v4659_v34 = vrot.slane %v4658_v49, 1  ;;  %v4677_v31 = vrot.slane %v4676_v41, 1  ;;  %v4695_v38 = vrot.slane %v4694_v1, 1 }
 0x2ad   :  { %v9490_v54 = vpop.eup %6505  ;;  %v4782_v12 = vadd.f32 %v4781_v4, %v4780_v51  ;;  %v4713_v5 = vrot.slane %v4712_v18, 1  ;;  %v4731_v57 = vrot.slane %v4730_v30, 1  ;;  %v4749_v48 = vrot.slane %v4748_v50, 1 }
 0x2ae   :  { %v9492_v45 = vpop.eup %6507  ;;  %v4765_v10 = vrot.slane %v4764_v27, 2  ;;  %v9497_v52 = vadd.f32 %v4659_v34, %v4658_v49  ;;  %v9499_v39 = vadd.f32 %v4677_v31, %v4676_v41  ;;  %v9501_v9 = vadd.f32 %v4695_v38, %v4694_v1 }
 0x2af   :  { %v9494_v62 = vpop.eup %6509  ;;  %v4865_v40 = vrot.slane %v9492_v45, 7  ;;  %v9506_v3 = vadd.f32 %v4713_v5, %v4712_v18  ;;  %v9508_v46 = vadd.f32 %v4731_v57, %v4730_v30  ;;  %v9510_v59 = vadd.f32 %v4749_v48, %v4748_v50 }
 0x2b0   :  { %v9503_v33 = vpop.eup %6511  ;;  %v4867_v14 = vrot.slane %v9494_v62, 6  ;;  %v4766_v6 = vadd.f32 %v4765_v10, %v4764_v27  ;;  %v4783_v51 = vrot.slane %v4782_v12, 2  ;;  %v4794_v56 = vmax.f32 %v9497_v52, %v9501_v9  ;;  %v9531_v27 = vpop.f32.mrf.mxu0 }
 0x2b1   :  { %v9512_v43 = vpop.eup %6513  ;;  %v4866_v58 = vsel %vm1847_vm1, %v4865_v40, %v9490_v54  ;;  %v4869_v37 = vrot.slane %v9503_v33, 5  ;;  %v4795_v49 = vmax.f32 %v9499_v39, %v9506_v3  ;;  %13933 = vst [vmem:[#allocation210_spill] sm:$0xff] %v9531_v27  ;;  %v13943_v27 = vld [vmem:[#allocation4_spill] sm:$0xff] }
 0x2b2   :  { %v9517_v55 = vpop.eup %6515  ;;  %v4868_v60 = vsel %vm1850_vm2, %v4867_v14, %v4866_v58  ;;  %v4871_v16 = vrot.slane %v9512_v43, 4  ;;  %v4767_v18 = vrot.slane %v4766_v6, 1  ;;  %v4784_v30 = vadd.f32 %v4783_v51, %v4782_v12  ;;  %v13934_v14 = vld [vmem:[#allocation56_spill] sm:$0xff] }
 0x2b3   :  { %v9525_v41 = vpop.eup %6517  ;;  %v4870_v1 = vsel %vm1853_vm3, %v4869_v37, %v4868_v60  ;;  %v4873_v4 = vrot.slane %v9517_v55, 3  ;;  %v4796_v38 = vmax.f32 %v4794_v56, %v9508_v46  ;;  %v4797_v5 = vmax.f32 %v4795_v49, %v9510_v59  ;;  %v13935_v37 = vld [vmem:[#allocation57_spill] sm:$0xff] }
 0x2b4   :  { %v9529_v50 = vpop.eup %6519  ;;  %v4872_v34 = vsel %vm1856_vm4, %v4871_v16, %v4870_v1  ;;  %v4875_v31 = vrot.slane %v9525_v41, 2  ;;  %v9539_v10 = vadd.f32 %v4767_v18, %v4766_v6  ;;  %v4785_v40 = vrot.slane %v4784_v30, 1  ;;  %v13937_v18 = vld [vmem:[#allocation195_spill] sm:$0xff] }
 0x2b5   :  { %v4874_v57 = vsel %vm1859_vm5, %v4873_v4, %v4872_v34  ;;  %v4877_v48 = vrot.slane %v9529_v50, 1  ;;  %v1957_v12 = vrot.slane %v9457_v61, 5  ;;  %v2103_v58 = vmul.f32 %v9354_v21, %v13934_v14  ;;  %v13936_v61 = vld [vmem:[#allocation58_spill] sm:$0xff]  ;;  %v13942_v14 = vld [vmem:[#allocation3_spill] sm:$0xff] }
 0x2b6   :  { %v2111_v51 = vmul.f32 %v9354_v21, %v13935_v37  ;;  %v4876_v60 = vsel %vm1862_vm6, %v4875_v31, %v4874_v57  ;;  %v9549_v49 = vadd.f32 %v4785_v40, %v4784_v30  ;;  %v4798_v6 = vmax.f32 %v4796_v38, %v9539_v10  ;;  %v905_v31 = vpop.f32.mrf.mxu0  ;;  %v13939_v40 = vld [vmem:[#allocation200_spill] sm:$0xff] }
 0x2b7   :  { %v4878_v56 = vsel %vm1865_vm7, %v4877_v48, %v4876_v60  ;;  %v9554_v1 = vsel %vm1853_vm3, %v1957_v12, %v9468_v11  ;;  %v2119_v4 = vmul.f32 %v9354_v21, %v13936_v61  ;;  %v2127_v34 = vmul.f32 %v13937_v18, %v9354_v21  ;;  %v13938_v48 = vld [vmem:[#allocation199_spill] sm:$0xff]  ;;  %v13940_v60 = vld [vmem:[#allocation201_spill] sm:$0xff] }
 0x2b8   :  { %v4895_v37 = vrot.slane %v4878_v56, 4  ;;  %v2133_v57 = vadd.f32 %v9373_v15, %v9267_v2  ;;  %v2151_v30 = vadd.f32 %v9377_v47, %v9270_v13  ;;  %v2169_v38 = vadd.f32 %v9442_v35, %v13938_v48  ;;  %v13941_v61 = vld [vmem:[#allocation203_spill] sm:$0xff]  ;;  %v13944_v15 = vld [vmem:[#allocation5_spill] sm:$0xff]  ;;  %v13946_v48 = vld [vmem:[#allocation8_spill] sm:$0xff] }
 0x2b9   :  { %v4799_v11 = vmax.f32 %v4797_v5, %v9549_v49  ;;  %v2187_v12 = vadd.f32 %v9446_v29, %v13939_v40  ;;  %v2205_v16 = vadd.f32 %v2103_v58, %v13940_v60  ;;  %v2223_v21 = vadd.f32 %v2111_v51, %v13941_v61  ;;  %v9577_v29 = vpop.f32.mrf.mxu0  ;;  %v13949_v58 = vld [vmem:[#allocation11_spill] sm:$0xff]  ;;  %v13950_v61 = vld [vmem:[#allocation204_spill] sm:$0xff] }
 0x2ba   :  { %v4896_v18 = vadd.f32 %v4895_v37, %v4878_v56  ;;  %v2073_v53 = vmul.f32 %v905_v31, %v13942_v14  ;;  %v2081_v2 = vmul.f32 %v905_v31, %v13943_v27  ;;  %v2089_v25 = vmul.f32 %v905_v31, %v13944_v15  ;;  %13948 = vst [vmem:[#allocation195_spill] sm:$0xff] %v9577_v29 }
 0x2bb   :  { %v4800_v13 = vmax.f32 %v4798_v6, %v4799_v11  ;;  %v2097_v35 = vmul.f32 %v905_v31, %v13945_v44  ;;  %v2105_v5 = vmul.f32 %v905_v31, %v13946_v48  ;;  %v2113_v36 = vmul.f32 %v905_v31, %v13947_v17  ;;  %v13951_v6 = vld [vmem:[#allocation205_spill] sm:$0xff]  ;;  %v13952_v44 = vld [vmem:[#allocation202_spill] sm:$0xff]  ;;  %v909_v23 = vpop.f32.mrf.mxu0 }
 0x2bc   :  { %v4897_v47 = vrot.slane %v4896_v18, 2  ;;  %v2121_v40 = vmul.f32 %v905_v31, %v13949_v58  ;;  %v2241_v60 = vadd.f32 %v2119_v4, %v13950_v61  ;;  %v2259_v11 = vadd.f32 %v2127_v34, %v13951_v6 }
 0x2bd   :  { %v4802_v37 = vsub.f32 %v9497_v52, %v4800_v13  ;;  %v4804_v51 = vsub.f32 %v9499_v39, %v4800_v13  ;;  %v4806_v56 = vsub.f32 %v9501_v9, %v4800_v13  ;;  %v2129_v27 = vmul.f32 %v13952_v44, %v905_v31 }
 0x2be   :  { %v4898_v15 = vadd.f32 %v4897_v47, %v4896_v18  ;;  %v2134_v48 = vadd.f32 %v2133_v57, %v2073_v53  ;;  %v2152_v14 = vadd.f32 %v2151_v30, %v2081_v2  ;;  %v4808_v17 = vsub.f32 %v9506_v3, %v4800_v13  ;;  %v13954_v57 = vld [vmem:[#allocation21_spill] sm:$0xff] }
 0x2bf   :  { %v4823_v29 = vmul.f32 1.442695, %v4804_v51  ;;  %v2170_v58 = vadd.f32 %v2169_v38, %v2089_v25  ;;  %v2188_v22 = vadd.f32 %v2187_v12, %v2097_v35  ;;  %v4819_v52 = vmul.f32 1.442695, %v4802_v37  ;;  %v13956_v38 = vld [vmem:[#allocation23_spill] sm:$0xff]  ;;  %v13957_v12 = vld [vmem:[#allocation24_spill] sm:$0xff] }
 0x2c0   :  { %v4899_v24 = vrot.slane %v4898_v15, 1  ;;  %v2206_v39 = vadd.f32 %v2205_v16, %v2105_v5  ;;  %v2224_v32 = vadd.f32 %v2223_v21, %v2113_v36  ;;  %v2242_v9 = vadd.f32 %v2241_v60, %v2121_v40  ;;  %v13953_v16 = vld [vmem:[#allocation20_spill] sm:$0xff]  ;;  %v13958_v40 = vld [vmem:[#allocation25_spill] sm:$0xff] }
 0x2c1   :  { %v4827_v7 = vmul.f32 1.442695, %v4806_v56  ;;  %v4810_v34 = vsub.f32 %v9508_v46, %v4800_v13  ;;  %v4812_v18 = vsub.f32 %v9510_v59, %v4800_v13  ;;  %6521 = vpow2.f32 %v4823_v29  ;;  %v9602_v60 = vld [vmem:[%s12761_s7 + $0x70] sm:$0xff] }
 0x2c2   :  { %v4900_v4 = vadd.f32 %v4899_v24, %v4898_v15  ;;  %v4814_v44 = vsub.f32 %v9539_v10, %v4800_v13  ;;  %v4816_v53 = vsub.f32 %v9549_v49, %v4800_v13  ;;  %v4831_v3 = vmul.f32 1.442695, %v4808_v17  ;;  %v13955_v24 = vld [vmem:[#allocation22_spill] sm:$0xff]  ;;  %13959 = vst [vmem:[#allocation199_spill] sm:$0xff] %v9602_v60 }
 0x2c3   :  { %v2075_v25 = vmul.f32 %v909_v23, %v13884_v42  ;;  %6523 = vpow2.f32 %v4819_v52  ;;  %v2083_v36 = vmul.f32 %v909_v23, %v13953_v16  ;;  %v2091_v30 = vmul.f32 %v909_v23, %v13954_v57 }
 0x2c4   :  { %v4910_v31 = vrot.slane %v4900_v4, %v13756_v28  ;;  %6525 = vpow2.f32 %v4827_v7  ;;  %v2099_v46 = vmul.f32 %v909_v23, %v13955_v24  ;;  %v2107_v59 = vmul.f32 %v909_v23, %v13956_v38 }
 0x2c5   :  { %v2115_v21 = vmul.f32 %v909_v23, %v13957_v12  ;;  %v4835_v10 = vmul.f32 1.442695, %v4810_v34  ;;  %v4839_v49 = vmul.f32 1.442695, %v4812_v18  ;;  %v2135_v17 = vadd.f32 %v2134_v48, %v2075_v25  ;;  %v13962_v34 = vld [vmem:[#allocation68_spill] sm:$0xff]  ;;  %v13963_v18 = vld [vmem:[#allocation191_spill] sm:$0xff] }
 0x2c6   :  { %6527 = vrcp.f32 %v4910_v31  ;;  %v4843_v2 = vmul.f32 1.442695, %v4814_v44  ;;  %v2153_v15 = vadd.f32 %v2152_v14, %v2083_v36  ;;  %v2171_v13 = vadd.f32 %v2170_v58, %v2091_v30 }
 0x2c7   :  { %v2189_v47 = vadd.f32 %v2188_v22, %v2099_v46  ;;  %6529 = vpow2.f32 %v4831_v3  ;;  %v2136_v35 = vrot.slane %v2135_v17, 4  ;;  %v2207_v5 = vadd.f32 %v2206_v39, %v2107_v59  ;;  %v13961_v39 = vld [vmem:[#allocation154_spill] sm:$0xff] }
 0x2c8   :  { %v2225_v29 = vadd.f32 %v2224_v32, %v2115_v21  ;;  %v2123_v7 = vmul.f32 %v909_v23, %v13958_v40  ;;  %v2154_v37 = vrot.slane %v2153_v15, 4  ;;  %v2172_v51 = vrot.slane %v2171_v13, 4  ;;  %v13960_v32 = vld [vmem:[#allocation187_spill] sm:$0xff]  ;;  %v13992_v40 = vld [vmem:[#allocation185_spill] sm:$0xff] }
 0x2c9   :  { %v2190_v56 = vrot.slane %v2189_v47, 4  ;;  %v4847_v61 = vmul.f32 1.442695, %v4816_v53  ;;  %v2131_v48 = vmul.f32 %v9602_v60, %v909_v23  ;;  %v2137_v14 = vadd.f32 %v2136_v35, %v2135_v17 }
 0x2ca   :  { %v2208_v58 = vrot.slane %v2207_v5, 4  ;;  %6531 = vpow2.f32 %v4835_v10  ;;  %v2155_v22 = vadd.f32 %v2154_v37, %v2153_v15  ;;  %v2173_v6 = vadd.f32 %v2172_v51, %v2171_v13  ;;  %v13966_v13 = vld [vmem:[#allocation197_spill] sm:$0xff] }
 0x2cb   :  { %v2226_v52 = vrot.slane %v2225_v29, 4  ;;  %v1933_v4 = vmul.f32 %v13961_v39, %v13960_v32  ;;  %v9609_v44 = vmul.f32 %v13963_v18, %v13962_v34  ;;  %v2260_v53 = vadd.f32 %v2259_v11, %v2129_v27  ;;  %v13965_v11 = vld [vmem:[#allocation196_spill] sm:$0xff] }
 0x2cc   :  { %v2191_v3 = vadd.f32 %v2190_v56, %v2189_v47  ;;  %v13964_v25 = vrot.slane %v9461_v19, 4  ;;  %6533 = vpow2.f32 %v4839_v49  ;;  %v2138_v31 = vrot.slane %v2137_v14, 2 }
 0x2cd   :  { %v2243_v36 = vadd.f32 %v2242_v9, %v2123_v7  ;;  %v1961_v30 = vrot.slane %v9465_v63, 3  ;;  %6535 = vpow2.f32 %v4843_v2  ;;  %v2209_v46 = vadd.f32 %v2208_v58, %v2207_v5  ;;  %v13967_v63 = vld [vmem:[#allocation77_spill] sm:$0xff] }
 0x2ce   :  { %v1960_v23 = vsel %vm1856_vm4, %v13964_v25, %v9554_v1  ;;  %v2261_v59 = vadd.f32 %v2260_v53, %v2131_v48  ;;  %v9616_v21 = vpop.eup %6521  ;;  %6537 = vpow2.f32 %v4847_v61  ;;  %v2156_v10 = vrot.slane %v2155_v22, 2  ;;  %v13968_v53 = vld [vmem:[#allocation74_spill] sm:$0xff] }
 0x2cf   :  { %v2174_v17 = vrot.slane %v2173_v6, 2  ;;  %v2227_v27 = vadd.f32 %v2226_v52, %v2225_v29  ;;  %v1962_v1 = vsel %vm1859_vm5, %v1961_v30, %v1960_v23  ;;  %v2192_v49 = vrot.slane %v2191_v3, 2 }
 0x2d0   :  { %v9621_v47 = vpop.eup %6523  ;;  %v1963_v9 = vrot.slane %v1933_v4, 2  ;;  %v9625_v2 = vmul.f32 %v9369_v8, %v13967_v63  ;;  %v2139_v35 = vadd.f32 %v2138_v31, %v2137_v14  ;;  %v2244_v5 = vrot.slane %v2243_v36, 4  ;;  %v13969_v14 = vld [vmem:[#allocation36_spill] sm:$0xff] }
 0x2d1   :  { %v9627_v7 = vpop.eup %6525  ;;  %v4879_v37 = vrot.slane %v9616_v21, 7  ;;  %v2210_v51 = vrot.slane %v2209_v46, 2  ;;  %v2262_v56 = vrot.slane %v2261_v59, 4  ;;  %v2157_v58 = vadd.f32 %v2156_v10, %v2155_v22 }
 0x2d2   :  { %v9632_v48 = vsel %vm1862_vm6, %v1963_v9, %v1962_v1  ;;  %v2175_v52 = vadd.f32 %v2174_v17, %v2173_v6  ;;  %v2228_v4 = vrot.slane %v2227_v27, 2  ;;  %v1922_v25 = vmul.f32 %v9388_v0, %v13968_v53  ;;  %v13990_v0 = vld [vmem:[#allocation184_spill] sm:$0xff] }
 0x2d3   :  { %v6528_v61 = vpop.eup %6527  ;;  %v9638_v23 = vmul.f32 %v9382_v20, %v13969_v14  ;;  %v2193_v30 = vadd.f32 %v2192_v49, %v2191_v3  ;;  %v1967_v29 = vrot.slane %v9625_v2, 7  ;;  %v4881_v1 = vrot.slane %v9627_v7, 6 }
 0x2d4   :  { %v9641_v31 = vmul.f32 %v6528_v61, %v9492_v45  ;;  %v9643_v19 = vpop.eup %6529  ;;  %v2140_v22 = vrot.slane %v2139_v35, 1  ;;  %v9647_v6 = vadd.f32 %v2244_v5, %v2243_v36  ;;  %v9650_v10 = vmul.f32 %v6528_v61, %v9494_v62 }
 0x2d5   :  { %v4880_v17 = vsel %vm1847_vm1, %v4879_v37, %v9621_v47  ;;  %v2211_v9 = vadd.f32 %v2210_v51, %v2209_v46  ;;  %v2263_v15 = vadd.f32 %v2262_v56, %v2261_v59  ;;  %v9655_v45 = vmul.f32 %v6528_v61, %v9503_v33 }
 0x2d6   :  { %13970 = vst [vmem:[#allocation200_spill] sm:$0xff] %v9641_v31  ;;  %13971 = vst [vmem:[#allocation201_spill] sm:$0xff] %v9650_v10  ;;  %v2158_v3 = vrot.slane %v2157_v58, 1  ;;  %v2176_v49 = vrot.slane %v2175_v52, 1  ;;  %v2229_v14 = vadd.f32 %v2228_v4, %v2227_v27  ;;  %v9660_v63 = vmul.f32 %v6528_v61, %v9490_v54 }
 0x2d7   :  { %13972 = vst [vmem:[#allocation203_spill] sm:$0xff] %v9655_v45  ;;  %v9657_v2 = vpop.eup %6531  ;;  %v9663_v36 = vmul.f32 %v6528_v61, %v9512_v43  ;;  %v5994_v62 = vrot.slane %v9641_v31, 7  ;;  %v2194_v5 = vrot.slane %v2193_v30, 1  ;;  %v9667_v46 = vmul.f32 %v6528_v61, %v9517_v55 }
 0x2d8   :  { %13973 = vst [vmem:[#allocation204_spill] sm:$0xff] %v9660_v63  ;;  %v4882_v33 = vsel %vm1850_vm2, %v4881_v1, %v4880_v17  ;;  %v4883_v59 = vrot.slane %v9643_v19, 5  ;;  %v9671_v37 = vadd.f32 %v2140_v22, %v2139_v35  ;;  %v9676_v54 = vmul.f32 %v6528_v61, %v9525_v41 }
 0x2d9   :  { %13974 = vst [vmem:[#allocation205_spill] sm:$0xff] %v9663_v36  ;;  %13975 = vst [vmem:[#allocation202_spill] sm:$0xff] %v9667_v46  ;;  %v9673_v27 = vpop.eup %6533  ;;  %v9679_v43 = vmul.f32 %v6528_v61, %v9529_v50  ;;  %v5995_v51 = vsel %vm1847_vm1, %v5994_v62, %v9660_v63  ;;  %v5996_v55 = vrot.slane %v9650_v10, 6  ;;  %v5998_v4 = vrot.slane %v9655_v45, 5 }
 0x2da   :  { %13976 = vst [vmem:[#allocation196_spill] sm:$0xff] %v9676_v54  ;;  %v9684_v56 = vpop.eup %6535  ;;  %v4885_v35 = vrot.slane %v9657_v2, 4  ;;  %v9688_v1 = vadd.f32 %v2158_v3, %v2157_v58  ;;  %v2212_v22 = vrot.slane %v2211_v9, 1  ;;  %v6000_v50 = vrot.slane %v9663_v36, 4 }
 0x2db   :  { %13977 = vst [vmem:[#allocation197_spill] sm:$0xff] %v9679_v43  ;;  %v9690_v17 = vpop.eup %6537  ;;  %v5997_v41 = vsel %vm1850_vm2, %v5996_v55, %v5995_v51  ;;  %v4884_v61 = vsel %vm1853_vm3, %v4883_v59, %v4882_v33  ;;  %v9695_v62 = vadd.f32 %v2176_v49, %v2175_v52  ;;  %v6002_v18 = vrot.slane %v9667_v46, 3 }
 0x2dc   :  { %v5999_v53 = vsel %vm1853_vm3, %v5998_v4, %v5997_v41  ;;  %v4886_v39 = vsel %vm1856_vm4, %v4885_v35, %v4884_v61  ;;  %v4887_v58 = vrot.slane %v9673_v27, 3  ;;  %v6004_v20 = vrot.slane %v9676_v54, 2  ;;  %v13978_v4 = vld [vmem:[#allocation17_spill] sm:$0xff] }
 0x2dd   :  { %v6001_v3 = vsel %vm1856_vm4, %v6000_v50, %v5999_v53  ;;  %v6006_v51 = vrot.slane %v9679_v43, 1  ;;  %v4889_v55 = vrot.slane %v9684_v56, 2  ;;  %v4891_v49 = vrot.slane %v9690_v17, 1 }
 0x2de   :  { %v6003_v33 = vsel %vm1859_vm5, %v6002_v18, %v6001_v3  ;;  %v4888_v52 = vsel %vm1859_vm5, %v4887_v58, %v4886_v39  ;;  %v9708_v59 = vadd.f32 %v2194_v5, %v2193_v30  ;;  %v1928_v35 = vmul.f32 %v9385_v26, %v13978_v4  ;;  %v13989_v26 = vld [vmem:[#allocation84_spill] sm:$0xff] }
 0x2df   :  { %v1969_v41 = vrot.slane %v9638_v23, 6  ;;  %v6005_v53 = vsel %vm1862_vm6, %v6004_v20, %v6003_v33  ;;  %v4890_v50 = vsel %vm1862_vm6, %v4889_v55, %v4888_v52  ;;  %v1968_v61 = vsel %vm1847_vm1, %v1967_v29, %v1922_v25  ;;  %v13979_v23 = vld [vmem:[#allocation194_spill] sm:$0xff] }
 0x2e0   :  { %v6007_v8 = vsel %vm1865_vm7, %v6006_v51, %v6005_v53  ;;  %v4892_v18 = vsel %vm1865_vm7, %v4891_v49, %v4890_v50  ;;  %v2230_v39 = vrot.slane %v2229_v14, 1  ;;  %v2246_v5 = vrot.slane %v9647_v6, 2  ;;  %v13982_v50 = vld [vmem:[#allocation125_spill] sm:$0xff] }
 0x2e1   :  { %6152 = vst [vmem:[%s12761_s7 + $0xe0] sm:$0xff] %v6007_v8  ;;  %v4901_v30 = vrot.slane %v4892_v18, 4  ;;  %v2264_v58 = vrot.slane %v2263_v15, 2  ;;  %v2277_v20 = vmax.f32 %v9671_v37, %v9695_v62  ;;  %v13980_v3 = vrot.slane %v13965_v11, 7  ;;  %v13983_v11 = vld [vmem:[#allocation73_spill] sm:$0xff] }
 0x2e2   :  { %v13981_v25 = vrot.slane %v9609_v44, 1  ;;  %v9732_v55 = vadd.f32 %v2212_v22, %v2211_v9  ;;  %v2278_v8 = vmax.f32 %v9688_v1, %v9708_v59  ;;  %v9736_v52 = vadd.f32 %v2230_v39, %v2229_v14 }
 0x2e3   :  { %v4478_v29 = vsel %vm1847_vm1, %v13980_v3, %v13979_v23  ;;  %v4902_v33 = vadd.f32 %v4901_v30, %v4892_v18  ;;  %v2247_v49 = vadd.f32 %v2246_v5, %v9647_v6  ;;  %v2265_v53 = vadd.f32 %v2264_v58, %v2263_v15  ;;  %v13984_v18 = vld [vmem:[#allocation183_spill] sm:$0xff]  ;;  %v13986_v6 = vld [vmem:[#allocation198_spill] sm:$0xff] }
 0x2e4   :  { %v1966_v51 = vsel %vm1865_vm7, %v13981_v25, %v9632_v48  ;;  %v1930_v4 = vmul.f32 %v13983_v11, %v13982_v50  ;;  %v1970_v23 = vsel %vm1850_vm2, %v1969_v41, %v1968_v61  ;;  %v1971_v3 = vrot.slane %v1928_v35, 5  ;;  %v13987_v5 = vld [vmem:[#allocation166_spill] sm:$0xff] }
 0x2e5   :  { %v2279_v44 = vmax.f32 %v2277_v20, %v9732_v55  ;;  %v4903_v48 = vrot.slane %v4902_v33, 2  ;;  %v2248_v9 = vrot.slane %v2247_v49, 1  ;;  %v2266_v22 = vrot.slane %v2265_v53, 1  ;;  %v13988_v58 = vld [vmem:[#allocation190_spill] sm:$0xff] }
 0x2e6   :  { %v2280_v25 = vmax.f32 %v2278_v8, %v9736_v52  ;;  %v4440_v14 = vmul.f32 %v13984_v18, %v13982_v50  ;;  %v13985_v39 = vrot.slane %v13966_v13, 6  ;;  %v4481_v30 = vrot.slane %v13986_v6, 5 }
 0x2e7   :  { %v1932_v41 = vmul.f32 %v13988_v58, %v13987_v5  ;;  %v1972_v35 = vsel %vm1853_vm3, %v1971_v3, %v1970_v23  ;;  %v4904_v61 = vadd.f32 %v4903_v48, %v4902_v33  ;;  %v2249_v20 = vadd.f32 %v2248_v9, %v2247_v49  ;;  %v13991_v58 = vld [vmem:[#allocation164_spill] sm:$0xff]  ;;  %v13994_v48 = vld [vmem:[#allocation167_spill] sm:$0xff]  ;;  %v13995_v9 = vld [vmem:[#allocation186_spill] sm:$0xff] }
 0x2e8   :  { %v4480_v15 = vsel %vm1850_vm2, %v13985_v39, %v4478_v29  ;;  %v9753_v11 = vadd.f32 %v2266_v22, %v2265_v53  ;;  %v4497_v8 = vrot.slane %v13989_v26, 1  ;;  %v4442_v18 = vmul.f32 %v13990_v0, %v13987_v5  ;;  %v13993_v49 = vld [vmem:[#allocation192_spill] sm:$0xff] }
 0x2e9   :  { %v1983_v50 = vrot.slane %v1966_v51, 4  ;;  %v1973_v13 = vrot.slane %v1930_v4, 4  ;;  %v4482_v29 = vsel %vm1853_vm3, %v4481_v30, %v4480_v15  ;;  %v4905_v39 = vrot.slane %v4904_v61, 1 }
 0x2ea   :  { %v2281_v6 = vmax.f32 %v2279_v44, %v2249_v20  ;;  %v2282_v60 = vmax.f32 %v2280_v25, %v9753_v11  ;;  %v4444_v23 = vmul.f32 %v13992_v40, %v13991_v58  ;;  %v4483_v33 = vrot.slane %v4440_v14, 4  ;;  %v13996_v25 = vld [vmem:[#allocation193_spill] sm:$0xff] }
 0x2eb   :  { %v1934_v53 = vmul.f32 %v13993_v49, %v13991_v58  ;;  %v1974_v3 = vsel %vm1856_vm4, %v1973_v13, %v1972_v35  ;;  %v4446_v22 = vmul.f32 %v13995_v9, %v13994_v48  ;;  %v1975_v0 = vrot.slane %v1932_v41, 3  ;;  %v9832_v9 = vld [vmem:[%s12761_s7 + $0x48] sm:$0xff] }
 0x2ec   :  { %v4906_v4 = vadd.f32 %v4905_v39, %v4904_v61  ;;  %v2283_v5 = vmax.f32 %v2281_v6, %v2282_v60  ;;  %v4484_v15 = vsel %vm1856_vm4, %v4483_v33, %v4482_v29  ;;  %v4485_v44 = vrot.slane %v4442_v18, 3  ;;  %v13999_v33 = vld [vmem:[#allocation78_spill] sm:$0xff] }
 0x2ed   :  { %v1984_v30 = vadd.f32 %v1983_v50, %v1966_v51  ;;  %v1936_v12 = vmul.f32 %v13996_v25, %v13994_v48  ;;  %v1976_v14 = vsel %vm1859_vm5, %v1975_v0, %v1974_v3  ;;  %v9775_v13 = vadd.f32 %v4497_v8, %v13989_v26  ;;  %v13998_v50 = vld [vmem:[#allocation75_spill] sm:$0xff]  ;;  %v14022_v25 = vld [vmem:[#allocation66_spill] sm:$0xff] }
 0x2ee   :  { %v4914_v40 = vrot.slane %v4906_v4, %v13756_v28  ;;  %v2291_v58 = vsub.f32 %v9671_v37, %v2283_v5  ;;  %v2293_v35 = vsub.f32 %v9688_v1, %v2283_v5  ;;  %v4487_v41 = vrot.slane %v4444_v23, 2 }
 0x2ef   :  { %13997 = vst [vmem:[#allocation194_spill] sm:$0xff] %v9775_v13  ;;  %v1977_v60 = vrot.slane %v1934_v53, 2  ;;  %v2295_v61 = vsub.f32 %v9695_v62, %v2283_v5  ;;  %v4486_v51 = vsel %vm1859_vm5, %v4485_v44, %v4484_v15  ;;  %v4935_v18 = vmul.f32 %v9641_v31, %v13998_v50 }
 0x2f0   :  { %6539 = vrcp.f32 %v4914_v40  ;;  %v2297_v0 = vsub.f32 %v9708_v59, %v2283_v5  ;;  %v1985_v29 = vrot.slane %v1984_v30, 2  ;;  %v2299_v1 = vsub.f32 %v9732_v55, %v2283_v5 }
 0x2f1   :  { %v1978_v37 = vsel %vm1862_vm6, %v1977_v60, %v1976_v14  ;;  %v2307_v39 = vmul.f32 1.442695, %v2291_v58  ;;  %v4489_v26 = vrot.slane %v4446_v22, 1  ;;  %v1979_v8 = vrot.slane %v1936_v12, 1  ;;  %v14001_v22 = vld [vmem:[#allocation72_spill] sm:$0xff] }
 0x2f2   :  { %v2301_v6 = vsub.f32 %v9736_v52, %v2283_v5  ;;  %v2311_v23 = vmul.f32 1.442695, %v2293_v35  ;;  %v4488_v62 = vsel %vm1862_vm6, %v4487_v41, %v4486_v51  ;;  %v4937_v53 = vmul.f32 %v9650_v10, %v13999_v33  ;;  %v14021_v10 = vld [vmem:[#allocation65_spill] sm:$0xff] }
 0x2f3   :  { %v2303_v3 = vsub.f32 %v2249_v20, %v2283_v5  ;;  %v2315_v40 = vmul.f32 1.442695, %v2295_v61  ;;  %v1980_v59 = vsel %vm1865_vm7, %v1979_v8, %v1978_v37  ;;  %v4965_v4 = vrot.slane %v4935_v18, 7  ;;  %v14002_v61 = vld [vmem:[#allocation80_spill] sm:$0xff] }
 0x2f4   :  { %v2305_v15 = vsub.f32 %v9753_v11, %v2283_v5  ;;  %v2319_v44 = vmul.f32 1.442695, %v2297_v0  ;;  %v1986_v58 = vadd.f32 %v1985_v29, %v1984_v30  ;;  %6541 = vpow2.f32 %v2307_v39  ;;  %v14003_v0 = vld [vmem:[#allocation42_spill] sm:$0xff]  ;;  %v14004_v29 = vld [vmem:[#allocation179_spill] sm:$0xff] }
 0x2f5   :  { %v2323_v12 = vmul.f32 1.442695, %v2299_v1  ;;  %v9792_v52 = vsel %vm1865_vm7, %v4489_v26, %v4488_v62  ;;  %v4933_v14 = vmul.f32 %v9660_v63, %v14001_v22  ;;  %6543 = vpow2.f32 %v2311_v23  ;;  %v14005_v1 = vld [vmem:[#allocation43_spill] sm:$0xff]  ;;  %v14006_v26 = vld [vmem:[#allocation45_spill] sm:$0xff]  ;;  %14013 = vst [vmem:[#allocation179_spill] sm:$0xff] %v9832_v9  ;;  %v14020_v63 = vld [vmem:[#allocation64_spill] sm:$0xff] }
 0x2f6   :  { %14000 = vst [vmem:[#allocation198_spill] sm:$0xff] %v9792_v52  ;;  %v2327_v20 = vmul.f32 1.442695, %v2301_v6  ;;  %v1989_v35 = vrot.slane %v1980_v59, 4  ;;  %v4967_v41 = vrot.slane %v4937_v53, 6  ;;  %6545 = vpow2.f32 %v2315_v40  ;;  %v14007_v6 = vld [vmem:[#allocation46_spill] sm:$0xff] }
 0x2f7   :  { %v2331_v60 = vmul.f32 1.442695, %v2303_v3  ;;  %v4939_v11 = vmul.f32 %v9655_v45, %v14002_v61  ;;  %v4966_v5 = vsel %vm1847_vm1, %v4965_v4, %v4933_v14  ;;  %6547 = vpow2.f32 %v2319_v44  ;;  %v14008_v62 = vld [vmem:[#allocation47_spill] sm:$0xff]  ;;  %v14010_v44 = vld [vmem:[#allocation48_spill] sm:$0xff] }
 0x2f8   :  { %v2335_v30 = vmul.f32 1.442695, %v2305_v15  ;;  %v1987_v18 = vrot.slane %v1986_v58, 1  ;;  %v2070_v37 = vmul.f32 %v14004_v29, %v14003_v0  ;;  %6549 = vpow2.f32 %v2323_v12  ;;  %v14009_v3 = vld [vmem:[#allocation83_spill] sm:$0xff] }
 0x2f9   :  { %v2078_v39 = vmul.f32 %v14004_v29, %v14005_v1  ;;  %v9806_v8 = vmul.f32 %v14004_v29, %v14006_v26  ;;  %v9810_v23 = vmul.f32 %v14004_v29, %v14007_v6  ;;  %6551 = vpow2.f32 %v2327_v20  ;;  %v14012_v20 = vld [vmem:[#allocation49_spill] sm:$0xff] }
 0x2fa   :  { %v9814_v53 = vmul.f32 %v14004_v29, %v14008_v62  ;;  %v4941_v40 = vmul.f32 %v9663_v36, %v14009_v3  ;;  %v4968_v4 = vsel %vm1850_vm2, %v4967_v41, %v4966_v5  ;;  %6553 = vpow2.f32 %v2331_v60  ;;  %v14015_v41 = vld [vmem:[#allocation210_spill] sm:$0xff]  ;;  %v14017_v5 = vld [vmem:[#allocation169_spill] sm:$0xff] }
 0x2fb   :  { %v1990_v15 = vadd.f32 %v1989_v35, %v1980_v59  ;;  %v9821_v12 = vmul.f32 %v14004_v29, %v14010_v44  ;;  %v4969_v14 = vrot.slane %v4939_v11, 5  ;;  %6555 = vpow2.f32 %v2335_v30  ;;  %v14014_v35 = vld [vmem:[#allocation59_spill] sm:$0xff]  ;;  %v14016_v11 = vld [vmem:[#allocation60_spill] sm:$0xff]  ;;  %v14019_v36 = vld [vmem:[#allocation61_spill] sm:$0xff] }
 0x2fc   :  { %v9823_v55 = vadd.f32 %v1987_v18, %v1986_v58  ;;  %v9827_v52 = vmul.f32 %v14004_v29, %v14012_v20  ;;  %v9836_v59 = vmul.f32 %v9832_v9, %v14004_v29  ;;  %v2072_v60 = vmul.f32 %v14015_v41, %v14014_v35 }
 0x2fd   :  { %v6540_v51 = vpop.eup %6539  ;;  %v2080_v58 = vmul.f32 %v14015_v41, %v14016_v11  ;;  %v4943_v30 = vmul.f32 %v9667_v46, %v14017_v5  ;;  %v4970_v18 = vsel %vm1853_vm3, %v4969_v14, %v4968_v4  ;;  %v2088_v45 = vmul.f32 %v14015_v41, %v14019_v36  ;;  %v14023_v4 = vld [vmem:[#allocation67_spill] sm:$0xff] }
 0x2fe   :  { %14011 = vst [vmem:[#allocation84_spill] sm:$0xff] %v9823_v55  ;;  %v9846_v13 = vmul.f32 %v6540_v51, %v9616_v21  ;;  %v2096_v29 = vmul.f32 %v14015_v41, %v14020_v63  ;;  %v9854_v31 = vmul.f32 %v14015_v41, %v14021_v10  ;;  %v4971_v55 = vrot.slane %v4941_v40, 4 }
 0x2ff   :  { %v1991_v48 = vrot.slane %v1990_v15, 2  ;;  %v9858_v46 = vmul.f32 %v14015_v41, %v14022_v25  ;;  %v9862_v21 = vmul.f32 %v14015_v41, %v14023_v4  ;;  %v9865_v14 = vmul.f32 %v6540_v51, %v9627_v7 }
 0x300   :  { %14018 = vst [vmem:[#allocation210_spill] sm:$0xff] %v9846_v13  ;;  %v4945_v49 = vmul.f32 %v9676_v54, %v13960_v32  ;;  %v4947_v9 = vmul.f32 %v9679_v43, %v13962_v34  ;;  %v4972_v40 = vsel %vm1856_vm4, %v4971_v55, %v4970_v18  ;;  %v9873_v5 = vmul.f32 %v6540_v51, %v9643_v19  ;;  %v9889_v55 = vld [vmem:[%s12761_s7 + $0x58] sm:$0xff] }
 0x301   :  { %14024 = vst [vmem:[#allocation211_spill] sm:$0xff] %v9865_v14  ;;  %v9875_v3 = vpop.eup %6541  ;;  %v4973_v22 = vrot.slane %v4943_v30, 3  ;;  %v9878_v61 = vmul.f32 %v6540_v51, %v9621_v47  ;;  %v9881_v7 = vmul.f32 %v6540_v51, %v9657_v2  ;;  %v6008_v33 = vrot.slane %v9846_v13, 7  ;;  %14028 = vst [vmem:[#allocation215_spill] sm:$0xff] %v9889_v55 }
 0x302   :  { %14025 = vst [vmem:[#allocation212_spill] sm:$0xff] %v9873_v5  ;;  %v9884_v54 = vpop.eup %6543  ;;  %v2128_v19 = vmul.f32 %v9889_v55, %v14015_v41  ;;  %v9893_v18 = vadd.f32 %v2072_v60, %v2070_v37  ;;  %v9895_v30 = vadd.f32 %v2080_v58, %v2078_v39  ;;  %v9898_v47 = vmul.f32 %v6540_v51, %v9673_v27  ;;  %v14044_v55 = vld [vmem:[#allocation18_spill] sm:$0xff] }
 0x303   :  { %14026 = vst [vmem:[#allocation213_spill] sm:$0xff] %v9878_v61  ;;  %14027 = vst [vmem:[#allocation214_spill] sm:$0xff] %v9881_v7  ;;  %v9900_v2 = vpop.eup %6545  ;;  %v4974_v43 = vsel %vm1859_vm5, %v4973_v22, %v4972_v40  ;;  %v9904_v13 = vmul.f32 %v6540_v51, %v9684_v56  ;;  %v6009_v34 = vsel %vm1847_vm1, %v6008_v33, %v9878_v61  ;;  %v6010_v32 = vrot.slane %v9865_v14, 6 }
 0x304   :  { %14029 = vst [vmem:[#allocation216_spill] sm:$0xff] %v9898_v47  ;;  %v9909_v41 = vpop.eup %6547  ;;  %v1992_v37 = vadd.f32 %v1991_v48, %v1990_v15  ;;  %v4975_v39 = vrot.slane %v4945_v49, 2  ;;  %v9912_v60 = vmul.f32 %v6540_v51, %v9690_v17  ;;  %v6012_v27 = vrot.slane %v9873_v5, 5 }
 0x305   :  { %14030 = vst [vmem:[#allocation217_spill] sm:$0xff] %v9904_v13  ;;  %14031 = vst [vmem:[#allocation218_spill] sm:$0xff] %v9909_v41  ;;  %v9915_v58 = vpop.eup %6549  ;;  %v4977_v22 = vrot.slane %v4947_v9, 1  ;;  %v6011_v56 = vsel %vm1850_vm2, %v6010_v32, %v6009_v34  ;;  %v6014_v40 = vrot.slane %v9881_v7, 4  ;;  %v2355_v33 = vrot.slane %v9884_v54, 7 }
 0x306   :  { %14032 = vst [vmem:[#allocation219_spill] sm:$0xff] %v9912_v60  ;;  %14033 = vst [vmem:[#allocation220_spill] sm:$0xff] %v9915_v58  ;;  %v9920_v61 = vpop.eup %6551  ;;  %v4976_v14 = vsel %vm1862_vm6, %v4975_v39, %v4974_v43  ;;  %v6013_v49 = vsel %vm1853_vm3, %v6012_v27, %v6011_v56  ;;  %v6016_v17 = vrot.slane %v9898_v47, 3  ;;  %v2357_v48 = vrot.slane %v9900_v2, 6 }
 0x307   :  { %14034 = vst [vmem:[#allocation221_spill] sm:$0xff] %v9920_v61  ;;  %v9926_v51 = vpop.eup %6553  ;;  %v6015_v9 = vsel %vm1856_vm4, %v6014_v40, %v6013_v49  ;;  %v6018_v32 = vrot.slane %v9904_v13, 2  ;;  %v2356_v34 = vsel %vm1847_vm1, %v2355_v33, %v9875_v3  ;;  %v2359_v15 = vrot.slane %v9909_v41, 5 }
 0x308   :  { %14035 = vst [vmem:[#allocation222_spill] sm:$0xff] %v9926_v51  ;;  %v9933_v7 = vpop.eup %6555  ;;  %v6017_v43 = vsel %vm1859_vm5, %v6016_v17, %v6015_v9  ;;  %v6020_v39 = vrot.slane %v9912_v60, 1  ;;  %v2358_v27 = vsel %vm1850_vm2, %v2357_v48, %v2356_v34  ;;  %v2361_v56 = vrot.slane %v9915_v58, 4  ;;  %v14038_v34 = vld [vmem:[#allocation195_spill] sm:$0xff] }
 0x309   :  { %14036 = vst [vmem:[#allocation223_spill] sm:$0xff] %v9933_v7  ;;  %v2178_v47 = vadd.f32 %v2088_v45, %v9806_v8  ;;  %v6019_v40 = vsel %vm1862_vm6, %v6018_v32, %v6017_v43  ;;  %v2360_v49 = vsel %vm1853_vm3, %v2359_v15, %v2358_v27  ;;  %v2363_v33 = vrot.slane %v9920_v61, 3  ;;  %v14037_v32 = vld [vmem:[#allocation10_spill] sm:$0xff]  ;;  %v14040_v43 = vld [vmem:[#allocation13_spill] sm:$0xff] }
 0x30a   :  { %v4978_v13 = vsel %vm1865_vm7, %v4977_v22, %v4976_v14  ;;  %v6021_v5 = vsel %vm1865_vm7, %v6020_v39, %v6019_v40  ;;  %v2362_v17 = vsel %vm1856_vm4, %v2361_v56, %v2360_v49  ;;  %v2365_v9 = vrot.slane %v9926_v51, 2  ;;  %v14039_v22 = vld [vmem:[#allocation12_spill] sm:$0xff] }
 0x30b   :  { %v1993_v60 = vrot.slane %v1992_v37, 1  ;;  %v2196_v48 = vadd.f32 %v2096_v29, %v9810_v23  ;;  %6153 = vst [vmem:[%s12761_s7 + $0xe8] sm:$0xff] %v6021_v5  ;;  %v2364_v45 = vsel %vm1859_vm5, %v2363_v33, %v2362_v17  ;;  %v2367_v8 = vrot.slane %v9933_v7, 1  ;;  %v14041_v29 = vld [vmem:[#allocation14_spill] sm:$0xff]  ;;  %v14042_v5 = vld [vmem:[#allocation15_spill] sm:$0xff]  ;;  %v14043_v33 = vld [vmem:[#allocation16_spill] sm:$0xff] }
 0x30c   :  { %v2074_v14 = vmul.f32 %v14038_v34, %v14037_v32  ;;  %v2082_v15 = vmul.f32 %v14038_v34, %v14039_v22  ;;  %v2090_v39 = vmul.f32 %v14038_v34, %v14040_v43  ;;  %v2366_v27 = vsel %vm1862_vm6, %v2365_v9, %v2364_v45  ;;  %v14045_v7 = vld [vmem:[#allocation209_spill] sm:$0xff] }
 0x30d   :  { %v4995_v23 = vrot.slane %v4978_v13, 4  ;;  %v2098_v56 = vmul.f32 %v14038_v34, %v14041_v29  ;;  %v2106_v40 = vmul.f32 %v14038_v34, %v14042_v5  ;;  %v2368_v49 = vsel %vm1865_vm7, %v2367_v8, %v2366_v27 }
 0x30e   :  { %v2114_v17 = vmul.f32 %v14038_v34, %v14043_v33  ;;  %v2122_v50 = vmul.f32 %v14038_v34, %v14044_v55  ;;  %v2130_v51 = vmul.f32 %v14045_v7, %v14038_v34  ;;  %v2385_v61 = vrot.slane %v2368_v49, 4 }
 0x30f   :  { %v2214_v9 = vadd.f32 %v9854_v31, %v9814_v53  ;;  %v2232_v45 = vadd.f32 %v9858_v46, %v9821_v12  ;;  %v2250_v58 = vadd.f32 %v9862_v21, %v9827_v52  ;;  %v2268_v8 = vadd.f32 %v2128_v19, %v9836_v59  ;;  %v1015_v21 = vpop.f32.mrf.mxu1 }
 0x310   :  { %v9978_v27 = vadd.f32 %v1993_v60, %v1992_v37  ;;  %v9981_v41 = vadd.f32 %v9893_v18, %v2074_v14  ;;  %v9984_v55 = vadd.f32 %v9895_v30, %v2082_v15  ;;  %v2386_v7 = vadd.f32 %v2385_v61, %v2368_v49  ;;  %v14056_v18 = vld [vmem:[#allocation34_spill] sm:$0xff]  ;;  %v14058_v61 = vld [vmem:[#allocation35_spill] sm:$0xff] }
 0x311   :  { %v9986_v34 = vadd.f32 %v4995_v23, %v4978_v13  ;;  %v9988_v31 = vadd.f32 %v2178_v47, %v2090_v39  ;;  %v9990_v53 = vadd.f32 %v2196_v48, %v2098_v56  ;;  %v9992_v46 = vadd.f32 %v2214_v9, %v2106_v40  ;;  %v14060_v47 = vld [vmem:[#allocation37_spill] sm:$0xff]  ;;  %v14062_v60 = vld [vmem:[#allocation38_spill] sm:$0xff]  ;;  %v14064_v14 = vld [vmem:[#allocation39_spill] sm:$0xff] }
 0x312   :  { %14046 = vst [vmem:[#allocation195_spill] sm:$0xff] %v9978_v27  ;;  %14047 = vst [vmem:[#allocation209_spill] sm:$0xff] %v9981_v41  ;;  %v9994_v52 = vadd.f32 %v2232_v45, %v2114_v17  ;;  %v9996_v12 = vadd.f32 %v2250_v58, %v2122_v50  ;;  %v9998_v59 = vadd.f32 %v2268_v8, %v2130_v51  ;;  %v2387_v19 = vrot.slane %v2386_v7, 2  ;;  %v14066_v50 = vld [vmem:[#allocation40_spill] sm:$0xff]  ;;  %v14068_v51 = vld [vmem:[#allocation41_spill] sm:$0xff] }
 0x313   :  { %14048 = vst [vmem:[#allocation224_spill] sm:$0xff] %v9984_v55  ;;  %14049 = vst [vmem:[#allocation225_spill] sm:$0xff] %v9986_v34  ;;  %v10001_v30 = vmul.f32 %v1015_v21, %v14056_v18  ;;  %v10004_v13 = vmul.f32 %v1015_v21, %v14058_v61  ;;  %v10007_v37 = vmul.f32 %v1015_v21, %v14060_v47  ;;  %v10025_v40 = vld [vmem:[%s12761_s7 + $0x40] sm:$0xff]  ;;  %v14072_v17 = vld [vmem:[#allocation124_spill] sm:$0xff] }
 0x314   :  { %14050 = vst [vmem:[#allocation226_spill] sm:$0xff] %v9988_v31  ;;  %14051 = vst [vmem:[#allocation227_spill] sm:$0xff] %v9990_v53  ;;  %v10010_v48 = vmul.f32 %v1015_v21, %v14062_v60  ;;  %v10013_v15 = vmul.f32 %v1015_v21, %v14064_v14  ;;  %v10016_v58 = vmul.f32 %v1015_v21, %v14066_v50  ;;  %v14073_v27 = vld [vmem:[#allocation51_spill] sm:$0xff]  ;;  %v14083_v53 = vld [vmem:[#allocation5_spill] sm:$0xff] }
 0x315   :  { %14052 = vst [vmem:[#allocation228_spill] sm:$0xff] %v9992_v46  ;;  %14053 = vst [vmem:[#allocation229_spill] sm:$0xff] %v9994_v52  ;;  %v10019_v39 = vmul.f32 %v1015_v21, %v14068_v51  ;;  %v2388_v23 = vadd.f32 %v2387_v19, %v2386_v7  ;;  %v10028_v49 = vmul.f32 %v10025_v40, %v1015_v21  ;;  %v14075_v56 = vld [vmem:[#allocation3_spill] sm:$0xff]  ;;  %v14082_v46 = vld [vmem:[#allocation53_spill] sm:$0xff] }
 0x316   :  { %14054 = vst [vmem:[#allocation230_spill] sm:$0xff] %v9996_v12  ;;  %14055 = vst [vmem:[#allocation231_spill] sm:$0xff] %v9998_v59  ;;  %v1318_v9 = vmul.f32 %v14072_v17, %v14056_v18  ;;  %v1319_v45 = vmul.f32 %v14072_v17, %v14003_v0  ;;  %v14078_v18 = vld [vmem:[#allocation26_spill] sm:$0xff]  ;;  %v14080_v59 = vld [vmem:[#allocation4_spill] sm:$0xff] }
 0x317   :  { %14057 = vst [vmem:[#allocation232_spill] sm:$0xff] %v10001_v30  ;;  %14059 = vst [vmem:[#allocation233_spill] sm:$0xff] %v10004_v13  ;;  %v2389_v8 = vrot.slane %v2388_v23, 1  ;;  %v1326_v13 = vmul.f32 %v14072_v17, %v14058_v61  ;;  %v14081_v61 = vld [vmem:[#allocation27_spill] sm:$0xff]  ;;  %v14087_v41 = vld [vmem:[#allocation30_spill] sm:$0xff] }
 0x318   :  { %14061 = vst [vmem:[#allocation234_spill] sm:$0xff] %v10007_v37  ;;  %14063 = vst [vmem:[#allocation235_spill] sm:$0xff] %v10010_v48 }
 0x319   :  { %14065 = vst [vmem:[#allocation236_spill] sm:$0xff] %v10013_v15  ;;  %14067 = vst [vmem:[#allocation237_spill] sm:$0xff] %v10016_v58  ;;  %v14076_v58 = vld [vmem:[#allocation117_spill] sm:$0xff]  ;;  %v2390_v30 = vadd.f32 %v2389_v8, %v2388_v23 }
 0x31a   :  { %14069 = vst [vmem:[#allocation238_spill] sm:$0xff] %v10019_v39  ;;  %14070 = vst [vmem:[#allocation239_spill] sm:$0xff] %v10025_v40  ;;  %v14074_v39 = vld [vmem:[#allocation105_spill] sm:$0xff]  ;;  %v1322_v15 = vmul.f32 %v14076_v58, %v14075_v56  ;;  %v1323_v21 = vmul.f32 %v14076_v58, %v14037_v32  ;;  %v1331_v12 = vmul.f32 %v14076_v58, %v14039_v22 }
 0x31b   :  { %14071 = vst [vmem:[#allocation240_spill] sm:$0xff] %v10028_v49  ;;  %v1320_v7 = vmul.f32 %v14074_v39, %v14073_v27  ;;  %v1321_v19 = vmul.f32 %v14074_v39, %v14014_v35  ;;  %v14077_v49 = vld [vmem:[#allocation129_spill] sm:$0xff]  ;;  %v1327_v35 = vmul.f32 %v14072_v17, %v14005_v1  ;;  %v14079_v27 = vld [vmem:[#allocation52_spill] sm:$0xff]  ;;  %v1329_v32 = vmul.f32 %v14074_v39, %v14016_v11 }
 0x31c   :  { %v10044_v48 = vmul.f32 %v14077_v49, %v13884_v42  ;;  %v10048_v37 = vmul.f32 %v14077_v49, %v14078_v18  ;;  %v1328_v56 = vmul.f32 %v14074_v39, %v14079_v27  ;;  %v1330_v42 = vmul.f32 %v14076_v58, %v14080_v59 }
 0x31d   :  { %v1332_v52 = vmul.f32 %v14077_v49, %v13953_v16  ;;  %v1333_v23 = vmul.f32 %v14077_v49, %v14081_v61  ;;  %v2400_v8 = vrot.slane %v2390_v30, %v13756_v28  ;;  %v1334_v27 = vmul.f32 %v14072_v17, %v14060_v47  ;;  %v14084_v47 = vld [vmem:[#allocation29_spill] sm:$0xff]  ;;  %v14085_v61 = vld [vmem:[#allocation55_spill] sm:$0xff] }
 0x31e   :  { %v1335_v11 = vmul.f32 %v14072_v17, %v14006_v26  ;;  %v1336_v59 = vmul.f32 %v14074_v39, %v14082_v46  ;;  %v1337_v22 = vmul.f32 %v14074_v39, %v14019_v36  ;;  %v1338_v16 = vmul.f32 %v14076_v58, %v14083_v53 }
 0x31f   :  { %v1339_v31 = vmul.f32 %v14076_v58, %v14040_v43  ;;  %v1340_v30 = vmul.f32 %v14077_v49, %v13954_v57  ;;  %6557 = vrcp.f32 %v2400_v8  ;;  %v10083_v55 = vmul.f32 %v14077_v49, %v14084_v47  ;;  %v14086_v57 = vld [vmem:[#allocation7_spill] sm:$0xff] }
 0x320   :  { %v1342_v46 = vmul.f32 %v14072_v17, %v14062_v60  ;;  %v10089_v36 = vmul.f32 %v14072_v17, %v14007_v6  ;;  %v1344_v53 = vmul.f32 %v14074_v39, %v14085_v61  ;;  %v10095_v43 = vmul.f32 %v14074_v39, %v14020_v63 }
 0x321   :  { %v1346_v8 = vmul.f32 %v14076_v58, %v14086_v57  ;;  %v10101_v47 = vmul.f32 %v14076_v58, %v14041_v29  ;;  %v10105_v60 = vmul.f32 %v14077_v49, %v13955_v24  ;;  %v10109_v18 = vmul.f32 %v14077_v49, %v14087_v41  ;;  %v14088_v57 = vld [vmem:[#allocation56_spill] sm:$0xff] }
 0x322   :  { %v1350_v61 = vmul.f32 %v14072_v17, %v14064_v14  ;;  %v10115_v63 = vmul.f32 %v14072_v17, %v14008_v62  ;;  %v1352_v6 = vmul.f32 %v14074_v39, %v14088_v57  ;;  %v10121_v29 = vmul.f32 %v14074_v39, %v14021_v10  ;;  %v14089_v24 = vld [vmem:[#allocation8_spill] sm:$0xff]  ;;  %v14090_v57 = vld [vmem:[#allocation31_spill] sm:$0xff] }
 0x323   :  { %v10125_v26 = vmul.f32 %v14076_v58, %v14089_v24  ;;  %v1382_v41 = vadd.f32 %v1320_v7, %v1318_v9  ;;  %v10129_v1 = vmul.f32 %v14076_v58, %v14042_v5  ;;  %v1391_v14 = vadd.f32 %v1321_v19, %v1319_v45  ;;  %v14092_v7 = vld [vmem:[#allocation57_spill] sm:$0xff]  ;;  %v14095_v19 = vld [vmem:[#allocation24_spill] sm:$0xff] }
 0x324   :  { %v1400_v0 = vadd.f32 %v1328_v56, %v1326_v13  ;;  %v1409_v62 = vadd.f32 %v1329_v32, %v1327_v35  ;;  %v10133_v28 = vmul.f32 %v14077_v49, %v13956_v38  ;;  %v10137_v10 = vmul.f32 %v14077_v49, %v14090_v57  ;;  %v14093_v32 = vld [vmem:[#allocation9_spill] sm:$0xff] }
 0x325   :  { %v1358_v24 = vmul.f32 %v14072_v17, %v14066_v50  ;;  %v1418_v34 = vadd.f32 %v1336_v59, %v1334_v27  ;;  %v10143_v9 = vmul.f32 %v14072_v17, %v14010_v44  ;;  %v1360_v13 = vmul.f32 %v14074_v39, %v14092_v7  ;;  %v14096_v59 = vld [vmem:[#allocation32_spill] sm:$0xff] }
 0x326   :  { %14091 = vst [vmem:[#allocation124_spill] sm:$0xff] %v10137_v10  ;;  %v10149_v35 = vmul.f32 %v14074_v39, %v14022_v25  ;;  %v1362_v56 = vmul.f32 %v14076_v58, %v14093_v32  ;;  %v10155_v45 = vmul.f32 %v14076_v58, %v14043_v33  ;;  %v10159_v27 = vmul.f32 %v14077_v49, %v14095_v19  ;;  %v14098_v19 = vld [vmem:[#allocation58_spill] sm:$0xff] }
 0x327   :  { %v10163_v38 = vmul.f32 %v14077_v49, %v14096_v59  ;;  %v1383_v5 = vadd.f32 %v1382_v41, %v1322_v15  ;;  %v1392_v50 = vadd.f32 %v1391_v14, %v1323_v21  ;;  %v1401_v7 = vadd.f32 %v1400_v0, %v1330_v42  ;;  %v14100_v41 = vld [vmem:[#allocation11_spill] sm:$0xff]  ;;  %v14101_v0 = vld [vmem:[#allocation25_spill] sm:$0xff] }
 0x328   :  { %14094 = vst [vmem:[#allocation105_spill] sm:$0xff] %v10155_v45  ;;  %v1410_v25 = vadd.f32 %v1409_v62, %v1331_v12  ;;  %v1427_v57 = vadd.f32 %v1337_v22, %v1335_v11  ;;  %v1366_v32 = vmul.f32 %v14072_v17, %v14068_v51  ;;  %v10169_v33 = vmul.f32 %v14072_v17, %v14012_v20 }
 0x329   :  { %14097 = vst [vmem:[#allocation117_spill] sm:$0xff] %v10163_v38  ;;  %v1419_v44 = vadd.f32 %v1418_v34, %v1338_v16  ;;  %v1436_v10 = vadd.f32 %v1344_v53, %v1342_v46  ;;  %v1368_v45 = vmul.f32 %v14074_v39, %v14098_v19  ;;  %v10175_v59 = vmul.f32 %v14074_v39, %v14023_v4  ;;  %v10190_v16 = vld [vmem:[%s12761_s7 + $0x50] sm:$0xff]  ;;  %v10199_v34 = vld [vmem:[%s12761_s7 + $0x60] sm:$0xff] }
 0x32a   :  { %v1370_v42 = vmul.f32 %v14076_v58, %v14100_v41  ;;  %v10181_v62 = vmul.f32 %v14077_v49, %v14101_v0  ;;  %v10185_v11 = vmul.f32 %v10025_v40, %v14072_v17  ;;  %14102 = vst [vmem:[#allocation241_spill] sm:$0xff] %v10190_v16  ;;  %v10194_v22 = vmul.f32 %v10190_v16, %v14074_v39  ;;  %v14115_v16 = vld [vmem:[#allocation187_spill] sm:$0xff]  ;;  %v14116_v40 = vld [vmem:[#allocation68_spill] sm:$0xff] }
 0x32b   :  { %14099 = vst [vmem:[#allocation129_spill] sm:$0xff] %v10175_v59  ;;  %14103 = vst [vmem:[#allocation242_spill] sm:$0xff] %v10199_v34  ;;  %v10203_v53 = vmul.f32 %v10199_v34, %v14076_v58  ;;  %v10206_v46 = vadd.f32 %v1383_v5, %v10044_v48  ;;  %v10209_v12 = vadd.f32 %v1392_v50, %v10048_v37 }
 0x32c   :  { %v10211_v14 = vadd.f32 %v1401_v7, %v1332_v52  ;;  %v10213_v15 = vadd.f32 %v1410_v25, %v1333_v23  ;;  %v1428_v21 = vadd.f32 %v1427_v57, %v1339_v31  ;;  %v6558_v0 = vpop.eup %6557  ;;  %v10215_v41 = vadd.f32 %v1419_v44, %v1340_v30  ;;  %v14104_v52 = vld [vmem:[#allocation218_spill] sm:$0xff]  ;;  %v14105_v25 = vld [vmem:[#allocation220_spill] sm:$0xff]  ;;  %v14106_v44 = vld [vmem:[#allocation221_spill] sm:$0xff] }
 0x32d   :  { %v1437_v4 = vadd.f32 %v1436_v10, %v1346_v8  ;;  %v1454_v51 = vadd.f32 %v1352_v6, %v1350_v61  ;;  %v1472_v19 = vadd.f32 %v1360_v13, %v1358_v24  ;;  %v10218_v20 = vmul.f32 %v6558_v0, %v9875_v3  ;;  %v14107_v10 = vld [vmem:[#allocation222_spill] sm:$0xff]  ;;  %v14108_v6 = vld [vmem:[#allocation223_spill] sm:$0xff]  ;;  %v14111_v23 = vld [vmem:[#allocation80_spill] sm:$0xff] }
 0x32e   :  { %v10221_v5 = vmul.f32 %v6558_v0, %v9884_v54  ;;  %v10224_v37 = vmul.f32 %v6558_v0, %v9900_v2  ;;  %v10227_v48 = vmul.f32 %v6558_v0, %v14104_v52  ;;  %v10230_v57 = vmul.f32 %v6558_v0, %v14105_v25  ;;  %v14109_v54 = vld [vmem:[#allocation75_spill] sm:$0xff]  ;;  %v14110_v2 = vld [vmem:[#allocation78_spill] sm:$0xff]  ;;  %v14112_v7 = vld [vmem:[#allocation72_spill] sm:$0xff] }
 0x32f   :  { %v10233_v31 = vmul.f32 %v6558_v0, %v14106_v44  ;;  %v10236_v24 = vmul.f32 %v6558_v0, %v14107_v10  ;;  %v10239_v3 = vmul.f32 %v6558_v0, %v14108_v6  ;;  %v1385_v8 = vrot.slane %v10206_v46, 4  ;;  %v14113_v52 = vld [vmem:[#allocation83_spill] sm:$0xff]  ;;  %v14114_v10 = vld [vmem:[#allocation169_spill] sm:$0xff] }
 0x330   :  { %v2425_v61 = vmul.f32 %v10221_v5, %v14109_v54  ;;  %v2427_v50 = vmul.f32 %v10224_v37, %v14110_v2  ;;  %v2429_v30 = vmul.f32 %v10227_v48, %v14111_v23  ;;  %v2423_v13 = vmul.f32 %v10218_v20, %v14112_v7 }
 0x331   :  { %v2431_v25 = vmul.f32 %v10230_v57, %v14113_v52  ;;  %v1438_v0 = vadd.f32 %v1437_v4, %v10105_v60  ;;  %v1490_v44 = vadd.f32 %v1368_v45, %v1366_v32  ;;  %v2433_v6 = vmul.f32 %v10233_v31, %v14114_v10 }
 0x332   :  { %v2455_v54 = vrot.slane %v2425_v61, 7  ;;  %v2457_v34 = vrot.slane %v2427_v50, 6  ;;  %v5764_v2 = vrot.slane %v10221_v5, 7  ;;  %v2435_v23 = vmul.f32 %v10236_v24, %v14115_v16 }
 0x333   :  { %v2437_v38 = vmul.f32 %v10239_v3, %v14116_v40  ;;  %v1455_v7 = vadd.f32 %v1454_v51, %v10125_v26  ;;  %v1473_v59 = vadd.f32 %v1472_v19, %v1362_v56  ;;  %v2459_v4 = vrot.slane %v2429_v30, 5 }
 0x334   :  { %v2456_v52 = vsel %vm1847_vm1, %v2455_v54, %v2423_v13  ;;  %v5765_v60 = vsel %vm1847_vm1, %v5764_v2, %v10218_v20  ;;  %v5766_v32 = vrot.slane %v10224_v37, 6  ;;  %v2461_v61 = vrot.slane %v2431_v25, 4 }
 0x335   :  { %v2458_v45 = vsel %vm1850_vm2, %v2457_v34, %v2456_v52  ;;  %v5768_v50 = vrot.slane %v10227_v48, 5  ;;  %v1491_v16 = vadd.f32 %v1490_v44, %v1370_v42  ;;  %v2463_v40 = vrot.slane %v2433_v6, 3 }
 0x336   :  { %v2460_v10 = vsel %vm1853_vm3, %v2459_v4, %v2458_v45  ;;  %v5767_v26 = vsel %vm1850_vm2, %v5766_v32, %v5765_v60  ;;  %v5770_v51 = vrot.slane %v10230_v57, 4  ;;  %v2465_v19 = vrot.slane %v2435_v23, 2 }
 0x337   :  { %v2462_v56 = vsel %vm1856_vm4, %v2461_v61, %v2460_v10  ;;  %v5769_v54 = vsel %vm1853_vm3, %v5768_v50, %v5767_v26  ;;  %v5772_v2 = vrot.slane %v10233_v31, 3  ;;  %v2467_v30 = vrot.slane %v2437_v38, 1 }
 0x338   :  { %v2464_v34 = vsel %vm1859_vm5, %v2463_v40, %v2462_v56  ;;  %v5771_v13 = vsel %vm1856_vm4, %v5770_v51, %v5769_v54  ;;  %v5774_v42 = vrot.slane %v10236_v24, 2  ;;  %v5776_v44 = vrot.slane %v10239_v3, 1  ;;  %v14119_v56 = vld [vmem:[#allocation33_spill] sm:$0xff] }
 0x339   :  { %v2466_v52 = vsel %vm1862_vm6, %v2465_v19, %v2464_v34  ;;  %v5773_v25 = vsel %vm1859_vm5, %v5772_v2, %v5771_v13  ;;  %v1429_v10 = vadd.f32 %v1428_v21, %v10083_v55  ;;  %v1394_v40 = vrot.slane %v10209_v12, 4  ;;  %v14117_v55 = vld [vmem:[#allocation18_spill] sm:$0xff] }
 0x33a   :  { %v10281_v23 = vsel %vm1865_vm7, %v2467_v30, %v2466_v52  ;;  %v5775_v6 = vsel %vm1862_vm6, %v5774_v42, %v5773_v25  ;;  %v1456_v38 = vadd.f32 %v1455_v7, %v10133_v28  ;;  %v1403_v60 = vrot.slane %v10211_v14, 4  ;;  %v14118_v7 = vld [vmem:[#allocation199_spill] sm:$0xff] }
 0x33b   :  { %v5777_v4 = vsel %vm1865_vm7, %v5776_v44, %v5775_v6  ;;  %v1412_v32 = vrot.slane %v10213_v15, 4  ;;  %v1474_v45 = vadd.f32 %v1473_v59, %v10159_v27  ;;  %v1371_v21 = vmul.f32 %v14076_v58, %v14117_v55  ;;  %v14230_v55 = vld [vmem:[#allocation77_spill] sm:$0xff] }
 0x33c   :  { %6142 = vst [vmem:[%s12761_s7 + $0x90] sm:$0xff] %v5777_v4  ;;  %v1421_v61 = vrot.slane %v10215_v41, 4  ;;  %v1439_v50 = vrot.slane %v1438_v0, 4  ;;  %v1492_v28 = vadd.f32 %v1491_v16, %v10181_v62  ;;  %v1380_v26 = vmul.f32 %v14118_v7, %v14077_v49 }
 0x33d   :  { %v1386_v51 = vadd.f32 %v1385_v8, %v10206_v46  ;;  %v1445_v27 = vadd.f32 %v10095_v43, %v10089_v36  ;;  %v1508_v59 = vadd.f32 %v10194_v22, %v10185_v11  ;;  %v10306_v19 = vmul.f32 %v14077_v49, %v14119_v56  ;;  %v14120_v36 = vld [vmem:[#allocation179_spill] sm:$0xff] }
 0x33e   :  { %v1395_v54 = vadd.f32 %v1394_v40, %v10209_v12  ;;  %v1430_v2 = vrot.slane %v1429_v10, 4  ;;  %v1457_v34 = vrot.slane %v1456_v38, 4  ;;  %v1404_v62 = vadd.f32 %v1403_v60, %v10211_v14 }
 0x33f   :  { %v1413_v16 = vadd.f32 %v1412_v32, %v10213_v15  ;;  %v1475_v30 = vrot.slane %v1474_v45, 4  ;;  %v1509_v46 = vadd.f32 %v1508_v59, %v10203_v53  ;;  %v10314_v43 = vmul.f32 %v14120_v36, %v14072_v17 }
 0x340   :  { %v1422_v11 = vadd.f32 %v1421_v61, %v10215_v41  ;;  %v1440_v22 = vadd.f32 %v1439_v50, %v1438_v0  ;;  %v1493_v8 = vrot.slane %v1492_v28, 4  ;;  %v1387_v13 = vrot.slane %v1386_v51, 2  ;;  %v14121_v41 = vld [vmem:[#allocation215_spill] sm:$0xff] }
 0x341   :  { %v1446_v12 = vadd.f32 %v1445_v27, %v10101_v47  ;;  %v1463_v42 = vadd.f32 %v10121_v29, %v10115_v63  ;;  %v1510_v14 = vadd.f32 %v1509_v46, %v1380_v26  ;;  %v1396_v52 = vrot.slane %v1395_v54, 2 }
 0x342   :  { %v1431_v15 = vadd.f32 %v1430_v2, %v1429_v10  ;;  %v1458_v25 = vadd.f32 %v1457_v34, %v1456_v38  ;;  %v1481_v53 = vadd.f32 %v10149_v35, %v10143_v9  ;;  %v1405_v44 = vrot.slane %v1404_v62, 2  ;;  %v14122_v10 = vld [vmem:[#allocation129_spill] sm:$0xff] }
 0x343   :  { %v1414_v17 = vrot.slane %v1413_v16, 2  ;;  %v1476_v6 = vadd.f32 %v1475_v30, %v1474_v45  ;;  %v1511_v40 = vrot.slane %v1510_v14, 4  ;;  %v10324_v0 = vmul.f32 %v14121_v41, %v14074_v39  ;;  %v14123_v45 = vld [vmem:[#allocation105_spill] sm:$0xff] }
 0x344   :  { %v1423_v4 = vrot.slane %v1422_v11, 2  ;;  %v1441_v47 = vrot.slane %v1440_v22, 2  ;;  %v1494_v60 = vadd.f32 %v1493_v8, %v1492_v28  ;;  %v1447_v63 = vadd.f32 %v1446_v12, %v10109_v18 }
 0x345   :  { %v1464_v29 = vadd.f32 %v1463_v42, %v10129_v1  ;;  %v1499_v38 = vadd.f32 %v14122_v10, %v10169_v33  ;;  %v1512_v32 = vadd.f32 %v1511_v40, %v1510_v14  ;;  %v1388_v9 = vadd.f32 %v1387_v13, %v1386_v51  ;;  %v10334_v1 = vld [vmem:[%s12761_s7 + $0x68] sm:$0xff]  ;;  %v14124_v51 = vld [vmem:[#allocation124_spill] sm:$0xff] }
 0x346   :  { %v1432_v35 = vrot.slane %v1431_v15, 2  ;;  %v1459_v61 = vrot.slane %v1458_v25, 2  ;;  %v1482_v50 = vadd.f32 %v1481_v53, %v14123_v45  ;;  %v1397_v7 = vadd.f32 %v1396_v52, %v1395_v54 }
 0x347   :  { %v1406_v26 = vadd.f32 %v1405_v44, %v1404_v62  ;;  %v1415_v39 = vadd.f32 %v1414_v17, %v1413_v16  ;;  %v1477_v27 = vrot.slane %v1476_v6, 2  ;;  %v1424_v59 = vadd.f32 %v1423_v4, %v1422_v11  ;;  %v14125_v11 = vld [vmem:[#allocation117_spill] sm:$0xff] }
 0x348   :  { %v1442_v2 = vadd.f32 %v1441_v47, %v1440_v22  ;;  %v1495_v28 = vrot.slane %v1494_v60, 2  ;;  %v1513_v34 = vrot.slane %v1512_v32, 2  ;;  %v1379_v33 = vmul.f32 %v10334_v1, %v14076_v58  ;;  %v10345_v58 = vld [vmem:[%s12761_s7 + $0x78] sm:$0xff] }
 0x349   :  { %v1448_v18 = vrot.slane %v1447_v63, 4  ;;  %v1465_v30 = vadd.f32 %v1464_v29, %v14124_v51  ;;  %v1500_v46 = vadd.f32 %v1499_v38, %v1371_v21  ;;  %v1389_v54 = vrot.slane %v1388_v9, 1 }
 0x34a   :  { %v10339_v62 = vadd.f32 %v1432_v35, %v1431_v15  ;;  %v1460_v16 = vadd.f32 %v1459_v61, %v1458_v25  ;;  %v1483_v22 = vadd.f32 %v1482_v50, %v14125_v11  ;;  %v1398_v8 = vrot.slane %v1397_v7, 1 }
 0x34b   :  { %v1407_v13 = vrot.slane %v1406_v26, 1  ;;  %v1416_v12 = vrot.slane %v1415_v39, 1  ;;  %v1478_v42 = vadd.f32 %v1477_v27, %v1476_v6  ;;  %v1425_v14 = vrot.slane %v1424_v59, 1 }
 0x34c   :  { %v1443_v52 = vrot.slane %v1442_v2, 1  ;;  %v1496_v53 = vadd.f32 %v1495_v28, %v1494_v60  ;;  %v1514_v44 = vadd.f32 %v1513_v34, %v1512_v32  ;;  %v1381_v21 = vmul.f32 %v10345_v58, %v14077_v49  ;;  %v10355_v32 = vpop.permute.xlu0 %1527 }
 0x34d   :  { %v1449_v15 = vadd.f32 %v1448_v18, %v1447_v63  ;;  %v1466_v25 = vrot.slane %v1465_v30, 4  ;;  %v1501_v17 = vadd.f32 %v1500_v46, %v10306_v19  ;;  %v1390_v40 = vadd.f32 %v1389_v54, %v1388_v9 }
 0x34e   :  { %v1434_v4 = vrot.slane %v10339_v62, 1  ;;  %v1461_v6 = vrot.slane %v1460_v16, 1  ;;  %v1484_v47 = vrot.slane %v1483_v22, 4  ;;  %v10351_v29 = vadd.f32 %v1398_v8, %v1397_v7 }
 0x34f   :  { %v1408_v60 = vadd.f32 %v1407_v13, %v1406_v26  ;;  %v10353_v10 = vadd.f32 %v1416_v12, %v1415_v39  ;;  %v1479_v38 = vrot.slane %v1478_v42, 1  ;;  %v1426_v35 = vadd.f32 %v1425_v14, %v1424_v59 }
 0x350   :  { %v1444_v61 = vadd.f32 %v1443_v52, %v1442_v2  ;;  %v1497_v49 = vrot.slane %v1496_v53, 1  ;;  %v1515_v63 = vrot.slane %v1514_v44, 1  ;;  %v1450_v45 = vrot.slane %v1449_v15, 2 }
 0x351   :  { %v1467_v50 = vadd.f32 %v1466_v25, %v1465_v30  ;;  %v1502_v19 = vrot.slane %v1501_v17, 4  ;;  %v1529_v9 = vrot.slane %v10355_v32, 1  ;;  %v1462_v27 = vadd.f32 %v1461_v6, %v1460_v16 }
 0x352   :  { %v1485_v28 = vadd.f32 %v1484_v47, %v1483_v22  ;;  %v1530_v7 = vrot.slane %v10355_v32, 2  ;;  %v1531_v26 = vrot.slane %v10355_v32, 3  ;;  %v1480_v39 = vadd.f32 %v1479_v38, %v1478_v42 }
 0x353   :  { %v1517_v34 = vadd.f32 %v10324_v0, %v10314_v43  ;;  %v1532_v59 = vrot.slane %v10355_v32, 4  ;;  %v1533_v2 = vrot.slane %v10355_v32, 5  ;;  %v1498_v18 = vadd.f32 %v1497_v49, %v1496_v53 }
 0x354   :  { %v1516_v51 = vadd.f32 %v1515_v63, %v1514_v44  ;;  %v1534_v30 = vrot.slane %v10355_v32, 6  ;;  %v1535_v46 = vrot.slane %v10355_v32, 7  ;;  %v1451_v54 = vadd.f32 %v1450_v45, %v1449_v15 }
 0x355   :  { %v1468_v16 = vrot.slane %v1467_v50, 2  ;;  %v1503_v11 = vadd.f32 %v1502_v19, %v1501_v17  ;;  %v10368_v22 = vadd.f32 %v1529_v9, %v1408_v60  ;;  %v1486_v8 = vrot.slane %v1485_v28, 2 }
 0x356   :  { %v1518_v13 = vadd.f32 %v1517_v34, %v1379_v33  ;;  %v10372_v43 = vadd.f32 %v1530_v7, %v1426_v35  ;;  %v10376_v0 = vadd.f32 %v1531_v26, %v1444_v61  ;;  %v10379_v12 = vadd.f32 %v10355_v32, %v1390_v40 }
 0x357   :  { %14126 = vst [vmem:[#allocation218_spill] sm:$0xff] %v10368_v22  ;;  %v10383_v42 = vadd.f32 %v1532_v59, %v1462_v27  ;;  %v10387_v14 = vadd.f32 %v1533_v2, %v1480_v39  ;;  %v2499_v33 = vmul.f32 %v10221_v5, %v10368_v22  ;;  %v10393_v52 = vadd.f32 %v1534_v30, %v1498_v18 }
 0x358   :  { %14127 = vst [vmem:[#allocation220_spill] sm:$0xff] %v10372_v43  ;;  %14128 = vst [vmem:[#allocation221_spill] sm:$0xff] %v10376_v0  ;;  %v10397_v53 = vadd.f32 %v1535_v46, %v1516_v51  ;;  %v2501_v44 = vmul.f32 %v10224_v37, %v10372_v43  ;;  %v2503_v15 = vmul.f32 %v10227_v48, %v10376_v0  ;;  %v1504_v25 = vrot.slane %v1503_v11, 2 }
 0x359   :  { %14129 = vst [vmem:[#allocation222_spill] sm:$0xff] %v10379_v12  ;;  %14130 = vst [vmem:[#allocation223_spill] sm:$0xff] %v10383_v42  ;;  %v1519_v17 = vadd.f32 %v1518_v13, %v1381_v21  ;;  %v2497_v40 = vmul.f32 %v10218_v20, %v10379_v12  ;;  %v2505_v5 = vmul.f32 %v10230_v57, %v10383_v42  ;;  %v2529_v60 = vrot.slane %v2499_v33, 7  ;;  %v14139_v13 = vld [vmem:[#allocation102_spill] sm:$0xff] }
 0x35a   :  { %14131 = vst [vmem:[#allocation199_spill] sm:$0xff] %v10387_v14  ;;  %14132 = vst [vmem:[#allocation179_spill] sm:$0xff] %v10393_v52  ;;  %v2507_v6 = vmul.f32 %v10233_v31, %v10387_v14  ;;  %v2509_v47 = vmul.f32 %v10236_v24, %v10393_v52  ;;  %v2511_v37 = vmul.f32 %v10239_v3, %v10397_v53  ;;  %v2485_v48 = vrot.slane %v10281_v23, 4 }
 0x35b   :  { %14133 = vst [vmem:[#allocation215_spill] sm:$0xff] %v10397_v53  ;;  %v1435_v21 = vadd.f32 %v1434_v4, %v10339_v62  ;;  %v1452_v38 = vrot.slane %v1451_v54, 1  ;;  %v2531_v35 = vrot.slane %v2501_v44, 6  ;;  %v1469_v20 = vadd.f32 %v1468_v16, %v1467_v50  ;;  %v14134_v62 = vld [vmem:[#allocation92_spill] sm:$0xff]  ;;  %v14135_v4 = vld [vmem:[#allocation239_spill] sm:$0xff]  ;;  %v14136_v50 = vld [vmem:[#allocation113_spill] sm:$0xff] }
 0x35c   :  { %v1487_v61 = vadd.f32 %v1486_v8, %v1485_v28  ;;  %v2530_v57 = vsel %vm1847_vm1, %v2529_v60, %v2497_v40  ;;  %v2533_v49 = vrot.slane %v2503_v15, 5  ;;  %v1505_v63 = vadd.f32 %v1504_v25, %v1503_v11  ;;  %v14137_v28 = vld [vmem:[#allocation241_spill] sm:$0xff]  ;;  %v14138_v16 = vld [vmem:[#allocation119_spill] sm:$0xff]  ;;  %v14140_v44 = vld [vmem:[#allocation122_spill] sm:$0xff] }
 0x35d   :  { %v1520_v31 = vrot.slane %v1519_v17, 4  ;;  %v2532_v45 = vsel %vm1850_vm2, %v2531_v35, %v2530_v57  ;;  %v2535_v24 = vrot.slane %v2505_v5, 4  ;;  %v2537_v3 = vrot.slane %v2507_v6, 3  ;;  %v14141_v15 = vld [vmem:[#allocation242_spill] sm:$0xff]  ;;  %v14142_v40 = vld [vmem:[#allocation127_spill] sm:$0xff]  ;;  %v6753_v60 = vld [vmem:[%s12761_s7 + $0x70] sm:$0xff] }
 0x35e   :  { %v2534_v19 = vsel %vm1853_vm3, %v2533_v49, %v2532_v45  ;;  %v2539_v27 = vrot.slane %v2509_v47, 2  ;;  %v2541_v39 = vrot.slane %v2511_v37, 1  ;;  %v3129_v18 = vmul.f32 %v14135_v4, %v14134_v62  ;;  %v14143_v35 = vld [vmem:[#allocation131_spill] sm:$0xff]  ;;  %v14144_v45 = vld [vmem:[#allocation132_spill] sm:$0xff] }
 0x35f   :  { %v2536_v34 = vsel %vm1856_vm4, %v2535_v24, %v2534_v19  ;;  %v3131_v51 = vmul.f32 %v14137_v28, %v14136_v50  ;;  %v3132_v11 = vmul.f32 %v14121_v41, %v14138_v16  ;;  %v3130_v33 = vmul.f32 %v14120_v36, %v14139_v13  ;;  %v14145_v13 = vld [vmem:[#allocation118_spill] sm:$0xff] }
 0x360   :  { %v2538_v8 = vsel %vm1859_vm5, %v2537_v3, %v2536_v34  ;;  %v3133_v25 = vmul.f32 %v14141_v15, %v14140_v44  ;;  %v3134_v5 = vmul.f32 %v10334_v1, %v14142_v40  ;;  %v1470_v6 = vrot.slane %v1469_v20, 1  ;;  %v14146_v40 = vld [vmem:[#allocation146_spill] sm:$0xff] }
 0x361   :  { %v1488_v47 = vrot.slane %v1487_v61, 1  ;;  %v2540_v37 = vsel %vm1862_vm6, %v2539_v27, %v2538_v8  ;;  %v3135_v57 = vmul.f32 %v6753_v60, %v14143_v35  ;;  %v3136_v24 = vmul.f32 %v10345_v58, %v14144_v45  ;;  %v14148_v45 = vld [vmem:[#allocation151_spill] sm:$0xff] }
 0x362   :  { %v10438_v49 = vsel %vm1865_vm7, %v2541_v39, %v2540_v37  ;;  %v3263_v19 = vadd.f32 %v3131_v51, %v3129_v18  ;;  %v3272_v3 = vadd.f32 %v3132_v11, %v3130_v33  ;;  %v10443_v34 = vadd.f32 %v2485_v48, %v10281_v23  ;;  %v14147_v37 = vld [vmem:[#allocation142_spill] sm:$0xff]  ;;  %v14149_v51 = vld [vmem:[#allocation123_spill] sm:$0xff] }
 0x363   :  { %v1453_v62 = vadd.f32 %v1452_v38, %v1451_v54  ;;  %v1506_v50 = vrot.slane %v1505_v63, 1  ;;  %v1521_v27 = vadd.f32 %v1520_v31, %v1519_v17  ;;  %v3631_v44 = vmul.f32 %v14135_v4, %v14145_v13  ;;  %v14150_v54 = vld [vmem:[#allocation28_spill] sm:$0xff] }
 0x364   :  { %v3264_v16 = vadd.f32 %v3263_v19, %v3133_v25  ;;  %v3273_v8 = vadd.f32 %v3272_v3, %v3134_v5  ;;  %v3633_v39 = vmul.f32 %v14137_v28, %v14146_v40  ;;  %v3632_v35 = vmul.f32 %v14120_v36, %v14147_v37  ;;  %v14151_v4 = vld [vmem:[#allocation152_spill] sm:$0xff]  ;;  %v14152_v25 = vld [vmem:[#allocation133_spill] sm:$0xff]  ;;  %v14163_v40 = vld [vmem:[#allocation206_spill] sm:$0xff] }
 0x365   :  { %v3634_v18 = vmul.f32 %v14121_v41, %v14148_v45  ;;  %v3635_v23 = vmul.f32 %v14141_v15, %v14149_v51  ;;  %v3636_v17 = vmul.f32 %v10334_v1, %v14150_v54  ;;  %v1471_v48 = vadd.f32 %v1470_v6, %v1469_v20  ;;  %v14166_v54 = vld [vmem:[#allocation149_spill] sm:$0xff] }
 0x366   :  { %v1489_v38 = vadd.f32 %v1488_v47, %v1487_v61  ;;  %v3265_v31 = vadd.f32 %v3264_v16, %v3135_v57  ;;  %v3274_v11 = vadd.f32 %v3273_v8, %v3136_v24  ;;  %v3637_v33 = vmul.f32 %v6753_v60, %v14151_v4 }
 0x367   :  { %v3638_v28 = vmul.f32 %v10345_v58, %v14152_v25  ;;  %v3765_v5 = vadd.f32 %v3633_v39, %v3631_v44  ;;  %v3774_v36 = vadd.f32 %v3634_v18, %v3632_v35  ;;  %v1507_v19 = vadd.f32 %v1506_v50, %v1505_v63  ;;  %v14161_v50 = vld [vmem:[#allocation63_spill] sm:$0xff]  ;;  %v14164_v35 = vld [vmem:[#allocation168_spill] sm:$0xff] }
 0x368   :  { %v10462_v41 = vadd.f32 %v10355_v32, %v10351_v29  ;;  %v3266_v15 = vrot.slane %v3265_v31, 4  ;;  %v3275_v3 = vrot.slane %v3274_v11, 4  ;;  %v1522_v13 = vrot.slane %v1521_v27, 2  ;;  %v14165_v18 = vld [vmem:[#allocation207_spill] sm:$0xff] }
 0x369   :  { %v10467_v1 = vadd.f32 %v1529_v9, %v10353_v10  ;;  %v3766_v20 = vadd.f32 %v3765_v5, %v3635_v23  ;;  %v3775_v61 = vadd.f32 %v3774_v36, %v3636_v17  ;;  %v10471_v58 = vadd.f32 %v1530_v7, %v1435_v21  ;;  %v14160_v21 = vld [vmem:[#allocation165_spill] sm:$0xff]  ;;  %v14168_v5 = vld [vmem:[#allocation82_spill] sm:$0xff] }
 0x36a   :  { %14153 = vst [vmem:[#allocation129_spill] sm:$0xff] %v10462_v41  ;;  %v10475_v63 = vadd.f32 %v1531_v26, %v1453_v62  ;;  %v3267_v29 = vadd.f32 %v3266_v15, %v3265_v31  ;;  %v3276_v6 = vadd.f32 %v3275_v3, %v3274_v11  ;;  %v10479_v47 = vadd.f32 %v1532_v59, %v1471_v48  ;;  %v14167_v48 = vld [vmem:[#allocation208_spill] sm:$0xff] }
 0x36b   :  { %14154 = vst [vmem:[#allocation105_spill] sm:$0xff] %v10467_v1  ;;  %14155 = vst [vmem:[#allocation124_spill] sm:$0xff] %v10471_v58  ;;  %v10483_v10 = vadd.f32 %v1533_v2, %v1489_v38  ;;  %v3767_v9 = vadd.f32 %v3766_v20, %v3637_v33  ;;  %v3776_v60 = vadd.f32 %v3775_v61, %v3638_v28  ;;  %v14162_v2 = vld [vmem:[#allocation79_spill] sm:$0xff]  ;;  %v14170_v20 = vld [vmem:[#allocation70_spill] sm:$0xff] }
 0x36c   :  { %14156 = vst [vmem:[#allocation117_spill] sm:$0xff] %v10475_v63  ;;  %14157 = vst [vmem:[#allocation92_spill] sm:$0xff] %v10479_v47  ;;  %v10487_v7 = vadd.f32 %v1534_v30, %v1507_v19  ;;  %v1995_v26 = vmul.f32 %v14160_v21, %v10379_v12  ;;  %v3268_v57 = vrot.slane %v3267_v29, 2  ;;  %v3277_v24 = vrot.slane %v3276_v6, 2  ;;  %v14169_v19 = vld [vmem:[#allocation73_spill] sm:$0xff] }
 0x36d   :  { %14158 = vst [vmem:[#allocation239_spill] sm:$0xff] %v10483_v10  ;;  %v1523_v62 = vadd.f32 %v1522_v13, %v1521_v27  ;;  %v1997_v59 = vmul.f32 %v14161_v50, %v10368_v22  ;;  %v3768_v16 = vrot.slane %v3767_v9, 4  ;;  %v3777_v8 = vrot.slane %v3776_v60, 4 }
 0x36e   :  { %14159 = vst [vmem:[#allocation113_spill] sm:$0xff] %v10487_v7  ;;  %v1996_v44 = vmul.f32 %v14162_v2, %v10462_v41  ;;  %v1998_v39 = vmul.f32 %v14163_v40, %v10467_v1  ;;  %v3269_v37 = vadd.f32 %v3268_v57, %v3267_v29  ;;  %v3278_v30 = vadd.f32 %v3277_v24, %v3276_v6  ;;  %v14172_v24 = vld [vmem:[#allocation145_spill] sm:$0xff]  ;;  %v14174_v2 = vld [vmem:[#allocation154_spill] sm:$0xff] }
 0x36f   :  { %v1999_v45 = vmul.f32 %v14164_v35, %v10372_v43  ;;  %v2000_v51 = vmul.f32 %v14165_v18, %v10471_v58  ;;  %v3769_v27 = vadd.f32 %v3768_v16, %v3767_v9  ;;  %v3778_v23 = vadd.f32 %v3777_v8, %v3776_v60  ;;  %v14171_v60 = vld [vmem:[#allocation190_spill] sm:$0xff] }
 0x370   :  { %v2001_v17 = vmul.f32 %v14166_v54, %v10376_v0  ;;  %v2002_v38 = vmul.f32 %v14167_v48, %v10475_v63  ;;  %v3270_v31 = vrot.slane %v3269_v37, 1  ;;  %v3279_v11 = vrot.slane %v3278_v30, 1  ;;  %v14176_v18 = vld [vmem:[#allocation138_spill] sm:$0xff]  ;;  %v14180_v48 = vld [vmem:[#allocation148_spill] sm:$0xff]  ;;  %v14270_v63 = vld [vmem:[#allocation219_spill] sm:$0xff] }
 0x371   :  { %v1524_v4 = vrot.slane %v1523_v62, 1  ;;  %v2027_v33 = vrot.slane %v1997_v59, 7  ;;  %v3770_v25 = vrot.slane %v3769_v27, 2  ;;  %v3779_v28 = vrot.slane %v3778_v23, 2  ;;  %v14173_v59 = vld [vmem:[#allocation44_spill] sm:$0xff]  ;;  %v14179_v54 = vld [vmem:[#allocation150_spill] sm:$0xff] }
 0x372   :  { %v2003_v36 = vmul.f32 %v14168_v5, %v10383_v42  ;;  %v2004_v15 = vmul.f32 %v14169_v19, %v10479_v47  ;;  %v10509_v3 = vadd.f32 %v3270_v31, %v3269_v37  ;;  %v10511_v13 = vadd.f32 %v3279_v11, %v3278_v30  ;;  %v14252_v47 = vld [vmem:[#allocation46_spill] sm:$0xff] }
 0x373   :  { %v10515_v61 = vmul.f32 %v14170_v20, %v10387_v14  ;;  %v2041_v29 = vrot.slane %v1998_v39, 7  ;;  %v3771_v6 = vadd.f32 %v3770_v25, %v3769_v27  ;;  %v3780_v9 = vadd.f32 %v3779_v28, %v3778_v23  ;;  %v14175_v39 = vld [vmem:[#allocation192_spill] sm:$0xff]  ;;  %v14184_v20 = vld [vmem:[#allocation139_spill] sm:$0xff] }
 0x374   :  { %v10519_v21 = vmul.f32 %v14171_v60, %v10483_v10  ;;  %v2029_v57 = vrot.slane %v1999_v45, 6  ;;  %v3286_v50 = vmax.f32 %v14172_v24, %v10509_v3  ;;  %v3293_v16 = vmax.f32 %v14173_v59, %v10511_v13  ;;  %v14177_v45 = vld [vmem:[#allocation120_spill] sm:$0xff]  ;;  %v14185_v24 = vld [vmem:[#allocation2_spill] sm:$0xff]  ;;  %v14250_v10 = vld [vmem:[#allocation125_spill] sm:$0xff] }
 0x375   :  { %v1525_v8 = vadd.f32 %v1524_v4, %v1523_v62  ;;  %v10527_v40 = vmul.f32 %v14174_v2, %v10393_v52  ;;  %v10531_v37 = vmul.f32 %v14175_v39, %v10487_v7  ;;  %v2028_v30 = vsel %vm1847_vm1, %v2027_v33, %v1995_v26  ;;  %v14182_v4 = vld [vmem:[#allocation191_spill] sm:$0xff]  ;;  %v14183_v33 = vld [vmem:[#allocation6_spill] sm:$0xff] }
 0x376   :  { %v2043_v35 = vrot.slane %v2000_v51, 6  ;;  %v14178_v27 = vmax.f32 %v14176_v18, %v14177_v45  ;;  %v14181_v31 = vmax.f32 %v14179_v54, %v14180_v48  ;;  %v3772_v11 = vrot.slane %v3771_v6, 1  ;;  %v14188_v39 = vld [vmem:[#allocation135_spill] sm:$0xff] }
 0x377   :  { %v10546_v25 = vmul.f32 %v14182_v4, %v10397_v53  ;;  %v2031_v28 = vrot.slane %v2001_v17, 5  ;;  %v2042_v5 = vsel %vm1847_vm1, %v2041_v29, %v1996_v44  ;;  %v3781_v26 = vrot.slane %v3780_v9, 1  ;;  %v14186_v17 = vld [vmem:[#allocation143_spill] sm:$0xff]  ;;  %v14190_v4 = vld [vmem:[#allocation136_spill] sm:$0xff]  ;;  %v14248_v53 = vld [vmem:[#allocation45_spill] sm:$0xff] }
 0x378   :  { %v10537_v23 = vmax.f32 %v14178_v27, %v3286_v50  ;;  %v10542_v62 = vmax.f32 %v14181_v31, %v3293_v16  ;;  %v2030_v51 = vsel %vm1850_vm2, %v2029_v57, %v2028_v30  ;;  %v2033_v59 = vrot.slane %v2003_v36, 4 }
 0x379   :  { %v2035_v16 = vrot.slane %v10515_v61, 3  ;;  %v2037_v2 = vrot.slane %v10527_v40, 2  ;;  %v10562_v29 = vadd.f32 %v1535_v46, %v1525_v8  ;;  %v2044_v57 = vsel %vm1850_vm2, %v2043_v35, %v2042_v5  ;;  %v14189_v61 = vld [vmem:[#allocation140_spill] sm:$0xff] }
 0x37a   :  { %v3295_v19 = vsub.f32 %v14183_v33, %v10537_v23  ;;  %v3296_v60 = vsub.f32 %v14184_v20, %v10542_v62  ;;  %v3297_v50 = vsub.f32 %v14185_v24, %v10537_v23  ;;  %v3298_v44 = vsub.f32 %v14186_v17, %v10542_v62  ;;  %v14194_v24 = vld [vmem:[#allocation121_spill] sm:$0xff] }
 0x37b   :  { %14187 = vst [vmem:[#allocation241_spill] sm:$0xff] %v10562_v29  ;;  %v3299_v30 = vsub.f32 %v14188_v39, %v10537_v23  ;;  %v10567_v18 = vadd.f32 %v3772_v11, %v3771_v6  ;;  %v2032_v36 = vsel %vm1853_vm3, %v2031_v28, %v2030_v51  ;;  %v2045_v27 = vrot.slane %v2002_v38, 5  ;;  %v14191_v6 = vld [vmem:[#allocation144_spill] sm:$0xff]  ;;  %v14192_v38 = vld [vmem:[#allocation137_spill] sm:$0xff] }
 0x37c   :  { %v3300_v54 = vsub.f32 %v14189_v61, %v10542_v62  ;;  %v10572_v31 = vadd.f32 %v3781_v26, %v3780_v9  ;;  %v3301_v32 = vsub.f32 %v14190_v4, %v10537_v23  ;;  %v3311_v46 = vmul.f32 1.442695, %v3295_v19  ;;  %v14193_v9 = vld [vmem:[#allocation69_spill] sm:$0xff] }
 0x37d   :  { %v3313_v8 = vmul.f32 1.442695, %v3296_v60  ;;  %v3315_v33 = vmul.f32 1.442695, %v3297_v50  ;;  %v2046_v35 = vsel %vm1853_vm3, %v2045_v27, %v2044_v57  ;;  %v2047_v5 = vrot.slane %v2004_v15, 4  ;;  %v14195_v50 = vld [vmem:[#allocation71_spill] sm:$0xff] }
 0x37e   :  { %v3302_v11 = vsub.f32 %v14191_v6, %v10542_v62  ;;  %v3317_v20 = vmul.f32 1.442695, %v3298_v44  ;;  %v3303_v28 = vsub.f32 %v14192_v38, %v10537_v23  ;;  %6559 = vpow2.f32 %v3311_v46  ;;  %v14196_v44 = vld [vmem:[#allocation141_spill] sm:$0xff]  ;;  %v14197_v27 = vld [vmem:[#allocation147_spill] sm:$0xff] }
 0x37f   :  { %v3319_v51 = vmul.f32 1.442695, %v3299_v30  ;;  %v3788_v26 = vmax.f32 %v14193_v9, %v10567_v18  ;;  %v3304_v19 = vsub.f32 %v14194_v24, %v10542_v62  ;;  %6561 = vpow2.f32 %v3313_v8  ;;  %v14198_v8 = vld [vmem:[#allocation54_spill] sm:$0xff]  ;;  %v14199_v6 = vld [vmem:[#allocation157_spill] sm:$0xff] }
 0x380   :  { %v3321_v60 = vmul.f32 1.442695, %v3300_v54  ;;  %v3795_v15 = vmax.f32 %v14195_v50, %v10572_v31  ;;  %v2034_v17 = vsel %vm1856_vm4, %v2033_v59, %v2032_v36  ;;  %v3305_v57 = vsub.f32 %v14196_v44, %v10537_v23  ;;  %v14207_v44 = vld [vmem:[#allocation130_spill] sm:$0xff] }
 0x381   :  { %6563 = vpow2.f32 %v3315_v33  ;;  %v3323_v39 = vmul.f32 1.442695, %v3301_v32  ;;  %v2048_v30 = vsel %vm1856_vm4, %v2047_v5, %v2046_v35  ;;  %v3306_v61 = vsub.f32 %v14197_v27, %v10542_v62  ;;  %v14201_v35 = vld [vmem:[#allocation189_spill] sm:$0xff]  ;;  %v14202_v5 = vld [vmem:[#allocation188_spill] sm:$0xff] }
 0x382   :  { %6565 = vpow2.f32 %v3317_v20  ;;  %v3325_v4 = vmul.f32 1.442695, %v3302_v11  ;;  %v3307_v54 = vsub.f32 %v14177_v45, %v10537_v23  ;;  %v3327_v46 = vmul.f32 1.442695, %v3303_v28 }
 0x383   :  { %6567 = vpow2.f32 %v3319_v51  ;;  %v14200_v59 = vmax.f32 %v14198_v8, %v14199_v6  ;;  %v3308_v32 = vsub.f32 %v14180_v48, %v10542_v62  ;;  %v3329_v33 = vmul.f32 1.442695, %v3304_v19  ;;  %v14204_v51 = vld [vmem:[#allocation193_spill] sm:$0xff] }
 0x384   :  { %6569 = vpow2.f32 %v3321_v60  ;;  %v14203_v38 = vmax.f32 %v14201_v35, %v14202_v5  ;;  %v3309_v45 = vsub.f32 %v10509_v3, %v10537_v23  ;;  %v3310_v11 = vsub.f32 %v10511_v13, %v10542_v62  ;;  %v14205_v3 = vld [vmem:[#allocation134_spill] sm:$0xff] }
 0x385   :  { %v10598_v36 = vmax.f32 %v14200_v59, %v3788_v26  ;;  %6571 = vpow2.f32 %v3323_v39  ;;  %v3331_v28 = vmul.f32 1.442695, %v3305_v57  ;;  %v10613_v9 = vmul.f32 %v14204_v51, %v10562_v29  ;;  %v14206_v60 = vld [vmem:[#allocation158_spill] sm:$0xff]  ;;  %v14215_v51 = vld [vmem:[#allocation156_spill] sm:$0xff] }
 0x386   :  { %v10605_v20 = vmax.f32 %v14203_v38, %v3795_v15  ;;  %v2049_v48 = vrot.slane %v10519_v21, 3  ;;  %6573 = vpow2.f32 %v3325_v4  ;;  %v3333_v26 = vmul.f32 1.442695, %v3306_v61  ;;  %v14209_v39 = vld [vmem:[#allocation126_spill] sm:$0xff]  ;;  %v14211_v4 = vld [vmem:[#allocation153_spill] sm:$0xff] }
 0x387   :  { %v10617_v24 = vsel %vm1859_vm5, %v2035_v16, %v2034_v17  ;;  %6575 = vpow2.f32 %v3327_v46  ;;  %v3335_v19 = vmul.f32 1.442695, %v3307_v54  ;;  %v3797_v23 = vsub.f32 %v14205_v3, %v10598_v36  ;;  %v14208_v17 = vld [vmem:[#allocation159_spill] sm:$0xff]  ;;  %v14212_v46 = vld [vmem:[#allocation161_spill] sm:$0xff]  ;;  %v14214_v38 = vld [vmem:[#allocation162_spill] sm:$0xff] }
 0x388   :  { %v10622_v13 = vsel %vm1859_vm5, %v2049_v48, %v2048_v30  ;;  %6577 = vpow2.f32 %v3329_v33  ;;  %v3337_v62 = vmul.f32 1.442695, %v3308_v32  ;;  %v3798_v50 = vsub.f32 %v14206_v60, %v10605_v20  ;;  %v14210_v30 = vld [vmem:[#allocation160_spill] sm:$0xff]  ;;  %v14213_v33 = vld [vmem:[#allocation155_spill] sm:$0xff] }
 0x389   :  { %6579 = vpow2.f32 %v3331_v28  ;;  %v3339_v21 = vmul.f32 1.442695, %v3309_v45  ;;  %v3341_v15 = vmul.f32 1.442695, %v3310_v11  ;;  %v3799_v16 = vsub.f32 %v14207_v44, %v10598_v36 }
 0x38a   :  { %6581 = vpow2.f32 %v3333_v26  ;;  %v3800_v57 = vsub.f32 %v14208_v17, %v10605_v20  ;;  %v3801_v27 = vsub.f32 %v14209_v39, %v10598_v36  ;;  %v3802_v61 = vsub.f32 %v14210_v30, %v10605_v20  ;;  %v14216_v26 = vld [vmem:[#allocation163_spill] sm:$0xff] }
 0x38b   :  { %6583 = vpow2.f32 %v3335_v19  ;;  %v3803_v54 = vsub.f32 %v14211_v4, %v10598_v36  ;;  %v3804_v8 = vsub.f32 %v14212_v46, %v10605_v20  ;;  %v3813_v59 = vmul.f32 1.442695, %v3797_v23  ;;  %v10638_v32 = vpop.eup %6559 }
 0x38c   :  { %6585 = vpow2.f32 %v3337_v62  ;;  %v3805_v35 = vsub.f32 %v14213_v33, %v10598_v36  ;;  %v3806_v45 = vsub.f32 %v14214_v38, %v10605_v20  ;;  %v3815_v11 = vmul.f32 1.442695, %v3798_v50  ;;  %v10644_v28 = vpop.eup %6561 }
 0x38d   :  { %6587 = vpow2.f32 %v3339_v21  ;;  %v3807_v48 = vsub.f32 %v14215_v51, %v10598_v36  ;;  %v3808_v19 = vsub.f32 %v14216_v26, %v10605_v20  ;;  %v3817_v3 = vmul.f32 1.442695, %v3799_v16 }
 0x38e   :  { %v10650_v23 = vpop.eup %6563  ;;  %6589 = vpow2.f32 %v3341_v15  ;;  %v3809_v62 = vsub.f32 %v14199_v6, %v10598_v36  ;;  %v3810_v60 = vsub.f32 %v14202_v5, %v10605_v20  ;;  %v3819_v50 = vmul.f32 1.442695, %v3800_v57 }
 0x38f   :  { %v10656_v44 = vpop.eup %6565  ;;  %v3359_v21 = vrot.slane %v10650_v23, 7  ;;  %v3811_v17 = vsub.f32 %v10567_v18, %v10598_v36  ;;  %6591 = vpow2.f32 %v3813_v59  ;;  %v3821_v39 = vmul.f32 1.442695, %v3801_v27 }
 0x390   :  { %v10661_v16 = vpop.eup %6567  ;;  %v3373_v15 = vrot.slane %v10656_v44, 7  ;;  %v3812_v6 = vsub.f32 %v10572_v31, %v10605_v20  ;;  %6593 = vpow2.f32 %v3815_v11  ;;  %v3823_v30 = vmul.f32 1.442695, %v3802_v61 }
 0x391   :  { %v10666_v5 = vpop.eup %6569  ;;  %v3360_v57 = vsel %vm1847_vm1, %v3359_v21, %v10638_v32  ;;  %v3361_v4 = vrot.slane %v10661_v16, 6  ;;  %6595 = vpow2.f32 %v3817_v3  ;;  %v3825_v18 = vmul.f32 1.442695, %v3803_v54 }
 0x392   :  { %v10671_v36 = vpop.eup %6571  ;;  %v3374_v27 = vsel %vm1847_vm1, %v3373_v15, %v10644_v28  ;;  %v3375_v46 = vrot.slane %v10666_v5, 6  ;;  %6597 = vpow2.f32 %v3819_v50  ;;  %v3827_v31 = vmul.f32 1.442695, %v3804_v8 }
 0x393   :  { %v10676_v20 = vpop.eup %6573  ;;  %v3362_v61 = vsel %vm1850_vm2, %v3361_v4, %v3360_v57  ;;  %v3363_v59 = vrot.slane %v10671_v36, 5  ;;  %6599 = vpow2.f32 %v3821_v39  ;;  %v3829_v33 = vmul.f32 1.442695, %v3805_v35 }
 0x394   :  { %v10680_v38 = vpop.eup %6575  ;;  %v3376_v54 = vsel %vm1850_vm2, %v3375_v46, %v3374_v27  ;;  %v3377_v11 = vrot.slane %v10676_v20, 5  ;;  %6601 = vpow2.f32 %v3823_v30  ;;  %v3831_v51 = vmul.f32 1.442695, %v3806_v45 }
 0x395   :  { %v10684_v26 = vpop.eup %6577  ;;  %v3364_v8 = vsel %vm1853_vm3, %v3363_v59, %v3362_v61  ;;  %v3365_v3 = vrot.slane %v10680_v38, 4  ;;  %6603 = vpow2.f32 %v3825_v18  ;;  %v3833_v50 = vmul.f32 1.442695, %v3807_v48 }
 0x396   :  { %v10688_v21 = vpop.eup %6579  ;;  %v3378_v35 = vsel %vm1853_vm3, %v3377_v11, %v3376_v54  ;;  %v3379_v39 = vrot.slane %v10684_v26, 4  ;;  %6605 = vpow2.f32 %v3827_v31  ;;  %v3835_v15 = vmul.f32 1.442695, %v3808_v19 }
 0x397   :  { %v10692_v57 = vpop.eup %6581  ;;  %v3366_v45 = vsel %vm1856_vm4, %v3365_v3, %v3364_v8  ;;  %v3367_v30 = vrot.slane %v10688_v21, 3  ;;  %6607 = vpow2.f32 %v3829_v33  ;;  %v3837_v4 = vmul.f32 1.442695, %v3809_v62 }
 0x398   :  { %v10696_v27 = vpop.eup %6583  ;;  %v3380_v48 = vsel %vm1856_vm4, %v3379_v39, %v3378_v35  ;;  %v3381_v18 = vrot.slane %v10692_v57, 3  ;;  %6609 = vpow2.f32 %v3831_v51  ;;  %v3839_v46 = vmul.f32 1.442695, %v3810_v60 }
 0x399   :  { %v10700_v61 = vpop.eup %6585  ;;  %v3368_v19 = vsel %vm1859_vm5, %v3367_v30, %v3366_v45  ;;  %v3369_v31 = vrot.slane %v10696_v27, 2  ;;  %6611 = vpow2.f32 %v3833_v50  ;;  %v3841_v59 = vmul.f32 1.442695, %v3811_v17 }
 0x39a   :  { %v10704_v54 = vpop.eup %6587  ;;  %v3382_v62 = vsel %vm1859_vm5, %v3381_v18, %v3380_v48  ;;  %v3383_v33 = vrot.slane %v10700_v61, 2  ;;  %6613 = vpow2.f32 %v3835_v15  ;;  %v3843_v11 = vmul.f32 1.442695, %v3812_v6  ;;  %v14221_v48 = vld [vmem:[#allocation225_spill] sm:$0xff] }
 0x39b   :  { %v10708_v8 = vpop.eup %6589  ;;  %v2051_v60 = vrot.slane %v10531_v37, 2  ;;  %v3370_v51 = vsel %vm1862_vm6, %v3369_v31, %v3368_v19  ;;  %v3371_v3 = vrot.slane %v10704_v54, 1  ;;  %6615 = vpow2.f32 %v3837_v4 }
 0x39c   :  { %v10713_v35 = vpop.eup %6591  ;;  %v2038_v17 = vsel %vm1862_vm6, %v2037_v2, %v10617_v24  ;;  %v3384_v50 = vsel %vm1862_vm6, %v3383_v33, %v3382_v62  ;;  %v3385_v6 = vrot.slane %v10708_v8, 1  ;;  %6617 = vpow2.f32 %v3839_v46 }
 0x39d   :  { %14217 = vst [vmem:[#allocation119_spill] sm:$0xff] %v10713_v35  ;;  %v10721_v39 = vpop.eup %6593  ;;  %v2039_v37 = vrot.slane %v10546_v25, 1  ;;  %v2052_v15 = vsel %vm1862_vm6, %v2051_v60, %v10622_v13  ;;  %v3372_v45 = vsel %vm1865_vm7, %v3371_v3, %v3370_v51  ;;  %6619 = vpow2.f32 %v3841_v59  ;;  %v14224_v59 = vld [vmem:[#allocation74_spill] sm:$0xff] }
 0x39e   :  { %14218 = vst [vmem:[#allocation102_spill] sm:$0xff] %v10721_v39  ;;  %v10727_v30 = vpop.eup %6595  ;;  %v2053_v40 = vrot.slane %v10613_v9, 1  ;;  %v3386_v2 = vsel %vm1865_vm7, %v3385_v6, %v3384_v50  ;;  %v3389_v24 = vrot.slane %v3372_v45, 4  ;;  %6621 = vpow2.f32 %v3843_v11  ;;  %v14225_v9 = vld [vmem:[#allocation213_spill] sm:$0xff] }
 0x39f   :  { %14219 = vst [vmem:[#allocation122_spill] sm:$0xff] %v10727_v30  ;;  %v10731_v4 = vpop.eup %6597  ;;  %v14222_v18 = vrot.slane %v14221_v48, 2  ;;  %v2040_v13 = vsel %vm1865_vm7, %v2039_v37, %v2038_v17  ;;  %v3395_v46 = vrot.slane %v3386_v2, 4  ;;  %v3861_v19 = vrot.slane %v10727_v30, 7 }
 0x3a0   :  { %14220 = vst [vmem:[#allocation242_spill] sm:$0xff] %v10731_v4  ;;  %v10740_v31 = vpop.eup %6599  ;;  %v10744_v62 = vmul.f32 %v14225_v9, %v14224_v59  ;;  %v2054_v33 = vsel %vm1865_vm7, %v2053_v40, %v2052_v15  ;;  %v3390_v11 = vadd.f32 %v3389_v24, %v3372_v45  ;;  %v3875_v60 = vrot.slane %v10731_v4, 7 }
 0x3a1   :  { %v10736_v25 = vadd.f32 %v14222_v18, %v14221_v48  ;;  %14223 = vst [vmem:[#allocation127_spill] sm:$0xff] %v10740_v31  ;;  %v10748_v51 = vpop.eup %6601  ;;  %v2487_v3 = vrot.slane %v10443_v34, 2  ;;  %v3396_v50 = vadd.f32 %v3395_v46, %v3386_v2  ;;  %v3862_v17 = vsel %vm1847_vm1, %v3861_v19, %v10713_v35  ;;  %v14231_v35 = vld [vmem:[#allocation210_spill] sm:$0xff] }
 0x3a2   :  { %14226 = vst [vmem:[#allocation131_spill] sm:$0xff] %v10748_v51  ;;  %v3863_v6 = vrot.slane %v10740_v31, 6  ;;  %v10754_v37 = vpop.eup %6603  ;;  %v2057_v48 = vrot.slane %v2040_v13, 4  ;;  %v3391_v18 = vrot.slane %v3390_v11, 2  ;;  %v3876_v15 = vsel %vm1847_vm1, %v3875_v60, %v10721_v39 }
 0x3a3   :  { %14227 = vst [vmem:[#allocation132_spill] sm:$0xff] %v10754_v37  ;;  %v3877_v45 = vrot.slane %v10748_v51, 6  ;;  %v10759_v40 = vpop.eup %6605  ;;  %v2063_v24 = vrot.slane %v2054_v33, 4  ;;  %v3397_v9 = vrot.slane %v3396_v50, 2  ;;  %v3865_v46 = vrot.slane %v10754_v37, 5 }
 0x3a4   :  { %14228 = vst [vmem:[#allocation118_spill] sm:$0xff] %v10759_v40  ;;  %v3864_v2 = vsel %vm1850_vm2, %v3863_v6, %v3862_v17  ;;  %v10763_v19 = vpop.eup %6607  ;;  %v4936_v31 = vmul.f32 %v14231_v35, %v14230_v55  ;;  %v3392_v4 = vadd.f32 %v3391_v18, %v3390_v11  ;;  %v3879_v60 = vrot.slane %v10759_v40, 5 }
 0x3a5   :  { %14229 = vst [vmem:[#allocation146_spill] sm:$0xff] %v10763_v19  ;;  %v3878_v30 = vsel %vm1850_vm2, %v3877_v45, %v3876_v15  ;;  %v10769_v39 = vpop.eup %6609  ;;  %v2488_v51 = vadd.f32 %v2487_v3, %v10443_v34  ;;  %v3398_v56 = vadd.f32 %v3397_v9, %v3396_v50  ;;  %v3866_v29 = vsel %vm1853_vm3, %v3865_v46, %v3864_v2  ;;  %v14236_v3 = vld [vmem:[#allocation36_spill] sm:$0xff]  ;;  %v14237_v50 = vld [vmem:[#allocation211_spill] sm:$0xff] }
 0x3a6   :  { %14232 = vst [vmem:[#allocation142_spill] sm:$0xff] %v10769_v39  ;;  %v3867_v17 = vrot.slane %v10763_v19, 4  ;;  %v10774_v6 = vpop.eup %6611  ;;  %v2058_v37 = vadd.f32 %v2057_v48, %v2040_v13  ;;  %v3393_v7 = vrot.slane %v3392_v4, 1  ;;  %v3880_v35 = vsel %vm1853_vm3, %v3879_v60, %v3878_v30 }
 0x3a7   :  { %14233 = vst [vmem:[#allocation151_spill] sm:$0xff] %v10774_v6  ;;  %v3881_v11 = vrot.slane %v10769_v39, 4  ;;  %v10778_v18 = vpop.eup %6613  ;;  %v2064_v15 = vadd.f32 %v2063_v24, %v2054_v33  ;;  %v3399_v45 = vrot.slane %v3398_v56, 1  ;;  %v3869_v34 = vrot.slane %v10774_v6, 3  ;;  %v14240_v6 = vld [vmem:[#allocation170_spill] sm:$0xff] }
 0x3a8   :  { %14234 = vst [vmem:[#allocation123_spill] sm:$0xff] %v10778_v18  ;;  %v3868_v40 = vsel %vm1856_vm4, %v3867_v17, %v3866_v29  ;;  %v10782_v9 = vpop.eup %6615  ;;  %v4938_v2 = vmul.f32 %v14237_v50, %v14236_v3  ;;  %v3394_v46 = vadd.f32 %v3393_v7, %v3392_v4  ;;  %v3883_v30 = vrot.slane %v10778_v18, 3 }
 0x3a9   :  { %14235 = vst [vmem:[#allocation28_spill] sm:$0xff] %v10782_v9  ;;  %v3882_v13 = vsel %vm1856_vm4, %v3881_v11, %v3880_v35  ;;  %v10788_v48 = vpop.eup %6617  ;;  %v4979_v60 = vrot.slane %v4936_v31, 7  ;;  %v3400_v39 = vadd.f32 %v3399_v45, %v3398_v56  ;;  %v3870_v33 = vsel %vm1859_vm5, %v3869_v34, %v3868_v40 }
 0x3aa   :  { %14238 = vst [vmem:[#allocation152_spill] sm:$0xff] %v10788_v48  ;;  %v3871_v29 = vrot.slane %v10782_v9, 2  ;;  %v10792_v24 = vpop.eup %6619  ;;  %v2489_v17 = vrot.slane %v2488_v51, 1  ;;  %v3404_v19 = vrot.slane %v3394_v46, %v14240_v6  ;;  %v3884_v50 = vsel %vm1859_vm5, %v3883_v30, %v3882_v13  ;;  %v14243_v9 = vld [vmem:[#allocation212_spill] sm:$0xff] }
 0x3ab   :  { %14239 = vst [vmem:[#allocation133_spill] sm:$0xff] %v10792_v24  ;;  %v3885_v7 = vrot.slane %v10788_v48, 2  ;;  %v10797_v35 = vpop.eup %6621  ;;  %v2059_v4 = vrot.slane %v2058_v37, 2  ;;  %v2065_v11 = vrot.slane %v2064_v15, 2  ;;  %v3408_v31 = vrot.slane %v3400_v39, %v14240_v6  ;;  %v14242_v48 = vld [vmem:[#allocation17_spill] sm:$0xff] }
 0x3ac   :  { %14241 = vst [vmem:[#allocation165_spill] sm:$0xff] %v10797_v35  ;;  %v3872_v56 = vsel %vm1862_vm6, %v3871_v29, %v3870_v33  ;;  %6623 = vrcp.f32 %v3404_v19  ;;  %v3873_v40 = vrot.slane %v10792_v24, 1  ;;  %v3887_v34 = vrot.slane %v10797_v35, 1  ;;  %v1017_v33 = vpop.f32.mrf.mxu1  ;;  %v14246_v24 = vld [vmem:[#allocation43_spill] sm:$0xff] }
 0x3ad   :  { %v3886_v45 = vsel %vm1862_vm6, %v3885_v7, %v3884_v50  ;;  %v4999_v46 = vrot.slane %v10736_v25, 1  ;;  %v4981_v13 = vrot.slane %v4938_v2, 6  ;;  %v2559_v30 = vrot.slane %v10438_v49, 4  ;;  %v14244_v7 = vld [vmem:[#allocation42_spill] sm:$0xff] }
 0x3ae   :  { %6625 = vrcp.f32 %v3408_v31  ;;  %v4940_v18 = vmul.f32 %v14243_v9, %v14242_v48  ;;  %v4980_v39 = vsel %vm1847_vm1, %v4979_v60, %v10744_v62  ;;  %v3874_v19 = vsel %vm1865_vm7, %v3873_v40, %v3872_v56  ;;  %v14251_v9 = vld [vmem:[#allocation214_spill] sm:$0xff]  ;;  %v10826_v40 = vpop.f32.mrf.mxu0 }
 0x3af   :  { %v3888_v29 = vsel %vm1865_vm7, %v3887_v34, %v3886_v45  ;;  %v2490_v50 = vadd.f32 %v2489_v17, %v2488_v51  ;;  %v10813_v35 = vmul.f32 %v1017_v33, %v14244_v7  ;;  %v10816_v2 = vmul.f32 %v1017_v33, %v14246_v24  ;;  %v14267_v7 = vld [vmem:[#allocation217_spill] sm:$0xff] }
 0x3b0   :  { %v10819_v31 = vmul.f32 %v1017_v33, %v14248_v53  ;;  %v4942_v6 = vmul.f32 %v14251_v9, %v14250_v10  ;;  %v10824_v62 = vmul.f32 %v1017_v33, %v14252_v47  ;;  %v2060_v60 = vadd.f32 %v2059_v4, %v2058_v37  ;;  %v14257_v9 = vld [vmem:[#allocation48_spill] sm:$0xff]  ;;  %v14259_v37 = vld [vmem:[#allocation166_spill] sm:$0xff] }
 0x3b1   :  { %14245 = vst [vmem:[#allocation63_spill] sm:$0xff] %v10813_v35  ;;  %14247 = vst [vmem:[#allocation79_spill] sm:$0xff] %v10816_v2  ;;  %v2066_v56 = vadd.f32 %v2065_v11, %v2064_v15  ;;  %v4982_v51 = vsel %vm1850_vm2, %v4981_v13, %v4980_v39  ;;  %v2560_v17 = vadd.f32 %v2559_v30, %v10438_v49  ;;  %v3891_v45 = vrot.slane %v3874_v19, 4  ;;  %v14255_v35 = vld [vmem:[#allocation47_spill] sm:$0xff]  ;;  %v14260_v15 = vld [vmem:[#allocation216_spill] sm:$0xff] }
 0x3b2   :  { %14249 = vst [vmem:[#allocation206_spill] sm:$0xff] %v10819_v31  ;;  %14253 = vst [vmem:[#allocation168_spill] sm:$0xff] %v10824_v62  ;;  %v3897_v34 = vrot.slane %v3888_v29, 4  ;;  %v10831_v2 = vadd.f32 %v4999_v46, %v10736_v25  ;;  %v4983_v31 = vrot.slane %v4940_v18, 5  ;;  %v10834_v53 = vmul.f32 %v1017_v33, %v14255_v35  ;;  %v14262_v13 = vld [vmem:[#allocation49_spill] sm:$0xff]  ;;  %v14264_v49 = vld [vmem:[#allocation26_spill] sm:$0xff] }
 0x3b3   :  { %v10837_v47 = vmul.f32 %v1017_v33, %v14257_v9  ;;  %v10841_v4 = vmul.f32 %v14260_v15, %v14259_v37  ;;  %v5585_v11 = vrot.slane %v2490_v50, 7  ;;  %v10844_v39 = vmul.f32 %v1017_v33, %v14262_v13  ;;  %v14266_v50 = vld [vmem:[#allocation164_spill] sm:$0xff] }
 0x3b4   :  { %14254 = vst [vmem:[#allocation207_spill] sm:$0xff] %v10831_v2  ;;  %14256 = vst [vmem:[#allocation149_spill] sm:$0xff] %v10834_v53  ;;  %v2076_v30 = vmul.f32 %v10826_v40, %v14264_v49  ;;  %v4984_v25 = vsel %vm1853_vm3, %v4983_v31, %v4982_v51  ;;  %v4985_v18 = vrot.slane %v4942_v6, 4  ;;  %v2061_v46 = vrot.slane %v2060_v60, 1  ;;  %v6754_v6 = vld [vmem:[%s12761_s7 + $0x48] sm:$0xff] }
 0x3b5   :  { %14258 = vst [vmem:[#allocation208_spill] sm:$0xff] %v10837_v47  ;;  %14261 = vst [vmem:[#allocation82_spill] sm:$0xff] %v10841_v4  ;;  %v2067_v62 = vrot.slane %v2066_v56, 1  ;;  %v2561_v53 = vrot.slane %v2560_v17, 2  ;;  %v3892_v35 = vadd.f32 %v3891_v45, %v3874_v19  ;;  %v3898_v9 = vadd.f32 %v3897_v34, %v3888_v29  ;;  %v14265_v47 = vld [vmem:[#allocation171_spill] sm:$0xff]  ;;  %v14274_v29 = vld [vmem:[#allocation84_spill] sm:$0xff] }
 0x3b6   :  { %14263 = vst [vmem:[#allocation73_spill] sm:$0xff] %v10844_v39  ;;  %v4507_v24 = vmul.f32 %v14265_v47, %v10368_v22  ;;  %v10854_v13 = vmul.f32 %v14267_v7, %v14266_v50  ;;  %v14269_v39 = vld [vmem:[#allocation167_spill] sm:$0xff]  ;;  %v10863_v31 = vmul.f32 %v6754_v6, %v1017_v33  ;;  %v10866_v19 = vsel %vm1856_vm4, %v4985_v18, %v4984_v25  ;;  %v14276_v45 = vld [vmem:[#allocation209_spill] sm:$0xff]  ;;  %v14279_v7 = vld [vmem:[#allocation172_spill] sm:$0xff] }
 0x3b7   :  { %v10858_v49 = vmul.f32 %v14270_v63, %v14269_v39  ;;  %14273 = vst [vmem:[#allocation44_spill] sm:$0xff] %v10866_v19  ;;  %v10871_v51 = vsel %vm5625_vm8, %v14274_v29, %v5585_v11  ;;  %v10874_v34 = vadd.f32 %v14276_v45, %v2076_v30  ;;  %v10876_v15 = vadd.f32 %v2061_v46, %v2060_v60  ;;  %v14280_v6 = vld [vmem:[#allocation27_spill] sm:$0xff]  ;;  %v14282_v60 = vld [vmem:[#allocation29_spill] sm:$0xff] }
 0x3b8   :  { %14268 = vst [vmem:[#allocation70_spill] sm:$0xff] %v10854_v13  ;;  %14272 = vst [vmem:[#allocation145_spill] sm:$0xff] %v10863_v31  ;;  %v10878_v63 = vadd.f32 %v2067_v62, %v2066_v56  ;;  %v4509_v33 = vmul.f32 %v14279_v7, %v10372_v43  ;;  %v10884_v25 = vmul.f32 %v10826_v40, %v14280_v6  ;;  %v3893_v2 = vrot.slane %v3892_v35, 2  ;;  %v14284_v56 = vld [vmem:[#allocation30_spill] sm:$0xff]  ;;  %v14286_v46 = vld [vmem:[#allocation31_spill] sm:$0xff] }
 0x3b9   :  { %14271 = vst [vmem:[#allocation190_spill] sm:$0xff] %v10858_v49  ;;  %14275 = vst [vmem:[#allocation154_spill] sm:$0xff] %v10871_v51  ;;  %v6624_v18 = vpop.eup %6623  ;;  %v10886_v47 = vadd.f32 %v2561_v53, %v2560_v17  ;;  %v3899_v11 = vrot.slane %v3898_v9, 2  ;;  %v4537_v29 = vrot.slane %v4507_v24, 7  ;;  %v10893_v62 = vmul.f32 %v10826_v40, %v14282_v60  ;;  %v14295_v4 = vld [vmem:[#allocation75_spill] sm:$0xff] }
 0x3ba   :  { %14277 = vst [vmem:[#allocation192_spill] sm:$0xff] %v10876_v15  ;;  %14278 = vst [vmem:[#allocation138_spill] sm:$0xff] %v10878_v63  ;;  %v10889_v30 = vmul.f32 %v6624_v18, %v10650_v23  ;;  %v10897_v7 = vmul.f32 %v10826_v40, %v14284_v56  ;;  %v10901_v45 = vmul.f32 %v10826_v40, %v14286_v46  ;;  %v14289_v23 = vld [vmem:[#allocation174_spill] sm:$0xff]  ;;  %v14292_v63 = vld [vmem:[#allocation173_spill] sm:$0xff]  ;;  %v4539_v46 = vrot.slane %v4509_v33, 6 }
 0x3bb   :  { %14281 = vst [vmem:[#allocation120_spill] sm:$0xff] %v10884_v25  ;;  %v6626_v49 = vpop.eup %6625  ;;  %14283 = vst [vmem:[#allocation150_spill] sm:$0xff] %v10893_v62  ;;  %v10907_v24 = vmul.f32 %v6624_v18, %v10661_v16  ;;  %v4505_v17 = vmul.f32 %v14289_v23, %v10379_v12  ;;  %v10916_v13 = vmul.f32 %v6624_v18, %v10671_v36  ;;  %v14296_v60 = vld [vmem:[#allocation175_spill] sm:$0xff]  ;;  %v14304_v62 = vld [vmem:[#allocation169_spill] sm:$0xff] }
 0x3bc   :  { %14285 = vst [vmem:[#allocation148_spill] sm:$0xff] %v10897_v7  ;;  %14287 = vst [vmem:[#allocation191_spill] sm:$0xff] %v10901_v45  ;;  %v10904_v53 = vmul.f32 %v6626_v49, %v10656_v44  ;;  %v10913_v19 = vmul.f32 %v6626_v49, %v10666_v5  ;;  %v4511_v31 = vmul.f32 %v14292_v63, %v10376_v0  ;;  %v14303_v45 = vld [vmem:[#allocation72_spill] sm:$0xff] }
 0x3bd   :  { %14291 = vst [vmem:[#allocation2_spill] sm:$0xff] %v10916_v13  ;;  %v10921_v44 = vmul.f32 %v6624_v18, %v10680_v38  ;;  %v3894_v16 = vadd.f32 %v3893_v2, %v3892_v35  ;;  %v3900_v51 = vadd.f32 %v3899_v11, %v3898_v9  ;;  %v4538_v56 = vsel %vm1847_vm1, %v4537_v29, %v4505_v17  ;;  %v14299_v35 = vld [vmem:[#allocation78_spill] sm:$0xff]  ;;  %v14301_v11 = vld [vmem:[#allocation80_spill] sm:$0xff] }
 0x3be   :  { %14288 = vst [vmem:[#allocation6_spill] sm:$0xff] %v10904_v53  ;;  %14290 = vst [vmem:[#allocation139_spill] sm:$0xff] %v10913_v19  ;;  %v10925_v23 = vmul.f32 %v6624_v18, %v10638_v32  ;;  %v10928_v5 = vmul.f32 %v6624_v18, %v10688_v21  ;;  %v3429_v36 = vmul.f32 %v10889_v30, %v14295_v4  ;;  %v4541_v15 = vrot.slane %v4511_v31, 5 }
 0x3bf   :  { %14293 = vst [vmem:[#allocation143_spill] sm:$0xff] %v10921_v44  ;;  %v10934_v63 = vmul.f32 %v14296_v60, %v10383_v42  ;;  %v10937_v38 = vmul.f32 %v6626_v49, %v10644_v28  ;;  %v10940_v9 = vmul.f32 %v6624_v18, %v10696_v27  ;;  %v3430_v32 = vmul.f32 %v10904_v53, %v14230_v55  ;;  %v14302_v60 = vld [vmem:[#allocation83_spill] sm:$0xff] }
 0x3c0   :  { %14294 = vst [vmem:[#allocation135_spill] sm:$0xff] %v10928_v5  ;;  %v3431_v21 = vmul.f32 %v10907_v24, %v14299_v35  ;;  %v10947_v2 = vmul.f32 %v6626_v49, %v10676_v20  ;;  %v3432_v33 = vmul.f32 %v10913_v19, %v14236_v3  ;;  %v3433_v29 = vmul.f32 %v10916_v13, %v14301_v11 }
 0x3c1   :  { %14297 = vst [vmem:[#allocation140_spill] sm:$0xff] %v10937_v38  ;;  %14298 = vst [vmem:[#allocation136_spill] sm:$0xff] %v10940_v9  ;;  %v4540_v28 = vsel %vm1850_vm2, %v4539_v46, %v4538_v56  ;;  %v3435_v27 = vmul.f32 %v10921_v44, %v14302_v60  ;;  %v3895_v17 = vrot.slane %v3894_v16, 1  ;;  %v3901_v6 = vrot.slane %v3900_v51, 1  ;;  %v14306_v46 = vld [vmem:[#allocation187_spill] sm:$0xff] }
 0x3c2   :  { %14300 = vst [vmem:[#allocation144_spill] sm:$0xff] %v10947_v2  ;;  %v3427_v7 = vmul.f32 %v10925_v23, %v14303_v45  ;;  %v3437_v20 = vmul.f32 %v10928_v5, %v14304_v62  ;;  %v3459_v25 = vrot.slane %v3429_v36, 7  ;;  %v3461_v35 = vrot.slane %v3431_v21, 6 }
 0x3c3   :  { %v10961_v3 = vmul.f32 %v6626_v49, %v10684_v26  ;;  %v3428_v56 = vmul.f32 %v10937_v38, %v14224_v59  ;;  %v3439_v60 = vmul.f32 %v10940_v9, %v14306_v46  ;;  %v3473_v11 = vrot.slane %v3430_v32, 7 }
 0x3c4   :  { %v3434_v31 = vmul.f32 %v10947_v2, %v14242_v48  ;;  %v3460_v45 = vsel %vm1847_vm1, %v3459_v25, %v3427_v7  ;;  %v3463_v55 = vrot.slane %v3433_v29, 5  ;;  %v3475_v4 = vrot.slane %v3432_v33, 6 }
 0x3c5   :  { %14305 = vst [vmem:[#allocation137_spill] sm:$0xff] %v10961_v3  ;;  %v10971_v36 = vmul.f32 %v6626_v49, %v10692_v57  ;;  %v3462_v26 = vsel %vm1850_vm2, %v3461_v35, %v3460_v45  ;;  %v3465_v21 = vrot.slane %v3435_v27, 4  ;;  %v3474_v62 = vsel %vm1847_vm1, %v3473_v11, %v3428_v56 }
 0x3c6   :  { %v10976_v59 = vmul.f32 %v6626_v49, %v10700_v61  ;;  %v10979_v32 = vmul.f32 %v6624_v18, %v10704_v54  ;;  %v3464_v46 = vsel %vm1853_vm3, %v3463_v55, %v3462_v26  ;;  %v3467_v48 = vrot.slane %v3437_v20, 3  ;;  %v14311_v54 = vld [vmem:[#allocation176_spill] sm:$0xff] }
 0x3c7   :  { %14307 = vst [vmem:[#allocation69_spill] sm:$0xff] %v10971_v36  ;;  %v3436_v25 = vmul.f32 %v10961_v3, %v14250_v10  ;;  %v3466_v57 = vsel %vm1856_vm4, %v3465_v21, %v3464_v46  ;;  %v3469_v7 = vrot.slane %v3439_v60, 2  ;;  %v3476_v45 = vsel %vm1850_vm2, %v3475_v4, %v3474_v62 }
 0x3c8   :  { %14308 = vst [vmem:[#allocation121_spill] sm:$0xff] %v10976_v59  ;;  %14309 = vst [vmem:[#allocation71_spill] sm:$0xff] %v10979_v32  ;;  %v10987_v35 = vmul.f32 %v6626_v49, %v10708_v8  ;;  %v3468_v61 = vsel %vm1859_vm5, %v3467_v48, %v3466_v57  ;;  %v3477_v33 = vrot.slane %v3434_v31, 5  ;;  %v10992_v18 = vmul.f32 %v14311_v54, %v10387_v14  ;;  %v14312_v8 = vld [vmem:[#allocation68_spill] sm:$0xff] }
 0x3c9   :  { %v3470_v55 = vsel %vm1862_vm6, %v3469_v7, %v3468_v61  ;;  %v3503_v11 = vmul.f32 %v10889_v30, %v10368_v22  ;;  %v3896_v29 = vadd.f32 %v3895_v17, %v3894_v16  ;;  %v4542_v60 = vsel %vm1853_vm3, %v4541_v15, %v4540_v28 }
 0x3ca   :  { %14310 = vst [vmem:[#allocation141_spill] sm:$0xff] %v10987_v35  ;;  %v3438_v4 = vmul.f32 %v10971_v36, %v14259_v37  ;;  %v3441_v49 = vmul.f32 %v10979_v32, %v14312_v8  ;;  %v3478_v48 = vsel %vm1853_vm3, %v3477_v33, %v3476_v45  ;;  %v3505_v62 = vmul.f32 %v10907_v24, %v10372_v43 }
 0x3cb   :  { %v3440_v27 = vmul.f32 %v10976_v59, %v14266_v50  ;;  %v3479_v20 = vrot.slane %v3436_v25, 4  ;;  %v3507_v16 = vmul.f32 %v10916_v13, %v10376_v0  ;;  %v3902_v17 = vadd.f32 %v3901_v6, %v3900_v51 }
 0x3cc   :  { %v3442_v15 = vmul.f32 %v10987_v35, %v14269_v39  ;;  %v3501_v28 = vmul.f32 %v10925_v23, %v10379_v12  ;;  %v3504_v56 = vmul.f32 %v10904_v53, %v10467_v1  ;;  %v3509_v46 = vmul.f32 %v10921_v44, %v10383_v42 }
 0x3cd   :  { %v3480_v31 = vsel %vm1856_vm4, %v3479_v20, %v3478_v48  ;;  %v3506_v26 = vmul.f32 %v10913_v19, %v10471_v58  ;;  %v3511_v51 = vmul.f32 %v10928_v5, %v10387_v14  ;;  %v3533_v6 = vrot.slane %v3503_v11, 7  ;;  %v14313_v11 = vld [vmem:[#allocation117_spill] sm:$0xff] }
 0x3ce   :  { %v3471_v21 = vrot.slane %v3441_v49, 1  ;;  %v3481_v25 = vrot.slane %v3438_v4, 3  ;;  %v3513_v57 = vmul.f32 %v10940_v9, %v10393_v52  ;;  %v3535_v7 = vrot.slane %v3505_v62, 6 }
 0x3cf   :  { %v3483_v45 = vrot.slane %v3440_v27, 2  ;;  %v3502_v61 = vmul.f32 %v10937_v38, %v10462_v41  ;;  %v3534_v33 = vsel %vm1847_vm1, %v3533_v6, %v3501_v28  ;;  %v3537_v54 = vrot.slane %v3507_v16, 5 }
 0x3d0   :  { %v3482_v48 = vsel %vm1859_vm5, %v3481_v25, %v3480_v31  ;;  %v3536_v20 = vsel %vm1850_vm2, %v3535_v7, %v3534_v33  ;;  %v3539_v19 = vrot.slane %v3509_v46, 4  ;;  %v3547_v53 = vrot.slane %v3504_v56, 7  ;;  %v14314_v56 = vld [vmem:[#allocation177_spill] sm:$0xff]  ;;  %v14315_v7 = vld [vmem:[#allocation92_spill] sm:$0xff]  ;;  %v14318_v33 = vld [vmem:[#allocation239_spill] sm:$0xff] }
 0x3d1   :  { %v3508_v4 = vmul.f32 %v10947_v2, %v14313_v11  ;;  %v3538_v49 = vsel %vm1853_vm3, %v3537_v54, %v3536_v20  ;;  %v3541_v9 = vrot.slane %v3511_v51, 3  ;;  %v3549_v62 = vrot.slane %v3506_v26, 6  ;;  %v14320_v20 = vld [vmem:[#allocation178_spill] sm:$0xff]  ;;  %v14372_v2 = vld [vmem:[#allocation36_spill] sm:$0xff] }
 0x3d2   :  { %v3472_v27 = vsel %vm1865_vm7, %v3471_v21, %v3470_v55  ;;  %v3540_v38 = vsel %vm1856_vm4, %v3539_v19, %v3538_v49  ;;  %v3543_v5 = vrot.slane %v3513_v57, 2  ;;  %v3548_v16 = vsel %vm1847_vm1, %v3547_v53, %v3502_v61 }
 0x3d3   :  { %v3484_v28 = vsel %vm1862_vm6, %v3483_v45, %v3482_v48  ;;  %v3542_v31 = vsel %vm1859_vm5, %v3541_v9, %v3540_v38  ;;  %v4517_v46 = vmul.f32 %v14314_v56, %v10393_v52  ;;  %v4543_v6 = vrot.slane %v10934_v63, 4  ;;  %v14316_v9 = vld [vmem:[#allocation170_spill] sm:$0xff]  ;;  %v14319_v48 = vld [vmem:[#allocation215_spill] sm:$0xff]  ;;  %v14323_v56 = vld [vmem:[#allocation113_spill] sm:$0xff] }
 0x3d4   :  { %v3485_v25 = vrot.slane %v3442_v15, 1  ;;  %v3510_v26 = vmul.f32 %v10961_v3, %v14315_v7  ;;  %v3544_v55 = vsel %vm1862_vm6, %v3543_v5, %v3542_v31  ;;  %v3550_v19 = vsel %vm1850_vm2, %v3549_v62, %v3548_v16  ;;  %v14317_v15 = vld [vmem:[#allocation200_spill] sm:$0xff] }
 0x3d5   :  { %v3489_v51 = vrot.slane %v3472_v27, 4  ;;  %v3551_v21 = vrot.slane %v3508_v4, 5  ;;  %v4544_v53 = vsel %vm1856_vm4, %v4543_v6, %v4542_v60  ;;  %v4545_v57 = vrot.slane %v10992_v18, 3 }
 0x3d6   :  { %v3486_v38 = vsel %vm1865_vm7, %v3485_v25, %v3484_v28  ;;  %v3906_v45 = vrot.slane %v3896_v29, %v14316_v9  ;;  %v3910_v63 = vrot.slane %v3902_v17, %v14316_v9  ;;  %v5009_v61 = vmul.f32 %v14317_v15, %v10368_v22  ;;  %v14322_v17 = vld [vmem:[#allocation201_spill] sm:$0xff]  ;;  %v14327_v15 = vld [vmem:[#allocation204_spill] sm:$0xff] }
 0x3d7   :  { %v3512_v5 = vmul.f32 %v10971_v36, %v14318_v33  ;;  %v3552_v54 = vsel %vm1853_vm3, %v3551_v21, %v3550_v19  ;;  %v4519_v4 = vmul.f32 %v14320_v20, %v14319_v48  ;;  %v14321_v18 = vrot.slane %v10874_v34, 4 }
 0x3d8   :  { %v3553_v49 = vrot.slane %v3510_v26, 4  ;;  %6627 = vrcp.f32 %v3906_v45  ;;  %v4546_v29 = vsel %vm1859_vm5, %v4545_v57, %v4544_v53  ;;  %v5011_v62 = vmul.f32 %v14322_v17, %v10372_v43  ;;  %v14324_v53 = vld [vmem:[#allocation32_spill] sm:$0xff] }
 0x3d9   :  { %v2146_v60 = vadd.f32 %v14321_v18, %v10874_v34  ;;  %v3490_v16 = vadd.f32 %v3489_v51, %v3472_v27  ;;  %v3495_v28 = vrot.slane %v3486_v38, 4  ;;  %v3515_v31 = vmul.f32 %v10979_v32, %v14319_v48  ;;  %v14326_v51 = vld [vmem:[#allocation241_spill] sm:$0xff] }
 0x3da   :  { %6629 = vrcp.f32 %v3910_v63  ;;  %v3514_v6 = vmul.f32 %v10976_v59, %v14323_v56  ;;  %v3554_v25 = vsel %vm1856_vm4, %v3553_v49, %v3552_v54  ;;  %v4547_v19 = vrot.slane %v4517_v46, 2  ;;  %v14329_v59 = vld [vmem:[#allocation33_spill] sm:$0xff] }
 0x3db   :  { %v5039_v34 = vrot.slane %v5009_v61, 7  ;;  %v2563_v26 = vrot.slane %v10886_v47, 1  ;;  %v3555_v21 = vrot.slane %v3512_v5, 3  ;;  %v11070_v57 = vmul.f32 %v10826_v40, %v14324_v53  ;;  %v14328_v53 = vld [vmem:[#allocation203_spill] sm:$0xff]  ;;  %v14375_v32 = vld [vmem:[#allocation17_spill] sm:$0xff] }
 0x3dc   :  { %v2147_v27 = vrot.slane %v2146_v60, 2  ;;  %v3516_v45 = vmul.f32 %v10987_v35, %v14326_v51  ;;  %v4548_v63 = vsel %vm1862_vm6, %v4547_v19, %v4546_v29  ;;  %v5007_v20 = vmul.f32 %v14327_v15, %v10379_v12  ;;  %v14339_v15 = vld [vmem:[#allocation202_spill] sm:$0xff] }
 0x3dd   :  { %14325 = vst [vmem:[#allocation147_spill] sm:$0xff] %v11070_v57  ;;  %v5041_v18 = vrot.slane %v5011_v62, 6  ;;  %v3491_v54 = vrot.slane %v3490_v16, 2  ;;  %v3496_v46 = vadd.f32 %v3495_v28, %v3486_v38  ;;  %v3545_v61 = vrot.slane %v3515_v31, 1  ;;  %v6755_v38 = vld [vmem:[%s12761_s7 + $0x78] sm:$0xff]  ;;  %v14333_v31 = vld [vmem:[#allocation180_spill] sm:$0xff] }
 0x3de   :  { %v3556_v49 = vsel %vm1859_vm5, %v3555_v21, %v3554_v25  ;;  %v3557_v5 = vrot.slane %v3514_v6, 2  ;;  %v4549_v17 = vrot.slane %v4519_v4, 1  ;;  %v5013_v9 = vmul.f32 %v14328_v53, %v10376_v0  ;;  %v14336_v25 = vld [vmem:[#allocation205_spill] sm:$0xff] }
 0x3df   :  { %v5040_v57 = vsel %vm1847_vm1, %v5039_v34, %v5007_v20  ;;  %v3546_v35 = vsel %vm1865_vm7, %v3545_v61, %v3544_v55  ;;  %v11084_v29 = vmul.f32 %v10826_v40, %v14329_v59  ;;  %v11090_v62 = vmul.f32 %v6755_v38, %v10826_v40  ;;  %v14362_v59 = vld [vmem:[#allocation28_spill] sm:$0xff] }
 0x3e0   :  { %v11092_v28 = vadd.f32 %v2147_v27, %v2146_v60  ;;  %v3558_v4 = vsel %vm1862_vm6, %v3557_v5, %v3556_v49  ;;  %v11097_v6 = vmul.f32 %v14333_v31, %v10467_v1  ;;  %v11100_v55 = vsel %vm1865_vm7, %v4549_v17, %v4548_v63  ;;  %v14341_v49 = vld [vmem:[#allocation182_spill] sm:$0xff]  ;;  %v14348_v31 = vld [vmem:[#allocation197_spill] sm:$0xff] }
 0x3e1   :  { %14330 = vst [vmem:[#allocation54_spill] sm:$0xff] %v11084_v29  ;;  %14331 = vst [vmem:[#allocation157_spill] sm:$0xff] %v11090_v62  ;;  %v5015_v19 = vmul.f32 %v14336_v25, %v10383_v42  ;;  %v11104_v34 = vadd.f32 %v3491_v54, %v3490_v16  ;;  %v3497_v21 = vrot.slane %v3496_v46, 2  ;;  %v3559_v53 = vrot.slane %v3516_v45, 1  ;;  %v14343_v45 = vld [vmem:[#allocation196_spill] sm:$0xff] }
 0x3e2   :  { %14332 = vst [vmem:[#allocation189_spill] sm:$0xff] %v11092_v28  ;;  %14334 = vst [vmem:[#allocation188_spill] sm:$0xff] %v11097_v6  ;;  %v5042_v40 = vsel %vm1850_vm2, %v5041_v18, %v5040_v57  ;;  %v11108_v60 = vadd.f32 %v2563_v26, %v10886_v47  ;;  %v3563_v27 = vrot.slane %v3546_v35, 4  ;;  %v11112_v20 = vmul.f32 %v14339_v15, %v10387_v14  ;;  %v14345_v26 = vld [vmem:[#allocation181_spill] sm:$0xff]  ;;  %v14354_v47 = vld [vmem:[#allocation131_spill] sm:$0xff] }
 0x3e3   :  { %14335 = vst [vmem:[#allocation193_spill] sm:$0xff] %v11100_v55  ;;  %14337 = vst [vmem:[#allocation134_spill] sm:$0xff] %v11104_v34  ;;  %v5043_v61 = vrot.slane %v5013_v9, 5  ;;  %v11115_v63 = vsel %vm1865_vm7, %v3559_v53, %v3558_v4  ;;  %v11119_v16 = vmul.f32 %v14341_v49, %v10462_v41  ;;  %v11123_v54 = vmul.f32 %v14343_v45, %v10393_v52  ;;  %v14360_v55 = vld [vmem:[#allocation151_spill] sm:$0xff] }
 0x3e4   :  { %14338 = vst [vmem:[#allocation158_spill] sm:$0xff] %v11108_v60  ;;  %14340 = vst [vmem:[#allocation130_spill] sm:$0xff] %v11115_v63  ;;  %v11128_v57 = vmul.f32 %v14345_v26, %v10471_v58  ;;  %v11134_v4 = vadd.f32 %v3497_v21, %v3496_v46  ;;  %v11138_v25 = vmul.f32 %v14348_v31, %v14319_v48  ;;  %v5045_v53 = vrot.slane %v5015_v19, 4  ;;  %v14350_v26 = vld [vmem:[#allocation122_spill] sm:$0xff]  ;;  %v14352_v46 = vld [vmem:[#allocation127_spill] sm:$0xff] }
 0x3e5   :  { %14342 = vst [vmem:[#allocation159_spill] sm:$0xff] %v11119_v16  ;;  %14344 = vst [vmem:[#allocation126_spill] sm:$0xff] %v11123_v54  ;;  %v5044_v5 = vsel %vm1853_vm3, %v5043_v61, %v5042_v40  ;;  %v6628_v17 = vpop.eup %6627  ;;  %v11140_v49 = vadd.f32 %v3563_v27, %v3546_v35  ;;  %v14351_v61 = vld [vmem:[#allocation242_spill] sm:$0xff]  ;;  %v14353_v35 = vld [vmem:[#allocation119_spill] sm:$0xff] }
 0x3e6   :  { %14346 = vst [vmem:[#allocation160_spill] sm:$0xff] %v11128_v57  ;;  %14347 = vst [vmem:[#allocation153_spill] sm:$0xff] %v11134_v4  ;;  %v11144_v18 = vmul.f32 %v6628_v17, %v14350_v26  ;;  %v11151_v21 = vmul.f32 %v6628_v17, %v14352_v46  ;;  %v11154_v31 = vsel %vm1856_vm4, %v5045_v53, %v5044_v5  ;;  %v14355_v26 = vld [vmem:[#allocation132_spill] sm:$0xff]  ;;  %v14356_v40 = vld [vmem:[#allocation102_spill] sm:$0xff] }
 0x3e7   :  { %14349 = vst [vmem:[#allocation161_spill] sm:$0xff] %v11138_v25  ;;  %v6630_v15 = vpop.eup %6629  ;;  %v11158_v27 = vmul.f32 %v6628_v17, %v14353_v35  ;;  %v11164_v45 = vmul.f32 %v6628_v17, %v14355_v26  ;;  %v14357_v46 = vld [vmem:[#allocation118_spill] sm:$0xff]  ;;  %v14361_v57 = vld [vmem:[#allocation123_spill] sm:$0xff] }
 0x3e8   :  { %v11148_v9 = vmul.f32 %v6630_v15, %v14351_v61  ;;  %v11161_v38 = vmul.f32 %v6630_v15, %v14354_v47  ;;  %v11168_v6 = vmul.f32 %v6630_v15, %v14356_v40  ;;  %v11171_v16 = vmul.f32 %v6630_v15, %v14357_v46  ;;  %v14358_v5 = vld [vmem:[#allocation146_spill] sm:$0xff]  ;;  %v14363_v40 = vld [vmem:[#allocation75_spill] sm:$0xff]  ;;  %v14364_v46 = vld [vmem:[#allocation152_spill] sm:$0xff] }
 0x3e9   :  { %v11174_v53 = vmul.f32 %v6628_v17, %v14358_v5  ;;  %v14359_v19 = vld [vmem:[#allocation142_spill] sm:$0xff]  ;;  %v11180_v47 = vmul.f32 %v6628_v17, %v14360_v55  ;;  %v11183_v26 = vmul.f32 %v6630_v15, %v14361_v57  ;;  %v11186_v61 = vmul.f32 %v6628_v17, %v14362_v59  ;;  %v14366_v5 = vld [vmem:[#allocation133_spill] sm:$0xff]  ;;  %v14371_v59 = vld [vmem:[#allocation72_spill] sm:$0xff] }
 0x3ea   :  { %v11177_v35 = vmul.f32 %v6630_v15, %v14359_v19  ;;  %v3931_v28 = vmul.f32 %v11144_v18, %v14363_v40  ;;  %v11191_v62 = vmul.f32 %v6630_v15, %v14364_v46  ;;  %v11194_v29 = vmul.f32 %v6628_v17, %v14366_v5  ;;  %v14368_v19 = vld [vmem:[#allocation77_spill] sm:$0xff]  ;;  %v14369_v55 = vld [vmem:[#allocation78_spill] sm:$0xff]  ;;  %v14373_v46 = vld [vmem:[#allocation80_spill] sm:$0xff] }
 0x3eb   :  { %v3932_v60 = vmul.f32 %v11148_v9, %v14368_v19  ;;  %v3933_v36 = vmul.f32 %v11151_v21, %v14369_v55  ;;  %v14370_v57 = vld [vmem:[#allocation165_spill] sm:$0xff]  ;;  %v3929_v34 = vmul.f32 %v11158_v27, %v14371_v59  ;;  %v3934_v40 = vmul.f32 %v11161_v38, %v14372_v2  ;;  %v14374_v17 = vld [vmem:[#allocation74_spill] sm:$0xff]  ;;  %v14376_v54 = vld [vmem:[#allocation83_spill] sm:$0xff] }
 0x3ec   :  { %14365 = vst [vmem:[#allocation155_spill] sm:$0xff] %v11191_v62  ;;  %14367 = vst [vmem:[#allocation162_spill] sm:$0xff] %v11194_v29  ;;  %v11201_v3 = vmul.f32 %v6630_v15, %v14370_v57  ;;  %v3935_v4 = vmul.f32 %v11164_v45, %v14373_v46  ;;  %v3930_v5 = vmul.f32 %v11168_v6, %v14374_v17  ;;  %v14377_v57 = vld [vmem:[#allocation169_spill] sm:$0xff]  ;;  %v3961_v44 = vrot.slane %v3931_v28, 7  ;;  %v14378_v25 = vld [vmem:[#allocation187_spill] sm:$0xff] }
 0x3ed   :  { %v3936_v19 = vmul.f32 %v11171_v16, %v14375_v32  ;;  %v3937_v55 = vmul.f32 %v11174_v53, %v14376_v54  ;;  %v3938_v15 = vmul.f32 %v11177_v35, %v14250_v10  ;;  %v3939_v59 = vmul.f32 %v11180_v47, %v14377_v57 }
 0x3ee   :  { %v3940_v2 = vmul.f32 %v11183_v26, %v14259_v37  ;;  %v3963_v46 = vrot.slane %v3933_v36, 6  ;;  %v3941_v17 = vmul.f32 %v11186_v61, %v14378_v25  ;;  %v3942_v32 = vmul.f32 %v11191_v62, %v14266_v50 }
 0x3ef   :  { %v3943_v54 = vmul.f32 %v11194_v29, %v14312_v8  ;;  %v3975_v63 = vrot.slane %v3932_v60, 7  ;;  %v3944_v10 = vmul.f32 %v11201_v3, %v14269_v39  ;;  %v3962_v57 = vsel %vm1847_vm1, %v3961_v44, %v3929_v34 }
 0x3f0   :  { %v3965_v13 = vrot.slane %v3935_v4, 5  ;;  %v3977_v51 = vrot.slane %v3934_v40, 6  ;;  %v3964_v28 = vsel %vm1850_vm2, %v3963_v46, %v3962_v57  ;;  %v3967_v36 = vrot.slane %v3937_v55, 4 }
 0x3f1   :  { %v3976_v37 = vsel %vm1847_vm1, %v3975_v63, %v3930_v5  ;;  %v3979_v25 = vrot.slane %v3936_v19, 5  ;;  %v3969_v50 = vrot.slane %v3939_v59, 3  ;;  %v3981_v8 = vrot.slane %v3938_v15, 4 }
 0x3f2   :  { %v3966_v56 = vsel %vm1853_vm3, %v3965_v13, %v3964_v28  ;;  %v3978_v62 = vsel %vm1850_vm2, %v3977_v51, %v3976_v37  ;;  %v3971_v29 = vrot.slane %v3941_v17, 2  ;;  %v3983_v44 = vrot.slane %v3940_v2, 3 }
 0x3f3   :  { %v3968_v60 = vsel %vm1856_vm4, %v3967_v36, %v3966_v56  ;;  %v3980_v39 = vsel %vm1853_vm3, %v3979_v25, %v3978_v62  ;;  %v3973_v4 = vrot.slane %v3943_v54, 1  ;;  %v3985_v55 = vrot.slane %v3942_v32, 2  ;;  %v14381_v28 = vld [vmem:[#allocation162_spill] sm:$0xff] }
 0x3f4   :  { %v3970_v34 = vsel %vm1859_vm5, %v3969_v50, %v3968_v60  ;;  %v3982_v40 = vsel %vm1856_vm4, %v3981_v8, %v3980_v39  ;;  %v3987_v19 = vrot.slane %v3944_v10, 1  ;;  %v4005_v37 = vmul.f32 %v11144_v18, %v10368_v22  ;;  %v14477_v22 = vld [vmem:[#allocation90_spill] sm:$0xff] }
 0x3f5   :  { %v3972_v63 = vsel %vm1862_vm6, %v3971_v29, %v3970_v34  ;;  %v3984_v13 = vsel %vm1859_vm5, %v3983_v44, %v3982_v40  ;;  %v3565_v56 = vrot.slane %v11140_v49, 2  ;;  %v4007_v50 = vmul.f32 %v11151_v21, %v10372_v43  ;;  %v14382_v34 = vld [vmem:[#allocation113_spill] sm:$0xff] }
 0x3f6   :  { %v11244_v51 = vsel %vm1865_vm7, %v3973_v4, %v3972_v63  ;;  %v3986_v2 = vsel %vm1862_vm6, %v3985_v55, %v3984_v13  ;;  %v4009_v32 = vmul.f32 %v11164_v45, %v10376_v0  ;;  %v14379_v10 = vrot.slane %v11112_v20, 3  ;;  %v14383_v4 = vld [vmem:[#allocation155_spill] sm:$0xff]  ;;  %v14476_v0 = vld [vmem:[#allocation89_spill] sm:$0xff] }
 0x3f7   :  { %v11250_v39 = vsel %vm1865_vm7, %v3987_v19, %v3986_v2  ;;  %v5858_v29 = vrot.slane %v10907_v24, 6  ;;  %v4003_v62 = vmul.f32 %v11158_v27, %v10379_v12  ;;  %v4006_v54 = vmul.f32 %v11148_v9, %v10467_v1  ;;  %v14384_v19 = vld [vmem:[#allocation241_spill] sm:$0xff] }
 0x3f8   :  { %v5048_v8 = vsel %vm1859_vm5, %v14379_v10, %v11154_v31  ;;  %v4011_v25 = vmul.f32 %v11174_v53, %v10383_v42  ;;  %v14380_v59 = vrot.slane %v10889_v30, 7  ;;  %v4004_v20 = vmul.f32 %v11168_v6, %v10462_v41 }
 0x3f9   :  { %v4008_v24 = vmul.f32 %v11161_v38, %v10471_v58  ;;  %v4013_v31 = vmul.f32 %v11180_v47, %v10387_v14  ;;  %v4035_v17 = vrot.slane %v4005_v37, 7  ;;  %v4010_v5 = vmul.f32 %v11171_v16, %v14313_v11 }
 0x3fa   :  { %v5857_v46 = vsel %vm1847_vm1, %v14380_v59, %v10925_v23  ;;  %v4012_v15 = vmul.f32 %v11177_v35, %v14315_v7  ;;  %v4015_v30 = vmul.f32 %v11186_v61, %v10393_v52  ;;  %v4037_v23 = vrot.slane %v4007_v50, 6 }
 0x3fb   :  { %v4014_v57 = vmul.f32 %v11183_v26, %v14318_v33  ;;  %v4017_v36 = vmul.f32 %v14381_v28, %v14319_v48  ;;  %v4036_v60 = vsel %vm1847_vm1, %v4035_v17, %v4003_v62  ;;  %v4039_v44 = vrot.slane %v4009_v32, 5 }
 0x3fc   :  { %v4016_v40 = vmul.f32 %v14383_v4, %v14382_v34  ;;  %v4038_v55 = vsel %vm1850_vm2, %v4037_v23, %v4036_v60  ;;  %v4041_v63 = vrot.slane %v4011_v25, 4  ;;  %v4049_v13 = vrot.slane %v4006_v54, 7 }
 0x3fd   :  { %v4018_v37 = vmul.f32 %v11201_v3, %v14384_v19  ;;  %v4040_v2 = vsel %vm1853_vm3, %v4039_v44, %v4038_v55  ;;  %v4043_v50 = vrot.slane %v4013_v31, 3  ;;  %v4051_v10 = vrot.slane %v4008_v24, 6  ;;  %v14386_v55 = vld [vmem:[#allocation130_spill] sm:$0xff] }
 0x3fe   :  { %v4042_v59 = vsel %vm1856_vm4, %v4041_v63, %v4040_v2  ;;  %v4045_v48 = vrot.slane %v4015_v30, 2  ;;  %v4050_v62 = vsel %vm1847_vm1, %v4049_v13, %v4004_v20  ;;  %v4053_v32 = vrot.slane %v4010_v5, 5  ;;  %v14385_v20 = vld [vmem:[#allocation2_spill] sm:$0xff]  ;;  %v14388_v2 = vld [vmem:[#allocation161_spill] sm:$0xff] }
 0x3ff   :  { %v4044_v17 = vsel %vm1859_vm5, %v4043_v50, %v4042_v59  ;;  %v4047_v52 = vrot.slane %v4017_v36, 1  ;;  %v4052_v23 = vsel %vm1850_vm2, %v4051_v10, %v4050_v62  ;;  %v4055_v25 = vrot.slane %v4012_v15, 4  ;;  %v14390_v59 = vld [vmem:[#allocation126_spill] sm:$0xff] }
 0x400   :  { %v4046_v54 = vsel %vm1862_vm6, %v4045_v48, %v4044_v17  ;;  %v4054_v60 = vsel %vm1853_vm3, %v4053_v32, %v4052_v23  ;;  %v4057_v14 = vrot.slane %v4014_v57, 3  ;;  %v5859_v31 = vsel %vm1850_vm2, %v5858_v29, %v5857_v46  ;;  %v14389_v46 = vld [vmem:[#allocation143_spill] sm:$0xff]  ;;  %v14393_v23 = vld [vmem:[#allocation136_spill] sm:$0xff] }
 0x401   :  { %v4048_v24 = vsel %vm1865_vm7, %v4047_v52, %v4046_v54  ;;  %v4056_v30 = vsel %vm1856_vm4, %v4055_v25, %v4054_v60  ;;  %v4059_v44 = vrot.slane %v4016_v40, 2  ;;  %v5860_v5 = vrot.slane %v14385_v20, 5  ;;  %v14394_v54 = vld [vmem:[#allocation6_spill] sm:$0xff]  ;;  %v14396_v20 = vld [vmem:[#allocation71_spill] sm:$0xff] }
 0x402   :  { %v14387_v36 = vrot.slane %v14386_v55, 4  ;;  %v3991_v15 = vrot.slane %v11244_v51, 4  ;;  %v4058_v48 = vsel %vm1859_vm5, %v4057_v14, %v4056_v30  ;;  %v4061_v13 = vrot.slane %v4018_v37, 1  ;;  %v14392_v14 = vld [vmem:[#allocation135_spill] sm:$0xff] }
 0x403   :  { %v4060_v57 = vsel %vm1862_vm6, %v4059_v44, %v4058_v48  ;;  %v5051_v29 = vrot.slane %v14388_v2, 1  ;;  %v5861_v52 = vsel %vm1853_vm3, %v5860_v5, %v5859_v31  ;;  %v5862_v50 = vrot.slane %v14389_v46, 4  ;;  %v14395_v31 = vld [vmem:[#allocation139_spill] sm:$0xff]  ;;  %v14398_v48 = vld [vmem:[#allocation140_spill] sm:$0xff] }
 0x404   :  { %v3570_v63 = vadd.f32 %v14387_v36, %v14386_v55  ;;  %v11312_v40 = vadd.f32 %v3565_v56, %v11140_v49  ;;  %v11315_v10 = vsel %vm1865_vm7, %v4061_v13, %v4060_v57  ;;  %v14391_v62 = vrot.slane %v14390_v59, 2  ;;  %v14399_v57 = vld [vmem:[#allocation144_spill] sm:$0xff] }
 0x405   :  { %v5864_v37 = vrot.slane %v14392_v14, 3  ;;  %v5863_v17 = vsel %vm1856_vm4, %v5862_v50, %v5861_v52  ;;  %v5866_v25 = vrot.slane %v14393_v23, 2  ;;  %v5870_v60 = vrot.slane %v14394_v54, 7  ;;  %v14400_v52 = vld [vmem:[#allocation134_spill] sm:$0xff]  ;;  %v14406_v54 = vld [vmem:[#allocation69_spill] sm:$0xff] }
 0x406   :  { %v5050_v32 = vsel %vm1862_vm6, %v14391_v62, %v5048_v8  ;;  %v5872_v30 = vrot.slane %v14395_v31, 6  ;;  %v3571_v44 = vrot.slane %v3570_v63, 2  ;;  %v3992_v49 = vadd.f32 %v3991_v15, %v11244_v51 }
 0x407   :  { %v5865_v56 = vsel %vm1859_vm5, %v5864_v37, %v5863_v17  ;;  %v5868_v5 = vrot.slane %v14396_v20, 1  ;;  %v5871_v13 = vsel %vm1847_vm1, %v5870_v60, %v14398_v48  ;;  %v5874_v2 = vrot.slane %v14399_v57, 5  ;;  %v14404_v17 = vld [vmem:[#allocation137_spill] sm:$0xff]  ;;  %v14408_v48 = vld [vmem:[#allocation158_spill] sm:$0xff] }
 0x408   :  { %v5867_v8 = vsel %vm1862_vm6, %v5866_v25, %v5865_v56  ;;  %v14401_v46 = vrot.slane %v14400_v52, 1  ;;  %v11339_v51 = vsel %vm1865_vm7, %v5051_v29, %v5050_v32  ;;  %v5873_v59 = vsel %vm1850_vm2, %v5872_v30, %v5871_v13  ;;  %v14407_v30 = vld [vmem:[#allocation121_spill] sm:$0xff] }
 0x409   :  { %14403 = vst [vmem:[#allocation163_spill] sm:$0xff] %v11339_v51  ;;  %v5869_v15 = vsel %vm1865_vm7, %v5868_v5, %v5867_v8  ;;  %v3567_v62 = vrot.slane %v11312_v40, 1  ;;  %v3997_v14 = vrot.slane %v11250_v39, 4  ;;  %v5875_v37 = vsel %vm1853_vm3, %v5874_v2, %v5873_v59  ;;  %v14444_v8 = vld [vmem:[#allocation236_spill] sm:$0xff]  ;;  %v14446_v51 = vld [vmem:[#allocation238_spill] sm:$0xff] }
 0x40a   :  { %v11336_v50 = vadd.f32 %v14401_v46, %v14400_v52  ;;  %v5876_v23 = vrot.slane %v14404_v17, 4  ;;  %6146 = vst [vmem:[%s12761_s7 + $0xb0] sm:$0xff] %v5869_v15  ;;  %v11350_v25 = vadd.f32 %v3571_v44, %v3570_v63  ;;  %v3993_v29 = vrot.slane %v3992_v49, 2  ;;  %v14409_v63 = vld [vmem:[#allocation141_spill] sm:$0xff] }
 0x40b   :  { %v4065_v32 = vrot.slane %v4048_v24, 4  ;;  %v5878_v60 = vrot.slane %v14406_v54, 3  ;;  %v5880_v56 = vrot.slane %v14407_v30, 2  ;;  %v5902_v20 = vrot.slane %v11144_v18, 7  ;;  %v14410_v30 = vld [vmem:[#allocation120_spill] sm:$0xff] }
 0x40c   :  { %14402 = vst [vmem:[#allocation156_spill] sm:$0xff] %v11336_v50  ;;  %14405 = vst [vmem:[#allocation225_spill] sm:$0xff] %v11350_v25  ;;  %v5877_v31 = vsel %vm1856_vm4, %v5876_v23, %v5875_v37  ;;  %v5904_v5 = vrot.slane %v11151_v21, 6  ;;  %v5648_v13 = vrot.slane %v14408_v48, 7  ;;  %v5882_v44 = vrot.slane %v14409_v63, 1  ;;  %v14416_v63 = vld [vmem:[#allocation191_spill] sm:$0xff] }
 0x40d   :  { %v5879_v57 = vsel %vm1859_vm5, %v5878_v60, %v5877_v31  ;;  %v11362_v2 = vadd.f32 %v3997_v14, %v11250_v39  ;;  %v5903_v46 = vsel %vm1847_vm1, %v5902_v20, %v11158_v27  ;;  %v5906_v18 = vrot.slane %v11164_v45, 5  ;;  %v14413_v20 = vld [vmem:[#allocation226_spill] sm:$0xff] }
 0x40e   :  { %v5881_v52 = vsel %vm1862_vm6, %v5880_v56, %v5879_v57  ;;  %v11368_v15 = vadd.f32 %v3993_v29, %v3992_v49  ;;  %v5905_v59 = vsel %vm1850_vm2, %v5904_v5, %v5903_v46  ;;  %v5908_v37 = vrot.slane %v11174_v53, 4  ;;  %v14414_v5 = vld [vmem:[#allocation148_spill] sm:$0xff] }
 0x40f   :  { %v5883_v21 = vsel %vm1865_vm7, %v5882_v44, %v5881_v52  ;;  %v11373_v17 = vadd.f32 %v4065_v32, %v4048_v24  ;;  %v5907_v39 = vsel %vm1853_vm3, %v5906_v18, %v5905_v59  ;;  %v5910_v14 = vrot.slane %v11180_v47, 3  ;;  %v14417_v44 = vld [vmem:[#allocation228_spill] sm:$0xff]  ;;  %v14418_v18 = vld [vmem:[#allocation147_spill] sm:$0xff] }
 0x410   :  { %v5916_v23 = vrot.slane %v11148_v9, 7  ;;  %6147 = vst [vmem:[%s12761_s7 + $0xb8] sm:$0xff] %v5883_v21  ;;  %v5909_v45 = vsel %vm1856_vm4, %v5908_v37, %v5907_v39  ;;  %v5912_v27 = vrot.slane %v11186_v61, 2  ;;  %v5914_v49 = vrot.slane %v14381_v28, 1  ;;  %v14419_v21 = vld [vmem:[#allocation229_spill] sm:$0xff]  ;;  %v14420_v37 = vld [vmem:[#allocation54_spill] sm:$0xff] }
 0x411   :  { %v5918_v53 = vrot.slane %v11161_v38, 6  ;;  %v5911_v24 = vsel %vm1859_vm5, %v5910_v14, %v5909_v45  ;;  %v5920_v47 = vrot.slane %v11171_v16, 5  ;;  %v5922_v9 = vrot.slane %v11177_v35, 4  ;;  %v14412_v35 = vld [vmem:[#allocation150_spill] sm:$0xff] }
 0x412   :  { %v5917_v29 = vsel %vm1847_vm1, %v5916_v23, %v11168_v6  ;;  %v5913_v32 = vsel %vm1862_vm6, %v5912_v27, %v5911_v24  ;;  %v5924_v60 = vrot.slane %v11183_v26, 3  ;;  %v5926_v61 = vrot.slane %v14383_v4, 2  ;;  %v14411_v6 = vld [vmem:[#allocation224_spill] sm:$0xff]  ;;  %v14415_v4 = vld [vmem:[#allocation227_spill] sm:$0xff]  ;;  %v14421_v39 = vld [vmem:[#allocation230_spill] sm:$0xff] }
 0x413   :  { %v5919_v54 = vsel %vm1850_vm2, %v5918_v53, %v5917_v29  ;;  %v5915_v28 = vsel %vm1865_vm7, %v5914_v49, %v5913_v32  ;;  %v5928_v31 = vrot.slane %v11201_v3, 1  ;;  %v2162_v56 = vadd.f32 %v14411_v6, %v14410_v30 }
 0x414   :  { %v5921_v38 = vsel %vm1853_vm3, %v5920_v47, %v5919_v54  ;;  %6148 = vst [vmem:[%s12761_s7 + $0xc0] sm:$0xff] %v5915_v28  ;;  %v2180_v26 = vadd.f32 %v14413_v20, %v14412_v35  ;;  %v2198_v57 = vadd.f32 %v14415_v4, %v14414_v5  ;;  %v2216_v52 = vadd.f32 %v14417_v44, %v14416_v63  ;;  %v14423_v28 = vld [vmem:[#allocation231_spill] sm:$0xff] }
 0x415   :  { %v5923_v16 = vsel %vm1856_vm4, %v5922_v9, %v5921_v38  ;;  %v2163_v46 = vrot.slane %v2162_v56, 4  ;;  %v2234_v59 = vadd.f32 %v14419_v21, %v14418_v18  ;;  %v2252_v14 = vadd.f32 %v14421_v39, %v14420_v37 }
 0x416   :  { %v5925_v3 = vsel %vm1859_vm5, %v5924_v60, %v5923_v16  ;;  %v2181_v45 = vrot.slane %v2180_v26, 4  ;;  %v2199_v27 = vrot.slane %v2198_v57, 4  ;;  %v2217_v49 = vrot.slane %v2216_v52, 4  ;;  %v14422_v60 = vld [vmem:[#allocation157_spill] sm:$0xff] }
 0x417   :  { %v5927_v23 = vsel %vm1862_vm6, %v5926_v61, %v5925_v3  ;;  %v2164_v24 = vadd.f32 %v2163_v46, %v2162_v56  ;;  %v2235_v29 = vrot.slane %v2234_v59, 4  ;;  %v2253_v47 = vrot.slane %v2252_v14, 4  ;;  %v14424_v46 = vld [vmem:[#allocation189_spill] sm:$0xff] }
 0x418   :  { %v5929_v53 = vsel %vm1865_vm7, %v5928_v31, %v5927_v23  ;;  %v2182_v9 = vadd.f32 %v2181_v45, %v2180_v26  ;;  %v2200_v32 = vadd.f32 %v2199_v27, %v2198_v57  ;;  %v2218_v54 = vadd.f32 %v2217_v49, %v2216_v52 }
 0x419   :  { %6149 = vst [vmem:[%s12761_s7 + $0xc8] sm:$0xff] %v5929_v53  ;;  %v2270_v38 = vadd.f32 %v14423_v28, %v14422_v60  ;;  %v3995_v61 = vrot.slane %v11368_v15, 1  ;;  %v2165_v30 = vrot.slane %v2164_v24, 2  ;;  %v2236_v6 = vadd.f32 %v2235_v29, %v2234_v59 }
 0x41a   :  { %v2254_v16 = vadd.f32 %v2253_v47, %v2252_v14  ;;  %v2183_v35 = vrot.slane %v2182_v9, 2  ;;  %v2201_v31 = vrot.slane %v2200_v32, 2  ;;  %v2219_v56 = vrot.slane %v2218_v54, 2 }
 0x41b   :  { %v2271_v20 = vrot.slane %v2270_v38, 4  ;;  %v4067_v5 = vrot.slane %v11373_v17, 2  ;;  %v2166_v4 = vadd.f32 %v2165_v30, %v2164_v24  ;;  %v2237_v63 = vrot.slane %v2236_v6, 2 }
 0x41c   :  { %v2255_v44 = vrot.slane %v2254_v16, 2  ;;  %v2184_v26 = vadd.f32 %v2183_v35, %v2182_v9  ;;  %v2202_v57 = vadd.f32 %v2201_v31, %v2200_v32  ;;  %v2220_v52 = vadd.f32 %v2219_v56, %v2218_v54 }
 0x41d   :  { %v2272_v3 = vadd.f32 %v2271_v20, %v2270_v38  ;;  %v14425_v18 = vrot.slane %v14424_v46, 1  ;;  %v2167_v59 = vrot.slane %v2166_v4, 1  ;;  %v2238_v37 = vadd.f32 %v2237_v63, %v2236_v6 }
 0x41e   :  { %v2256_v39 = vadd.f32 %v2255_v44, %v2254_v16  ;;  %v2185_v14 = vrot.slane %v2184_v26, 1  ;;  %v2203_v23 = vrot.slane %v2202_v57, 1  ;;  %v2221_v45 = vrot.slane %v2220_v52, 1 }
 0x41f   :  { %v11426_v21 = vadd.f32 %v14425_v18, %v14424_v46  ;;  %v2273_v27 = vrot.slane %v2272_v3, 2  ;;  %v4068_v49 = vadd.f32 %v4067_v5, %v11373_v17  ;;  %v4071_v53 = vrot.slane %v11315_v10, 4  ;;  %v14434_v18 = vld [vmem:[#allocation55_spill] sm:$0xff] }
 0x420   :  { %v2168_v24 = vadd.f32 %v2167_v59, %v2166_v4  ;;  %v2239_v29 = vrot.slane %v2238_v37, 1  ;;  %v2186_v47 = vadd.f32 %v2185_v14, %v2184_v26  ;;  %v2204_v9 = vadd.f32 %v2203_v23, %v2202_v57  ;;  %v1019_v26 = vpop.f32.mrf.mxu1  ;;  %v14431_v57 = vld [vmem:[#allocation51_spill] sm:$0xff]  ;;  %v14436_v23 = vld [vmem:[#allocation56_spill] sm:$0xff] }
 0x421   :  { %v2257_v32 = vrot.slane %v2256_v39, 1  ;;  %v2274_v54 = vadd.f32 %v2273_v27, %v2272_v3  ;;  %v11433_v60 = vadd.f32 %v3567_v62, %v11312_v40  ;;  %v3999_v38 = vrot.slane %v11362_v2, 2  ;;  %v14429_v40 = vld [vmem:[#allocation192_spill] sm:$0xff]  ;;  %v14437_v27 = vld [vmem:[#allocation57_spill] sm:$0xff] }
 0x422   :  { %v2222_v30 = vadd.f32 %v2221_v45, %v2220_v52  ;;  %v2240_v6 = vadd.f32 %v2239_v29, %v2238_v37  ;;  %v2284_v16 = vmax.f32 %v11426_v21, %v2186_v47  ;;  %v2285_v35 = vmax.f32 %v2168_v24, %v2204_v9  ;;  %v14432_v3 = vld [vmem:[#allocation52_spill] sm:$0xff] }
 0x423   :  { %14426 = vst [vmem:[#allocation171_spill] sm:$0xff] %v11433_v60  ;;  %v2275_v17 = vrot.slane %v2274_v54, 1  ;;  %v11439_v31 = vadd.f32 %v3995_v61, %v11368_v15  ;;  %v4069_v56 = vrot.slane %v4068_v49, 1  ;;  %v11442_v20 = vadd.f32 %v4071_v53, %v11315_v10  ;;  %v14433_v61 = vld [vmem:[#allocation53_spill] sm:$0xff] }
 0x424   :  { %v11448_v62 = vsel %vm5625_vm8, %v14429_v40, %v5648_v13  ;;  %v2258_v5 = vadd.f32 %v2257_v32, %v2256_v39  ;;  %v2286_v63 = vmax.f32 %v2284_v16, %v2222_v30  ;;  %v2287_v44 = vmax.f32 %v2285_v35, %v2240_v6  ;;  %v14440_v16 = vld [vmem:[#allocation232_spill] sm:$0xff]  ;;  %v14441_v40 = vld [vmem:[#allocation233_spill] sm:$0xff] }
 0x425   :  { %14427 = vst [vmem:[#allocation84_spill] sm:$0xff] %v11439_v31  ;;  %14428 = vst [vmem:[#allocation209_spill] sm:$0xff] %v11442_v20  ;;  %v2276_v4 = vadd.f32 %v2275_v17, %v2274_v54  ;;  %v5083_v52 = vmul.f32 %v1019_v26, %v14431_v57  ;;  %v5091_v15 = vmul.f32 %v1019_v26, %v14432_v3  ;;  %v14439_v54 = vld [vmem:[#allocation58_spill] sm:$0xff]  ;;  %v11537_v60 = vld [vmem:[%s12761_s7 + $0x58] sm:$0xff] }
 0x426   :  { %14430 = vst [vmem:[#allocation172_spill] sm:$0xff] %v11448_v62  ;;  %v5099_v46 = vmul.f32 %v1019_v26, %v14433_v61  ;;  %v5107_v10 = vmul.f32 %v1019_v26, %v14434_v18  ;;  %v11455_v59 = vadd.f32 %v3999_v38, %v11362_v2  ;;  %v2288_v13 = vmax.f32 %v2286_v63, %v2258_v5  ;;  %v11468_v2 = vld [vmem:[%s12761_s7 + $0x50] sm:$0xff] }
 0x427   :  { %v2289_v37 = vmax.f32 %v2287_v44, %v2276_v4  ;;  %v5115_v45 = vmul.f32 %v1019_v26, %v14436_v23  ;;  %v5123_v53 = vmul.f32 %v1019_v26, %v14437_v27  ;;  %v11462_v29 = vadd.f32 %v4069_v56, %v4068_v49  ;;  %v14442_v44 = vld [vmem:[#allocation234_spill] sm:$0xff]  ;;  %v14443_v49 = vld [vmem:[#allocation235_spill] sm:$0xff]  ;;  %14469 = vst [vmem:[#allocation203_spill] sm:$0xff] %v11537_v60 }
 0x428   :  { %14435 = vst [vmem:[#allocation174_spill] sm:$0xff] %v11455_v59  ;;  %v5131_v17 = vmul.f32 %v1019_v26, %v14439_v54  ;;  %v5139_v38 = vmul.f32 %v11468_v2, %v1019_v26  ;;  %v11472_v35 = vadd.f32 %v5083_v52, %v14440_v16  ;;  %v11475_v63 = vadd.f32 %v5091_v15, %v14441_v40  ;;  %v14445_v16 = vld [vmem:[#allocation237_spill] sm:$0xff] }
 0x429   :  { %14438 = vst [vmem:[#allocation173_spill] sm:$0xff] %v11462_v29  ;;  %v2290_v32 = vmax.f32 %v2288_v13, %v2289_v37  ;;  %v11478_v28 = vadd.f32 %v5099_v46, %v14442_v44  ;;  %v11481_v56 = vadd.f32 %v5107_v10, %v14443_v49  ;;  %v915_v13 = vpop.f32.mrf.mxu0  ;;  %v11485_v52 = vadd.f32 %v5115_v45, %v14444_v8 }
 0x42a   :  { %v11488_v15 = vadd.f32 %v5123_v53, %v14445_v16  ;;  %v11491_v55 = vadd.f32 %v5131_v17, %v14446_v51  ;;  %v14452_v53 = vld [vmem:[#allocation39_spill] sm:$0xff]  ;;  %v14453_v17 = vld [vmem:[#allocation40_spill] sm:$0xff]  ;;  %v14454_v16 = vld [vmem:[#allocation41_spill] sm:$0xff] }
 0x42b   :  { %v2292_v37 = vsub.f32 %v11426_v21, %v2290_v32  ;;  %v2294_v36 = vsub.f32 %v2168_v24, %v2290_v32  ;;  %v2296_v14 = vsub.f32 %v2186_v47, %v2290_v32  ;;  %v2298_v39 = vsub.f32 %v2204_v9, %v2290_v32  ;;  %v14447_v21 = vld [vmem:[#allocation240_spill] sm:$0xff]  ;;  %v11496_v47 = vpop.f32.mrf.mxu0  ;;  %v14448_v9 = vld [vmem:[#allocation34_spill] sm:$0xff] }
 0x42c   :  { %v2300_v48 = vsub.f32 %v2222_v30, %v2290_v32  ;;  %v2302_v26 = vsub.f32 %v2240_v6, %v2290_v32  ;;  %v2304_v40 = vsub.f32 %v2258_v5, %v2290_v32  ;;  %v2306_v10 = vsub.f32 %v2276_v4, %v2290_v32  ;;  %v14449_v6 = vld [vmem:[#allocation35_spill] sm:$0xff]  ;;  %v14451_v4 = vld [vmem:[#allocation38_spill] sm:$0xff] }
 0x42d   :  { %v2309_v46 = vmul.f32 1.442695, %v2292_v37  ;;  %v2313_v44 = vmul.f32 1.442695, %v2294_v36  ;;  %v2317_v25 = vmul.f32 1.442695, %v2296_v14  ;;  %v11494_v24 = vadd.f32 %v5139_v38, %v14447_v21  ;;  %v919_v21 = vpop.f32.mrf.mxu0 }
 0x42e   :  { %v2321_v49 = vmul.f32 1.442695, %v2298_v39  ;;  %v2325_v8 = vmul.f32 1.442695, %v2300_v48  ;;  %v2571_v30 = vmul.f32 %v915_v13, %v14448_v9  ;;  %v2579_v45 = vmul.f32 %v915_v13, %v14449_v6  ;;  %v14450_v36 = vld [vmem:[#allocation37_spill] sm:$0xff]  ;;  %v14455_v9 = vld [vmem:[#allocation59_spill] sm:$0xff] }
 0x42f   :  { %6631 = vpow2.f32 %v2309_v46  ;;  %v2329_v5 = vmul.f32 1.442695, %v2302_v26  ;;  %v2587_v14 = vmul.f32 %v915_v13, %v14450_v36  ;;  %v2595_v39 = vmul.f32 %v915_v13, %v14451_v4  ;;  %v6757_v46 = vld [vmem:[%s12761_s7 + $0x40] sm:$0xff]  ;;  %v1021_v26 = vpop.f32.mrf.mxu1  ;;  %v14459_v36 = vld [vmem:[#allocation61_spill] sm:$0xff] }
 0x430   :  { %6633 = vpow2.f32 %v2313_v44  ;;  %v2333_v51 = vmul.f32 1.442695, %v2304_v40  ;;  %v2603_v32 = vmul.f32 %v915_v13, %v14452_v53  ;;  %v2611_v38 = vmul.f32 %v915_v13, %v14453_v17  ;;  %v14463_v53 = vld [vmem:[#allocation65_spill] sm:$0xff] }
 0x431   :  { %6635 = vpow2.f32 %v2317_v25  ;;  %v2337_v37 = vmul.f32 1.442695, %v2306_v10  ;;  %v2619_v48 = vmul.f32 %v915_v13, %v14454_v16  ;;  %v2627_v44 = vmul.f32 %v6757_v46, %v915_v13  ;;  %v14457_v25 = vld [vmem:[#allocation60_spill] sm:$0xff]  ;;  %v14465_v13 = vld [vmem:[#allocation66_spill] sm:$0xff] }
 0x432   :  { %6637 = vpow2.f32 %v2321_v49  ;;  %v11509_v6 = vmul.f32 %v1021_v26, %v14455_v9  ;;  %v11512_v40 = vmul.f32 %v1021_v26, %v14457_v25  ;;  %v11515_v4 = vmul.f32 %v1021_v26, %v14459_v36  ;;  %v14461_v10 = vld [vmem:[#allocation64_spill] sm:$0xff] }
 0x433   :  { %6639 = vpow2.f32 %v2325_v8  ;;  %v11518_v49 = vmul.f32 %v1021_v26, %v14461_v10  ;;  %v11521_v17 = vmul.f32 %v1021_v26, %v14463_v53  ;;  %v11524_v16 = vmul.f32 %v1021_v26, %v14465_v13  ;;  %v14467_v8 = vld [vmem:[#allocation67_spill] sm:$0xff] }
 0x434   :  { %14456 = vst [vmem:[#allocation175_spill] sm:$0xff] %v11509_v6  ;;  %14458 = vst [vmem:[#allocation176_spill] sm:$0xff] %v11512_v40  ;;  %6641 = vpow2.f32 %v2329_v5  ;;  %v11527_v46 = vmul.f32 %v1021_v26, %v14467_v8  ;;  %v2573_v59 = vmul.f32 %v919_v21, %v14431_v57  ;;  %v2581_v31 = vmul.f32 %v919_v21, %v14432_v3  ;;  %v14475_v6 = vld [vmem:[#allocation88_spill] sm:$0xff] }
 0x435   :  { %14460 = vst [vmem:[#allocation177_spill] sm:$0xff] %v11515_v4  ;;  %14462 = vst [vmem:[#allocation200_spill] sm:$0xff] %v11518_v49  ;;  %6643 = vpow2.f32 %v2333_v51  ;;  %v2589_v5 = vmul.f32 %v919_v21, %v14433_v61  ;;  %v2597_v29 = vmul.f32 %v919_v21, %v14434_v18  ;;  %v2605_v20 = vmul.f32 %v919_v21, %v14436_v23  ;;  %v11548_v61 = vld [vmem:[%s12761_s7 + $0x60] sm:$0xff] }
 0x436   :  { %14464 = vst [vmem:[#allocation178_spill] sm:$0xff] %v11521_v17  ;;  %14466 = vst [vmem:[#allocation201_spill] sm:$0xff] %v11524_v16  ;;  %6645 = vpow2.f32 %v2337_v37  ;;  %v11540_v51 = vmul.f32 %v11537_v60, %v1021_v26  ;;  %v2621_v57 = vmul.f32 %v919_v21, %v14439_v54  ;;  %v2629_v3 = vmul.f32 %v11468_v2, %v919_v21  ;;  %v14471_v18 = vld [vmem:[#allocation50_spill] sm:$0xff]  ;;  %v14474_v2 = vld [vmem:[#allocation87_spill] sm:$0xff]  ;;  %v1025_v60 = vpop.f32.mrf.mxu1 }
 0x437   :  { %14468 = vst [vmem:[#allocation204_spill] sm:$0xff] %v11527_v46  ;;  %v2613_v46 = vmul.f32 %v919_v21, %v14437_v27  ;;  %v2631_v23 = vmul.f32 %v11548_v61, %v14471_v18  ;;  %v2635_v37 = vadd.f32 %v2573_v59, %v2571_v30  ;;  %v2653_v16 = vadd.f32 %v2581_v31, %v2579_v45  ;;  %v14472_v27 = vld [vmem:[#allocation85_spill] sm:$0xff]  ;;  %v14473_v54 = vld [vmem:[#allocation86_spill] sm:$0xff]  ;;  %v14478_v59 = vld [vmem:[#allocation91_spill] sm:$0xff] }
 0x438   :  { %14470 = vst [vmem:[#allocation180_spill] sm:$0xff] %v11540_v51  ;;  %v2671_v62 = vadd.f32 %v2589_v5, %v2587_v14  ;;  %v2689_v17 = vadd.f32 %v2597_v29, %v2595_v39  ;;  %v2707_v26 = vadd.f32 %v2605_v20, %v2603_v32  ;;  %v2743_v50 = vadd.f32 %v2621_v57, %v2619_v48  ;;  %v14479_v20 = vld [vmem:[#allocation100_spill] sm:$0xff]  ;;  %v14480_v45 = vld [vmem:[#allocation101_spill] sm:$0xff]  ;;  %v14481_v39 = vld [vmem:[#allocation103_spill] sm:$0xff] }
 0x439   :  { %v2725_v51 = vadd.f32 %v2613_v46, %v2611_v38  ;;  %v2636_v49 = vadd.f32 %v2635_v37, %v14472_v27  ;;  %v2654_v4 = vadd.f32 %v2653_v16, %v14473_v54  ;;  %v2761_v40 = vadd.f32 %v2629_v3, %v2627_v44  ;;  %v14482_v48 = vld [vmem:[#allocation104_spill] sm:$0xff] }
 0x43a   :  { %v2672_v21 = vadd.f32 %v2671_v62, %v14474_v2  ;;  %v2690_v42 = vadd.f32 %v2689_v17, %v14475_v6  ;;  %v2708_v43 = vadd.f32 %v2707_v26, %v14476_v0  ;;  %v2744_v31 = vadd.f32 %v2743_v50, %v14478_v59  ;;  %v14483_v6 = vld [vmem:[#allocation106_spill] sm:$0xff]  ;;  %v14484_v17 = vld [vmem:[#allocation107_spill] sm:$0xff]  ;;  %v14485_v16 = vld [vmem:[#allocation108_spill] sm:$0xff] }
 0x43b   :  { %v2726_v18 = vadd.f32 %v2725_v51, %v14477_v22  ;;  %v2637_v29 = vadd.f32 %v2636_v49, %v14479_v20  ;;  %v2655_v14 = vadd.f32 %v2654_v4, %v14480_v45  ;;  %v11564_v38 = vadd.f32 %v2761_v40, %v2631_v23 }
 0x43c   :  { %v11559_v30 = vpop.eup %6631  ;;  %v2673_v32 = vadd.f32 %v2672_v21, %v14481_v39  ;;  %v2691_v44 = vadd.f32 %v2690_v42, %v14482_v48  ;;  %v2709_v0 = vadd.f32 %v2708_v43, %v14483_v6  ;;  %v2745_v50 = vadd.f32 %v2744_v31, %v14485_v16 }
 0x43d   :  { %v11566_v62 = vpop.eup %6633  ;;  %v2727_v22 = vadd.f32 %v2726_v18, %v14484_v17  ;;  %v2638_v5 = vrot.slane %v2637_v29, 4  ;;  %v2656_v4 = vrot.slane %v2655_v14, 4 }
 0x43e   :  { %v11572_v46 = vpop.eup %6635  ;;  %v2369_v49 = vrot.slane %v11566_v62, 7  ;;  %v2674_v51 = vrot.slane %v2673_v32, 4  ;;  %v2692_v3 = vrot.slane %v2691_v44, 4  ;;  %v2710_v23 = vrot.slane %v2709_v0, 4 }
 0x43f   :  { %v11575_v57 = vpop.eup %6637  ;;  %v2371_v40 = vrot.slane %v11572_v46, 6  ;;  %v2728_v42 = vrot.slane %v2727_v22, 4  ;;  %v2639_v27 = vadd.f32 %v2638_v5, %v2637_v29  ;;  %v2657_v54 = vadd.f32 %v2656_v4, %v2655_v14 }
 0x440   :  { %v11578_v37 = vpop.eup %6639  ;;  %v2370_v43 = vsel %vm1847_vm1, %v2369_v49, %v11559_v30  ;;  %v2373_v26 = vrot.slane %v11575_v57, 5  ;;  %v2675_v59 = vadd.f32 %v2674_v51, %v2673_v32  ;;  %v2693_v31 = vadd.f32 %v2692_v3, %v2691_v44 }
 0x441   :  { %v11583_v2 = vpop.eup %6641  ;;  %v2372_v21 = vsel %vm1850_vm2, %v2371_v40, %v2370_v43  ;;  %v2375_v18 = vrot.slane %v11578_v37, 4  ;;  %v2640_v48 = vrot.slane %v2639_v27, 2  ;;  %v2658_v6 = vrot.slane %v2657_v54, 2 }
 0x442   :  { %v11587_v20 = vpop.eup %6643  ;;  %v2374_v45 = vsel %vm1853_vm3, %v2373_v26, %v2372_v21  ;;  %v2377_v39 = vrot.slane %v11583_v2, 3  ;;  %v2676_v16 = vrot.slane %v2675_v59, 2  ;;  %v2694_v49 = vrot.slane %v2693_v31, 2 }
 0x443   :  { %v11591_v17 = vpop.eup %6645  ;;  %v2376_v29 = vsel %vm1856_vm4, %v2375_v18, %v2374_v45  ;;  %v2379_v14 = vrot.slane %v11587_v20, 2  ;;  %v2641_v44 = vadd.f32 %v2640_v48, %v2639_v27  ;;  %v2659_v4 = vadd.f32 %v2658_v6, %v2657_v54  ;;  %v11603_v27 = vld [vmem:[%s12761_s7 + $0x70] sm:$0xff] }
 0x444   :  { %v2378_v5 = vsel %vm1859_vm5, %v2377_v39, %v2376_v29  ;;  %v2381_v32 = vrot.slane %v11591_v17, 1  ;;  %v2677_v40 = vadd.f32 %v2676_v16, %v2675_v59  ;;  %v2695_v3 = vadd.f32 %v2694_v49, %v2693_v31  ;;  %v14486_v39 = vld [vmem:[#allocation3_spill] sm:$0xff]  ;;  %14487 = vst [vmem:[#allocation205_spill] sm:$0xff] %v11603_v27  ;;  %v14488_v54 = vld [vmem:[#allocation76_spill] sm:$0xff] }
 0x445   :  { %v2380_v51 = vsel %vm1862_vm6, %v2379_v14, %v2378_v5  ;;  %v2711_v43 = vadd.f32 %v2710_v23, %v2709_v0  ;;  %v2642_v21 = vrot.slane %v2641_v44, 1  ;;  %v2660_v12 = vrot.slane %v2659_v4, 1  ;;  %v14489_v48 = vld [vmem:[#allocation4_spill] sm:$0xff] }
 0x446   :  { %v2382_v26 = vsel %vm1865_vm7, %v2381_v32, %v2380_v51  ;;  %v2729_v18 = vadd.f32 %v2728_v42, %v2727_v22  ;;  %v2678_v19 = vrot.slane %v2677_v40, 1  ;;  %v2696_v34 = vrot.slane %v2695_v3, 1  ;;  %v14490_v51 = vld [vmem:[#allocation5_spill] sm:$0xff] }
 0x447   :  { %v2391_v45 = vrot.slane %v2382_v26, 4  ;;  %v2712_v33 = vrot.slane %v2711_v43, 2  ;;  %v5085_v29 = vmul.f32 %v1025_v60, %v14486_v39  ;;  %v2633_v0 = vmul.f32 %v11603_v27, %v14488_v54  ;;  %v14491_v27 = vld [vmem:[#allocation7_spill] sm:$0xff] }
 0x448   :  { %v2730_v23 = vrot.slane %v2729_v18, 2  ;;  %v2746_v59 = vrot.slane %v2745_v50, 4  ;;  %v5093_v22 = vmul.f32 %v1025_v60, %v14489_v48  ;;  %v11608_v42 = vadd.f32 %v2642_v21, %v2641_v44 }
 0x449   :  { %v2392_v31 = vadd.f32 %v2391_v45, %v2382_v26  ;;  %v2713_v6 = vadd.f32 %v2712_v33, %v2711_v43  ;;  %v11610_v14 = vadd.f32 %v2678_v19, %v2677_v40  ;;  %v2763_v5 = vadd.f32 %v11564_v38, %v2633_v0  ;;  %v14492_v33 = vld [vmem:[#allocation8_spill] sm:$0xff]  ;;  %v14493_v40 = vld [vmem:[#allocation9_spill] sm:$0xff] }
 0x44a   :  { %v2731_v16 = vadd.f32 %v2730_v23, %v2729_v18  ;;  %v2747_v49 = vadd.f32 %v2746_v59, %v2745_v50  ;;  %v5101_v39 = vmul.f32 %v1025_v60, %v14490_v51  ;;  %v11614_v7 = vadd.f32 %v2660_v12, %v2659_v4  ;;  %v14494_v18 = vld [vmem:[#allocation11_spill] sm:$0xff] }
 0x44b   :  { %v2393_v32 = vrot.slane %v2392_v31, 2  ;;  %v11616_v54 = vadd.f32 %v2696_v34, %v2695_v3  ;;  %v5109_v26 = vmul.f32 %v1025_v60, %v14491_v27  ;;  %v2714_v45 = vrot.slane %v2713_v6, 1 }
 0x44c   :  { %v2748_v48 = vrot.slane %v2747_v49, 2  ;;  %v2764_v44 = vrot.slane %v2763_v5, 4  ;;  %v5117_v19 = vmul.f32 %v1025_v60, %v14492_v33  ;;  %v5125_v43 = vmul.f32 %v1025_v60, %v14493_v40 }
 0x44d   :  { %v2394_v21 = vadd.f32 %v2393_v32, %v2392_v31  ;;  %v2732_v50 = vrot.slane %v2731_v16, 1  ;;  %v5133_v38 = vmul.f32 %v1025_v60, %v14494_v18  ;;  %v2779_v12 = vmax.f32 %v11608_v42, %v11610_v14  ;;  %v14499_v18 = vld [vmem:[#allocation46_spill] sm:$0xff] }
 0x44e   :  { %v2749_v0 = vadd.f32 %v2748_v48, %v2747_v49  ;;  %v2765_v23 = vadd.f32 %v2764_v44, %v2763_v5  ;;  %v5141_v4 = vmul.f32 %v11548_v61, %v1025_v60  ;;  %v11626_v3 = vadd.f32 %v11472_v35, %v5085_v29  ;;  %v11635_v5 = vpop.f32.mrf.mxu0 }
 0x44f   :  { %v2395_v34 = vrot.slane %v2394_v21, 1  ;;  %v2780_v27 = vmax.f32 %v11614_v7, %v11616_v54  ;;  %v11631_v59 = vadd.f32 %v11475_v63, %v5093_v22  ;;  %v11633_v31 = vadd.f32 %v2714_v45, %v2713_v6  ;;  %v14495_v6 = vld [vmem:[#allocation170_spill] sm:$0xff] }
 0x450   :  { %v2750_v32 = vrot.slane %v2749_v0, 1  ;;  %v2766_v49 = vrot.slane %v2765_v23, 2  ;;  %v11638_v48 = vadd.f32 %v11478_v28, %v5101_v39  ;;  %v11641_v60 = vadd.f32 %v11481_v56, %v5109_v26 }
 0x451   :  { %v2396_v51 = vadd.f32 %v2395_v34, %v2394_v21  ;;  %v11643_v35 = vadd.f32 %v2732_v50, %v2731_v16  ;;  %v11646_v61 = vadd.f32 %v11485_v52, %v5117_v19  ;;  %v11649_v63 = vadd.f32 %v11488_v15, %v5125_v43  ;;  %v14496_v21 = vld [vmem:[#allocation42_spill] sm:$0xff]  ;;  %v14497_v19 = vld [vmem:[#allocation43_spill] sm:$0xff]  ;;  %v11669_v43 = vpop.f32.mrf.mxu1  ;;  %v14498_v50 = vld [vmem:[#allocation45_spill] sm:$0xff] }
 0x452   :  { %v2767_v29 = vadd.f32 %v2766_v49, %v2765_v23  ;;  %v2781_v22 = vmax.f32 %v2779_v12, %v11633_v31  ;;  %v2574_v28 = vmul.f32 %v11635_v5, %v14455_v9  ;;  %v2582_v56 = vmul.f32 %v11635_v5, %v14457_v25  ;;  %v14500_v49 = vld [vmem:[#allocation10_spill] sm:$0xff] }
 0x453   :  { %v2404_v45 = vrot.slane %v2396_v51, %v14495_v6  ;;  %v2782_v44 = vmax.f32 %v2780_v27, %v11643_v35  ;;  %v2751_v16 = vadd.f32 %v2750_v32, %v2749_v0  ;;  %v2590_v52 = vmul.f32 %v11635_v5, %v14459_v36 }
 0x454   :  { %v2768_v39 = vrot.slane %v2767_v29, 1  ;;  %v2598_v15 = vmul.f32 %v11635_v5, %v14461_v10  ;;  %v11663_v26 = vadd.f32 %v11491_v55, %v5133_v38  ;;  %v2572_v33 = vmul.f32 %v11496_v47, %v14496_v21  ;;  %v14507_v21 = vld [vmem:[#allocation95_spill] sm:$0xff] }
 0x455   :  { %6647 = vrcp.f32 %v2404_v45  ;;  %v2580_v9 = vmul.f32 %v11496_v47, %v14497_v19  ;;  %v2783_v25 = vmax.f32 %v2781_v22, %v2751_v16  ;;  %v2588_v36 = vmul.f32 %v11496_v47, %v14498_v50  ;;  %v14502_v45 = vld [vmem:[#allocation48_spill] sm:$0xff] }
 0x456   :  { %v2769_v40 = vadd.f32 %v2768_v39, %v2767_v29  ;;  %v2596_v10 = vmul.f32 %v11496_v47, %v14499_v18  ;;  %v2606_v55 = vmul.f32 %v11635_v5, %v14463_v53  ;;  %v2614_v38 = vmul.f32 %v11635_v5, %v14465_v13  ;;  %v14501_v29 = vld [vmem:[#allocation47_spill] sm:$0xff]  ;;  %v14503_v39 = vld [vmem:[#allocation93_spill] sm:$0xff]  ;;  %v14508_v19 = vld [vmem:[#allocation96_spill] sm:$0xff] }
 0x457   :  { %v2644_v0 = vadd.f32 %v2574_v28, %v2572_v33  ;;  %v2662_v23 = vadd.f32 %v2582_v56, %v2580_v9  ;;  %v11680_v12 = vadd.f32 %v11494_v24, %v5141_v4  ;;  %v2680_v27 = vadd.f32 %v2590_v52, %v2588_v36  ;;  %v14504_v56 = vld [vmem:[#allocation12_spill] sm:$0xff]  ;;  %v14505_v4 = vld [vmem:[#allocation13_spill] sm:$0xff]  ;;  %v14506_v52 = vld [vmem:[#allocation94_spill] sm:$0xff] }
 0x458   :  { %v2784_v34 = vmax.f32 %v2782_v44, %v2769_v40  ;;  %v2698_v32 = vadd.f32 %v2598_v15, %v2596_v10  ;;  %v11684_v51 = vmul.f32 %v11669_v43, %v14500_v49  ;;  %v2604_v22 = vmul.f32 %v11496_v47, %v14501_v29 }
 0x459   :  { %v2612_v53 = vmul.f32 %v11496_v47, %v14502_v45  ;;  %v2645_v13 = vadd.f32 %v2644_v0, %v14503_v39  ;;  %v11693_v24 = vmul.f32 %v11669_v43, %v14504_v56  ;;  %v11697_v44 = vmul.f32 %v11669_v43, %v14505_v4 }
 0x45a   :  { %v2785_v28 = vmax.f32 %v2783_v25, %v2784_v34  ;;  %v2663_v15 = vadd.f32 %v2662_v23, %v14506_v52  ;;  %v2681_v33 = vadd.f32 %v2680_v27, %v14507_v21  ;;  %v2699_v9 = vadd.f32 %v2698_v32, %v14508_v19  ;;  %v14509_v23 = vld [vmem:[#allocation109_spill] sm:$0xff] }
 0x45b   :  { %v2716_v50 = vadd.f32 %v2606_v55, %v2604_v22  ;;  %v2734_v36 = vadd.f32 %v2614_v38, %v2612_v53  ;;  %v11709_v45 = vadd.f32 %v2645_v13, %v14509_v23  ;;  %v14510_v38 = vld [vmem:[#allocation110_spill] sm:$0xff]  ;;  %v14514_v13 = vld [vmem:[#allocation111_spill] sm:$0xff]  ;;  %v14518_v23 = vld [vmem:[#allocation17_spill] sm:$0xff] }
 0x45c   :  { %v2793_v18 = vsub.f32 %v11608_v42, %v2785_v28  ;;  %v2795_v25 = vsub.f32 %v11614_v7, %v2785_v28  ;;  %v2797_v10 = vsub.f32 %v11610_v14, %v2785_v28  ;;  %v2799_v0 = vsub.f32 %v11616_v54, %v2785_v28  ;;  %v14511_v42 = vld [vmem:[#allocation49_spill] sm:$0xff] }
 0x45d   :  { %v2801_v34 = vsub.f32 %v11633_v31, %v2785_v28  ;;  %v2803_v49 = vsub.f32 %v11643_v35, %v2785_v28  ;;  %v2805_v29 = vsub.f32 %v2751_v16, %v2785_v28  ;;  %v2807_v27 = vsub.f32 %v2769_v40, %v2785_v28  ;;  %v14512_v54 = vld [vmem:[#allocation97_spill] sm:$0xff]  ;;  %v14513_v35 = vld [vmem:[#allocation98_spill] sm:$0xff] }
 0x45e   :  { %v2809_v32 = vmul.f32 1.442695, %v2793_v18  ;;  %v2813_v55 = vmul.f32 1.442695, %v2795_v25  ;;  %v11712_v22 = vadd.f32 %v2663_v15, %v14510_v38  ;;  %v11716_v7 = vmul.f32 %v11496_v47, %v14511_v42  ;;  %v14522_v38 = vld [vmem:[#allocation74_spill] sm:$0xff] }
 0x45f   :  { %v11720_v14 = vmul.f32 %v11635_v5, %v14467_v8  ;;  %v11723_v31 = vadd.f32 %v2716_v50, %v14512_v54  ;;  %v11726_v16 = vadd.f32 %v2734_v36, %v14513_v35  ;;  %v2817_v40 = vmul.f32 1.442695, %v2797_v10  ;;  %v14515_v8 = vld [vmem:[#allocation112_spill] sm:$0xff] }
 0x460   :  { %v11728_v53 = vmul.f32 1.442695, %v2799_v0  ;;  %v11730_v39 = vmul.f32 1.442695, %v2801_v34  ;;  %v11733_v28 = vadd.f32 %v2681_v33, %v14514_v13  ;;  %6649 = vpow2.f32 %v2809_v32  ;;  %v14520_v32 = vld [vmem:[#allocation166_spill] sm:$0xff]  ;;  %v14523_v13 = vld [vmem:[#allocation167_spill] sm:$0xff] }
 0x461   :  { %v11735_v56 = vmul.f32 1.442695, %v2803_v49  ;;  %v11737_v4 = vmul.f32 1.442695, %v2805_v29  ;;  %v11740_v52 = vadd.f32 %v2699_v9, %v14515_v8  ;;  %6651 = vpow2.f32 %v2813_v55  ;;  %v14516_v49 = vld [vmem:[#allocation77_spill] sm:$0xff]  ;;  %v14517_v29 = vld [vmem:[#allocation36_spill] sm:$0xff] }
 0x462   :  { %v6648_v15 = vpop.eup %6647  ;;  %v11742_v21 = vmul.f32 1.442695, %v2807_v27  ;;  %v2647_v19 = vrot.slane %v11709_v45, 4  ;;  %v14519_v27 = vld [vmem:[#allocation125_spill] sm:$0xff]  ;;  %v14521_v55 = vld [vmem:[#allocation164_spill] sm:$0xff]  ;;  %6653 = vpow2.f32 %v2817_v40 }
 0x463   :  { %v2408_v36 = vmul.f32 %v6648_v15, %v11559_v30  ;;  %v2410_v33 = vmul.f32 %v6648_v15, %v11566_v62  ;;  %v2412_v18 = vmul.f32 %v6648_v15, %v11572_v46  ;;  %v2414_v25 = vmul.f32 %v6648_v15, %v11575_v57  ;;  %v14524_v40 = vld [vmem:[#allocation92_spill] sm:$0xff] }
 0x464   :  { %v11751_v10 = vmul.f32 %v6648_v15, %v11578_v37  ;;  %v11754_v9 = vmul.f32 %v6648_v15, %v11583_v2  ;;  %v11757_v0 = vmul.f32 %v6648_v15, %v11587_v20  ;;  %v11760_v34 = vmul.f32 %v6648_v15, %v11591_v17 }
 0x465   :  { %v2426_v30 = vmul.f32 %v2410_v33, %v14516_v49  ;;  %v2428_v62 = vmul.f32 %v2412_v18, %v14517_v29  ;;  %v2430_v46 = vmul.f32 %v2414_v25, %v14518_v23  ;;  %v2424_v42 = vmul.f32 %v2408_v36, %v14522_v38  ;;  %v14527_v29 = vld [vmem:[#allocation241_spill] sm:$0xff] }
 0x466   :  { %v2432_v37 = vmul.f32 %v11751_v10, %v14519_v27  ;;  %v2434_v2 = vmul.f32 %v11754_v9, %v14520_v32  ;;  %v2436_v20 = vmul.f32 %v11757_v0, %v14521_v55  ;;  %v2438_v8 = vmul.f32 %v11760_v34, %v14523_v13 }
 0x467   :  { %v2469_v54 = vrot.slane %v2426_v30, 7  ;;  %v2471_v35 = vrot.slane %v2428_v62, 6  ;;  %v2473_v15 = vrot.slane %v2430_v46, 5  ;;  %v2498_v50 = vmul.f32 %v2408_v36, %v10462_v41 }
 0x468   :  { %v2475_v57 = vrot.slane %v2432_v37, 4  ;;  %v2500_v32 = vmul.f32 %v2410_v33, %v10467_v1  ;;  %v2502_v55 = vmul.f32 %v2412_v18, %v10471_v58  ;;  %v2504_v17 = vmul.f32 %v2414_v25, %v14313_v11  ;;  %v14525_v37 = vld [vmem:[#allocation239_spill] sm:$0xff]  ;;  %v14526_v58 = vld [vmem:[#allocation113_spill] sm:$0xff] }
 0x469   :  { %v2470_v27 = vsel %vm1847_vm1, %v2469_v54, %v2424_v42  ;;  %v2477_v30 = vrot.slane %v2434_v2, 3  ;;  %v2479_v62 = vrot.slane %v2436_v20, 2  ;;  %v2506_v23 = vmul.f32 %v11751_v10, %v14524_v40 }
 0x46a   :  { %v2472_v38 = vsel %vm1850_vm2, %v2471_v35, %v2470_v27  ;;  %v2508_v41 = vmul.f32 %v11754_v9, %v14525_v37  ;;  %v2543_v13 = vrot.slane %v2500_v32, 7  ;;  %v2545_v42 = vrot.slane %v2502_v55, 6 }
 0x46b   :  { %v2474_v46 = vsel %vm1853_vm3, %v2473_v15, %v2472_v38  ;;  %v2481_v1 = vrot.slane %v2438_v8, 1  ;;  %v2510_v11 = vmul.f32 %v11757_v0, %v14526_v58  ;;  %v2512_v27 = vmul.f32 %v11760_v34, %v14527_v29 }
 0x46c   :  { %v2476_v54 = vsel %vm1856_vm4, %v2475_v57, %v2474_v46  ;;  %v2544_v20 = vsel %vm1847_vm1, %v2543_v13, %v2498_v50  ;;  %v2547_v35 = vrot.slane %v2504_v17, 5  ;;  %v2549_v38 = vrot.slane %v2506_v23, 4 }
 0x46d   :  { %v2478_v2 = vsel %vm1859_vm5, %v2477_v30, %v2476_v54  ;;  %v11794_v15 = vpop.eup %6649  ;;  %v2546_v55 = vsel %vm1850_vm2, %v2545_v42, %v2544_v20  ;;  %v5778_v57 = vrot.slane %v2410_v33, 7  ;;  %v5780_v8 = vrot.slane %v2412_v18, 6 }
 0x46e   :  { %v2480_v32 = vsel %vm1862_vm6, %v2479_v62, %v2478_v2  ;;  %v11798_v46 = vpop.eup %6651  ;;  %v2548_v29 = vsel %vm1853_vm3, %v2547_v35, %v2546_v55  ;;  %v2551_v37 = vrot.slane %v2508_v41, 3  ;;  %v2648_v30 = vadd.f32 %v2647_v19, %v11709_v45 }
 0x46f   :  { %v2482_v58 = vsel %vm1865_vm7, %v2481_v1, %v2480_v32  ;;  %v2550_v50 = vsel %vm1856_vm4, %v2549_v38, %v2548_v29  ;;  %v2553_v23 = vrot.slane %v2510_v11, 2  ;;  %v5779_v17 = vsel %vm1847_vm1, %v5778_v57, %v2408_v36  ;;  %v11818_v36 = vpop.eup %6653 }
 0x470   :  { %v5782_v13 = vrot.slane %v2414_v25, 5  ;;  %v2552_v62 = vsel %vm1859_vm5, %v2551_v37, %v2550_v50  ;;  %v2555_v42 = vrot.slane %v2512_v27, 1  ;;  %v5781_v33 = vsel %vm1850_vm2, %v5780_v8, %v5779_v17  ;;  %v14529_v37 = vld [vmem:[#allocation14_spill] sm:$0xff] }
 0x471   :  { %v5784_v18 = vrot.slane %v11751_v10, 4  ;;  %v2554_v1 = vsel %vm1862_vm6, %v2553_v23, %v2552_v62  ;;  %v5786_v41 = vrot.slane %v11754_v9, 3  ;;  %6655 = vpow2.f32 %v11728_v53  ;;  %v14528_v9 = vld [vmem:[#allocation114_spill] sm:$0xff] }
 0x472   :  { %v5783_v54 = vsel %vm1853_vm3, %v5782_v13, %v5781_v33  ;;  %v11813_v11 = vsel %vm1865_vm7, %v2555_v42, %v2554_v1  ;;  %v5788_v19 = vrot.slane %v11757_v0, 2  ;;  %6657 = vpow2.f32 %v11730_v39  ;;  %v14530_v39 = vld [vmem:[#allocation115_spill] sm:$0xff] }
 0x473   :  { %v5785_v45 = vsel %vm1856_vm4, %v5784_v18, %v5783_v54  ;;  %v5790_v10 = vrot.slane %v11760_v34, 1  ;;  %6659 = vpow2.f32 %v11735_v56  ;;  %v2718_v53 = vadd.f32 %v11723_v31, %v14528_v9  ;;  %v14531_v31 = vld [vmem:[#allocation15_spill] sm:$0xff] }
 0x474   :  { %v5787_v25 = vsel %vm1859_vm5, %v5786_v41, %v5785_v45  ;;  %6661 = vpow2.f32 %v11737_v4  ;;  %v11829_v0 = vmul.f32 %v11669_v43, %v14529_v37  ;;  %v2736_v27 = vadd.f32 %v11726_v16, %v14530_v39  ;;  %v14537_v33 = vld [vmem:[#allocation99_spill] sm:$0xff] }
 0x475   :  { %v5789_v29 = vsel %vm1862_vm6, %v5788_v19, %v5787_v25  ;;  %v2491_v2 = vrot.slane %v2482_v58, 4  ;;  %6663 = vpow2.f32 %v11742_v21  ;;  %v2752_v56 = vadd.f32 %v11720_v14, %v11716_v7  ;;  %v14534_v7 = vld [vmem:[#allocation16_spill] sm:$0xff]  ;;  %v11871_v39 = vld [vmem:[%s12761_s7 + $0x68] sm:$0xff] }
 0x476   :  { %v5791_v20 = vsel %vm1865_vm7, %v5790_v10, %v5789_v29  ;;  %v11842_v4 = vmul.f32 %v11669_v43, %v14531_v31  ;;  %v2649_v34 = vrot.slane %v2648_v30, 2  ;;  %v14532_v16 = vrot.slane %v11712_v22, 4 }
 0x477   :  { %6143 = vst [vmem:[%s12761_s7 + $0x98] sm:$0xff] %v5791_v20  ;;  %v14533_v38 = vrot.slane %v11733_v28, 4  ;;  %v2857_v32 = vrot.slane %v11798_v46, 7  ;;  %v11853_v14 = vmul.f32 %v11669_v43, %v14534_v7  ;;  %v14536_v55 = vrot.slane %v11740_v52, 4 }
 0x478   :  { %v2666_v35 = vadd.f32 %v14532_v16, %v11712_v22  ;;  %v2719_v8 = vrot.slane %v2718_v53, 4  ;;  %v2650_v50 = vadd.f32 %v2649_v34, %v2648_v30  ;;  %v2737_v13 = vrot.slane %v2736_v27, 4  ;;  %v14538_v30 = vld [vmem:[#allocation203_spill] sm:$0xff]  ;;  %v11881_v34 = vld [vmem:[%s12761_s7 + $0x78] sm:$0xff] }
 0x479   :  { %v2684_v21 = vadd.f32 %v14533_v38, %v11733_v28  ;;  %14535 = vst [vmem:[#allocation202_spill] sm:$0xff] %v11853_v14  ;;  %v2702_v57 = vadd.f32 %v14536_v55, %v11740_v52  ;;  %v2492_v22 = vadd.f32 %v2491_v2, %v2482_v58  ;;  %v2753_v28 = vadd.f32 %v2752_v56, %v14537_v33  ;;  %v14541_v38 = vld [vmem:[#allocation116_spill] sm:$0xff] }
 0x47a   :  { %v2667_v23 = vrot.slane %v2666_v35, 2  ;;  %v2720_v42 = vadd.f32 %v2719_v8, %v2718_v53  ;;  %v2859_v18 = vrot.slane %v11818_v36, 6  ;;  %v2738_v41 = vadd.f32 %v2737_v13, %v2736_v27  ;;  %v6761_v53 = vld [vmem:[%s12761_s7 + $0x48] sm:$0xff]  ;;  %v14539_v27 = vld [vmem:[#allocation62_spill] sm:$0xff] }
 0x47b   :  { %v2685_v17 = vrot.slane %v2684_v21, 2  ;;  %v2703_v62 = vrot.slane %v2702_v57, 2  ;;  %v2858_v45 = vsel %vm1847_vm1, %v2857_v32, %v11794_v15  ;;  %v2651_v19 = vrot.slane %v2650_v50, 1 }
 0x47c   :  { %v2668_v1 = vadd.f32 %v2667_v23, %v2666_v35  ;;  %v2721_v25 = vrot.slane %v2720_v42, 2  ;;  %v2630_v10 = vmul.f32 %v14538_v30, %v11635_v5  ;;  %v2739_v29 = vrot.slane %v2738_v41, 2 }
 0x47d   :  { %v2686_v54 = vadd.f32 %v2685_v17, %v2684_v21  ;;  %v2704_v52 = vadd.f32 %v2703_v62, %v2702_v57  ;;  %v2628_v37 = vmul.f32 %v6761_v53, %v11496_v47  ;;  %v2632_v2 = vmul.f32 %v11871_v39, %v14539_v27  ;;  %v14540_v47 = vld [vmem:[#allocation81_spill] sm:$0xff]  ;;  %v14542_v53 = vld [vmem:[#allocation18_spill] sm:$0xff] }
 0x47e   :  { %v2669_v9 = vrot.slane %v2668_v1, 1  ;;  %v2722_v56 = vadd.f32 %v2721_v25, %v2720_v42  ;;  %v11875_v5 = vpop.eup %6655  ;;  %v2860_v31 = vsel %vm1850_vm2, %v2859_v18, %v2858_v45  ;;  %v2634_v16 = vmul.f32 %v11881_v34, %v14540_v47 }
 0x47f   :  { %v2687_v58 = vrot.slane %v2686_v54, 1  ;;  %v2705_v20 = vrot.slane %v2704_v52, 1  ;;  %v2740_v35 = vadd.f32 %v2739_v29, %v2738_v41  ;;  %v2754_v21 = vadd.f32 %v2753_v28, %v14541_v38  ;;  %v11886_v32 = vpop.eup %6657 }
 0x480   :  { %v2493_v7 = vrot.slane %v2492_v22, 2  ;;  %v2861_v55 = vrot.slane %v11875_v5, 5  ;;  %v11889_v57 = vadd.f32 %v2651_v19, %v2650_v50  ;;  %v11893_v23 = vpop.eup %6659  ;;  %v2863_v17 = vrot.slane %v11886_v32, 4 }
 0x481   :  { %v11891_v8 = vadd.f32 %v2687_v58, %v2686_v54  ;;  %v11896_v13 = vadd.f32 %v2669_v9, %v2668_v1  ;;  %v2755_v62 = vrot.slane %v2754_v21, 4  ;;  %v2770_v42 = vadd.f32 %v2630_v10, %v2628_v37  ;;  %v11898_v33 = vpop.eup %6661 }
 0x482   :  { %v2862_v28 = vsel %vm1853_vm3, %v2861_v55, %v2860_v31  ;;  %v2865_v18 = vrot.slane %v11893_v23, 3  ;;  %v11902_v41 = vadd.f32 %v2705_v20, %v2704_v52  ;;  %v2723_v50 = vrot.slane %v2722_v56, 1  ;;  %v11904_v45 = vpop.eup %6663  ;;  %v11918_v20 = vpop.f32.mrf.mxu1 }
 0x483   :  { %v2864_v54 = vsel %vm1856_vm4, %v2863_v17, %v2862_v28  ;;  %v2867_v19 = vrot.slane %v11898_v33, 2  ;;  %v2741_v25 = vrot.slane %v2740_v35, 1  ;;  %v2756_v1 = vadd.f32 %v2755_v62, %v2754_v21 }
 0x484   :  { %v2866_v30 = vsel %vm1859_vm5, %v2865_v18, %v2864_v54  ;;  %v2869_v10 = vrot.slane %v11904_v45, 1  ;;  %v2771_v9 = vadd.f32 %v2770_v42, %v2632_v2  ;;  %v2786_v58 = vmax.f32 %v11889_v57, %v11891_v8  ;;  %v14544_v18 = vld [vmem:[#allocation19_spill] sm:$0xff] }
 0x485   :  { %v2565_v52 = vrot.slane %v11813_v11, 4  ;;  %v2868_v29 = vsel %vm1862_vm6, %v2867_v19, %v2866_v30  ;;  %v11916_v37 = vmul.f32 %v11669_v43, %v14542_v53  ;;  %v2757_v27 = vrot.slane %v2756_v1, 2  ;;  %v14545_v19 = vld [vmem:[#allocation20_spill] sm:$0xff]  ;;  %v14546_v30 = vld [vmem:[#allocation21_spill] sm:$0xff] }
 0x486   :  { %v2870_v31 = vsel %vm1865_vm7, %v2869_v10, %v2868_v29  ;;  %v11921_v47 = vadd.f32 %v2723_v50, %v2722_v56  ;;  %v2772_v38 = vadd.f32 %v2771_v9, %v2634_v16  ;;  %v2787_v2 = vmax.f32 %v11896_v13, %v11902_v41  ;;  %v14548_v9 = vld [vmem:[#allocation23_spill] sm:$0xff] }
 0x487   :  { %14543 = vst [vmem:[#allocation182_spill] sm:$0xff] %v11916_v37  ;;  %v11925_v21 = vadd.f32 %v2493_v7, %v2492_v22  ;;  %v2887_v55 = vrot.slane %v2870_v31, 4  ;;  %v11927_v17 = vadd.f32 %v2741_v25, %v2740_v35  ;;  %v2758_v62 = vadd.f32 %v2757_v27, %v2756_v1  ;;  %v14547_v22 = vld [vmem:[#allocation22_spill] sm:$0xff]  ;;  %v14549_v27 = vld [vmem:[#allocation24_spill] sm:$0xff] }
 0x488   :  { %v2773_v42 = vrot.slane %v2772_v38, 4  ;;  %v2788_v28 = vmax.f32 %v2786_v58, %v11921_v47  ;;  %v5087_v54 = vmul.f32 %v11918_v20, %v14544_v18  ;;  %v5095_v56 = vmul.f32 %v11918_v20, %v14545_v19 }
 0x489   :  { %v2888_v50 = vadd.f32 %v2887_v55, %v2870_v31  ;;  %v2759_v16 = vrot.slane %v2758_v62, 1  ;;  %v5103_v10 = vmul.f32 %v11918_v20, %v14546_v30  ;;  %v5111_v7 = vmul.f32 %v11918_v20, %v14547_v22 }
 0x48a   :  { %v11939_v35 = vadd.f32 %v2565_v52, %v11813_v11  ;;  %v2774_v25 = vadd.f32 %v2773_v42, %v2772_v38  ;;  %v2789_v1 = vmax.f32 %v2787_v2, %v11927_v17  ;;  %v5119_v58 = vmul.f32 %v11918_v20, %v14548_v9 }
 0x48b   :  { %v2889_v29 = vrot.slane %v2888_v50, 2  ;;  %v11944_v53 = vadd.f32 %v2759_v16, %v2758_v62  ;;  %v5127_v31 = vmul.f32 %v11918_v20, %v14549_v27  ;;  %v5147_v55 = vadd.f32 %v11626_v3, %v5087_v54 }
 0x48c   :  { %v2775_v18 = vrot.slane %v2774_v25, 2  ;;  %v5165_v19 = vadd.f32 %v11631_v59, %v5095_v56  ;;  %v5183_v11 = vadd.f32 %v11638_v48, %v5103_v10  ;;  %v5201_v52 = vadd.f32 %v11641_v60, %v5111_v7 }
 0x48d   :  { %v2890_v38 = vadd.f32 %v2889_v29, %v2888_v50  ;;  %v2790_v2 = vmax.f32 %v2788_v28, %v11944_v53  ;;  %v5148_v42 = vrot.slane %v5147_v55, 4  ;;  %v5219_v30 = vadd.f32 %v11646_v61, %v5119_v58 }
 0x48e   :  { %v2776_v62 = vadd.f32 %v2775_v18, %v2774_v25  ;;  %v5166_v16 = vrot.slane %v5165_v19, 4  ;;  %v5184_v22 = vrot.slane %v5183_v11, 4  ;;  %v5202_v9 = vrot.slane %v5201_v52, 4 }
 0x48f   :  { %v2891_v27 = vrot.slane %v2890_v38, 1  ;;  %v5149_v40 = vadd.f32 %v5148_v42, %v5147_v55  ;;  %v5220_v3 = vrot.slane %v5219_v30, 4  ;;  %v5237_v54 = vadd.f32 %v11649_v63, %v5127_v31 }
 0x490   :  { %v2777_v59 = vrot.slane %v2776_v62, 1  ;;  %v5167_v56 = vadd.f32 %v5166_v16, %v5165_v19  ;;  %v5185_v48 = vadd.f32 %v5184_v22, %v5183_v11  ;;  %v5203_v10 = vadd.f32 %v5202_v9, %v5201_v52  ;;  %v14550_v19 = vld [vmem:[#allocation25_spill] sm:$0xff] }
 0x491   :  { %v2892_v60 = vadd.f32 %v2891_v27, %v2890_v38  ;;  %v5150_v50 = vrot.slane %v5149_v40, 2  ;;  %v5221_v7 = vadd.f32 %v5220_v3, %v5219_v30  ;;  %v5238_v28 = vrot.slane %v5237_v54, 4 }
 0x492   :  { %v2778_v29 = vadd.f32 %v2777_v59, %v2776_v62  ;;  %v5168_v49 = vrot.slane %v5167_v56, 2  ;;  %v5186_v61 = vrot.slane %v5185_v48, 2  ;;  %v5204_v25 = vrot.slane %v5203_v10, 2  ;;  %v14551_v62 = vld [vmem:[#allocation205_spill] sm:$0xff] }
 0x493   :  { %v2902_v58 = vrot.slane %v2892_v60, %v14495_v6  ;;  %v5151_v18 = vadd.f32 %v5150_v50, %v5149_v40  ;;  %v5222_v37 = vrot.slane %v5221_v7, 2  ;;  %v5239_v55 = vadd.f32 %v5238_v28, %v5237_v54 }
 0x494   :  { %v2791_v42 = vmax.f32 %v2789_v1, %v2778_v29  ;;  %v5169_v14 = vadd.f32 %v5168_v49, %v5167_v56  ;;  %v5187_v63 = vadd.f32 %v5186_v61, %v5185_v48  ;;  %v5205_v31 = vadd.f32 %v5204_v25, %v5203_v10 }
 0x495   :  { %6665 = vrcp.f32 %v2902_v58  ;;  %v5135_v11 = vmul.f32 %v11918_v20, %v14550_v19  ;;  %v5152_v52 = vrot.slane %v5151_v18, 1  ;;  %v5240_v38 = vrot.slane %v5239_v55, 2 }
 0x496   :  { %v2792_v30 = vmax.f32 %v2790_v2, %v2791_v42  ;;  %v5143_v16 = vmul.f32 %v14551_v62, %v11918_v20  ;;  %v5170_v22 = vrot.slane %v5169_v14, 1  ;;  %v5223_v9 = vadd.f32 %v5222_v37, %v5221_v7  ;;  %v11989_v42 = vpop.f32.mrf.mxu1 }
 0x497   :  { %v11960_v27 = vadd.f32 %v5152_v52, %v5151_v18  ;;  %v5188_v40 = vrot.slane %v5187_v63, 1  ;;  %v5206_v3 = vrot.slane %v5205_v31, 1  ;;  %v5241_v1 = vadd.f32 %v5240_v38, %v5239_v55  ;;  %v14567_v52 = vld [vmem:[#allocation179_spill] sm:$0xff] }
 0x498   :  { %v2794_v49 = vsub.f32 %v11889_v57, %v2792_v30  ;;  %v2796_v54 = vsub.f32 %v11896_v13, %v2792_v30  ;;  %v2798_v59 = vsub.f32 %v11891_v8, %v2792_v30  ;;  %v2800_v56 = vsub.f32 %v11902_v41, %v2792_v30 }
 0x499   :  { %v2802_v2 = vsub.f32 %v11921_v47, %v2792_v30  ;;  %v2804_v48 = vsub.f32 %v11927_v17, %v2792_v30  ;;  %v2806_v20 = vsub.f32 %v11944_v53, %v2792_v30  ;;  %v5255_v37 = vadd.f32 %v11663_v26, %v5135_v11 }
 0x49a   :  { %v2811_v10 = vmul.f32 1.442695, %v2794_v49  ;;  %v2815_v60 = vmul.f32 1.442695, %v2796_v54  ;;  %v2819_v50 = vmul.f32 1.442695, %v2798_v59  ;;  %v11970_v7 = vadd.f32 %v5170_v22, %v5169_v14 }
 0x49b   :  { %v2808_v57 = vsub.f32 %v2778_v29, %v2792_v30  ;;  %v2823_v28 = vmul.f32 1.442695, %v2800_v56  ;;  %v11972_v13 = vadd.f32 %v5188_v40, %v5187_v63  ;;  %v5224_v8 = vrot.slane %v5223_v9, 1  ;;  %v14552_v30 = vld [vmem:[#allocation26_spill] sm:$0xff]  ;;  %v14555_v56 = vld [vmem:[#allocation80_spill] sm:$0xff]  ;;  %v14564_v63 = vld [vmem:[#allocation221_spill] sm:$0xff] }
 0x49c   :  { %6667 = vpow2.f32 %v2811_v10  ;;  %v2827_v41 = vmul.f32 1.442695, %v2802_v2  ;;  %v2831_v61 = vmul.f32 1.442695, %v2804_v48  ;;  %v11974_v47 = vadd.f32 %v5206_v3, %v5205_v31  ;;  %v14554_v59 = vld [vmem:[#allocation78_spill] sm:$0xff] }
 0x49d   :  { %6669 = vpow2.f32 %v2815_v60  ;;  %v2835_v17 = vmul.f32 1.442695, %v2806_v20  ;;  %v5242_v53 = vrot.slane %v5241_v1, 1  ;;  %v5256_v25 = vrot.slane %v5255_v37, 4  ;;  %v14560_v60 = vld [vmem:[#allocation68_spill] sm:$0xff] }
 0x49e   :  { %6671 = vpow2.f32 %v2819_v50  ;;  %v5273_v26 = vadd.f32 %v11680_v12, %v5143_v16  ;;  %v5289_v14 = vmax.f32 %v11960_v27, %v11972_v13  ;;  %v5290_v29 = vmax.f32 %v11970_v7, %v11974_v47 }
 0x49f   :  { %v11983_v58 = vmul.f32 %v11871_v39, %v11669_v43  ;;  %6673 = vpow2.f32 %v2823_v28  ;;  %v11985_v18 = vadd.f32 %v5224_v8, %v5223_v9  ;;  %v11987_v55 = vadd.f32 %v5256_v25, %v5255_v37 }
 0x4a0   :  { %6675 = vpow2.f32 %v2827_v41  ;;  %v11993_v31 = vadd.f32 %v5242_v53, %v5241_v1  ;;  %v11995_v19 = vmul.f32 1.442695, %v2808_v57  ;;  %v5274_v11 = vrot.slane %v5273_v26, 4  ;;  %v14561_v53 = vld [vmem:[#allocation222_spill] sm:$0xff] }
 0x4a1   :  { %6677 = vpow2.f32 %v2831_v61  ;;  %v11998_v43 = vmax.f32 %v5289_v14, %v11985_v18  ;;  %v12006_v62 = vmul.f32 %v11989_v42, %v14552_v30 }
 0x4a2   :  { %v6666_v39 = vpop.eup %6665  ;;  %6679 = vpow2.f32 %v2835_v17  ;;  %v12002_v38 = vmax.f32 %v5290_v29, %v11993_v31  ;;  %v12033_v2 = vadd.f32 %v5274_v11, %v5273_v26  ;;  %v14562_v29 = vld [vmem:[#allocation218_spill] sm:$0xff] }
 0x4a3   :  { %v2908_v16 = vmul.f32 %v6666_v39, %v11794_v15  ;;  %v2911_v22 = vmul.f32 %v6666_v39, %v11798_v46  ;;  %v12011_v9 = vmul.f32 %v6666_v39, %v11818_v36  ;;  %v12014_v40 = vmul.f32 %v6666_v39, %v11875_v5  ;;  %v14553_v15 = vld [vmem:[#allocation75_spill] sm:$0xff] }
 0x4a4   :  { %v12017_v3 = vmul.f32 %v6666_v39, %v11886_v32  ;;  %v12020_v1 = vmul.f32 %v6666_v39, %v11893_v23  ;;  %v12023_v49 = vmul.f32 %v6666_v39, %v11898_v33  ;;  %v12026_v54 = vmul.f32 %v6666_v39, %v11904_v45  ;;  %v14556_v32 = vld [vmem:[#allocation72_spill] sm:$0xff]  ;;  %v14557_v23 = vld [vmem:[#allocation83_spill] sm:$0xff]  ;;  %v14558_v33 = vld [vmem:[#allocation169_spill] sm:$0xff] }
 0x4a5   :  { %v2927_v46 = vmul.f32 %v2911_v22, %v14553_v15  ;;  %v2929_v36 = vmul.f32 %v12011_v9, %v14554_v59  ;;  %v2931_v5 = vmul.f32 %v12014_v40, %v14555_v56  ;;  %v2925_v48 = vmul.f32 %v2908_v16, %v14556_v32  ;;  %v14559_v45 = vld [vmem:[#allocation187_spill] sm:$0xff]  ;;  %v14563_v39 = vld [vmem:[#allocation220_spill] sm:$0xff] }
 0x4a6   :  { %v2933_v20 = vmul.f32 %v12017_v3, %v14557_v23  ;;  %v2935_v37 = vmul.f32 %v12020_v1, %v14558_v33  ;;  %v2937_v10 = vmul.f32 %v12023_v49, %v14559_v45  ;;  %v2939_v50 = vmul.f32 %v12026_v54, %v14560_v60 }
 0x4a7   :  { %v2957_v57 = vrot.slane %v2927_v46, 7  ;;  %v2959_v28 = vrot.slane %v2929_v36, 6  ;;  %v2961_v8 = vrot.slane %v2931_v5, 5  ;;  %v2999_v25 = vmul.f32 %v2908_v16, %v14561_v53  ;;  %v14565_v5 = vld [vmem:[#allocation223_spill] sm:$0xff] }
 0x4a8   :  { %v2963_v41 = vrot.slane %v2933_v20, 4  ;;  %v2965_v61 = vrot.slane %v2935_v37, 3  ;;  %v2967_v17 = vrot.slane %v2937_v10, 2  ;;  %v3001_v11 = vmul.f32 %v2911_v22, %v14562_v29  ;;  %v14566_v37 = vld [vmem:[#allocation199_spill] sm:$0xff] }
 0x4a9   :  { %v12045_v26 = vpop.eup %6667  ;;  %v2958_v14 = vsel %vm1847_vm1, %v2957_v57, %v2925_v48  ;;  %v3003_v30 = vmul.f32 %v12011_v9, %v14563_v39  ;;  %v3005_v12 = vmul.f32 %v12014_v40, %v14564_v63  ;;  %v3007_v20 = vmul.f32 %v12017_v3, %v14565_v5  ;;  %v14568_v29 = vld [vmem:[#allocation215_spill] sm:$0xff] }
 0x4aa   :  { %v12053_v46 = vpop.eup %6669  ;;  %v2960_v36 = vsel %vm1850_vm2, %v2959_v28, %v2958_v14  ;;  %v3009_v10 = vmul.f32 %v12020_v1, %v14566_v37  ;;  %v3011_v48 = vmul.f32 %v12023_v49, %v14567_v52  ;;  %v3013_v63 = vmul.f32 %v12026_v54, %v14568_v29 }
 0x4ab   :  { %v12062_v57 = vpop.eup %6671  ;;  %v2962_v39 = vsel %vm1853_vm3, %v2961_v8, %v2960_v36  ;;  %v3031_v53 = vrot.slane %v3001_v11, 7  ;;  %v3033_v60 = vrot.slane %v3003_v30, 6  ;;  %v2969_v14 = vrot.slane %v2939_v50, 1 }
 0x4ac   :  { %v12067_v45 = vpop.eup %6673  ;;  %v2964_v28 = vsel %vm1856_vm4, %v2963_v41, %v2962_v39  ;;  %v3035_v5 = vrot.slane %v3005_v12, 5  ;;  %v3037_v33 = vrot.slane %v3007_v20, 4  ;;  %v3039_v56 = vrot.slane %v3009_v10, 3 }
 0x4ad   :  { %v12070_v37 = vpop.eup %6675  ;;  %v2966_v52 = vsel %vm1859_vm5, %v2965_v61, %v2964_v28  ;;  %v3032_v23 = vsel %vm1847_vm1, %v3031_v53, %v2999_v25  ;;  %v3041_v8 = vrot.slane %v3011_v48, 2  ;;  %v5810_v29 = vrot.slane %v2911_v22, 7 }
 0x4ae   :  { %v12074_v36 = vpop.eup %6677  ;;  %v2968_v11 = vsel %vm1862_vm6, %v2967_v17, %v2966_v52  ;;  %v3034_v30 = vsel %vm1850_vm2, %v3033_v60, %v3032_v23  ;;  %v5812_v41 = vrot.slane %v12011_v9, 6  ;;  %v3043_v61 = vrot.slane %v3013_v63, 1 }
 0x4af   :  { %v12079_v50 = vpop.eup %6679  ;;  %v2970_v12 = vsel %vm1865_vm7, %v2969_v14, %v2968_v11  ;;  %v3036_v39 = vsel %vm1853_vm3, %v3035_v5, %v3034_v30  ;;  %v5814_v53 = vrot.slane %v12014_v40, 5  ;;  %v5811_v10 = vsel %vm1847_vm1, %v5810_v29, %v2908_v16 }
 0x4b0   :  { %v2987_v25 = vrot.slane %v2970_v12, 4  ;;  %v3038_v20 = vsel %vm1856_vm4, %v3037_v33, %v3036_v39  ;;  %v5816_v52 = vrot.slane %v12017_v3, 4  ;;  %v5813_v9 = vsel %vm1850_vm2, %v5812_v41, %v5811_v10 }
 0x4b1   :  { %v3040_v22 = vsel %vm1859_vm5, %v3039_v56, %v3038_v20  ;;  %v5818_v23 = vrot.slane %v12020_v1, 3  ;;  %v5820_v60 = vrot.slane %v12023_v49, 2  ;;  %v5815_v40 = vsel %vm1853_vm3, %v5814_v53, %v5813_v9 }
 0x4b2   :  { %v2988_v17 = vadd.f32 %v2987_v25, %v2970_v12  ;;  %v3042_v63 = vsel %vm1862_vm6, %v3041_v8, %v3040_v22  ;;  %6681 = vpow2.f32 %v11995_v19  ;;  %v5817_v16 = vsel %vm1856_vm4, %v5816_v52, %v5815_v40  ;;  %v14570_v52 = vld [vmem:[#allocation27_spill] sm:$0xff] }
 0x4b3   :  { %v3044_v33 = vsel %vm1865_vm7, %v3043_v61, %v3042_v63  ;;  %v2871_v3 = vrot.slane %v12053_v46, 7  ;;  %v2873_v56 = vrot.slane %v12062_v57, 6  ;;  %v5819_v49 = vsel %vm1859_vm5, %v5818_v23, %v5817_v16  ;;  %v14572_v16 = vld [vmem:[#allocation30_spill] sm:$0xff] }
 0x4b4   :  { %v2989_v29 = vrot.slane %v2988_v17, 2  ;;  %v3061_v1 = vrot.slane %v3044_v33, 4  ;;  %v5822_v5 = vrot.slane %v12026_v54, 1  ;;  %v5821_v48 = vsel %vm1862_vm6, %v5820_v60, %v5819_v49  ;;  %v14573_v49 = vld [vmem:[#allocation63_spill] sm:$0xff] }
 0x4b5   :  { %v2872_v19 = vsel %vm1847_vm1, %v2871_v3, %v12045_v26  ;;  %v2875_v28 = vrot.slane %v12067_v45, 5  ;;  %v2877_v14 = vrot.slane %v12070_v37, 4  ;;  %v2879_v12 = vrot.slane %v12074_v36, 3 }
 0x4b6   :  { %v2990_v8 = vadd.f32 %v2989_v29, %v2988_v17  ;;  %v3062_v11 = vadd.f32 %v3061_v1, %v3044_v33  ;;  %v5823_v30 = vsel %vm1865_vm7, %v5822_v5, %v5821_v48  ;;  %v2874_v41 = vsel %vm1850_vm2, %v2873_v56, %v2872_v19  ;;  %v14571_v33 = vld [vmem:[#allocation29_spill] sm:$0xff]  ;;  %v14574_v5 = vld [vmem:[#allocation175_spill] sm:$0xff] }
 0x4b7   :  { %6144 = vst [vmem:[%s12761_s7 + $0xa0] sm:$0xff] %v5823_v30  ;;  %v2876_v54 = vsel %vm1853_vm3, %v2875_v28, %v2874_v41  ;;  %v14569_v39 = vrot.slane %v11987_v55, 2  ;;  %v5276_v53 = vrot.slane %v12033_v2, 2  ;;  %v5096_v22 = vmul.f32 %v11989_v42, %v14570_v52  ;;  %v14576_v30 = vld [vmem:[#allocation176_spill] sm:$0xff] }
 0x4b8   :  { %v2991_v25 = vrot.slane %v2990_v8, 1  ;;  %v3063_v20 = vrot.slane %v3062_v11, 2  ;;  %v2878_v10 = vsel %vm1856_vm4, %v2877_v14, %v2876_v54  ;;  %v2881_v23 = vrot.slane %v12079_v50, 2  ;;  %v14575_v14 = vld [vmem:[#allocation79_spill] sm:$0xff] }
 0x4b9   :  { %v5259_v61 = vadd.f32 %v14569_v39, %v11987_v55  ;;  %v2880_v9 = vsel %vm1859_vm5, %v2879_v12, %v2878_v10  ;;  %v5277_v17 = vadd.f32 %v5276_v53, %v12033_v2  ;;  %v5104_v55 = vmul.f32 %v11989_v42, %v14571_v33  ;;  %v14579_v53 = vld [vmem:[#allocation168_spill] sm:$0xff]  ;;  %v14581_v10 = vld [vmem:[#allocation154_spill] sm:$0xff] }
 0x4ba   :  { %v2992_v63 = vadd.f32 %v2991_v25, %v2990_v8  ;;  %v3064_v40 = vadd.f32 %v3063_v20, %v3062_v11  ;;  %v5112_v3 = vmul.f32 %v11989_v42, %v14572_v16  ;;  %v2882_v56 = vsel %vm1862_vm6, %v2881_v23, %v2880_v9  ;;  %v14577_v8 = vld [vmem:[#allocation206_spill] sm:$0xff]  ;;  %v14578_v11 = vld [vmem:[#allocation177_spill] sm:$0xff]  ;;  %v14580_v25 = vld [vmem:[#allocation200_spill] sm:$0xff] }
 0x4bb   :  { %v5260_v60 = vrot.slane %v5259_v61, 1  ;;  %v5278_v1 = vrot.slane %v5277_v17, 1  ;;  %v5154_v48 = vadd.f32 %v14574_v5, %v14573_v49  ;;  %v5172_v2 = vadd.f32 %v14576_v30, %v14575_v14 }
 0x4bc   :  { %v3065_v19 = vrot.slane %v3064_v40, 1  ;;  %v5591_v28 = vrot.slane %v2992_v63, 6  ;;  %v5190_v41 = vadd.f32 %v14578_v11, %v14577_v8  ;;  %v14582_v63 = vld [vmem:[#allocation156_spill] sm:$0xff] }
 0x4bd   :  { %v5261_v29 = vadd.f32 %v5260_v60, %v5259_v61  ;;  %v5279_v54 = vadd.f32 %v5278_v1, %v5277_v17  ;;  %v5155_v39 = vadd.f32 %v5154_v48, %v11684_v51  ;;  %v5208_v61 = vadd.f32 %v14580_v25, %v14579_v53 }
 0x4be   :  { %v3066_v20 = vadd.f32 %v3065_v19, %v3064_v40  ;;  %v5629_v52 = vsel %vm5628_vm9, %v14581_v10, %v5591_v28  ;;  %v5173_v9 = vadd.f32 %v5172_v2, %v11693_v24  ;;  %v5191_v23 = vadd.f32 %v5190_v41, %v11697_v44  ;;  %v14584_v19 = vld [vmem:[#allocation149_spill] sm:$0xff]  ;;  %v14585_v28 = vld [vmem:[#allocation178_spill] sm:$0xff]  ;;  %v14586_v2 = vld [vmem:[#allocation172_spill] sm:$0xff] }
 0x4bf   :  { %v5293_v12 = vmax.f32 %v11998_v43, %v5261_v29  ;;  %v12141_v60 = vpop.eup %6681  ;;  %v14583_v33 = vrot.slane %v14582_v63, 5  ;;  %v5294_v51 = vmax.f32 %v12002_v38, %v5279_v54  ;;  %v5156_v43 = vadd.f32 %v5155_v39, %v12006_v62 }
 0x4c0   :  { %v5209_v40 = vadd.f32 %v5208_v61, %v11829_v0  ;;  %v5654_v16 = vrot.slane %v3066_v20, 6  ;;  %v2883_v1 = vrot.slane %v12141_v60, 1  ;;  %v5174_v49 = vadd.f32 %v5173_v9, %v5096_v22  ;;  %v14587_v0 = vld [vmem:[#allocation171_spill] sm:$0xff] }
 0x4c1   :  { %v12146_v17 = vsel %vm5631_vm10, %v5629_v52, %v14583_v33  ;;  %v5192_v24 = vadd.f32 %v5191_v23, %v5104_v55  ;;  %v5295_v5 = vmax.f32 %v5293_v12, %v5294_v51  ;;  %v5157_v44 = vrot.slane %v5156_v43, 4 }
 0x4c2   :  { %v5210_v48 = vadd.f32 %v5209_v40, %v5112_v3  ;;  %v5226_v14 = vadd.f32 %v14585_v28, %v14584_v19  ;;  %v2884_v30 = vsel %vm1865_vm7, %v2883_v1, %v2882_v56  ;;  %v5690_v38 = vsel %vm5628_vm9, %v14586_v2, %v5654_v16  ;;  %v14590_v19 = vld [vmem:[#allocation32_spill] sm:$0xff] }
 0x4c3   :  { %v5175_v8 = vrot.slane %v5174_v49, 4  ;;  %v5193_v62 = vrot.slane %v5192_v24, 4  ;;  %v2893_v11 = vrot.slane %v2884_v30, 4  ;;  %v14588_v41 = vrot.slane %v14587_v0, 5 }
 0x4c4   :  { %v5303_v22 = vsub.f32 %v11960_v27, %v5295_v5  ;;  %v5305_v55 = vsub.f32 %v11970_v7, %v5295_v5  ;;  %v5307_v3 = vsub.f32 %v11972_v13, %v5295_v5  ;;  %v5309_v12 = vsub.f32 %v11974_v47, %v5295_v5  ;;  %v14589_v7 = vld [vmem:[#allocation31_spill] sm:$0xff] }
 0x4c5   :  { %v12160_v39 = vsel %vm5631_vm10, %v5690_v38, %v14588_v41  ;;  %v5311_v56 = vsub.f32 %v11985_v18, %v5295_v5  ;;  %v5313_v53 = vsub.f32 %v11993_v31, %v5295_v5  ;;  %v2894_v25 = vadd.f32 %v2893_v11, %v2884_v30  ;;  %v14591_v11 = vld [vmem:[#allocation33_spill] sm:$0xff] }
 0x4c6   :  { %v5315_v61 = vsub.f32 %v5261_v29, %v5295_v5  ;;  %v5317_v20 = vsub.f32 %v5279_v54, %v5295_v5  ;;  %v5319_v10 = vmul.f32 1.442695, %v5303_v22  ;;  %v5323_v52 = vmul.f32 1.442695, %v5305_v55  ;;  %v14592_v22 = vld [vmem:[#allocation208_spill] sm:$0xff]  ;;  %v14593_v55 = vld [vmem:[#allocation201_spill] sm:$0xff] }
 0x4c7   :  { %v5327_v9 = vmul.f32 1.442695, %v5307_v3  ;;  %v5331_v23 = vmul.f32 1.442695, %v5309_v12  ;;  %v5158_v63 = vadd.f32 %v5157_v44, %v5156_v43  ;;  %v2895_v33 = vrot.slane %v2894_v25, 2 }
 0x4c8   :  { %6683 = vpow2.f32 %v5319_v10  ;;  %v5335_v27 = vmul.f32 1.442695, %v5311_v56  ;;  %v5120_v13 = vmul.f32 %v11989_v42, %v14589_v7  ;;  %v5339_v47 = vmul.f32 1.442695, %v5313_v53  ;;  %v14594_v56 = vld [vmem:[#allocation73_spill] sm:$0xff]  ;;  %v14595_v53 = vld [vmem:[#allocation204_spill] sm:$0xff] }
 0x4c9   :  { %6685 = vpow2.f32 %v5323_v52  ;;  %v5343_v51 = vmul.f32 1.442695, %v5315_v61  ;;  %v5159_v18 = vrot.slane %v5158_v63, 2  ;;  %v2896_v40 = vadd.f32 %v2895_v33, %v2894_v25  ;;  %v14596_v61 = vld [vmem:[#allocation145_spill] sm:$0xff] }
 0x4ca   :  { %6687 = vpow2.f32 %v5327_v9  ;;  %v5176_v31 = vadd.f32 %v5175_v8, %v5174_v49  ;;  %v5194_v29 = vadd.f32 %v5193_v62, %v5192_v24  ;;  %v5347_v54 = vmul.f32 1.442695, %v5317_v20  ;;  %v14597_v20 = vld [vmem:[#allocation180_spill] sm:$0xff] }
 0x4cb   :  { %6689 = vpow2.f32 %v5331_v23  ;;  %v5211_v16 = vrot.slane %v5210_v48, 4  ;;  %v5227_v1 = vadd.f32 %v5226_v14, %v11842_v4  ;;  %v2897_v43 = vrot.slane %v2896_v40, 1 }
 0x4cc   :  { %6691 = vpow2.f32 %v5335_v27  ;;  %v5177_v5 = vrot.slane %v5176_v31, 2  ;;  %v5195_v44 = vrot.slane %v5194_v29, 2  ;;  %v5128_v28 = vmul.f32 %v11989_v42, %v14590_v19  ;;  %v14600_v27 = vld [vmem:[#allocation182_spill] sm:$0xff] }
 0x4cd   :  { %6693 = vpow2.f32 %v5339_v47  ;;  %v5212_v30 = vadd.f32 %v5211_v16, %v5210_v48  ;;  %v5228_v2 = vadd.f32 %v5227_v1, %v5120_v13  ;;  %v2898_v38 = vadd.f32 %v2897_v43, %v2896_v40  ;;  %v14601_v47 = vld [vmem:[#allocation209_spill] sm:$0xff] }
 0x4ce   :  { %6695 = vpow2.f32 %v5343_v51  ;;  %v5136_v49 = vmul.f32 %v11989_v42, %v14591_v11  ;;  %v5160_v24 = vadd.f32 %v5159_v18, %v5158_v63  ;;  %v5196_v8 = vadd.f32 %v5195_v44, %v5194_v29 }
 0x4cf   :  { %6697 = vpow2.f32 %v5347_v54  ;;  %v5213_v62 = vrot.slane %v5212_v30, 2  ;;  %v5229_v4 = vrot.slane %v5228_v2, 4  ;;  %v2906_v14 = vrot.slane %v2898_v38, %v14495_v6  ;;  %v14603_v54 = vld [vmem:[#allocation173_spill] sm:$0xff] }
 0x4d0   :  { %v5144_v0 = vmul.f32 %v11881_v34, %v11989_v42  ;;  %v5178_v41 = vadd.f32 %v5177_v5, %v5176_v31  ;;  %v5244_v48 = vadd.f32 %v14593_v55, %v14592_v22  ;;  %v5262_v25 = vadd.f32 %v14595_v53, %v14594_v56  ;;  %v14599_v34 = vld [vmem:[#allocation202_spill] sm:$0xff] }
 0x4d1   :  { %v5214_v3 = vadd.f32 %v5213_v62, %v5212_v30  ;;  %v5230_v12 = vadd.f32 %v5229_v4, %v5228_v2  ;;  %v5280_v10 = vadd.f32 %v14597_v20, %v14596_v61  ;;  %v14598_v52 = vrot.slane %v11939_v35, 2 }
 0x4d2   :  { %6699 = vrcp.f32 %v2906_v14  ;;  %v5161_v23 = vrot.slane %v5160_v24, 1  ;;  %v5245_v42 = vadd.f32 %v5244_v48, %v14599_v34  ;;  %v5197_v63 = vrot.slane %v5196_v8, 1 }
 0x4d3   :  { %v12187_v9 = vadd.f32 %v14598_v52, %v11939_v35  ;;  %v5231_v33 = vrot.slane %v5230_v12, 2  ;;  %v5263_v7 = vadd.f32 %v5262_v25, %v14600_v27  ;;  %v5281_v13 = vadd.f32 %v5280_v10, %v11983_v58 }
 0x4d4   :  { %v14602_v51 = vrot.slane %v14601_v47, 2  ;;  %v5179_v40 = vrot.slane %v5178_v41, 1  ;;  %v5215_v31 = vrot.slane %v5214_v3, 1  ;;  %v5246_v29 = vadd.f32 %v5245_v42, %v5128_v28 }
 0x4d5   :  { %v12197_v35 = vpop.eup %6683  ;;  %v5232_v1 = vadd.f32 %v5231_v33, %v5230_v12  ;;  %v5264_v43 = vadd.f32 %v5263_v7, %v5136_v49  ;;  %v5282_v5 = vadd.f32 %v5281_v13, %v5144_v0  ;;  %v14604_v58 = vrot.slane %v11925_v21, 1 }
 0x4d6   :  { %v12195_v18 = vadd.f32 %v14602_v51, %v14601_v47  ;;  %v12200_v44 = vpop.eup %6685  ;;  %v12208_v2 = vadd.f32 %v5161_v23, %v5160_v24  ;;  %v5247_v38 = vrot.slane %v5246_v29, 4  ;;  %v12213_v62 = vadd.f32 %v5197_v63, %v5196_v8 }
 0x4d7   :  { %v12205_v19 = vadd.f32 %v14604_v58, %v11925_v21  ;;  %v12210_v28 = vpop.eup %6687  ;;  %v5367_v11 = vrot.slane %v12200_v44, 7  ;;  %v5265_v49 = vrot.slane %v5264_v43, 4  ;;  %v5283_v4 = vrot.slane %v5282_v5, 4 }
 0x4d8   :  { %v12215_v14 = vpop.eup %6689  ;;  %v5369_v0 = vrot.slane %v12210_v28, 6  ;;  %v12218_v22 = vadd.f32 %v5179_v40, %v5178_v41  ;;  %v12220_v21 = vadd.f32 %v5215_v31, %v5214_v3  ;;  %v5248_v55 = vadd.f32 %v5247_v38, %v5246_v29  ;;  %v14620_v29 = vld [vmem:[#allocation105_spill] sm:$0xff] }
 0x4d9   :  { %v12222_v24 = vpop.eup %6691  ;;  %v5368_v48 = vsel %vm1847_vm1, %v5367_v11, %v12197_v35  ;;  %v5371_v12 = vrot.slane %v12215_v14, 5  ;;  %v5233_v8 = vrot.slane %v5232_v1, 1  ;;  %v5266_v56 = vadd.f32 %v5265_v49, %v5264_v43  ;;  %v14608_v43 = vld [vmem:[#allocation84_spill] sm:$0xff] }
 0x4da   :  { %v12227_v53 = vpop.eup %6693  ;;  %v5370_v25 = vsel %vm1850_vm2, %v5369_v0, %v5368_v48  ;;  %v5373_v61 = vrot.slane %v12222_v24, 4  ;;  %v5249_v41 = vrot.slane %v5248_v55, 2  ;;  %v5284_v20 = vadd.f32 %v5283_v4, %v5282_v5 }
 0x4db   :  { %14605 = vst [vmem:[#allocation196_spill] sm:$0xff] %v12227_v53  ;;  %v12231_v3 = vpop.eup %6695  ;;  %v5372_v10 = vsel %vm1853_vm3, %v5371_v12, %v5370_v25  ;;  %v5375_v52 = vrot.slane %v12227_v53, 3  ;;  %v5267_v23 = vrot.slane %v5266_v56, 2  ;;  %v5296_v34 = vmax.f32 %v12208_v2, %v12213_v62 }
 0x4dc   :  { %14606 = vst [vmem:[#allocation181_spill] sm:$0xff] %v12231_v3  ;;  %v12237_v42 = vpop.eup %6697  ;;  %v5374_v63 = vsel %vm1856_vm4, %v5373_v61, %v5372_v10  ;;  %v5377_v33 = vrot.slane %v12231_v3, 2  ;;  %v12241_v27 = vadd.f32 %v5249_v41, %v5248_v55  ;;  %v5285_v7 = vrot.slane %v5284_v20, 2  ;;  %v14611_v61 = vld [vmem:[#allocation77_spill] sm:$0xff]  ;;  %v14612_v41 = vld [vmem:[#allocation36_spill] sm:$0xff]  ;;  %v14614_v10 = vld [vmem:[#allocation74_spill] sm:$0xff] }
 0x4dd   :  { %14607 = vst [vmem:[#allocation197_spill] sm:$0xff] %v12237_v42  ;;  %v5376_v13 = vsel %vm1859_vm5, %v5375_v52, %v5374_v63  ;;  %v5379_v47 = vrot.slane %v12237_v42, 1  ;;  %v12245_v51 = vadd.f32 %v5233_v8, %v5232_v1  ;;  %v12248_v31 = vadd.f32 %v5267_v23, %v5266_v56  ;;  %v14615_v52 = vld [vmem:[#allocation125_spill] sm:$0xff]  ;;  %v14616_v23 = vld [vmem:[#allocation166_spill] sm:$0xff]  ;;  %v14618_v63 = vld [vmem:[#allocation167_spill] sm:$0xff] }
 0x4de   :  { %v5378_v40 = vsel %vm1862_vm6, %v5377_v33, %v5376_v13  ;;  %v14609_v5 = vrot.slane %v14608_v43, 4  ;;  %v12262_v49 = vadd.f32 %v5285_v7, %v5284_v20  ;;  %v14613_v20 = vld [vmem:[#allocation17_spill] sm:$0xff]  ;;  %v14621_v1 = vld [vmem:[#allocation124_spill] sm:$0xff] }
 0x4df   :  { %v6700_v38 = vpop.eup %6699  ;;  %v12259_v11 = vsel %vm1865_vm7, %v5379_v47, %v5378_v40  ;;  %v12265_v4 = vmax.f32 %v5296_v34, %v12245_v51  ;;  %v14617_v34 = vld [vmem:[#allocation164_spill] sm:$0xff] }
 0x4e0   :  { %v12256_v58 = vsel %vm5634_vm11, %v12146_v17, %v14609_v5  ;;  %v2910_v0 = vmul.f32 %v6700_v38, %v12045_v26  ;;  %v2912_v55 = vmul.f32 %v6700_v38, %v12053_v46  ;;  %v2914_v48 = vmul.f32 %v6700_v38, %v12062_v57 }
 0x4e1   :  { %14610 = vst [vmem:[#allocation122_spill] sm:$0xff] %v12256_v58  ;;  %v2916_v17 = vmul.f32 %v6700_v38, %v12067_v45  ;;  %v12272_v12 = vmul.f32 %v6700_v38, %v12070_v37  ;;  %v12275_v8 = vmul.f32 %v6700_v38, %v12074_v36  ;;  %v12278_v56 = vmul.f32 %v6700_v38, %v12079_v50 }
 0x4e2   :  { %v12281_v25 = vmul.f32 %v6700_v38, %v12141_v60  ;;  %v2928_v26 = vmul.f32 %v2912_v55, %v14611_v61  ;;  %v2930_v46 = vmul.f32 %v2914_v48, %v14612_v41  ;;  %v2926_v37 = vmul.f32 %v2910_v0, %v14614_v10  ;;  %v14619_v38 = vld [vmem:[#allocation129_spill] sm:$0xff] }
 0x4e3   :  { %v2932_v57 = vmul.f32 %v2916_v17, %v14613_v20  ;;  %v2934_v36 = vmul.f32 %v12272_v12, %v14615_v52  ;;  %v2936_v50 = vmul.f32 %v12275_v8, %v14616_v23  ;;  %v2938_v60 = vmul.f32 %v12278_v56, %v14617_v34  ;;  %v14622_v52 = vld [vmem:[#allocation117_spill] sm:$0xff]  ;;  %v14623_v20 = vld [vmem:[#allocation92_spill] sm:$0xff] }
 0x4e4   :  { %v2940_v33 = vmul.f32 %v12281_v25, %v14618_v63  ;;  %v2971_v7 = vrot.slane %v2928_v26, 7  ;;  %v2973_v13 = vrot.slane %v2930_v46, 6  ;;  %v3000_v30 = vmul.f32 %v2910_v0, %v14619_v38  ;;  %v14624_v46 = vld [vmem:[#allocation239_spill] sm:$0xff] }
 0x4e5   :  { %v2975_v47 = vrot.slane %v2932_v57, 5  ;;  %v2977_v40 = vrot.slane %v2934_v36, 4  ;;  %v2979_v43 = vrot.slane %v2936_v50, 3  ;;  %v2981_v5 = vrot.slane %v2938_v60, 2  ;;  %v14625_v36 = vld [vmem:[#allocation113_spill] sm:$0xff] }
 0x4e6   :  { %v2972_v16 = vsel %vm1847_vm1, %v2971_v7, %v2926_v37  ;;  %v3002_v45 = vmul.f32 %v2912_v55, %v14620_v29  ;;  %v3004_v23 = vmul.f32 %v2914_v48, %v14621_v1  ;;  %v3006_v10 = vmul.f32 %v2916_v17, %v14622_v52  ;;  %v14626_v37 = vld [vmem:[#allocation241_spill] sm:$0xff] }
 0x4e7   :  { %v2974_v34 = vsel %vm1850_vm2, %v2973_v13, %v2972_v16  ;;  %v3008_v26 = vmul.f32 %v12272_v12, %v14623_v20  ;;  %v3010_v57 = vmul.f32 %v12275_v8, %v14624_v46  ;;  %v3012_v50 = vmul.f32 %v12278_v56, %v14625_v36 }
 0x4e8   :  { %v2976_v60 = vsel %vm1853_vm3, %v2975_v47, %v2974_v34  ;;  %v3014_v7 = vmul.f32 %v12281_v25, %v14626_v37  ;;  %v3045_v63 = vrot.slane %v3002_v45, 7  ;;  %v3047_v41 = vrot.slane %v3004_v23, 6 }
 0x4e9   :  { %v2978_v61 = vsel %vm1856_vm4, %v2977_v40, %v2976_v60  ;;  %v2983_v58 = vrot.slane %v2940_v33, 1  ;;  %v3049_v16 = vrot.slane %v3006_v10, 5  ;;  %v3051_v13 = vrot.slane %v3008_v26, 4 }
 0x4ea   :  { %v2980_v59 = vsel %vm1859_vm5, %v2979_v43, %v2978_v61  ;;  %v3046_v15 = vsel %vm1847_vm1, %v3045_v63, %v3000_v30  ;;  %v3053_v32 = vrot.slane %v3010_v57, 3  ;;  %v3055_v42 = vrot.slane %v3012_v50, 2 }
 0x4eb   :  { %v2982_v3 = vsel %vm1862_vm6, %v2981_v5, %v2980_v59  ;;  %v3048_v34 = vsel %vm1850_vm2, %v3047_v41, %v3046_v15  ;;  %v5824_v47 = vrot.slane %v2912_v55, 7  ;;  %v5826_v53 = vrot.slane %v2914_v48, 6 }
 0x4ec   :  { %v2984_v45 = vsel %vm1865_vm7, %v2983_v58, %v2982_v3  ;;  %v3050_v23 = vsel %vm1853_vm3, %v3049_v16, %v3048_v34  ;;  %v3057_v40 = vrot.slane %v3014_v7, 1  ;;  %v5828_v33 = vrot.slane %v2916_v17, 5 }
 0x4ed   :  { %v2993_v10 = vrot.slane %v2984_v45, 4  ;;  %v3052_v26 = vsel %vm1856_vm4, %v3051_v13, %v3050_v23  ;;  %v5825_v61 = vsel %vm1847_vm1, %v5824_v47, %v2910_v0  ;;  %v5830_v30 = vrot.slane %v12272_v12, 4 }
 0x4ee   :  { %v3054_v63 = vsel %vm1859_vm5, %v3053_v32, %v3052_v26  ;;  %v5827_v59 = vsel %vm1850_vm2, %v5826_v53, %v5825_v61  ;;  %v5832_v15 = vrot.slane %v12275_v8, 3  ;;  %v5834_v55 = vrot.slane %v12278_v56, 2 }
 0x4ef   :  { %v2994_v3 = vadd.f32 %v2993_v10, %v2984_v45  ;;  %v3056_v58 = vsel %vm1862_vm6, %v3055_v42, %v3054_v63  ;;  %v5829_v48 = vsel %vm1853_vm3, %v5828_v33, %v5827_v59  ;;  %v5397_v17 = vrot.slane %v12259_v11, 4  ;;  %v14633_v59 = vld [vmem:[#allocation153_spill] sm:$0xff] }
 0x4f0   :  { %v3058_v41 = vsel %vm1865_vm7, %v3057_v40, %v3056_v58  ;;  %v5831_v0 = vsel %vm1856_vm4, %v5830_v30, %v5829_v48  ;;  %v5836_v12 = vrot.slane %v12281_v25, 1  ;;  %v14627_v32 = vrot.slane %v12241_v27, 1 }
 0x4f1   :  { %v2995_v8 = vrot.slane %v2994_v3, 2  ;;  %v3067_v56 = vrot.slane %v3058_v41, 4  ;;  %v5833_v43 = vsel %vm1859_vm5, %v5832_v15, %v5831_v0  ;;  %v5398_v42 = vadd.f32 %v5397_v17, %v12259_v11  ;;  %v14630_v11 = vld [vmem:[#allocation174_spill] sm:$0xff]  ;;  %v14636_v17 = vld [vmem:[#allocation193_spill] sm:$0xff] }
 0x4f2   :  { %v12334_v53 = vadd.f32 %v14627_v32, %v12241_v27  ;;  %v5835_v5 = vsel %vm1862_vm6, %v5834_v55, %v5833_v43  ;;  %v14628_v57 = vrot.slane %v12248_v31, 1  ;;  %v5287_v25 = vrot.slane %v12262_v49, 1  ;;  %v14635_v55 = vld [vmem:[#allocation160_spill] sm:$0xff] }
 0x4f3   :  { %v14629_v27 = vmax.f32 %v12218_v22, %v12220_v21  ;;  %v2996_v7 = vadd.f32 %v2995_v8, %v2994_v3  ;;  %v3068_v16 = vadd.f32 %v3067_v56, %v3058_v41  ;;  %v5837_v13 = vsel %vm1865_vm7, %v5836_v12, %v5835_v5  ;;  %v14638_v12 = vld [vmem:[#allocation163_spill] sm:$0xff]  ;;  %v14639_v8 = vld [vmem:[#allocation225_spill] sm:$0xff] }
 0x4f4   :  { %v12342_v50 = vadd.f32 %v14628_v57, %v12248_v31  ;;  %v5399_v34 = vrot.slane %v5398_v42, 2  ;;  %v4001_v47 = vrot.slane %v14630_v11, 1  ;;  %6145 = vst [vmem:[%s12761_s7 + $0xa8] sm:$0xff] %v5837_v13  ;;  %v12355_v31 = vadd.f32 %v5287_v25, %v12262_v49 }
 0x4f5   :  { %v5299_v60 = vmax.f32 %v14629_v27, %v12334_v53  ;;  %v14631_v23 = vrot.slane %v14603_v54, 4  ;;  %v4075_v33 = vrot.slane %v12195_v18, 1  ;;  %v2997_v10 = vrot.slane %v2996_v7, 1  ;;  %v14641_v27 = vld [vmem:[#allocation195_spill] sm:$0xff] }
 0x4f6   :  { %v5300_v45 = vmax.f32 %v12265_v4, %v12342_v50  ;;  %v3069_v26 = vrot.slane %v3068_v16, 2  ;;  %v5400_v61 = vadd.f32 %v5399_v34, %v5398_v42  ;;  %v14632_v30 = vrot.slane %v12187_v9, 1 }
 0x4f7   :  { %v12363_v40 = vsel %vm5634_vm11, %v12160_v39, %v14631_v23  ;;  %v5586_v49 = vrot.slane %v12205_v19, 7  ;;  %v14634_v4 = vrot.slane %v14633_v59, 1  ;;  %v5301_v54 = vmax.f32 %v5299_v60, %v12355_v31 }
 0x4f8   :  { %v2570_v63 = vadd.f32 %v14632_v30, %v12187_v9  ;;  %v4553_v39 = vrot.slane %v14635_v55, 6  ;;  %v2998_v3 = vadd.f32 %v2997_v10, %v2996_v7  ;;  %v3070_v58 = vadd.f32 %v3069_v26, %v3068_v16  ;;  %v14643_v55 = vld [vmem:[#allocation159_spill] sm:$0xff] }
 0x4f9   :  { %v3500_v15 = vadd.f32 %v14634_v4, %v14633_v59  ;;  %v5401_v48 = vrot.slane %v5400_v61, 1  ;;  %v14637_v41 = vrot.slane %v14636_v17, 4  ;;  %v5069_v32 = vrot.slane %v14638_v12, 4 }
 0x4fa   :  { %v4002_v9 = vadd.f32 %v4001_v47, %v14630_v11  ;;  %v5302_v19 = vmax.f32 %v5300_v45, %v5301_v54  ;;  %v14640_v56 = vrot.slane %v14639_v8, 1  ;;  %v3071_v42 = vrot.slane %v3070_v58, 1 }
 0x4fb   :  { %v4568_v0 = vadd.f32 %v14637_v41, %v14636_v17  ;;  %v5592_v5 = vrot.slane %v2998_v3, 6  ;;  %v5402_v57 = vadd.f32 %v5401_v48, %v5400_v61  ;;  %v4076_v25 = vadd.f32 %v4075_v33, %v12195_v18  ;;  %v14644_v3 = vld [vmem:[#allocation188_spill] sm:$0xff] }
 0x4fc   :  { %v3574_v43 = vadd.f32 %v14640_v56, %v14639_v8  ;;  %v5627_v60 = vsel %vm5625_vm8, %v14641_v27, %v5586_v49  ;;  %v5649_v7 = vrot.slane %v2570_v63, 7  ;;  %v5598_v16 = vrot.slane %v3500_v15, 5  ;;  %v14642_v63 = vld [vmem:[#allocation138_spill] sm:$0xff] }
 0x4fd   :  { %v3072_v13 = vadd.f32 %v3071_v42, %v3070_v58  ;;  %v5630_v34 = vsel %vm5628_vm9, %v5627_v60, %v5592_v5  ;;  %v5412_v11 = vrot.slane %v5402_v57, %v14495_v6  ;;  %v5304_v47 = vsub.f32 %v12208_v2, %v5302_v19  ;;  %v14646_v8 = vld [vmem:[#allocation70_spill] sm:$0xff]  ;;  %v14647_v5 = vld [vmem:[#allocation44_spill] sm:$0xff]  ;;  %v14651_v60 = vld [vmem:[#allocation183_spill] sm:$0xff] }
 0x4fe   :  { %v4569_v45 = vrot.slane %v4568_v0, 2  ;;  %v5633_v23 = vsel %vm5631_vm10, %v5630_v34, %v5598_v16  ;;  %v5306_v10 = vsub.f32 %v12218_v22, %v5302_v19  ;;  %v5604_v26 = vrot.slane %v4002_v9, 4  ;;  %v14648_v57 = vld [vmem:[#allocation82_spill] sm:$0xff] }
 0x4ff   :  { %v5070_v18 = vadd.f32 %v5069_v32, %v14638_v12  ;;  %v5655_v33 = vrot.slane %v3072_v13, 6  ;;  %6701 = vrcp.f32 %v5412_v11  ;;  %v5308_v61 = vsub.f32 %v12213_v62, %v5302_v19 }
 0x500   :  { %v5661_v30 = vrot.slane %v3574_v43, 5  ;;  %v5689_v49 = vsel %vm5625_vm8, %v14642_v63, %v5649_v7  ;;  %v5310_v59 = vsub.f32 %v12220_v21, %v5302_v19  ;;  %v12397_v2 = vsel %vm5634_vm11, %v5633_v23, %v5604_v26 }
 0x501   :  { %v5667_v4 = vrot.slane %v4076_v25, 4  ;;  %v5691_v15 = vsel %vm5628_vm9, %v5689_v49, %v5655_v33  ;;  %v5312_v22 = vsub.f32 %v12245_v51, %v5302_v19  ;;  %v5321_v54 = vmul.f32 1.442695, %v5304_v47  ;;  %v14653_v47 = vld [vmem:[#allocation211_spill] sm:$0xff]  ;;  %v14656_v49 = vld [vmem:[#allocation185_spill] sm:$0xff] }
 0x502   :  { %v14645_v58 = vrot.slane %v14644_v3, 7  ;;  %v5693_v48 = vsel %vm5631_vm10, %v5691_v15, %v5661_v30  ;;  %v5314_v17 = vsub.f32 %v12334_v53, %v5302_v19  ;;  %v5325_v41 = vmul.f32 1.442695, %v5306_v10  ;;  %v14650_v53 = vld [vmem:[#allocation128_spill] sm:$0xff] }
 0x503   :  { %v4570_v21 = vadd.f32 %v4569_v45, %v4568_v0  ;;  %v5316_v12 = vsub.f32 %v12342_v50, %v5302_v19  ;;  %v5329_v32 = vmul.f32 1.442695, %v5308_v61  ;;  %v12409_v9 = vsel %vm5634_vm11, %v5693_v48, %v5667_v4  ;;  %v14655_v30 = vld [vmem:[#allocation184_spill] sm:$0xff] }
 0x504   :  { %v4552_v62 = vsel %vm1847_vm1, %v14645_v58, %v14643_v55  ;;  %v4989_v51 = vrot.slane %v14646_v8, 2  ;;  %v5071_v56 = vrot.slane %v5070_v18, 2  ;;  %v5318_v43 = vsub.f32 %v12355_v31, %v5302_v19  ;;  %v14652_v19 = vld [vmem:[#allocation210_spill] sm:$0xff] }
 0x505   :  { %v5333_v42 = vmul.f32 1.442695, %v5310_v59  ;;  %v14649_v25 = vrot.slane %v14648_v57, 3  ;;  %v4512_v0 = vmul.f32 %v14650_v53, %v14622_v52  ;;  %6703 = vpow2.f32 %v5321_v54 }
 0x506   :  { %v5337_v50 = vmul.f32 1.442695, %v5312_v22  ;;  %v12421_v7 = vmul.f32 %v14651_v60, %v14623_v20  ;;  %v4554_v16 = vsel %vm1850_vm2, %v4553_v39, %v4552_v62  ;;  %6705 = vpow2.f32 %v5325_v41  ;;  %v14654_v39 = vld [vmem:[#allocation190_spill] sm:$0xff]  ;;  %v14657_v22 = vld [vmem:[#allocation213_spill] sm:$0xff]  ;;  %v14667_v60 = vld [vmem:[#allocation187_spill] sm:$0xff] }
 0x507   :  { %v4988_v27 = vsel %vm1859_vm5, %v14649_v25, %v14647_v5  ;;  %v5341_v13 = vmul.f32 1.442695, %v5314_v17  ;;  %v4571_v31 = vrot.slane %v4570_v21, 1  ;;  %v12426_v34 = vmul.f32 %v14652_v19, %v14620_v29 }
 0x508   :  { %6707 = vpow2.f32 %v5329_v32  ;;  %v5345_v11 = vmul.f32 1.442695, %v5316_v12  ;;  %v12430_v45 = vmul.f32 %v14653_v47, %v14621_v1  ;;  %v12432_v23 = vadd.f32 %v5071_v56, %v5070_v18  ;;  %v14658_v32 = vld [vmem:[#allocation196_spill] sm:$0xff] }
 0x509   :  { %6709 = vpow2.f32 %v5333_v42  ;;  %v5349_v10 = vmul.f32 1.442695, %v5318_v43  ;;  %v12435_v26 = vsel %vm1862_vm6, %v4989_v51, %v4988_v27  ;;  %v4555_v61 = vrot.slane %v4512_v0, 5  ;;  %v14659_v51 = vld [vmem:[#allocation181_spill] sm:$0xff]  ;;  %v14665_v27 = vld [vmem:[#allocation83_spill] sm:$0xff] }
 0x50a   :  { %6711 = vpow2.f32 %v5337_v50  ;;  %v12440_v63 = vmul.f32 %v14655_v30, %v14624_v46  ;;  %v12444_v59 = vmul.f32 %v14656_v49, %v14625_v36  ;;  %v12450_v15 = vadd.f32 %v4571_v31, %v4570_v21  ;;  %v14666_v0 = vld [vmem:[#allocation169_spill] sm:$0xff] }
 0x50b   :  { %6713 = vpow2.f32 %v5341_v13  ;;  %v12448_v4 = vsel %vm1853_vm3, %v4555_v61, %v4554_v16  ;;  %v12454_v54 = vmul.f32 %v14657_v22, %v14619_v38  ;;  %v5053_v3 = vrot.slane %v12426_v34, 7  ;;  %v14668_v13 = vld [vmem:[#allocation68_spill] sm:$0xff] }
 0x50c   :  { %6715 = vpow2.f32 %v5345_v11  ;;  %v6702_v55 = vpop.eup %6701  ;;  %v5073_v62 = vrot.slane %v12432_v23, 1 }
 0x50d   :  { %6717 = vpow2.f32 %v5349_v10  ;;  %v12460_v48 = vmul.f32 %v6702_v55, %v12197_v35  ;;  %v12463_v17 = vmul.f32 %v6702_v55, %v12200_v44  ;;  %v12466_v41 = vmul.f32 %v6702_v55, %v12210_v28  ;;  %v14660_v35 = vld [vmem:[#allocation197_spill] sm:$0xff]  ;;  %v14661_v44 = vld [vmem:[#allocation72_spill] sm:$0xff]  ;;  %v14662_v28 = vld [vmem:[#allocation75_spill] sm:$0xff] }
 0x50e   :  { %v12469_v21 = vmul.f32 %v6702_v55, %v12215_v14  ;;  %v12472_v12 = vmul.f32 %v6702_v55, %v12222_v24  ;;  %v12475_v8 = vmul.f32 %v6702_v55, %v14658_v32  ;;  %v12478_v56 = vmul.f32 %v6702_v55, %v14659_v51  ;;  %v14663_v14 = vld [vmem:[#allocation78_spill] sm:$0xff]  ;;  %v14664_v24 = vld [vmem:[#allocation80_spill] sm:$0xff] }
 0x50f   :  { %v12481_v43 = vmul.f32 %v6702_v55, %v14660_v35  ;;  %v5435_v42 = vmul.f32 %v12460_v48, %v14661_v44  ;;  %v5437_v5 = vmul.f32 %v12463_v17, %v14662_v28  ;;  %v5439_v57 = vmul.f32 %v12466_v41, %v14663_v14  ;;  %v14669_v10 = vld [vmem:[#allocation222_spill] sm:$0xff]  ;;  %v14671_v14 = vld [vmem:[#allocation220_spill] sm:$0xff] }
 0x510   :  { %v5441_v25 = vmul.f32 %v12469_v21, %v14664_v24  ;;  %v5443_v53 = vmul.f32 %v12472_v12, %v14665_v27  ;;  %v5445_v50 = vmul.f32 %v12475_v8, %v14666_v0  ;;  %v5447_v16 = vmul.f32 %v12478_v56, %v14667_v60  ;;  %v14670_v44 = vld [vmem:[#allocation218_spill] sm:$0xff] }
 0x511   :  { %v5449_v31 = vmul.f32 %v12481_v43, %v14668_v13  ;;  %v5467_v19 = vrot.slane %v5437_v5, 7  ;;  %v5469_v11 = vrot.slane %v5439_v57, 6  ;;  %v5509_v61 = vmul.f32 %v12460_v48, %v14669_v10  ;;  %v14672_v57 = vld [vmem:[#allocation221_spill] sm:$0xff] }
 0x512   :  { %v5471_v47 = vrot.slane %v5441_v25, 5  ;;  %v12501_v30 = vpop.eup %6703  ;;  %v5473_v49 = vrot.slane %v5443_v53, 4  ;;  %v5475_v22 = vrot.slane %v5445_v50, 3  ;;  %v5477_v55 = vrot.slane %v5447_v16, 2  ;;  %v14673_v53 = vld [vmem:[#allocation223_spill] sm:$0xff] }
 0x513   :  { %v5479_v32 = vrot.slane %v5449_v31, 1  ;;  %v12503_v51 = vpop.eup %6705  ;;  %v5468_v35 = vsel %vm1847_vm1, %v5467_v19, %v5435_v42  ;;  %v5511_v28 = vmul.f32 %v12463_v17, %v14670_v44  ;;  %v5513_v5 = vmul.f32 %v12466_v41, %v14671_v14  ;;  %v14674_v50 = vld [vmem:[#allocation199_spill] sm:$0xff] }
 0x514   :  { %v5515_v24 = vmul.f32 %v12469_v21, %v14672_v57  ;;  %v5470_v27 = vsel %vm1850_vm2, %v5469_v11, %v5468_v35  ;;  %v5517_v0 = vmul.f32 %v12472_v12, %v14673_v53  ;;  %v5519_v60 = vmul.f32 %v12475_v8, %v14674_v50  ;;  %v14675_v42 = vld [vmem:[#allocation179_spill] sm:$0xff] }
 0x515   :  { %v12512_v25 = vpop.eup %6707  ;;  %v5521_v16 = vmul.f32 %v12478_v56, %v14675_v42  ;;  %v5472_v31 = vsel %vm1853_vm3, %v5471_v47, %v5470_v27  ;;  %v14676_v19 = vld [vmem:[#allocation215_spill] sm:$0xff]  ;;  %v5541_v44 = vrot.slane %v5511_v28, 7  ;;  %v5543_v14 = vrot.slane %v5513_v5, 6 }
 0x516   :  { %v12521_v13 = vpop.eup %6709  ;;  %v5523_v10 = vmul.f32 %v12481_v43, %v14676_v19  ;;  %v5474_v11 = vsel %vm1856_vm4, %v5473_v49, %v5472_v31  ;;  %v5545_v35 = vrot.slane %v5515_v24, 5  ;;  %v5547_v53 = vrot.slane %v5517_v0, 4 }
 0x517   :  { %v12526_v57 = vpop.eup %6711  ;;  %v5549_v33 = vrot.slane %v5519_v60, 3  ;;  %v5476_v42 = vsel %vm1859_vm5, %v5475_v22, %v5474_v11  ;;  %v5542_v18 = vsel %vm1847_vm1, %v5541_v44, %v5509_v61  ;;  %v5551_v47 = vrot.slane %v5521_v16, 2 }
 0x518   :  { %v12529_v50 = vpop.eup %6713  ;;  %v5553_v27 = vrot.slane %v5523_v10, 1  ;;  %v5478_v28 = vsel %vm1862_vm6, %v5477_v55, %v5476_v42  ;;  %v5544_v5 = vsel %vm1850_vm2, %v5543_v14, %v5542_v18  ;;  %v6040_v49 = vrot.slane %v12463_v17, 7 }
 0x519   :  { %v12533_v58 = vpop.eup %6715  ;;  %v6042_v24 = vrot.slane %v12466_v41, 6  ;;  %v5480_v60 = vsel %vm1865_vm7, %v5479_v32, %v5478_v28  ;;  %v5546_v22 = vsel %vm1853_vm3, %v5545_v35, %v5544_v5  ;;  %v6044_v61 = vrot.slane %v12469_v21, 5 }
 0x51a   :  { %v12539_v0 = vpop.eup %6717  ;;  %v6046_v16 = vrot.slane %v12472_v12, 4  ;;  %v5497_v31 = vrot.slane %v5480_v60, 4  ;;  %v5548_v19 = vsel %vm1856_vm4, %v5547_v53, %v5546_v22  ;;  %v6041_v18 = vsel %vm1847_vm1, %v6040_v49, %v12460_v48 }
 0x51b   :  { %v6048_v17 = vrot.slane %v12475_v8, 3  ;;  %v5550_v41 = vsel %vm1859_vm5, %v5549_v33, %v5548_v19  ;;  %v6043_v55 = vsel %vm1850_vm2, %v6042_v24, %v6041_v18  ;;  %v6050_v32 = vrot.slane %v12478_v56, 2  ;;  %v14679_v19 = vld [vmem:[#allocation122_spill] sm:$0xff] }
 0x51c   :  { %v6052_v10 = vrot.slane %v12481_v43, 1  ;;  %v5498_v44 = vadd.f32 %v5497_v31, %v5480_v60  ;;  %v5552_v21 = vsel %vm1862_vm6, %v5551_v47, %v5550_v41  ;;  %v6045_v12 = vsel %vm1853_vm3, %v6044_v61, %v6043_v55 }
 0x51d   :  { %v5381_v14 = vrot.slane %v12503_v51, 7  ;;  %v5554_v11 = vsel %vm1865_vm7, %v5553_v27, %v5552_v21  ;;  %v6047_v48 = vsel %vm1856_vm4, %v6046_v16, %v6045_v12  ;;  %v5383_v8 = vrot.slane %v12512_v25, 6  ;;  %v14677_v16 = vld [vmem:[#allocation194_spill] sm:$0xff] }
 0x51e   :  { %v5385_v33 = vrot.slane %v12521_v13, 5  ;;  %v5499_v35 = vrot.slane %v5498_v44, 2  ;;  %v5571_v53 = vrot.slane %v5554_v11, 4  ;;  %v6049_v56 = vsel %vm1859_vm5, %v6048_v17, %v6047_v48 }
 0x51f   :  { %v5382_v43 = vsel %vm1847_vm1, %v5381_v14, %v12501_v30  ;;  %v6051_v42 = vsel %vm1862_vm6, %v6050_v32, %v6049_v56  ;;  %v5387_v28 = vrot.slane %v12526_v57, 4  ;;  %v5389_v27 = vrot.slane %v12529_v50, 3 }
 0x520   :  { %v5384_v47 = vsel %vm1850_vm2, %v5383_v8, %v5382_v43  ;;  %v5500_v5 = vadd.f32 %v5499_v35, %v5498_v44  ;;  %v5572_v49 = vadd.f32 %v5571_v53, %v5554_v11  ;;  %v6053_v24 = vsel %vm1865_vm7, %v6052_v10, %v6051_v42  ;;  %v14680_v10 = vld [vmem:[#allocation212_spill] sm:$0xff]  ;;  %v14681_v35 = vld [vmem:[#allocation214_spill] sm:$0xff]  ;;  %v14682_v43 = vld [vmem:[#allocation207_spill] sm:$0xff] }
 0x521   :  { %v5386_v60 = vsel %vm1853_vm3, %v5385_v33, %v5384_v47  ;;  %6154 = vst [vmem:[%s12761_s7 + $0xf0] sm:$0xff] %v6053_v24  ;;  %v5391_v61 = vrot.slane %v12533_v58, 2  ;;  %v14678_v31 = vrot.slane %v14677_v16, 3  ;;  %v5393_v32 = vrot.slane %v12539_v0, 1 }
 0x522   :  { %v5388_v22 = vsel %vm1856_vm4, %v5387_v28, %v5386_v60  ;;  %v5501_v17 = vrot.slane %v5500_v5, 1  ;;  %v5573_v41 = vrot.slane %v5572_v49, 2  ;;  %v5014_v44 = vmul.f32 %v14680_v10, %v14622_v52  ;;  %v14686_v60 = vld [vmem:[#allocation216_spill] sm:$0xff] }
 0x523   :  { %v5638_v18 = vsel %vm5637_vm12, %v14679_v19, %v14678_v31  ;;  %v5390_v55 = vsel %vm1859_vm5, %v5389_v27, %v5388_v22  ;;  %v5054_v21 = vsel %vm1847_vm1, %v5053_v3, %v12454_v54  ;;  %v5074_v12 = vadd.f32 %v5073_v62, %v12432_v23 }
 0x524   :  { %v5392_v14 = vsel %vm1862_vm6, %v5391_v61, %v5390_v55  ;;  %v5672_v11 = vrot.slane %v12450_v15, 3  ;;  %v5502_v48 = vadd.f32 %v5501_v17, %v5500_v5  ;;  %v5574_v8 = vadd.f32 %v5573_v41, %v5572_v49 }
 0x525   :  { %v5394_v33 = vsel %vm1865_vm7, %v5393_v32, %v5392_v14  ;;  %v5016_v53 = vmul.f32 %v14681_v35, %v14623_v20  ;;  %v14683_v34 = vrot.slane %v14682_v43, 2  ;;  %v14684_v3 = vrot.slane %v12430_v45, 6 }
 0x526   :  { %v5403_v56 = vrot.slane %v5394_v33, 4  ;;  %v5575_v62 = vrot.slane %v5574_v8, 1  ;;  %v5621_v42 = vrot.slane %v5502_v48, 1  ;;  %v5696_v15 = vsel %vm5637_vm12, %v12363_v40, %v5672_v11  ;;  %v14691_v11 = vld [vmem:[#allocation217_spill] sm:$0xff] }
 0x527   :  { %v5641_v54 = vsel %vm5640_vm13, %v5638_v18, %v14683_v34  ;;  %v5056_v23 = vsel %vm1850_vm2, %v14684_v3, %v5054_v21  ;;  %v14685_v47 = vrot.slane %v12421_v7, 4  ;;  %v5057_v27 = vrot.slane %v5014_v44, 5  ;;  %v14687_v7 = vld [vmem:[#allocation186_spill] sm:$0xff] }
 0x528   :  { %v5678_v5 = vrot.slane %v5074_v12, 2  ;;  %v5404_v49 = vadd.f32 %v5403_v56, %v5394_v33  ;;  %v4559_v24 = vrot.slane %v12440_v63, 3  ;;  %v5018_v45 = vmul.f32 %v14686_v60, %v14624_v46  ;;  %v14688_v63 = vld [vmem:[#allocation198_spill] sm:$0xff] }
 0x529   :  { %v4558_v28 = vsel %vm1856_vm4, %v14685_v47, %v12448_v4  ;;  %v5576_v22 = vadd.f32 %v5575_v62, %v5574_v8  ;;  %v5644_v61 = vsel %vm5643_vm14, %v5641_v54, %v5621_v42  ;;  %v5058_v16 = vsel %vm1853_vm3, %v5057_v27, %v5056_v23 }
 0x52a   :  { %v5405_v31 = vrot.slane %v5404_v49, 2  ;;  %v5698_v40 = vsel %vm5640_vm13, %v5696_v15, %v5678_v5  ;;  %v6070_v19 = vrot.slane %v5644_v61, 4  ;;  %v4520_v4 = vmul.f32 %v14687_v7, %v14626_v37 }
 0x52b   :  { %v4560_v18 = vsel %vm1859_vm5, %v4559_v24, %v4558_v28  ;;  %v5059_v17 = vrot.slane %v5016_v53, 4  ;;  %v5684_v41 = vrot.slane %v5576_v22, 1  ;;  %v14689_v55 = vrot.slane %v14688_v63, 4 }
 0x52c   :  { %v4561_v10 = vrot.slane %v12444_v59, 2  ;;  %v5406_v44 = vadd.f32 %v5405_v31, %v5404_v49  ;;  %v6071_v21 = vmax.f32 %v5644_v61, %v6070_v19  ;;  %v14690_v12 = vrot.slane %v14654_v39, 1  ;;  %v14692_v39 = vld [vmem:[#allocation219_spill] sm:$0xff] }
 0x52d   :  { %v4500_v32 = vadd.f32 %v14689_v55, %v14688_v63  ;;  %v5020_v48 = vmul.f32 %v14691_v11, %v14625_v36  ;;  %v5060_v8 = vsel %vm1856_vm4, %v5059_v17, %v5058_v16  ;;  %v5700_v33 = vsel %vm5643_vm14, %v5698_v40, %v5684_v41 }
 0x52e   :  { %v4992_v14 = vsel %vm1865_vm7, %v14690_v12, %v12435_v26  ;;  %v4562_v35 = vsel %vm1862_vm6, %v4561_v10, %v4560_v18  ;;  %v5061_v53 = vrot.slane %v5018_v45, 3  ;;  %v5407_v56 = vrot.slane %v5406_v44, 1  ;;  %6158 = vst [vmem:[%s12761_s7 + $0x110] sm:$0xff] %v5700_v33 }
 0x52f   :  { %v6072_v43 = vrot.slane %v6071_v21, 2  ;;  %v4563_v59 = vrot.slane %v4520_v4, 1  ;;  %v5022_v26 = vmul.f32 %v14692_v39, %v14626_v37  ;;  %v4501_v23 = vrot.slane %v4500_v32, 2 }
 0x530   :  { %v5062_v34 = vsel %vm1859_vm5, %v5061_v53, %v5060_v8  ;;  %v5408_v54 = vadd.f32 %v5407_v56, %v5406_v44  ;;  %v5001_v62 = vrot.slane %v4992_v14, 4  ;;  %v5063_v15 = vrot.slane %v5020_v48, 2  ;;  %v14694_v53 = vld [vmem:[#allocation36_spill] sm:$0xff]  ;;  %v14695_v56 = vld [vmem:[#allocation17_spill] sm:$0xff] }
 0x531   :  { %v6073_v3 = vmax.f32 %v6071_v21, %v6072_v43  ;;  %v4564_v42 = vsel %vm1865_vm7, %v4563_v59, %v4562_v35  ;;  %v5065_v49 = vrot.slane %v5022_v26, 1  ;;  %v4502_v24 = vadd.f32 %v4501_v23, %v4500_v32  ;;  %v14693_v35 = vld [vmem:[#allocation77_spill] sm:$0xff] }
 0x532   :  { %v5416_v47 = vrot.slane %v5408_v54, %v14495_v6  ;;  %v5064_v27 = vsel %vm1862_vm6, %v5063_v15, %v5062_v34  ;;  %v4573_v5 = vrot.slane %v4564_v42, 4  ;;  %v5002_v60 = vadd.f32 %v5001_v62, %v4992_v14  ;;  %v14700_v54 = vld [vmem:[#allocation167_spill] sm:$0xff] }
 0x533   :  { %v6074_v28 = vrot.slane %v6073_v3, 1  ;;  %v5066_v22 = vsel %vm1865_vm7, %v5065_v49, %v5064_v27  ;;  %v4503_v31 = vrot.slane %v4502_v24, 1 }
 0x534   :  { %6719 = vrcp.f32 %v5416_v47  ;;  %v4574_v16 = vadd.f32 %v4573_v5, %v4564_v42  ;;  %v5003_v40 = vrot.slane %v5002_v60, 2  ;;  %v5075_v19 = vrot.slane %v5066_v22, 4 }
 0x535   :  { %v6075_v45 = vmax.f32 %v6073_v3, %v6074_v28  ;;  %v12638_v18 = vadd.f32 %v4503_v31, %v4502_v24 }
 0x536   :  { %v4575_v4 = vrot.slane %v4574_v16, 2  ;;  %v12640_v6 = vadd.f32 %v5003_v40, %v5002_v60  ;;  %v5076_v17 = vadd.f32 %v5075_v19, %v5066_v22 }
 0x537   :  { %v6082_v7 = vsub.f32 %v5644_v61, %v6075_v45  ;;  %v5610_v32 = vrot.slane %v12638_v18, 3 }
 0x538   :  { %v12642_v63 = vadd.f32 %v4575_v4, %v4574_v16  ;;  %v5005_v10 = vrot.slane %v12640_v6, 1  ;;  %v5077_v44 = vrot.slane %v5076_v17, 2 }
 0x539   :  { %v6084_v41 = vmul.f32 1.442695, %v6082_v7 }
 0x53a   :  { %v12666_v43 = vadd.f32 %v5077_v44, %v5076_v17 }
 0x53b   :  { %6721 = vpow2.f32 %v6084_v41 }
 0x541   :  { %v6720_v55 = vpop.eup %6719 }
 0x542   :  { %v5420_v21 = vmul.f32 %v6720_v55, %v12501_v30  ;;  %v5422_v61 = vmul.f32 %v6720_v55, %v12503_v51  ;;  %v5424_v12 = vmul.f32 %v6720_v55, %v12512_v25  ;;  %v5426_v14 = vmul.f32 %v6720_v55, %v12521_v13 }
 0x543   :  { %v12651_v11 = vmul.f32 %v6720_v55, %v12526_v57  ;;  %v12654_v48 = vmul.f32 %v6720_v55, %v12529_v50  ;;  %v12657_v8 = vmul.f32 %v6720_v55, %v12533_v58  ;;  %v12660_v33 = vmul.f32 %v6720_v55, %v12539_v0  ;;  %v14696_v57 = vld [vmem:[#allocation74_spill] sm:$0xff]  ;;  %v14697_v50 = vld [vmem:[#allocation125_spill] sm:$0xff]  ;;  %v14699_v0 = vld [vmem:[#allocation164_spill] sm:$0xff] }
 0x544   :  { %v4577_v30 = vrot.slane %v12642_v63, 1  ;;  %v5438_v51 = vmul.f32 %v5422_v61, %v14693_v35  ;;  %v5440_v25 = vmul.f32 %v5424_v12, %v14694_v53  ;;  %v5442_v13 = vmul.f32 %v5426_v14, %v14695_v56  ;;  %v14698_v58 = vld [vmem:[#allocation166_spill] sm:$0xff] }
 0x545   :  { %v5436_v59 = vmul.f32 %v5420_v21, %v14696_v57  ;;  %v5444_v39 = vmul.f32 %v12651_v11, %v14697_v50  ;;  %v5446_v26 = vmul.f32 %v12654_v48, %v14698_v58  ;;  %v5448_v34 = vmul.f32 %v12657_v8, %v14699_v0 }
 0x546   :  { %v5450_v3 = vmul.f32 %v12660_v33, %v14700_v54  ;;  %v5481_v23 = vrot.slane %v5438_v51, 7  ;;  %v5483_v62 = vrot.slane %v5440_v25, 6  ;;  %v5485_v42 = vrot.slane %v5442_v13, 5 }
 0x547   :  { %v5487_v15 = vrot.slane %v5444_v39, 4  ;;  %v5489_v47 = vrot.slane %v5446_v26, 3  ;;  %v5510_v28 = vmul.f32 %v5420_v21, %v14619_v38  ;;  %v5512_v5 = vmul.f32 %v5422_v61, %v14620_v29 }
 0x548   :  { %v5482_v27 = vsel %vm1847_vm1, %v5481_v23, %v5436_v59  ;;  %v5514_v49 = vmul.f32 %v5424_v12, %v14621_v1  ;;  %v5516_v24 = vmul.f32 %v5426_v14, %v14622_v52  ;;  %v5518_v45 = vmul.f32 %v12651_v11, %v14623_v20 }
 0x549   :  { %v5484_v60 = vsel %vm1850_vm2, %v5483_v62, %v5482_v27  ;;  %v5520_v22 = vmul.f32 %v12654_v48, %v14624_v46  ;;  %v5522_v16 = vmul.f32 %v12657_v8, %v14625_v36  ;;  %v5524_v29 = vmul.f32 %v12660_v33, %v14626_v37  ;;  %v12697_v37 = vpop.eup %6721 }
 0x54a   :  { %v5486_v38 = vsel %vm1853_vm3, %v5485_v42, %v5484_v60  ;;  %v5555_v31 = vrot.slane %v5512_v5, 7  ;;  %v5557_v1 = vrot.slane %v5514_v49, 6  ;;  %v5491_v40 = vrot.slane %v5448_v34, 2 }
 0x54b   :  { %v5488_v52 = vsel %vm1856_vm4, %v5487_v15, %v5486_v38  ;;  %v5493_v19 = vrot.slane %v5450_v3, 1  ;;  %v5559_v7 = vrot.slane %v5516_v24, 5  ;;  %v5561_v46 = vrot.slane %v5518_v45, 4 }
 0x54c   :  { %v5490_v20 = vsel %vm1859_vm5, %v5489_v47, %v5488_v52  ;;  %v5556_v4 = vsel %vm1847_vm1, %v5555_v31, %v5510_v28  ;;  %v5563_v17 = vrot.slane %v5520_v22, 3  ;;  %v6054_v55 = vrot.slane %v5422_v61, 7 }
 0x54d   :  { %v5492_v36 = vsel %vm1862_vm6, %v5491_v40, %v5490_v20  ;;  %v5558_v41 = vsel %vm1850_vm2, %v5557_v1, %v5556_v4  ;;  %v6056_v44 = vrot.slane %v5424_v12, 6  ;;  %v5565_v53 = vrot.slane %v5522_v16, 2 }
 0x54e   :  { %v5494_v35 = vsel %vm1865_vm7, %v5493_v19, %v5492_v36  ;;  %v5560_v51 = vsel %vm1853_vm3, %v5559_v7, %v5558_v41  ;;  %v5567_v25 = vrot.slane %v5524_v29, 1  ;;  %v6055_v57 = vsel %vm1847_vm1, %v6054_v55, %v5420_v21  ;;  %v6104_v55 = vld [vmem:[%s12762_s4] sm:$0xff] }
 0x54f   :  { %v5503_v56 = vrot.slane %v5494_v35, 4  ;;  %v5562_v13 = vsel %vm1856_vm4, %v5561_v46, %v5560_v51  ;;  %v6058_v59 = vrot.slane %v5426_v14, 5  ;;  %v6057_v39 = vsel %vm1850_vm2, %v6056_v44, %v6055_v57 }
 0x550   :  { %v5564_v50 = vsel %vm1859_vm5, %v5563_v17, %v5562_v13  ;;  %v6060_v61 = vrot.slane %v12651_v11, 4  ;;  %v6062_v12 = vrot.slane %v12654_v48, 3  ;;  %v6088_v34 = vrot.slane %v12697_v37, 4 }
 0x551   :  { %v5504_v58 = vadd.f32 %v5503_v56, %v5494_v35  ;;  %v5566_v26 = vsel %vm1862_vm6, %v5565_v53, %v5564_v50  ;;  %v6059_v0 = vsel %vm1853_vm3, %v6058_v59, %v6057_v39  ;;  %v6064_v14 = vrot.slane %v12657_v8, 2 }
 0x552   :  { %v5568_v54 = vsel %vm1865_vm7, %v5567_v25, %v5566_v26  ;;  %v6061_v21 = vsel %vm1856_vm4, %v6060_v61, %v6059_v0  ;;  %v6066_v3 = vrot.slane %v12660_v33, 1  ;;  %v6089_v48 = vadd.f32 %v12697_v37, %v6088_v34 }
 0x553   :  { %v5505_v23 = vrot.slane %v5504_v58, 2  ;;  %v5577_v62 = vrot.slane %v5568_v54, 4  ;;  %v6063_v11 = vsel %vm1859_vm5, %v6062_v12, %v6061_v21  ;;  %v5006_v42 = vadd.f32 %v5005_v10, %v12640_v6  ;;  %v6105_v21 = vld [vmem:[%s12762_s4 + $0x8] sm:$0xff] }
 0x554   :  { %v4578_v15 = vadd.f32 %v4577_v30, %v12642_v63  ;;  %v5079_v47 = vrot.slane %v12666_v43, 1  ;;  %v6065_v8 = vsel %vm1862_vm6, %v6064_v14, %v6063_v11  ;;  %v6090_v5 = vrot.slane %v6089_v48, 2 }
 0x555   :  { %v5506_v28 = vadd.f32 %v5505_v23, %v5504_v58  ;;  %v5578_v33 = vadd.f32 %v5577_v62, %v5568_v54  ;;  %v6067_v27 = vsel %vm1865_vm7, %v6066_v3, %v6065_v8  ;;  %v5639_v6 = vsel %vm5637_vm12, %v12397_v2, %v5610_v32 }
 0x556   :  { %6155 = vst [vmem:[%s12761_s7 + $0xf8] sm:$0xff] %v6067_v27  ;;  %v6091_v63 = vadd.f32 %v6090_v5, %v6089_v48  ;;  %v5616_v10 = vrot.slane %v5006_v42, 2  ;;  %v5080_v30 = vadd.f32 %v5079_v47, %v12666_v43  ;;  %v5673_v60 = vrot.slane %v4578_v15, 3 }
 0x557   :  { %v5507_v49 = vrot.slane %v5506_v28, 1  ;;  %v5579_v24 = vrot.slane %v5578_v33, 2 }
 0x558   :  { %v6092_v16 = vrot.slane %v6091_v63, 1  ;;  %v5642_v38 = vsel %vm5640_vm13, %v5639_v6, %v5616_v10  ;;  %v5697_v1 = vsel %vm5637_vm12, %v12409_v9, %v5673_v60  ;;  %v5679_v18 = vrot.slane %v5080_v30, 2 }
 0x559   :  { %v5508_v45 = vadd.f32 %v5507_v49, %v5506_v28  ;;  %v5580_v22 = vadd.f32 %v5579_v24, %v5578_v33 }
 0x55a   :  { %v6093_v52 = vadd.f32 %v6092_v16, %v6091_v63  ;;  %v5699_v32 = vsel %vm5640_vm13, %v5697_v1, %v5679_v18 }
 0x55b   :  { %v5581_v29 = vrot.slane %v5580_v22, 1  ;;  %v5622_v31 = vrot.slane %v5508_v45, 1 }
 0x55c   :  { %6723 = vrcp.f32 %v6093_v52 }
 0x55d   :  { %v5582_v40 = vadd.f32 %v5581_v29, %v5580_v22  ;;  %v5645_v2 = vsel %vm5643_vm14, %v5642_v38, %v5622_v31 }
 0x55e   :  { %v6076_v43 = vrot.slane %v5645_v2, 4 }
 0x55f   :  { %v5685_v19 = vrot.slane %v5582_v40, 1 }
 0x560   :  { %v6077_v7 = vmax.f32 %v5645_v2, %v6076_v43 }
 0x561   :  { %v5701_v20 = vsel %vm5643_vm14, %v5699_v32, %v5685_v19 }
 0x562   :  { %v6078_v4 = vrot.slane %v6077_v7, 2  ;;  %6159 = vst [vmem:[%s12761_s7 + $0x118] sm:$0xff] %v5701_v20 }
 0x564   :  { %v6079_v46 = vmax.f32 %v6077_v7, %v6078_v4 }
 0x566   :  { %v6080_v9 = vrot.slane %v6079_v46, 1 }
 0x568   :  { %v6081_v17 = vmax.f32 %v6079_v46, %v6080_v9 }
 0x569   :  { %v6724_v36 = vpop.eup %6723 }
 0x56a   :  { %v6083_v41 = vsub.f32 %v5645_v2, %v6081_v17  ;;  %v6101_v44 = vmul.f32 %v6724_v36, %v12697_v37 }
 0x56c   :  { %v6086_v35 = vmul.f32 1.442695, %v6083_v41  ;;  %v6106_v51 = vmul.f32 %v6104_v55, %v6101_v44 }
 0x56e   :  { %6725 = vpow2.f32 %v6086_v35  ;;  %v6108_v53 = vrot.slane %v6106_v51, 4 }
 0x570   :  { %v6109_v25 = vadd.f32 %v6108_v53, %v6106_v51 }
 0x572   :  { %v6110_v56 = vrot.slane %v6109_v25, 2 }
 0x574   :  { %v6111_v13 = vadd.f32 %v6110_v56, %v6109_v25 }
 0x576   :  { %v6112_v57 = vrot.slane %v6111_v13, 1 }
 0x578   :  { %v6113_v59 = vadd.f32 %v6112_v57, %v6111_v13 }
 0x57a   :  { %6727 = vrcp.f32 %v6113_v59 }
 0x57b   :  { %v6726_v50 = vpop.eup %6725 }
 0x57c   :  { %v6094_v39 = vrot.slane %v6726_v50, 4 }
 0x57e   :  { %v6095_v61 = vadd.f32 %v6726_v50, %v6094_v39 }
 0x580   :  { %v6096_v12 = vrot.slane %v6095_v61, 2 }
 0x582   :  { %v6097_v58 = vadd.f32 %v6096_v12, %v6095_v61 }
 0x584   :  { %v6098_v26 = vrot.slane %v6097_v58, 1 }
 0x586   :  { %v6099_v0 = vadd.f32 %v6098_v26, %v6097_v58 }
 0x587   :  { %v6728_v34 = vpop.eup %6727 }
 0x588   :  { %6729 = vrcp.f32 %v6099_v0  ;;  %v6121_v37 = vmul.f32 %v6728_v34, %v6106_v51 }
 0x58a   :  { %6156 = vst [vmem:[%s12761_s7 + $0x100] sm:$0xff] %v6121_v37 }
 0x595   :  { %v6730_v54 = vpop.eup %6729 }
 0x596   :  { %v6103_v14 = vmul.f32 %v6730_v54, %v6726_v50 }
 0x598   :  { %v6107_v3 = vmul.f32 %v6105_v21, %v6103_v14 }
 0x59a   :  { %v6114_v23 = vrot.slane %v6107_v3, 4 }
 0x59c   :  { %v6115_v62 = vadd.f32 %v6114_v23, %v6107_v3 }
 0x59e   :  { %v6116_v11 = vrot.slane %v6115_v62, 2 }
 0x5a0   :  { %v6117_v48 = vadd.f32 %v6116_v11, %v6115_v62 }
 0x5a2   :  { %v6118_v42 = vrot.slane %v6117_v48, 1 }
 0x5a4   :  { %v6119_v15 = vadd.f32 %v6118_v42, %v6117_v48 }
 0x5a6   :  { %6731 = vrcp.f32 %v6119_v15 }
 0x5b3   :  { %v6732_v47 = vpop.eup %6731 }
 0x5b4   :  { %v6123_v8 = vmul.f32 %v6732_v47, %v6107_v3 }
 0x5b6   :  { %6157 = vst [vmem:[%s12761_s7 + $0x108] sm:$0xff] %v6123_v8 }

</bundles_post_ra>
